<compile_context>
chip_gen: v5e
topology: v5e:2x2
jax: 0.10.0
libtpu: 0.0.40
codegen_flags: <defaults>
</compile_context>

<pallas_src>
import math

import jax
import jax.numpy as jnp
from jax import lax
from jax.experimental import pallas as pl
from jax.experimental.pallas import tpu as pltpu

# ----------------------- small synthetic CLIP config ------------------------
IMG = 32          # input spatial size (assumed already resized)
PATCH = 8
CH = 3
HIDDEN = 32       # backbone hidden size ("feature_dim")
HEADS = 4
HEAD_DIM = HIDDEN // HEADS
MLP = 4 * HIDDEN  # 128
LAYERS = 2
OUT_DIM = 48      # projection output_dim
OUT_PAD = 128     # lane-dense output width (sliced back to OUT_DIM in wrapper)
EPS = 1e-5

GRID = IMG // PATCH
NUM_PATCHES = GRID * GRID
SEQ = NUM_PATCHES + 1                    # CLS + patch tokens (17)
SEQ_P = ((SEQ + 7) // 8) * 8             # padded to sublane multiple (24)
CPP = CH * PATCH * PATCH                 # im2col columns, (c, ph, pw) ordering

CLIP_MEAN = jnp.array([0.48145466, 0.4578275, 0.40821073], jnp.float32)
CLIP_STD = jnp.array([0.26862954, 0.26130258, 0.27577711], jnp.float32)


# ------------------------------ Pallas kernel -------------------------------
def _ln(x, g, b):
    mu = jnp.mean(x, axis=-1, keepdims=True)
    var = jnp.mean(jnp.square(x - mu), axis=-1, keepdims=True)
    return (x - mu) * lax.rsqrt(var + EPS) * g + b


def encoder_kernel(patches_ref, patch_w_ref, cls_pos_ref, preln_ref,
                   wqkv_ref, bqkv_ref, wo_ref, vecs_ref,
                   w1_ref, b1_ref, w2_ref, proj_w_ref, proj_b_ref, o_ref):
    """Full CLIP-vision forward for the whole batch in one kernel invocation."""
    D, HD = HIDDEN, HEAD_DIM
    BSP = patches_ref.shape[0]            # B * SEQ_P (static)
    B = BSP // SEQ_P
    scale = 1.0 / math.sqrt(HD)

    # Key-validity mask: padded token positions must never receive attention.
    kmask = lax.broadcasted_iota(jnp.int32, (1, 1, SEQ_P), 2) < SEQ

    # Patch embedding (+ folded CLIP normalization) for all batch rows at once.
    # Row b*SEQ_P is the CLS slot (zero patch row); cls_pos already holds
    # (cls + pos[0]) there and (pos[1:] + folded patch bias) for patch rows.
    x = jnp.dot(patches_ref[...], patch_w_ref[...],
                preferred_element_type=jnp.float32) + cls_pos_ref[...]   # [B*SP, D]

    # pre_layrnorm
    x = _ln(x, preln_ref[0], preln_ref[1])

    for li in range(LAYERS):              # static unroll (tiny LAYERS)
        ln1g = vecs_ref[li, 0]
        ln1b = vecs_ref[li, 1]
        ln2g = vecs_ref[li, 2]
        ln2b = vecs_ref[li, 3]
        bo = vecs_ref[li, 4]
        b2 = vecs_ref[li, 5]

        # ---- multi-head self-attention (per-head weight slabs, no slicing) ----
        h = _ln(x, ln1g, ln1b)                                   # [B*SP, D]
        attn = jnp.zeros((BSP, D), jnp.float32)
        for hd in range(HEADS):                                  # static unroll
            qh = (jnp.dot(h, wqkv_ref[li, 0, hd],
                          preferred_element_type=jnp.float32)
                  + bqkv_ref[li, 0, hd]).reshape(B, SEQ_P, HD)
            kh = (jnp.dot(h, wqkv_ref[li, 1, hd],
                          preferred_element_type=jnp.float32)
                  + bqkv_ref[li, 1, hd]).reshape(B, SEQ_P, HD)
            vh = (jnp.dot(h, wqkv_ref[li, 2, hd],
                          preferred_element_type=jnp.float32)
                  + bqkv_ref[li, 2, hd]).reshape(B, SEQ_P, HD)

            # batched over the (folded) batch axis
            s = lax.dot_general(qh, kh, (((2,), (2,)), ((0,), (0,))),
                                preferred_element_type=jnp.float32) * scale
            s = jnp.where(kmask, s, -1e30)                       # mask padded keys
            s = s - jnp.max(s, axis=-1, keepdims=True)
            p = jnp.exp(s)
            p = p * pl.reciprocal(jnp.sum(p, axis=-1, keepdims=True), approx=True)
            ctx = lax.dot_general(p, vh, (((2,), (1,)), ((0,), (0,))),
                                  preferred_element_type=jnp.float32)  # [B,SP,HD]

            # head_out @ Wo[head rows] == concat(heads) @ Wo, without the concat
            attn = attn + jnp.dot(ctx.reshape(BSP, HD), wo_ref[li, hd],
                                  preferred_element_type=jnp.float32)
        x = x + attn + bo

        # ---- MLP with CLIP quick_gelu ----
        h2 = _ln(x, ln2g, ln2b)
        m = jnp.dot(h2, w1_ref[li], preferred_element_type=jnp.float32) + b1_ref[li]
        m = m * jax.nn.sigmoid(1.702 * m)
        x = x + jnp.dot(m, w2_ref[li], preferred_element_type=jnp.float32) + b2

    # last_hidden_state[:, 0] per batch element (no post_layernorm) -> projection.
    # CLS rows sit at sublane-aligned offsets b*SEQ_P (SEQ_P multiple of 8).
    cls = jnp.concatenate([x[b * SEQ_P:b * SEQ_P + 1, :] for b in range(B)], axis=0)
    o_ref[...] = (jnp.dot(cls, proj_w_ref[...],
                          preferred_element_type=jnp.float32) + proj_b_ref[...])


def clip_encoder(patches2d, patch_w, cls_pos2d, preln, wqkv, bqkv, wo, vecs,
                 w1, b1, w2, proj_w, proj_b, batch):
    """One fused pallas_call, single grid step covering the whole batch."""

    def full(a):
        return pl.BlockSpec(a.shape, lambda i, _n=a.ndim: (0,) * _n)

    args = (patches2d, patch_w, cls_pos2d, preln, wqkv, bqkv, wo, vecs,
            w1, b1, w2, proj_w, proj_b)
    out = pl.pallas_call(
        encoder_kernel,
        grid=(1,),
        out_shape=jax.ShapeDtypeStruct((batch, OUT_PAD), jnp.float32),
        in_specs=[full(a) for a in args],
        out_specs=pl.BlockSpec((batch, OUT_PAD), lambda i: (0, 0)),
        compiler_params=pltpu.CompilerParams(dimension_semantics=("arbitrary",)),
    )(*args)
    return out[:, :OUT_DIM]


# ------------------------------ parameter init ------------------------------
def init_params(key):
    keys = jax.random.split(key, 4 + LAYERS)

    def w(k, shape, scale=0.02):
        return scale * jax.random.normal(k, shape, jnp.float32)

    params = {
        "patch_w": w(keys[0], (CPP, HIDDEN)),     # conv-as-matmul, no bias
        "cls": w(keys[1], (1, HIDDEN)),
        "pos": w(keys[2], (SEQ, HIDDEN)),
        "pre_ln_g": jnp.ones((HIDDEN,), jnp.float32),
        "pre_ln_b": jnp.zeros((HIDDEN,), jnp.float32),
        "proj_w": w(keys[3], (HIDDEN, OUT_DIM)),  # nn.Linear(feature_dim, output_dim)
        "proj_b": jnp.zeros((OUT_DIM,), jnp.float32),
    }

    wqkv_l, bqkv_l, wo_l, vecs_l, w1_l, b1_l, w2_l = [], [], [], [], [], [], []
    for li in range(LAYERS):
        lk = jax.random.split(keys[4 + li], 6)
        wq, wk, wv, wo_ = (w(lk[i], (HIDDEN, HIDDEN)) for i in range(4))
        w1 = w(lk[4], (HIDDEN, MLP))
        w2 = w(lk[5], (MLP, HIDDEN))
        zD = jnp.zeros((HIDDEN,), jnp.float32)
        oD = jnp.ones((HIDDEN,), jnp.float32)
        bq = bk = bv = bo = b2 = zD
        b1 = jnp.zeros((MLP,), jnp.float32)
        ln1g, ln1b, ln2g, ln2b = oD, zD, oD, zD

        def heads_cols(m):  # [D, D] -> [HEADS, D, HD] (per-head output columns)
            return m.reshape(HIDDEN, HEADS, HEAD_DIM).transpose(1, 0, 2)

        wqkv_l.append(jnp.stack([heads_cols(wq), heads_cols(wk), heads_cols(wv)]))
        bqkv_l.append(jnp.stack([bq.reshape(HEADS, HEAD_DIM),
                                 bk.reshape(HEADS, HEAD_DIM),
                                 bv.reshape(HEADS, HEAD_DIM)]))
        wo_l.append(wo_.reshape(HEADS, HEAD_DIM, HIDDEN))         # per-head Wo rows
        vecs_l.append(jnp.stack([ln1g, ln1b, ln2g, ln2b, bo, b2]))  # [6, D] aligned rows
        w1_l.append(w1)
        b1_l.append(b1)
        w2_l.append(w2)

    params["wqkv_h"] = jnp.stack(wqkv_l)   # [L, 3, HEADS, D, HD]
    params["bqkv_h"] = jnp.stack(bqkv_l)   # [L, 3, HEADS, HD]
    params["wo_h"] = jnp.stack(wo_l)       # [L, HEADS, HD, D]
    params["vecs_d"] = jnp.stack(vecs_l)   # [L, 6, D]
    params["w1"] = jnp.stack(w1_l)         # [L, D, MLP]
    params["b1"] = jnp.stack(b1_l)         # [L, MLP]
    params["w2"] = jnp.stack(w2_l)         # [L, MLP, D]
    return params


# --------------------------------- forward ----------------------------------
def cloth_encoder_forward(cloth_images, params):
    """cloth_images: [B, 3, H, W] in [-1, 1]  ->  [B, OUT_DIM] features."""
    B = cloth_images.shape[0]
    # TODO(synk): CLIPImageProcessor's PIL resize / center-crop / uint8 round-trip
    # has no Pallas equivalent; inputs are assumed to already be IMG x IMG.

    # Fold [-1,1]->[0,1]->CLIP mean/std normalization into the patch weights:
    #   y = ((x+1)*0.5 - mean)/std  =>  y @ W = x @ (W * col_scale) + col_shift @ W
    col_scale = jnp.repeat(0.5 / CLIP_STD, PATCH * PATCH)                 # [CPP]
    col_shift = jnp.repeat((0.5 - CLIP_MEAN) / CLIP_STD, PATCH * PATCH)   # [CPP]
    patch_w = params["patch_w"] * col_scale[:, None]                      # [CPP, D]
    patch_b = col_shift @ params["patch_w"]                               # [D]

    # im2col (glue): [B,3,H,W] -> [B, np, 3*p*p] (c,ph,pw) ordering.
    x = cloth_images.reshape(B, CH, GRID, PATCH, GRID, PATCH)
    x = x.transpose(0, 2, 4, 1, 3, 5).reshape(B, NUM_PATCHES, CPP)
    # Prepend zero CLS slot row and pad sequence to SEQ_P (multiple of 8),
    # then flatten batch into the row axis for the kernel.
    patches = jnp.pad(x, ((0, 0), (1, SEQ_P - SEQ), (0, 0)))              # [B, SP, CPP]
    patches2d = patches.reshape(B * SEQ_P, CPP)

    # Combined additive table: row 0 = cls + pos[0]; rows 1:SEQ = pos[1:] + patch
    # bias; padded rows zero. Tiled over batch so the kernel adds one [B*SP, D].
    cls_pos = jnp.concatenate(
        [params["cls"] + params["pos"][0:1],
         params["pos"][1:] + patch_b[None, :]], axis=0)                   # [SEQ, D]
    cls_pos = jnp.pad(cls_pos, ((0, SEQ_P - SEQ), (0, 0)))                # [SP, D]
    cls_pos2d = jnp.tile(cls_pos, (B, 1))                                 # [B*SP, D]

    preln = jnp.stack([params["pre_ln_g"], params["pre_ln_b"]])           # [2, D]

    # Lane-dense (128-wide) projection weights/bias; sliced back after the kernel.
    proj_w = jnp.pad(params["proj_w"], ((0, 0), (0, OUT_PAD - OUT_DIM)))  # [D, 128]
    proj_b = jnp.pad(params["proj_b"], (0, OUT_PAD - OUT_DIM)).reshape(1, OUT_PAD)

    return clip_encoder(patches2d, patch_w, cls_pos2d, preln,
                        params["wqkv_h"], params["bqkv_h"], params["wo_h"],
                        params["vecs_d"], params["w1"], params["b1"],
                        params["w2"], proj_w, proj_b, B)


if __name__ == "__main__":
    key = jax.random.PRNGKey(0)
    pkey, xkey = jax.random.split(key)
    params = init_params(pkey)
    cloth_images = jax.random.uniform(
        xkey, (2, 3, IMG, IMG), jnp.float32, minval=-1.0, maxval=1.0
    )
    out = jax.jit(cloth_encoder_forward)(cloth_images, params)
    out = jax.block_until_ready(out)
    assert out.shape == (2, OUT_DIM), out.shape
    assert out.dtype == jnp.float32
    print("KERNEL_OK")
</pallas_src>

<mosaic_0001>
module attributes {stable_mosaic.version = 11 : i64} {
  func.func @encoder_kernel(%arg0: i32, %arg1: memref<48x192xf32, #tpu.memory_space<vmem>>, %arg2: memref<192x32xf32, #tpu.memory_space<vmem>>, %arg3: memref<48x32xf32, #tpu.memory_space<vmem>>, %arg4: memref<2x32xf32, #tpu.memory_space<vmem>>, %arg5: memref<2x3x4x32x8xf32, #tpu.memory_space<vmem>>, %arg6: memref<2x3x4x8xf32, #tpu.memory_space<vmem>>, %arg7: memref<2x4x8x32xf32, #tpu.memory_space<vmem>>, %arg8: memref<2x6x32xf32, #tpu.memory_space<vmem>>, %arg9: memref<2x32x128xf32, #tpu.memory_space<vmem>>, %arg10: memref<2x128xf32, #tpu.memory_space<vmem>>, %arg11: memref<2x128x32xf32, #tpu.memory_space<vmem>>, %arg12: memref<32x128xf32, #tpu.memory_space<vmem>>, %arg13: memref<1x128xf32, #tpu.memory_space<vmem>>, %arg14: memref<2x128xf32, #tpu.memory_space<vmem>>) attributes {dimension_semantics = [#tpu.dimension_semantics<arbitrary>], iteration_bounds = array<i64: 1>, scalar_prefetch = 0 : i64, scratch_operands = 0 : i64, tpu.core_type = #tpu.core_type<tc>, window_params = [{pipeline_mode = #tpu.pipeline_mode<synchronous>, transform_indices = @transform_0, window_bounds = array<i64: 48, 192>}, {pipeline_mode = #tpu.pipeline_mode<synchronous>, transform_indices = @transform_1, window_bounds = array<i64: 192, 32>}, {pipeline_mode = #tpu.pipeline_mode<synchronous>, transform_indices = @transform_2, window_bounds = array<i64: 48, 32>}, {pipeline_mode = #tpu.pipeline_mode<synchronous>, transform_indices = @transform_3, window_bounds = array<i64: 2, 32>}, {pipeline_mode = #tpu.pipeline_mode<synchronous>, transform_indices = @transform_4, window_bounds = array<i64: 2, 3, 4, 32, 8>}, {pipeline_mode = #tpu.pipeline_mode<synchronous>, transform_indices = @transform_5, window_bounds = array<i64: 2, 3, 4, 8>}, {pipeline_mode = #tpu.pipeline_mode<synchronous>, transform_indices = @transform_6, window_bounds = array<i64: 2, 4, 8, 32>}, {pipeline_mode = #tpu.pipeline_mode<synchronous>, transform_indices = @transform_7, window_bounds = array<i64: 2, 6, 32>}, {pipeline_mode = #tpu.pipeline_mode<synchronous>, transform_indices = @transform_8, window_bounds = array<i64: 2, 32, 128>}, {pipeline_mode = #tpu.pipeline_mode<synchronous>, transform_indices = @transform_9, window_bounds = array<i64: 2, 128>}, {pipeline_mode = #tpu.pipeline_mode<synchronous>, transform_indices = @transform_10, window_bounds = array<i64: 2, 128, 32>}, {pipeline_mode = #tpu.pipeline_mode<synchronous>, transform_indices = @transform_11, window_bounds = array<i64: 32, 128>}, {pipeline_mode = #tpu.pipeline_mode<synchronous>, transform_indices = @transform_12, window_bounds = array<i64: 1, 128>}, {pipeline_mode = #tpu.pipeline_mode<synchronous>, transform_indices = @transform_13, window_bounds = array<i64: 2, 128>}]} {
    %0 = tpu.iota {dimensions = array<i32: 2>} : vector<1x1x24xi32>
    %c17_i32 = arith.constant 17 : i32
    %1 = vector.broadcast %c17_i32 : i32 to vector<1x1x24xi32>
    %2 = arith.cmpi slt, %0, %1 : vector<1x1x24xi32>
    %c0 = arith.constant 0 : index
    %c0_0 = arith.constant 0 : index
    %3 = vector.load %arg1[%c0, %c0_0] : memref<48x192xf32, #tpu.memory_space<vmem>>, vector<48x192xf32>
    %c0_1 = arith.constant 0 : index
    %c0_2 = arith.constant 0 : index
    %4 = vector.load %arg2[%c0_1, %c0_2] : memref<192x32xf32, #tpu.memory_space<vmem>>, vector<192x32xf32>
    %cst = arith.constant dense<0.000000e+00> : vector<48x32xf32>
    %5 = tpu.matmul %3, %4, %cst {dimension_numbers = #tpu.dot_dimension_numbers<[1], [0], [0], [1], [0, 0, 1, 1], [], []>} : vector<48x192xf32>, vector<192x32xf32>, vector<48x32xf32> -> vector<48x32xf32>
    %c0_3 = arith.constant 0 : index
    %c0_4 = arith.constant 0 : index
    %6 = vector.load %arg3[%c0_3, %c0_4] : memref<48x32xf32, #tpu.memory_space<vmem>>, vector<48x32xf32>
    %7 = arith.addf %5, %6 : vector<48x32xf32>
    %c0_5 = arith.constant 0 : index
    %c0_6 = arith.constant 0 : index
    %8 = vector.load %arg4[%c0_5, %c0_6] : memref<2x32xf32, #tpu.memory_space<vmem>>, vector<1x32xf32>
    %9 = vector.shape_cast %8 : vector<1x32xf32> to vector<32xf32>
    %c1 = arith.constant 1 : index
    %c0_7 = arith.constant 0 : index
    %10 = vector.load %arg4[%c1, %c0_7] : memref<2x32xf32, #tpu.memory_space<vmem>>, vector<1x32xf32>
    %11 = vector.shape_cast %10 : vector<1x32xf32> to vector<32xf32>
    %cst_8 = arith.constant dense<0.000000e+00> : vector<48xf32>
    %12 = vector.multi_reduction <add>, %7, %cst_8 [1] : vector<48x32xf32> to vector<48xf32>
    %13 = vector.shape_cast %12 : vector<48xf32> to vector<48x1xf32>
    %cst_9 = arith.constant 3.200000e+01 : f32
    %14 = vector.broadcast %cst_9 : f32 to vector<48x1xf32>
    %15 = arith.divf %13, %14 : vector<48x1xf32>
    %16 = vector.broadcast %15 : vector<48x1xf32> to vector<48x32xf32>
    %17 = arith.subf %7, %16 : vector<48x32xf32>
    %18 = arith.mulf %17, %17 : vector<48x32xf32>
    %cst_10 = arith.constant dense<0.000000e+00> : vector<48xf32>
    %19 = vector.multi_reduction <add>, %18, %cst_10 [1] : vector<48x32xf32> to vector<48xf32>
    %20 = vector.shape_cast %19 : vector<48xf32> to vector<48x1xf32>
    %cst_11 = arith.constant 3.200000e+01 : f32
    %21 = vector.broadcast %cst_11 : f32 to vector<48x1xf32>
    %22 = arith.divf %20, %21 : vector<48x1xf32>
    %23 = vector.broadcast %15 : vector<48x1xf32> to vector<48x32xf32>
    %24 = arith.subf %7, %23 : vector<48x32xf32>
    %cst_12 = arith.constant 9.99999974E-6 : f32
    %25 = vector.broadcast %cst_12 : f32 to vector<48x1xf32>
    %26 = arith.addf %22, %25 : vector<48x1xf32>
    %27 = math.rsqrt %26 : vector<48x1xf32>
    %28 = vector.broadcast %27 : vector<48x1xf32> to vector<48x32xf32>
    %29 = arith.mulf %24, %28 : vector<48x32xf32>
    %30 = vector.shape_cast %9 : vector<32xf32> to vector<1x32xf32>
    %31 = vector.broadcast %30 : vector<1x32xf32> to vector<48x32xf32>
    %32 = arith.mulf %29, %31 : vector<48x32xf32>
    %33 = vector.shape_cast %11 : vector<32xf32> to vector<1x32xf32>
    %34 = vector.broadcast %33 : vector<1x32xf32> to vector<48x32xf32>
    %35 = arith.addf %32, %34 : vector<48x32xf32>
    %c0_13 = arith.constant 0 : index
    %c0_14 = arith.constant 0 : index
    %c0_15 = arith.constant 0 : index
    %36 = vector.load %arg8[%c0_13, %c0_14, %c0_15] : memref<2x6x32xf32, #tpu.memory_space<vmem>>, vector<1x1x32xf32>
    %37 = vector.shape_cast %36 : vector<1x1x32xf32> to vector<32xf32>
    %c0_16 = arith.constant 0 : index
    %c1_17 = arith.constant 1 : index
    %c0_18 = arith.constant 0 : index
    %38 = vector.load %arg8[%c0_16, %c1_17, %c0_18] : memref<2x6x32xf32, #tpu.memory_space<vmem>>, vector<1x1x32xf32>
    %39 = vector.shape_cast %38 : vector<1x1x32xf32> to vector<32xf32>
    %c0_19 = arith.constant 0 : index
    %c2 = arith.constant 2 : index
    %c0_20 = arith.constant 0 : index
    %40 = vector.load %arg8[%c0_19, %c2, %c0_20] : memref<2x6x32xf32, #tpu.memory_space<vmem>>, vector<1x1x32xf32>
    %41 = vector.shape_cast %40 : vector<1x1x32xf32> to vector<32xf32>
    %c0_21 = arith.constant 0 : index
    %c3 = arith.constant 3 : index
    %c0_22 = arith.constant 0 : index
    %42 = vector.load %arg8[%c0_21, %c3, %c0_22] : memref<2x6x32xf32, #tpu.memory_space<vmem>>, vector<1x1x32xf32>
    %43 = vector.shape_cast %42 : vector<1x1x32xf32> to vector<32xf32>
    %c0_23 = arith.constant 0 : index
    %c4 = arith.constant 4 : index
    %c0_24 = arith.constant 0 : index
    %44 = vector.load %arg8[%c0_23, %c4, %c0_24] : memref<2x6x32xf32, #tpu.memory_space<vmem>>, vector<1x1x32xf32>
    %45 = vector.shape_cast %44 : vector<1x1x32xf32> to vector<32xf32>
    %c0_25 = arith.constant 0 : index
    %c5 = arith.constant 5 : index
    %c0_26 = arith.constant 0 : index
    %46 = vector.load %arg8[%c0_25, %c5, %c0_26] : memref<2x6x32xf32, #tpu.memory_space<vmem>>, vector<1x1x32xf32>
    %47 = vector.shape_cast %46 : vector<1x1x32xf32> to vector<32xf32>
    %cst_27 = arith.constant dense<0.000000e+00> : vector<48xf32>
    %48 = vector.multi_reduction <add>, %35, %cst_27 [1] : vector<48x32xf32> to vector<48xf32>
    %49 = vector.shape_cast %48 : vector<48xf32> to vector<48x1xf32>
    %cst_28 = arith.constant 3.200000e+01 : f32
    %50 = vector.broadcast %cst_28 : f32 to vector<48x1xf32>
    %51 = arith.divf %49, %50 : vector<48x1xf32>
    %52 = vector.broadcast %51 : vector<48x1xf32> to vector<48x32xf32>
    %53 = arith.subf %35, %52 : vector<48x32xf32>
    %54 = arith.mulf %53, %53 : vector<48x32xf32>
    %cst_29 = arith.constant dense<0.000000e+00> : vector<48xf32>
    %55 = vector.multi_reduction <add>, %54, %cst_29 [1] : vector<48x32xf32> to vector<48xf32>
    %56 = vector.shape_cast %55 : vector<48xf32> to vector<48x1xf32>
    %cst_30 = arith.constant 3.200000e+01 : f32
    %57 = vector.broadcast %cst_30 : f32 to vector<48x1xf32>
    %58 = arith.divf %56, %57 : vector<48x1xf32>
    %59 = vector.broadcast %51 : vector<48x1xf32> to vector<48x32xf32>
    %60 = arith.subf %35, %59 : vector<48x32xf32>
    %cst_31 = arith.constant 9.99999974E-6 : f32
    %61 = vector.broadcast %cst_31 : f32 to vector<48x1xf32>
    %62 = arith.addf %58, %61 : vector<48x1xf32>
    %63 = math.rsqrt %62 : vector<48x1xf32>
    %64 = vector.broadcast %63 : vector<48x1xf32> to vector<48x32xf32>
    %65 = arith.mulf %60, %64 : vector<48x32xf32>
    %66 = vector.shape_cast %37 : vector<32xf32> to vector<1x32xf32>
    %67 = vector.broadcast %66 : vector<1x32xf32> to vector<48x32xf32>
    %68 = arith.mulf %65, %67 : vector<48x32xf32>
    %69 = vector.shape_cast %39 : vector<32xf32> to vector<1x32xf32>
    %70 = vector.broadcast %69 : vector<1x32xf32> to vector<48x32xf32>
    %71 = arith.addf %68, %70 : vector<48x32xf32>
    %cst_32 = arith.constant 0.000000e+00 : f32
    %72 = vector.broadcast %cst_32 : f32 to vector<48x32xf32>
    %c0_33 = arith.constant 0 : index
    %c0_34 = arith.constant 0 : index
    %c0_35 = arith.constant 0 : index
    %c0_36 = arith.constant 0 : index
    %c0_37 = arith.constant 0 : index
    %73 = vector.load %arg5[%c0_33, %c0_34, %c0_35, %c0_36, %c0_37] : memref<2x3x4x32x8xf32, #tpu.memory_space<vmem>>, vector<1x1x1x32x8xf32>
    %74 = vector.shape_cast %73 : vector<1x1x1x32x8xf32> to vector<32x8xf32>
    %cst_38 = arith.constant dense<0.000000e+00> : vector<48x8xf32>
    %75 = tpu.matmul %71, %74, %cst_38 {dimension_numbers = #tpu.dot_dimension_numbers<[1], [0], [0], [1], [0, 0, 1, 1], [], []>} : vector<48x32xf32>, vector<32x8xf32>, vector<48x8xf32> -> vector<48x8xf32>
    %c0_39 = arith.constant 0 : index
    %c0_40 = arith.constant 0 : index
    %c0_41 = arith.constant 0 : index
    %c0_42 = arith.constant 0 : index
    %76 = vector.load %arg6[%c0_39, %c0_40, %c0_41, %c0_42] : memref<2x3x4x8xf32, #tpu.memory_space<vmem>>, vector<1x1x1x8xf32>
    %77 = vector.shape_cast %76 : vector<1x1x1x8xf32> to vector<8xf32>
    %78 = vector.shape_cast %77 : vector<8xf32> to vector<1x8xf32>
    %79 = vector.broadcast %78 : vector<1x8xf32> to vector<48x8xf32>
    %80 = arith.addf %75, %79 : vector<48x8xf32>
    %81 = vector.shape_cast %80 : vector<48x8xf32> to vector<2x24x8xf32>
    %c0_43 = arith.constant 0 : index
    %c1_44 = arith.constant 1 : index
    %c0_45 = arith.constant 0 : index
    %c0_46 = arith.constant 0 : index
    %c0_47 = arith.constant 0 : index
    %82 = vector.load %arg5[%c0_43, %c1_44, %c0_45, %c0_46, %c0_47] : memref<2x3x4x32x8xf32, #tpu.memory_space<vmem>>, vector<1x1x1x32x8xf32>
    %83 = vector.shape_cast %82 : vector<1x1x1x32x8xf32> to vector<32x8xf32>
    %cst_48 = arith.constant dense<0.000000e+00> : vector<48x8xf32>
    %84 = tpu.matmul %71, %83, %cst_48 {dimension_numbers = #tpu.dot_dimension_numbers<[1], [0], [0], [1], [0, 0, 1, 1], [], []>} : vector<48x32xf32>, vector<32x8xf32>, vector<48x8xf32> -> vector<48x8xf32>
    %c0_49 = arith.constant 0 : index
    %c1_50 = arith.constant 1 : index
    %c0_51 = arith.constant 0 : index
    %c0_52 = arith.constant 0 : index
    %85 = vector.load %arg6[%c0_49, %c1_50, %c0_51, %c0_52] : memref<2x3x4x8xf32, #tpu.memory_space<vmem>>, vector<1x1x1x8xf32>
    %86 = vector.shape_cast %85 : vector<1x1x1x8xf32> to vector<8xf32>
    %87 = vector.shape_cast %86 : vector<8xf32> to vector<1x8xf32>
    %88 = vector.broadcast %87 : vector<1x8xf32> to vector<48x8xf32>
    %89 = arith.addf %84, %88 : vector<48x8xf32>
    %90 = vector.shape_cast %89 : vector<48x8xf32> to vector<2x24x8xf32>
    %c0_53 = arith.constant 0 : index
    %c2_54 = arith.constant 2 : index
    %c0_55 = arith.constant 0 : index
    %c0_56 = arith.constant 0 : index
    %c0_57 = arith.constant 0 : index
    %91 = vector.load %arg5[%c0_53, %c2_54, %c0_55, %c0_56, %c0_57] : memref<2x3x4x32x8xf32, #tpu.memory_space<vmem>>, vector<1x1x1x32x8xf32>
    %92 = vector.shape_cast %91 : vector<1x1x1x32x8xf32> to vector<32x8xf32>
    %cst_58 = arith.constant dense<0.000000e+00> : vector<48x8xf32>
    %93 = tpu.matmul %71, %92, %cst_58 {dimension_numbers = #tpu.dot_dimension_numbers<[1], [0], [0], [1], [0, 0, 1, 1], [], []>} : vector<48x32xf32>, vector<32x8xf32>, vector<48x8xf32> -> vector<48x8xf32>
    %c0_59 = arith.constant 0 : index
    %c2_60 = arith.constant 2 : index
    %c0_61 = arith.constant 0 : index
    %c0_62 = arith.constant 0 : index
    %94 = vector.load %arg6[%c0_59, %c2_60, %c0_61, %c0_62] : memref<2x3x4x8xf32, #tpu.memory_space<vmem>>, vector<1x1x1x8xf32>
    %95 = vector.shape_cast %94 : vector<1x1x1x8xf32> to vector<8xf32>
    %96 = vector.shape_cast %95 : vector<8xf32> to vector<1x8xf32>
    %97 = vector.broadcast %96 : vector<1x8xf32> to vector<48x8xf32>
    %98 = arith.addf %93, %97 : vector<48x8xf32>
    %99 = vector.shape_cast %98 : vector<48x8xf32> to vector<2x24x8xf32>
    %cst_63 = arith.constant dense<0.000000e+00> : vector<2x24x24xf32>
    %100 = tpu.matmul %81, %90, %cst_63 {dimension_numbers = #tpu.dot_dimension_numbers<[2], [2], [1], [1], [0, 0, 0, 1, 1, 1], [0], [0]>} : vector<2x24x8xf32>, vector<2x24x8xf32>, vector<2x24x24xf32> -> vector<2x24x24xf32>
    %cst_64 = arith.constant 0.353553385 : f32
    %101 = vector.broadcast %cst_64 : f32 to vector<2x24x24xf32>
    %102 = arith.mulf %100, %101 : vector<2x24x24xf32>
    %cst_65 = arith.constant -1.000000e+30 : f32
    %103 = vector.shape_cast %2 : vector<1x1x24xi1> to vector<1x1x24xi1>
    %104 = vector.broadcast %103 : vector<1x1x24xi1> to vector<2x24x24xi1>
    %105 = vector.broadcast %cst_65 : f32 to vector<2x24x24xf32>
    %106 = arith.select %104, %102, %105 : vector<2x24x24xi1>, vector<2x24x24xf32>
    %cst_66 = arith.constant dense<0xFF800000> : vector<2x24xf32>
    %107 = vector.multi_reduction <maximumf>, %106, %cst_66 [2] : vector<2x24x24xf32> to vector<2x24xf32>
    %108 = vector.shape_cast %107 : vector<2x24xf32> to vector<2x24x1xf32>
    %109 = vector.broadcast %108 : vector<2x24x1xf32> to vector<2x24x24xf32>
    %110 = arith.subf %106, %109 : vector<2x24x24xf32>
    %111 = math.exp %110 : vector<2x24x24xf32>
    %cst_67 = arith.constant dense<0.000000e+00> : vector<2x24xf32>
    %112 = vector.multi_reduction <add>, %111, %cst_67 [2] : vector<2x24x24xf32> to vector<2x24xf32>
    %113 = vector.shape_cast %112 : vector<2x24xf32> to vector<2x24x1xf32>
    %114 = tpu.reciprocal %113 {approx = true} : vector<2x24x1xf32> -> vector<2x24x1xf32>
    %115 = vector.broadcast %114 : vector<2x24x1xf32> to vector<2x24x24xf32>
    %116 = arith.mulf %111, %115 : vector<2x24x24xf32>
    %cst_68 = arith.constant dense<0.000000e+00> : vector<2x24x8xf32>
    %117 = tpu.matmul %116, %99, %cst_68 {dimension_numbers = #tpu.dot_dimension_numbers<[2], [1], [1], [2], [0, 0, 0, 1, 1, 2], [0], [0]>} : vector<2x24x24xf32>, vector<2x24x8xf32>, vector<2x24x8xf32> -> vector<2x24x8xf32>
    %118 = vector.shape_cast %117 : vector<2x24x8xf32> to vector<48x8xf32>
    %c0_69 = arith.constant 0 : index
    %c0_70 = arith.constant 0 : index
    %c0_71 = arith.constant 0 : index
    %c0_72 = arith.constant 0 : index
    %119 = vector.load %arg7[%c0_69, %c0_70, %c0_71, %c0_72] : memref<2x4x8x32xf32, #tpu.memory_space<vmem>>, vector<1x1x8x32xf32>
    %120 = vector.shape_cast %119 : vector<1x1x8x32xf32> to vector<8x32xf32>
    %cst_73 = arith.constant dense<0.000000e+00> : vector<48x32xf32>
    %121 = tpu.matmul %118, %120, %cst_73 {dimension_numbers = #tpu.dot_dimension_numbers<[1], [0], [0], [1], [0, 0, 1, 1], [], []>} : vector<48x8xf32>, vector<8x32xf32>, vector<48x32xf32> -> vector<48x32xf32>
    %122 = arith.addf %72, %121 : vector<48x32xf32>
    %c0_74 = arith.constant 0 : index
    %c0_75 = arith.constant 0 : index
    %c1_76 = arith.constant 1 : index
    %c0_77 = arith.constant 0 : index
    %c0_78 = arith.constant 0 : index
    %123 = vector.load %arg5[%c0_74, %c0_75, %c1_76, %c0_77, %c0_78] : memref<2x3x4x32x8xf32, #tpu.memory_space<vmem>>, vector<1x1x1x32x8xf32>
    %124 = vector.shape_cast %123 : vector<1x1x1x32x8xf32> to vector<32x8xf32>
    %cst_79 = arith.constant dense<0.000000e+00> : vector<48x8xf32>
    %125 = tpu.matmul %71, %124, %cst_79 {dimension_numbers = #tpu.dot_dimension_numbers<[1], [0], [0], [1], [0, 0, 1, 1], [], []>} : vector<48x32xf32>, vector<32x8xf32>, vector<48x8xf32> -> vector<48x8xf32>
    %c0_80 = arith.constant 0 : index
    %c0_81 = arith.constant 0 : index
    %c1_82 = arith.constant 1 : index
    %c0_83 = arith.constant 0 : index
    %126 = vector.load %arg6[%c0_80, %c0_81, %c1_82, %c0_83] : memref<2x3x4x8xf32, #tpu.memory_space<vmem>>, vector<1x1x1x8xf32>
    %127 = vector.shape_cast %126 : vector<1x1x1x8xf32> to vector<8xf32>
    %128 = vector.shape_cast %127 : vector<8xf32> to vector<1x8xf32>
    %129 = vector.broadcast %128 : vector<1x8xf32> to vector<48x8xf32>
    %130 = arith.addf %125, %129 : vector<48x8xf32>
    %131 = vector.shape_cast %130 : vector<48x8xf32> to vector<2x24x8xf32>
    %c0_84 = arith.constant 0 : index
    %c1_85 = arith.constant 1 : index
    %c1_86 = arith.constant 1 : index
    %c0_87 = arith.constant 0 : index
    %c0_88 = arith.constant 0 : index
    %132 = vector.load %arg5[%c0_84, %c1_85, %c1_86, %c0_87, %c0_88] : memref<2x3x4x32x8xf32, #tpu.memory_space<vmem>>, vector<1x1x1x32x8xf32>
    %133 = vector.shape_cast %132 : vector<1x1x1x32x8xf32> to vector<32x8xf32>
    %cst_89 = arith.constant dense<0.000000e+00> : vector<48x8xf32>
    %134 = tpu.matmul %71, %133, %cst_89 {dimension_numbers = #tpu.dot_dimension_numbers<[1], [0], [0], [1], [0, 0, 1, 1], [], []>} : vector<48x32xf32>, vector<32x8xf32>, vector<48x8xf32> -> vector<48x8xf32>
    %c0_90 = arith.constant 0 : index
    %c1_91 = arith.constant 1 : index
    %c1_92 = arith.constant 1 : index
    %c0_93 = arith.constant 0 : index
    %135 = vector.load %arg6[%c0_90, %c1_91, %c1_92, %c0_93] : memref<2x3x4x8xf32, #tpu.memory_space<vmem>>, vector<1x1x1x8xf32>
    %136 = vector.shape_cast %135 : vector<1x1x1x8xf32> to vector<8xf32>
    %137 = vector.shape_cast %136 : vector<8xf32> to vector<1x8xf32>
    %138 = vector.broadcast %137 : vector<1x8xf32> to vector<48x8xf32>
    %139 = arith.addf %134, %138 : vector<48x8xf32>
    %140 = vector.shape_cast %139 : vector<48x8xf32> to vector<2x24x8xf32>
    %c0_94 = arith.constant 0 : index
    %c2_95 = arith.constant 2 : index
    %c1_96 = arith.constant 1 : index
    %c0_97 = arith.constant 0 : index
    %c0_98 = arith.constant 0 : index
    %141 = vector.load %arg5[%c0_94, %c2_95, %c1_96, %c0_97, %c0_98] : memref<2x3x4x32x8xf32, #tpu.memory_space<vmem>>, vector<1x1x1x32x8xf32>
    %142 = vector.shape_cast %141 : vector<1x1x1x32x8xf32> to vector<32x8xf32>
    %cst_99 = arith.constant dense<0.000000e+00> : vector<48x8xf32>
    %143 = tpu.matmul %71, %142, %cst_99 {dimension_numbers = #tpu.dot_dimension_numbers<[1], [0], [0], [1], [0, 0, 1, 1], [], []>} : vector<48x32xf32>, vector<32x8xf32>, vector<48x8xf32> -> vector<48x8xf32>
    %c0_100 = arith.constant 0 : index
    %c2_101 = arith.constant 2 : index
    %c1_102 = arith.constant 1 : index
    %c0_103 = arith.constant 0 : index
    %144 = vector.load %arg6[%c0_100, %c2_101, %c1_102, %c0_103] : memref<2x3x4x8xf32, #tpu.memory_space<vmem>>, vector<1x1x1x8xf32>
    %145 = vector.shape_cast %144 : vector<1x1x1x8xf32> to vector<8xf32>
    %146 = vector.shape_cast %145 : vector<8xf32> to vector<1x8xf32>
    %147 = vector.broadcast %146 : vector<1x8xf32> to vector<48x8xf32>
    %148 = arith.addf %143, %147 : vector<48x8xf32>
    %149 = vector.shape_cast %148 : vector<48x8xf32> to vector<2x24x8xf32>
    %cst_104 = arith.constant dense<0.000000e+00> : vector<2x24x24xf32>
    %150 = tpu.matmul %131, %140, %cst_104 {dimension_numbers = #tpu.dot_dimension_numbers<[2], [2], [1], [1], [0, 0, 0, 1, 1, 1], [0], [0]>} : vector<2x24x8xf32>, vector<2x24x8xf32>, vector<2x24x24xf32> -> vector<2x24x24xf32>
    %cst_105 = arith.constant 0.353553385 : f32
    %151 = vector.broadcast %cst_105 : f32 to vector<2x24x24xf32>
    %152 = arith.mulf %150, %151 : vector<2x24x24xf32>
    %cst_106 = arith.constant -1.000000e+30 : f32
    %153 = vector.shape_cast %2 : vector<1x1x24xi1> to vector<1x1x24xi1>
    %154 = vector.broadcast %153 : vector<1x1x24xi1> to vector<2x24x24xi1>
    %155 = vector.broadcast %cst_106 : f32 to vector<2x24x24xf32>
    %156 = arith.select %154, %152, %155 : vector<2x24x24xi1>, vector<2x24x24xf32>
    %cst_107 = arith.constant dense<0xFF800000> : vector<2x24xf32>
    %157 = vector.multi_reduction <maximumf>, %156, %cst_107 [2] : vector<2x24x24xf32> to vector<2x24xf32>
    %158 = vector.shape_cast %157 : vector<2x24xf32> to vector<2x24x1xf32>
    %159 = vector.broadcast %158 : vector<2x24x1xf32> to vector<2x24x24xf32>
    %160 = arith.subf %156, %159 : vector<2x24x24xf32>
    %161 = math.exp %160 : vector<2x24x24xf32>
    %cst_108 = arith.constant dense<0.000000e+00> : vector<2x24xf32>
    %162 = vector.multi_reduction <add>, %161, %cst_108 [2] : vector<2x24x24xf32> to vector<2x24xf32>
    %163 = vector.shape_cast %162 : vector<2x24xf32> to vector<2x24x1xf32>
    %164 = tpu.reciprocal %163 {approx = true} : vector<2x24x1xf32> -> vector<2x24x1xf32>
    %165 = vector.broadcast %164 : vector<2x24x1xf32> to vector<2x24x24xf32>
    %166 = arith.mulf %161, %165 : vector<2x24x24xf32>
    %cst_109 = arith.constant dense<0.000000e+00> : vector<2x24x8xf32>
    %167 = tpu.matmul %166, %149, %cst_109 {dimension_numbers = #tpu.dot_dimension_numbers<[2], [1], [1], [2], [0, 0, 0, 1, 1, 2], [0], [0]>} : vector<2x24x24xf32>, vector<2x24x8xf32>, vector<2x24x8xf32> -> vector<2x24x8xf32>
    %168 = vector.shape_cast %167 : vector<2x24x8xf32> to vector<48x8xf32>
    %c0_110 = arith.constant 0 : index
    %c1_111 = arith.constant 1 : index
    %c0_112 = arith.constant 0 : index
    %c0_113 = arith.constant 0 : index
    %169 = vector.load %arg7[%c0_110, %c1_111, %c0_112, %c0_113] : memref<2x4x8x32xf32, #tpu.memory_space<vmem>>, vector<1x1x8x32xf32>
    %170 = vector.shape_cast %169 : vector<1x1x8x32xf32> to vector<8x32xf32>
    %cst_114 = arith.constant dense<0.000000e+00> : vector<48x32xf32>
    %171 = tpu.matmul %168, %170, %cst_114 {dimension_numbers = #tpu.dot_dimension_numbers<[1], [0], [0], [1], [0, 0, 1, 1], [], []>} : vector<48x8xf32>, vector<8x32xf32>, vector<48x32xf32> -> vector<48x32xf32>
    %172 = arith.addf %122, %171 : vector<48x32xf32>
    %c0_115 = arith.constant 0 : index
    %c0_116 = arith.constant 0 : index
    %c2_117 = arith.constant 2 : index
    %c0_118 = arith.constant 0 : index
    %c0_119 = arith.constant 0 : index
    %173 = vector.load %arg5[%c0_115, %c0_116, %c2_117, %c0_118, %c0_119] : memref<2x3x4x32x8xf32, #tpu.memory_space<vmem>>, vector<1x1x1x32x8xf32>
    %174 = vector.shape_cast %173 : vector<1x1x1x32x8xf32> to vector<32x8xf32>
    %cst_120 = arith.constant dense<0.000000e+00> : vector<48x8xf32>
    %175 = tpu.matmul %71, %174, %cst_120 {dimension_numbers = #tpu.dot_dimension_numbers<[1], [0], [0], [1], [0, 0, 1, 1], [], []>} : vector<48x32xf32>, vector<32x8xf32>, vector<48x8xf32> -> vector<48x8xf32>
    %c0_121 = arith.constant 0 : index
    %c0_122 = arith.constant 0 : index
    %c2_123 = arith.constant 2 : index
    %c0_124 = arith.constant 0 : index
    %176 = vector.load %arg6[%c0_121, %c0_122, %c2_123, %c0_124] : memref<2x3x4x8xf32, #tpu.memory_space<vmem>>, vector<1x1x1x8xf32>
    %177 = vector.shape_cast %176 : vector<1x1x1x8xf32> to vector<8xf32>
    %178 = vector.shape_cast %177 : vector<8xf32> to vector<1x8xf32>
    %179 = vector.broadcast %178 : vector<1x8xf32> to vector<48x8xf32>
    %180 = arith.addf %175, %179 : vector<48x8xf32>
    %181 = vector.shape_cast %180 : vector<48x8xf32> to vector<2x24x8xf32>
    %c0_125 = arith.constant 0 : index
    %c1_126 = arith.constant 1 : index
    %c2_127 = arith.constant 2 : index
    %c0_128 = arith.constant 0 : index
    %c0_129 = arith.constant 0 : index
    %182 = vector.load %arg5[%c0_125, %c1_126, %c2_127, %c0_128, %c0_129] : memref<2x3x4x32x8xf32, #tpu.memory_space<vmem>>, vector<1x1x1x32x8xf32>
    %183 = vector.shape_cast %182 : vector<1x1x1x32x8xf32> to vector<32x8xf32>
    %cst_130 = arith.constant dense<0.000000e+00> : vector<48x8xf32>
    %184 = tpu.matmul %71, %183, %cst_130 {dimension_numbers = #tpu.dot_dimension_numbers<[1], [0], [0], [1], [0, 0, 1, 1], [], []>} : vector<48x32xf32>, vector<32x8xf32>, vector<48x8xf32> -> vector<48x8xf32>
    %c0_131 = arith.constant 0 : index
    %c1_132 = arith.constant 1 : index
    %c2_133 = arith.constant 2 : index
    %c0_134 = arith.constant 0 : index
    %185 = vector.load %arg6[%c0_131, %c1_132, %c2_133, %c0_134] : memref<2x3x4x8xf32, #tpu.memory_space<vmem>>, vector<1x1x1x8xf32>
    %186 = vector.shape_cast %185 : vector<1x1x1x8xf32> to vector<8xf32>
    %187 = vector.shape_cast %186 : vector<8xf32> to vector<1x8xf32>
    %188 = vector.broadcast %187 : vector<1x8xf32> to vector<48x8xf32>
    %189 = arith.addf %184, %188 : vector<48x8xf32>
    %190 = vector.shape_cast %189 : vector<48x8xf32> to vector<2x24x8xf32>
    %c0_135 = arith.constant 0 : index
    %c2_136 = arith.constant 2 : index
    %c2_137 = arith.constant 2 : index
    %c0_138 = arith.constant 0 : index
    %c0_139 = arith.constant 0 : index
    %191 = vector.load %arg5[%c0_135, %c2_136, %c2_137, %c0_138, %c0_139] : memref<2x3x4x32x8xf32, #tpu.memory_space<vmem>>, vector<1x1x1x32x8xf32>
    %192 = vector.shape_cast %191 : vector<1x1x1x32x8xf32> to vector<32x8xf32>
    %cst_140 = arith.constant dense<0.000000e+00> : vector<48x8xf32>
    %193 = tpu.matmul %71, %192, %cst_140 {dimension_numbers = #tpu.dot_dimension_numbers<[1], [0], [0], [1], [0, 0, 1, 1], [], []>} : vector<48x32xf32>, vector<32x8xf32>, vector<48x8xf32> -> vector<48x8xf32>
    %c0_141 = arith.constant 0 : index
    %c2_142 = arith.constant 2 : index
    %c2_143 = arith.constant 2 : index
    %c0_144 = arith.constant 0 : index
    %194 = vector.load %arg6[%c0_141, %c2_142, %c2_143, %c0_144] : memref<2x3x4x8xf32, #tpu.memory_space<vmem>>, vector<1x1x1x8xf32>
    %195 = vector.shape_cast %194 : vector<1x1x1x8xf32> to vector<8xf32>
    %196 = vector.shape_cast %195 : vector<8xf32> to vector<1x8xf32>
    %197 = vector.broadcast %196 : vector<1x8xf32> to vector<48x8xf32>
    %198 = arith.addf %193, %197 : vector<48x8xf32>
    %199 = vector.shape_cast %198 : vector<48x8xf32> to vector<2x24x8xf32>
    %cst_145 = arith.constant dense<0.000000e+00> : vector<2x24x24xf32>
    %200 = tpu.matmul %181, %190, %cst_145 {dimension_numbers = #tpu.dot_dimension_numbers<[2], [2], [1], [1], [0, 0, 0, 1, 1, 1], [0], [0]>} : vector<2x24x8xf32>, vector<2x24x8xf32>, vector<2x24x24xf32> -> vector<2x24x24xf32>
    %cst_146 = arith.constant 0.353553385 : f32
    %201 = vector.broadcast %cst_146 : f32 to vector<2x24x24xf32>
    %202 = arith.mulf %200, %201 : vector<2x24x24xf32>
    %cst_147 = arith.constant -1.000000e+30 : f32
    %203 = vector.shape_cast %2 : vector<1x1x24xi1> to vector<1x1x24xi1>
    %204 = vector.broadcast %203 : vector<1x1x24xi1> to vector<2x24x24xi1>
    %205 = vector.broadcast %cst_147 : f32 to vector<2x24x24xf32>
    %206 = arith.select %204, %202, %205 : vector<2x24x24xi1>, vector<2x24x24xf32>
    %cst_148 = arith.constant dense<0xFF800000> : vector<2x24xf32>
    %207 = vector.multi_reduction <maximumf>, %206, %cst_148 [2] : vector<2x24x24xf32> to vector<2x24xf32>
    %208 = vector.shape_cast %207 : vector<2x24xf32> to vector<2x24x1xf32>
    %209 = vector.broadcast %208 : vector<2x24x1xf32> to vector<2x24x24xf32>
    %210 = arith.subf %206, %209 : vector<2x24x24xf32>
    %211 = math.exp %210 : vector<2x24x24xf32>
    %cst_149 = arith.constant dense<0.000000e+00> : vector<2x24xf32>
    %212 = vector.multi_reduction <add>, %211, %cst_149 [2] : vector<2x24x24xf32> to vector<2x24xf32>
    %213 = vector.shape_cast %212 : vector<2x24xf32> to vector<2x24x1xf32>
    %214 = tpu.reciprocal %213 {approx = true} : vector<2x24x1xf32> -> vector<2x24x1xf32>
    %215 = vector.broadcast %214 : vector<2x24x1xf32> to vector<2x24x24xf32>
    %216 = arith.mulf %211, %215 : vector<2x24x24xf32>
    %cst_150 = arith.constant dense<0.000000e+00> : vector<2x24x8xf32>
    %217 = tpu.matmul %216, %199, %cst_150 {dimension_numbers = #tpu.dot_dimension_numbers<[2], [1], [1], [2], [0, 0, 0, 1, 1, 2], [0], [0]>} : vector<2x24x24xf32>, vector<2x24x8xf32>, vector<2x24x8xf32> -> vector<2x24x8xf32>
    %218 = vector.shape_cast %217 : vector<2x24x8xf32> to vector<48x8xf32>
    %c0_151 = arith.constant 0 : index
    %c2_152 = arith.constant 2 : index
    %c0_153 = arith.constant 0 : index
    %c0_154 = arith.constant 0 : index
    %219 = vector.load %arg7[%c0_151, %c2_152, %c0_153, %c0_154] : memref<2x4x8x32xf32, #tpu.memory_space<vmem>>, vector<1x1x8x32xf32>
    %220 = vector.shape_cast %219 : vector<1x1x8x32xf32> to vector<8x32xf32>
    %cst_155 = arith.constant dense<0.000000e+00> : vector<48x32xf32>
    %221 = tpu.matmul %218, %220, %cst_155 {dimension_numbers = #tpu.dot_dimension_numbers<[1], [0], [0], [1], [0, 0, 1, 1], [], []>} : vector<48x8xf32>, vector<8x32xf32>, vector<48x32xf32> -> vector<48x32xf32>
    %222 = arith.addf %172, %221 : vector<48x32xf32>
    %c0_156 = arith.constant 0 : index
    %c0_157 = arith.constant 0 : index
    %c3_158 = arith.constant 3 : index
    %c0_159 = arith.constant 0 : index
    %c0_160 = arith.constant 0 : index
    %223 = vector.load %arg5[%c0_156, %c0_157, %c3_158, %c0_159, %c0_160] : memref<2x3x4x32x8xf32, #tpu.memory_space<vmem>>, vector<1x1x1x32x8xf32>
    %224 = vector.shape_cast %223 : vector<1x1x1x32x8xf32> to vector<32x8xf32>
    %cst_161 = arith.constant dense<0.000000e+00> : vector<48x8xf32>
    %225 = tpu.matmul %71, %224, %cst_161 {dimension_numbers = #tpu.dot_dimension_numbers<[1], [0], [0], [1], [0, 0, 1, 1], [], []>} : vector<48x32xf32>, vector<32x8xf32>, vector<48x8xf32> -> vector<48x8xf32>
    %c0_162 = arith.constant 0 : index
    %c0_163 = arith.constant 0 : index
    %c3_164 = arith.constant 3 : index
    %c0_165 = arith.constant 0 : index
    %226 = vector.load %arg6[%c0_162, %c0_163, %c3_164, %c0_165] : memref<2x3x4x8xf32, #tpu.memory_space<vmem>>, vector<1x1x1x8xf32>
    %227 = vector.shape_cast %226 : vector<1x1x1x8xf32> to vector<8xf32>
    %228 = vector.shape_cast %227 : vector<8xf32> to vector<1x8xf32>
    %229 = vector.broadcast %228 : vector<1x8xf32> to vector<48x8xf32>
    %230 = arith.addf %225, %229 : vector<48x8xf32>
    %231 = vector.shape_cast %230 : vector<48x8xf32> to vector<2x24x8xf32>
    %c0_166 = arith.constant 0 : index
    %c1_167 = arith.constant 1 : index
    %c3_168 = arith.constant 3 : index
    %c0_169 = arith.constant 0 : index
    %c0_170 = arith.constant 0 : index
    %232 = vector.load %arg5[%c0_166, %c1_167, %c3_168, %c0_169, %c0_170] : memref<2x3x4x32x8xf32, #tpu.memory_space<vmem>>, vector<1x1x1x32x8xf32>
    %233 = vector.shape_cast %232 : vector<1x1x1x32x8xf32> to vector<32x8xf32>
    %cst_171 = arith.constant dense<0.000000e+00> : vector<48x8xf32>
    %234 = tpu.matmul %71, %233, %cst_171 {dimension_numbers = #tpu.dot_dimension_numbers<[1], [0], [0], [1], [0, 0, 1, 1], [], []>} : vector<48x32xf32>, vector<32x8xf32>, vector<48x8xf32> -> vector<48x8xf32>
    %c0_172 = arith.constant 0 : index
    %c1_173 = arith.constant 1 : index
    %c3_174 = arith.constant 3 : index
    %c0_175 = arith.constant 0 : index
    %235 = vector.load %arg6[%c0_172, %c1_173, %c3_174, %c0_175] : memref<2x3x4x8xf32, #tpu.memory_space<vmem>>, vector<1x1x1x8xf32>
    %236 = vector.shape_cast %235 : vector<1x1x1x8xf32> to vector<8xf32>
    %237 = vector.shape_cast %236 : vector<8xf32> to vector<1x8xf32>
    %238 = vector.broadcast %237 : vector<1x8xf32> to vector<48x8xf32>
    %239 = arith.addf %234, %238 : vector<48x8xf32>
    %240 = vector.shape_cast %239 : vector<48x8xf32> to vector<2x24x8xf32>
    %c0_176 = arith.constant 0 : index
    %c2_177 = arith.constant 2 : index
    %c3_178 = arith.constant 3 : index
    %c0_179 = arith.constant 0 : index
    %c0_180 = arith.constant 0 : index
    %241 = vector.load %arg5[%c0_176, %c2_177, %c3_178, %c0_179, %c0_180] : memref<2x3x4x32x8xf32, #tpu.memory_space<vmem>>, vector<1x1x1x32x8xf32>
    %242 = vector.shape_cast %241 : vector<1x1x1x32x8xf32> to vector<32x8xf32>
    %cst_181 = arith.constant dense<0.000000e+00> : vector<48x8xf32>
    %243 = tpu.matmul %71, %242, %cst_181 {dimension_numbers = #tpu.dot_dimension_numbers<[1], [0], [0], [1], [0, 0, 1, 1], [], []>} : vector<48x32xf32>, vector<32x8xf32>, vector<48x8xf32> -> vector<48x8xf32>
    %c0_182 = arith.constant 0 : index
    %c2_183 = arith.constant 2 : index
    %c3_184 = arith.constant 3 : index
    %c0_185 = arith.constant 0 : index
    %244 = vector.load %arg6[%c0_182, %c2_183, %c3_184, %c0_185] : memref<2x3x4x8xf32, #tpu.memory_space<vmem>>, vector<1x1x1x8xf32>
    %245 = vector.shape_cast %244 : vector<1x1x1x8xf32> to vector<8xf32>
    %246 = vector.shape_cast %245 : vector<8xf32> to vector<1x8xf32>
    %247 = vector.broadcast %246 : vector<1x8xf32> to vector<48x8xf32>
    %248 = arith.addf %243, %247 : vector<48x8xf32>
    %249 = vector.shape_cast %248 : vector<48x8xf32> to vector<2x24x8xf32>
    %cst_186 = arith.constant dense<0.000000e+00> : vector<2x24x24xf32>
    %250 = tpu.matmul %231, %240, %cst_186 {dimension_numbers = #tpu.dot_dimension_numbers<[2], [2], [1], [1], [0, 0, 0, 1, 1, 1], [0], [0]>} : vector<2x24x8xf32>, vector<2x24x8xf32>, vector<2x24x24xf32> -> vector<2x24x24xf32>
    %cst_187 = arith.constant 0.353553385 : f32
    %251 = vector.broadcast %cst_187 : f32 to vector<2x24x24xf32>
    %252 = arith.mulf %250, %251 : vector<2x24x24xf32>
    %cst_188 = arith.constant -1.000000e+30 : f32
    %253 = vector.shape_cast %2 : vector<1x1x24xi1> to vector<1x1x24xi1>
    %254 = vector.broadcast %253 : vector<1x1x24xi1> to vector<2x24x24xi1>
    %255 = vector.broadcast %cst_188 : f32 to vector<2x24x24xf32>
    %256 = arith.select %254, %252, %255 : vector<2x24x24xi1>, vector<2x24x24xf32>
    %cst_189 = arith.constant dense<0xFF800000> : vector<2x24xf32>
    %257 = vector.multi_reduction <maximumf>, %256, %cst_189 [2] : vector<2x24x24xf32> to vector<2x24xf32>
    %258 = vector.shape_cast %257 : vector<2x24xf32> to vector<2x24x1xf32>
    %259 = vector.broadcast %258 : vector<2x24x1xf32> to vector<2x24x24xf32>
    %260 = arith.subf %256, %259 : vector<2x24x24xf32>
    %261 = math.exp %260 : vector<2x24x24xf32>
    %cst_190 = arith.constant dense<0.000000e+00> : vector<2x24xf32>
    %262 = vector.multi_reduction <add>, %261, %cst_190 [2] : vector<2x24x24xf32> to vector<2x24xf32>
    %263 = vector.shape_cast %262 : vector<2x24xf32> to vector<2x24x1xf32>
    %264 = tpu.reciprocal %263 {approx = true} : vector<2x24x1xf32> -> vector<2x24x1xf32>
    %265 = vector.broadcast %264 : vector<2x24x1xf32> to vector<2x24x24xf32>
    %266 = arith.mulf %261, %265 : vector<2x24x24xf32>
    %cst_191 = arith.constant dense<0.000000e+00> : vector<2x24x8xf32>
    %267 = tpu.matmul %266, %249, %cst_191 {dimension_numbers = #tpu.dot_dimension_numbers<[2], [1], [1], [2], [0, 0, 0, 1, 1, 2], [0], [0]>} : vector<2x24x24xf32>, vector<2x24x8xf32>, vector<2x24x8xf32> -> vector<2x24x8xf32>
    %268 = vector.shape_cast %267 : vector<2x24x8xf32> to vector<48x8xf32>
    %c0_192 = arith.constant 0 : index
    %c3_193 = arith.constant 3 : index
    %c0_194 = arith.constant 0 : index
    %c0_195 = arith.constant 0 : index
    %269 = vector.load %arg7[%c0_192, %c3_193, %c0_194, %c0_195] : memref<2x4x8x32xf32, #tpu.memory_space<vmem>>, vector<1x1x8x32xf32>
    %270 = vector.shape_cast %269 : vector<1x1x8x32xf32> to vector<8x32xf32>
    %cst_196 = arith.constant dense<0.000000e+00> : vector<48x32xf32>
    %271 = tpu.matmul %268, %270, %cst_196 {dimension_numbers = #tpu.dot_dimension_numbers<[1], [0], [0], [1], [0, 0, 1, 1], [], []>} : vector<48x8xf32>, vector<8x32xf32>, vector<48x32xf32> -> vector<48x32xf32>
    %272 = arith.addf %222, %271 : vector<48x32xf32>
    %273 = arith.addf %35, %272 : vector<48x32xf32>
    %274 = vector.shape_cast %45 : vector<32xf32> to vector<1x32xf32>
    %275 = vector.broadcast %274 : vector<1x32xf32> to vector<48x32xf32>
    %276 = arith.addf %273, %275 : vector<48x32xf32>
    %cst_197 = arith.constant dense<0.000000e+00> : vector<48xf32>
    %277 = vector.multi_reduction <add>, %276, %cst_197 [1] : vector<48x32xf32> to vector<48xf32>
    %278 = vector.shape_cast %277 : vector<48xf32> to vector<48x1xf32>
    %cst_198 = arith.constant 3.200000e+01 : f32
    %279 = vector.broadcast %cst_198 : f32 to vector<48x1xf32>
    %280 = arith.divf %278, %279 : vector<48x1xf32>
    %281 = vector.broadcast %280 : vector<48x1xf32> to vector<48x32xf32>
    %282 = arith.subf %276, %281 : vector<48x32xf32>
    %283 = arith.mulf %282, %282 : vector<48x32xf32>
    %cst_199 = arith.constant dense<0.000000e+00> : vector<48xf32>
    %284 = vector.multi_reduction <add>, %283, %cst_199 [1] : vector<48x32xf32> to vector<48xf32>
    %285 = vector.shape_cast %284 : vector<48xf32> to vector<48x1xf32>
    %cst_200 = arith.constant 3.200000e+01 : f32
    %286 = vector.broadcast %cst_200 : f32 to vector<48x1xf32>
    %287 = arith.divf %285, %286 : vector<48x1xf32>
    %288 = vector.broadcast %280 : vector<48x1xf32> to vector<48x32xf32>
    %289 = arith.subf %276, %288 : vector<48x32xf32>
    %cst_201 = arith.constant 9.99999974E-6 : f32
    %290 = vector.broadcast %cst_201 : f32 to vector<48x1xf32>
    %291 = arith.addf %287, %290 : vector<48x1xf32>
    %292 = math.rsqrt %291 : vector<48x1xf32>
    %293 = vector.broadcast %292 : vector<48x1xf32> to vector<48x32xf32>
    %294 = arith.mulf %289, %293 : vector<48x32xf32>
    %295 = vector.shape_cast %41 : vector<32xf32> to vector<1x32xf32>
    %296 = vector.broadcast %295 : vector<1x32xf32> to vector<48x32xf32>
    %297 = arith.mulf %294, %296 : vector<48x32xf32>
    %298 = vector.shape_cast %43 : vector<32xf32> to vector<1x32xf32>
    %299 = vector.broadcast %298 : vector<1x32xf32> to vector<48x32xf32>
    %300 = arith.addf %297, %299 : vector<48x32xf32>
    %c0_202 = arith.constant 0 : index
    %c0_203 = arith.constant 0 : index
    %c0_204 = arith.constant 0 : index
    %301 = vector.load %arg9[%c0_202, %c0_203, %c0_204] : memref<2x32x128xf32, #tpu.memory_space<vmem>>, vector<1x32x128xf32>
    %302 = vector.shape_cast %301 : vector<1x32x128xf32> to vector<32x128xf32>
    %cst_205 = arith.constant dense<0.000000e+00> : vector<48x128xf32>
    %303 = tpu.matmul %300, %302, %cst_205 {dimension_numbers = #tpu.dot_dimension_numbers<[1], [0], [0], [1], [0, 0, 1, 1], [], []>} : vector<48x32xf32>, vector<32x128xf32>, vector<48x128xf32> -> vector<48x128xf32>
    %c0_206 = arith.constant 0 : index
    %c0_207 = arith.constant 0 : index
    %304 = vector.load %arg10[%c0_206, %c0_207] : memref<2x128xf32, #tpu.memory_space<vmem>>, vector<1x128xf32>
    %305 = vector.shape_cast %304 : vector<1x128xf32> to vector<128xf32>
    %306 = vector.shape_cast %305 : vector<128xf32> to vector<1x128xf32>
    %307 = vector.broadcast %306 : vector<1x128xf32> to vector<48x128xf32>
    %308 = arith.addf %303, %307 : vector<48x128xf32>
    %cst_208 = arith.constant 1.702000e+00 : f32
    %309 = vector.broadcast %cst_208 : f32 to vector<48x128xf32>
    %310 = arith.mulf %309, %308 : vector<48x128xf32>
    %311 = arith.negf %310 : vector<48x128xf32>
    %312 = math.exp %311 : vector<48x128xf32>
    %cst_209 = arith.constant 1.000000e+00 : f32
    %313 = vector.broadcast %cst_209 : f32 to vector<48x128xf32>
    %314 = arith.addf %313, %312 : vector<48x128xf32>
    %315 = arith.divf %313, %314 : vector<48x128xf32>
    %316 = arith.mulf %308, %315 : vector<48x128xf32>
    %c0_210 = arith.constant 0 : index
    %c0_211 = arith.constant 0 : index
    %c0_212 = arith.constant 0 : index
    %317 = vector.load %arg11[%c0_210, %c0_211, %c0_212] : memref<2x128x32xf32, #tpu.memory_space<vmem>>, vector<1x128x32xf32>
    %318 = vector.shape_cast %317 : vector<1x128x32xf32> to vector<128x32xf32>
    %cst_213 = arith.constant dense<0.000000e+00> : vector<48x32xf32>
    %319 = tpu.matmul %316, %318, %cst_213 {dimension_numbers = #tpu.dot_dimension_numbers<[1], [0], [0], [1], [0, 0, 1, 1], [], []>} : vector<48x128xf32>, vector<128x32xf32>, vector<48x32xf32> -> vector<48x32xf32>
    %320 = arith.addf %276, %319 : vector<48x32xf32>
    %321 = vector.shape_cast %47 : vector<32xf32> to vector<1x32xf32>
    %322 = vector.broadcast %321 : vector<1x32xf32> to vector<48x32xf32>
    %323 = arith.addf %320, %322 : vector<48x32xf32>
    %c1_214 = arith.constant 1 : index
    %c0_215 = arith.constant 0 : index
    %c0_216 = arith.constant 0 : index
    %324 = vector.load %arg8[%c1_214, %c0_215, %c0_216] : memref<2x6x32xf32, #tpu.memory_space<vmem>>, vector<1x1x32xf32>
    %325 = vector.shape_cast %324 : vector<1x1x32xf32> to vector<32xf32>
    %c1_217 = arith.constant 1 : index
    %c1_218 = arith.constant 1 : index
    %c0_219 = arith.constant 0 : index
    %326 = vector.load %arg8[%c1_217, %c1_218, %c0_219] : memref<2x6x32xf32, #tpu.memory_space<vmem>>, vector<1x1x32xf32>
    %327 = vector.shape_cast %326 : vector<1x1x32xf32> to vector<32xf32>
    %c1_220 = arith.constant 1 : index
    %c2_221 = arith.constant 2 : index
    %c0_222 = arith.constant 0 : index
    %328 = vector.load %arg8[%c1_220, %c2_221, %c0_222] : memref<2x6x32xf32, #tpu.memory_space<vmem>>, vector<1x1x32xf32>
    %329 = vector.shape_cast %328 : vector<1x1x32xf32> to vector<32xf32>
    %c1_223 = arith.constant 1 : index
    %c3_224 = arith.constant 3 : index
    %c0_225 = arith.constant 0 : index
    %330 = vector.load %arg8[%c1_223, %c3_224, %c0_225] : memref<2x6x32xf32, #tpu.memory_space<vmem>>, vector<1x1x32xf32>
    %331 = vector.shape_cast %330 : vector<1x1x32xf32> to vector<32xf32>
    %c1_226 = arith.constant 1 : index
    %c4_227 = arith.constant 4 : index
    %c0_228 = arith.constant 0 : index
    %332 = vector.load %arg8[%c1_226, %c4_227, %c0_228] : memref<2x6x32xf32, #tpu.memory_space<vmem>>, vector<1x1x32xf32>
    %333 = vector.shape_cast %332 : vector<1x1x32xf32> to vector<32xf32>
    %c1_229 = arith.constant 1 : index
    %c5_230 = arith.constant 5 : index
    %c0_231 = arith.constant 0 : index
    %334 = vector.load %arg8[%c1_229, %c5_230, %c0_231] : memref<2x6x32xf32, #tpu.memory_space<vmem>>, vector<1x1x32xf32>
    %335 = vector.shape_cast %334 : vector<1x1x32xf32> to vector<32xf32>
    %cst_232 = arith.constant dense<0.000000e+00> : vector<48xf32>
    %336 = vector.multi_reduction <add>, %323, %cst_232 [1] : vector<48x32xf32> to vector<48xf32>
    %337 = vector.shape_cast %336 : vector<48xf32> to vector<48x1xf32>
    %cst_233 = arith.constant 3.200000e+01 : f32
    %338 = vector.broadcast %cst_233 : f32 to vector<48x1xf32>
    %339 = arith.divf %337, %338 : vector<48x1xf32>
    %340 = vector.broadcast %339 : vector<48x1xf32> to vector<48x32xf32>
    %341 = arith.subf %323, %340 : vector<48x32xf32>
    %342 = arith.mulf %341, %341 : vector<48x32xf32>
    %cst_234 = arith.constant dense<0.000000e+00> : vector<48xf32>
    %343 = vector.multi_reduction <add>, %342, %cst_234 [1] : vector<48x32xf32> to vector<48xf32>
    %344 = vector.shape_cast %343 : vector<48xf32> to vector<48x1xf32>
    %cst_235 = arith.constant 3.200000e+01 : f32
    %345 = vector.broadcast %cst_235 : f32 to vector<48x1xf32>
    %346 = arith.divf %344, %345 : vector<48x1xf32>
    %347 = vector.broadcast %339 : vector<48x1xf32> to vector<48x32xf32>
    %348 = arith.subf %323, %347 : vector<48x32xf32>
    %cst_236 = arith.constant 9.99999974E-6 : f32
    %349 = vector.broadcast %cst_236 : f32 to vector<48x1xf32>
    %350 = arith.addf %346, %349 : vector<48x1xf32>
    %351 = math.rsqrt %350 : vector<48x1xf32>
    %352 = vector.broadcast %351 : vector<48x1xf32> to vector<48x32xf32>
    %353 = arith.mulf %348, %352 : vector<48x32xf32>
    %354 = vector.shape_cast %325 : vector<32xf32> to vector<1x32xf32>
    %355 = vector.broadcast %354 : vector<1x32xf32> to vector<48x32xf32>
    %356 = arith.mulf %353, %355 : vector<48x32xf32>
    %357 = vector.shape_cast %327 : vector<32xf32> to vector<1x32xf32>
    %358 = vector.broadcast %357 : vector<1x32xf32> to vector<48x32xf32>
    %359 = arith.addf %356, %358 : vector<48x32xf32>
    %cst_237 = arith.constant 0.000000e+00 : f32
    %360 = vector.broadcast %cst_237 : f32 to vector<48x32xf32>
    %c1_238 = arith.constant 1 : index
    %c0_239 = arith.constant 0 : index
    %c0_240 = arith.constant 0 : index
    %c0_241 = arith.constant 0 : index
    %c0_242 = arith.constant 0 : index
    %361 = vector.load %arg5[%c1_238, %c0_239, %c0_240, %c0_241, %c0_242] : memref<2x3x4x32x8xf32, #tpu.memory_space<vmem>>, vector<1x1x1x32x8xf32>
    %362 = vector.shape_cast %361 : vector<1x1x1x32x8xf32> to vector<32x8xf32>
    %cst_243 = arith.constant dense<0.000000e+00> : vector<48x8xf32>
    %363 = tpu.matmul %359, %362, %cst_243 {dimension_numbers = #tpu.dot_dimension_numbers<[1], [0], [0], [1], [0, 0, 1, 1], [], []>} : vector<48x32xf32>, vector<32x8xf32>, vector<48x8xf32> -> vector<48x8xf32>
    %c1_244 = arith.constant 1 : index
    %c0_245 = arith.constant 0 : index
    %c0_246 = arith.constant 0 : index
    %c0_247 = arith.constant 0 : index
    %364 = vector.load %arg6[%c1_244, %c0_245, %c0_246, %c0_247] : memref<2x3x4x8xf32, #tpu.memory_space<vmem>>, vector<1x1x1x8xf32>
    %365 = vector.shape_cast %364 : vector<1x1x1x8xf32> to vector<8xf32>
    %366 = vector.shape_cast %365 : vector<8xf32> to vector<1x8xf32>
    %367 = vector.broadcast %366 : vector<1x8xf32> to vector<48x8xf32>
    %368 = arith.addf %363, %367 : vector<48x8xf32>
    %369 = vector.shape_cast %368 : vector<48x8xf32> to vector<2x24x8xf32>
    %c1_248 = arith.constant 1 : index
    %c1_249 = arith.constant 1 : index
    %c0_250 = arith.constant 0 : index
    %c0_251 = arith.constant 0 : index
    %c0_252 = arith.constant 0 : index
    %370 = vector.load %arg5[%c1_248, %c1_249, %c0_250, %c0_251, %c0_252] : memref<2x3x4x32x8xf32, #tpu.memory_space<vmem>>, vector<1x1x1x32x8xf32>
    %371 = vector.shape_cast %370 : vector<1x1x1x32x8xf32> to vector<32x8xf32>
    %cst_253 = arith.constant dense<0.000000e+00> : vector<48x8xf32>
    %372 = tpu.matmul %359, %371, %cst_253 {dimension_numbers = #tpu.dot_dimension_numbers<[1], [0], [0], [1], [0, 0, 1, 1], [], []>} : vector<48x32xf32>, vector<32x8xf32>, vector<48x8xf32> -> vector<48x8xf32>
    %c1_254 = arith.constant 1 : index
    %c1_255 = arith.constant 1 : index
    %c0_256 = arith.constant 0 : index
    %c0_257 = arith.constant 0 : index
    %373 = vector.load %arg6[%c1_254, %c1_255, %c0_256, %c0_257] : memref<2x3x4x8xf32, #tpu.memory_space<vmem>>, vector<1x1x1x8xf32>
    %374 = vector.shape_cast %373 : vector<1x1x1x8xf32> to vector<8xf32>
    %375 = vector.shape_cast %374 : vector<8xf32> to vector<1x8xf32>
    %376 = vector.broadcast %375 : vector<1x8xf32> to vector<48x8xf32>
    %377 = arith.addf %372, %376 : vector<48x8xf32>
    %378 = vector.shape_cast %377 : vector<48x8xf32> to vector<2x24x8xf32>
    %c1_258 = arith.constant 1 : index
    %c2_259 = arith.constant 2 : index
    %c0_260 = arith.constant 0 : index
    %c0_261 = arith.constant 0 : index
    %c0_262 = arith.constant 0 : index
    %379 = vector.load %arg5[%c1_258, %c2_259, %c0_260, %c0_261, %c0_262] : memref<2x3x4x32x8xf32, #tpu.memory_space<vmem>>, vector<1x1x1x32x8xf32>
    %380 = vector.shape_cast %379 : vector<1x1x1x32x8xf32> to vector<32x8xf32>
    %cst_263 = arith.constant dense<0.000000e+00> : vector<48x8xf32>
    %381 = tpu.matmul %359, %380, %cst_263 {dimension_numbers = #tpu.dot_dimension_numbers<[1], [0], [0], [1], [0, 0, 1, 1], [], []>} : vector<48x32xf32>, vector<32x8xf32>, vector<48x8xf32> -> vector<48x8xf32>
    %c1_264 = arith.constant 1 : index
    %c2_265 = arith.constant 2 : index
    %c0_266 = arith.constant 0 : index
    %c0_267 = arith.constant 0 : index
    %382 = vector.load %arg6[%c1_264, %c2_265, %c0_266, %c0_267] : memref<2x3x4x8xf32, #tpu.memory_space<vmem>>, vector<1x1x1x8xf32>
    %383 = vector.shape_cast %382 : vector<1x1x1x8xf32> to vector<8xf32>
    %384 = vector.shape_cast %383 : vector<8xf32> to vector<1x8xf32>
    %385 = vector.broadcast %384 : vector<1x8xf32> to vector<48x8xf32>
    %386 = arith.addf %381, %385 : vector<48x8xf32>
    %387 = vector.shape_cast %386 : vector<48x8xf32> to vector<2x24x8xf32>
    %cst_268 = arith.constant dense<0.000000e+00> : vector<2x24x24xf32>
    %388 = tpu.matmul %369, %378, %cst_268 {dimension_numbers = #tpu.dot_dimension_numbers<[2], [2], [1], [1], [0, 0, 0, 1, 1, 1], [0], [0]>} : vector<2x24x8xf32>, vector<2x24x8xf32>, vector<2x24x24xf32> -> vector<2x24x24xf32>
    %cst_269 = arith.constant 0.353553385 : f32
    %389 = vector.broadcast %cst_269 : f32 to vector<2x24x24xf32>
    %390 = arith.mulf %388, %389 : vector<2x24x24xf32>
    %cst_270 = arith.constant -1.000000e+30 : f32
    %391 = vector.shape_cast %2 : vector<1x1x24xi1> to vector<1x1x24xi1>
    %392 = vector.broadcast %391 : vector<1x1x24xi1> to vector<2x24x24xi1>
    %393 = vector.broadcast %cst_270 : f32 to vector<2x24x24xf32>
    %394 = arith.select %392, %390, %393 : vector<2x24x24xi1>, vector<2x24x24xf32>
    %cst_271 = arith.constant dense<0xFF800000> : vector<2x24xf32>
    %395 = vector.multi_reduction <maximumf>, %394, %cst_271 [2] : vector<2x24x24xf32> to vector<2x24xf32>
    %396 = vector.shape_cast %395 : vector<2x24xf32> to vector<2x24x1xf32>
    %397 = vector.broadcast %396 : vector<2x24x1xf32> to vector<2x24x24xf32>
    %398 = arith.subf %394, %397 : vector<2x24x24xf32>
    %399 = math.exp %398 : vector<2x24x24xf32>
    %cst_272 = arith.constant dense<0.000000e+00> : vector<2x24xf32>
    %400 = vector.multi_reduction <add>, %399, %cst_272 [2] : vector<2x24x24xf32> to vector<2x24xf32>
    %401 = vector.shape_cast %400 : vector<2x24xf32> to vector<2x24x1xf32>
    %402 = tpu.reciprocal %401 {approx = true} : vector<2x24x1xf32> -> vector<2x24x1xf32>
    %403 = vector.broadcast %402 : vector<2x24x1xf32> to vector<2x24x24xf32>
    %404 = arith.mulf %399, %403 : vector<2x24x24xf32>
    %cst_273 = arith.constant dense<0.000000e+00> : vector<2x24x8xf32>
    %405 = tpu.matmul %404, %387, %cst_273 {dimension_numbers = #tpu.dot_dimension_numbers<[2], [1], [1], [2], [0, 0, 0, 1, 1, 2], [0], [0]>} : vector<2x24x24xf32>, vector<2x24x8xf32>, vector<2x24x8xf32> -> vector<2x24x8xf32>
    %406 = vector.shape_cast %405 : vector<2x24x8xf32> to vector<48x8xf32>
    %c1_274 = arith.constant 1 : index
    %c0_275 = arith.constant 0 : index
    %c0_276 = arith.constant 0 : index
    %c0_277 = arith.constant 0 : index
    %407 = vector.load %arg7[%c1_274, %c0_275, %c0_276, %c0_277] : memref<2x4x8x32xf32, #tpu.memory_space<vmem>>, vector<1x1x8x32xf32>
    %408 = vector.shape_cast %407 : vector<1x1x8x32xf32> to vector<8x32xf32>
    %cst_278 = arith.constant dense<0.000000e+00> : vector<48x32xf32>
    %409 = tpu.matmul %406, %408, %cst_278 {dimension_numbers = #tpu.dot_dimension_numbers<[1], [0], [0], [1], [0, 0, 1, 1], [], []>} : vector<48x8xf32>, vector<8x32xf32>, vector<48x32xf32> -> vector<48x32xf32>
    %410 = arith.addf %360, %409 : vector<48x32xf32>
    %c1_279 = arith.constant 1 : index
    %c0_280 = arith.constant 0 : index
    %c1_281 = arith.constant 1 : index
    %c0_282 = arith.constant 0 : index
    %c0_283 = arith.constant 0 : index
    %411 = vector.load %arg5[%c1_279, %c0_280, %c1_281, %c0_282, %c0_283] : memref<2x3x4x32x8xf32, #tpu.memory_space<vmem>>, vector<1x1x1x32x8xf32>
    %412 = vector.shape_cast %411 : vector<1x1x1x32x8xf32> to vector<32x8xf32>
    %cst_284 = arith.constant dense<0.000000e+00> : vector<48x8xf32>
    %413 = tpu.matmul %359, %412, %cst_284 {dimension_numbers = #tpu.dot_dimension_numbers<[1], [0], [0], [1], [0, 0, 1, 1], [], []>} : vector<48x32xf32>, vector<32x8xf32>, vector<48x8xf32> -> vector<48x8xf32>
    %c1_285 = arith.constant 1 : index
    %c0_286 = arith.constant 0 : index
    %c1_287 = arith.constant 1 : index
    %c0_288 = arith.constant 0 : index
    %414 = vector.load %arg6[%c1_285, %c0_286, %c1_287, %c0_288] : memref<2x3x4x8xf32, #tpu.memory_space<vmem>>, vector<1x1x1x8xf32>
    %415 = vector.shape_cast %414 : vector<1x1x1x8xf32> to vector<8xf32>
    %416 = vector.shape_cast %415 : vector<8xf32> to vector<1x8xf32>
    %417 = vector.broadcast %416 : vector<1x8xf32> to vector<48x8xf32>
    %418 = arith.addf %413, %417 : vector<48x8xf32>
    %419 = vector.shape_cast %418 : vector<48x8xf32> to vector<2x24x8xf32>
    %c1_289 = arith.constant 1 : index
    %c1_290 = arith.constant 1 : index
    %c1_291 = arith.constant 1 : index
    %c0_292 = arith.constant 0 : index
    %c0_293 = arith.constant 0 : index
    %420 = vector.load %arg5[%c1_289, %c1_290, %c1_291, %c0_292, %c0_293] : memref<2x3x4x32x8xf32, #tpu.memory_space<vmem>>, vector<1x1x1x32x8xf32>
    %421 = vector.shape_cast %420 : vector<1x1x1x32x8xf32> to vector<32x8xf32>
    %cst_294 = arith.constant dense<0.000000e+00> : vector<48x8xf32>
    %422 = tpu.matmul %359, %421, %cst_294 {dimension_numbers = #tpu.dot_dimension_numbers<[1], [0], [0], [1], [0, 0, 1, 1], [], []>} : vector<48x32xf32>, vector<32x8xf32>, vector<48x8xf32> -> vector<48x8xf32>
    %c1_295 = arith.constant 1 : index
    %c1_296 = arith.constant 1 : index
    %c1_297 = arith.constant 1 : index
    %c0_298 = arith.constant 0 : index
    %423 = vector.load %arg6[%c1_295, %c1_296, %c1_297, %c0_298] : memref<2x3x4x8xf32, #tpu.memory_space<vmem>>, vector<1x1x1x8xf32>
    %424 = vector.shape_cast %423 : vector<1x1x1x8xf32> to vector<8xf32>
    %425 = vector.shape_cast %424 : vector<8xf32> to vector<1x8xf32>
    %426 = vector.broadcast %425 : vector<1x8xf32> to vector<48x8xf32>
    %427 = arith.addf %422, %426 : vector<48x8xf32>
    %428 = vector.shape_cast %427 : vector<48x8xf32> to vector<2x24x8xf32>
    %c1_299 = arith.constant 1 : index
    %c2_300 = arith.constant 2 : index
    %c1_301 = arith.constant 1 : index
    %c0_302 = arith.constant 0 : index
    %c0_303 = arith.constant 0 : index
    %429 = vector.load %arg5[%c1_299, %c2_300, %c1_301, %c0_302, %c0_303] : memref<2x3x4x32x8xf32, #tpu.memory_space<vmem>>, vector<1x1x1x32x8xf32>
    %430 = vector.shape_cast %429 : vector<1x1x1x32x8xf32> to vector<32x8xf32>
    %cst_304 = arith.constant dense<0.000000e+00> : vector<48x8xf32>
    %431 = tpu.matmul %359, %430, %cst_304 {dimension_numbers = #tpu.dot_dimension_numbers<[1], [0], [0], [1], [0, 0, 1, 1], [], []>} : vector<48x32xf32>, vector<32x8xf32>, vector<48x8xf32> -> vector<48x8xf32>
    %c1_305 = arith.constant 1 : index
    %c2_306 = arith.constant 2 : index
    %c1_307 = arith.constant 1 : index
    %c0_308 = arith.constant 0 : index
    %432 = vector.load %arg6[%c1_305, %c2_306, %c1_307, %c0_308] : memref<2x3x4x8xf32, #tpu.memory_space<vmem>>, vector<1x1x1x8xf32>
    %433 = vector.shape_cast %432 : vector<1x1x1x8xf32> to vector<8xf32>
    %434 = vector.shape_cast %433 : vector<8xf32> to vector<1x8xf32>
    %435 = vector.broadcast %434 : vector<1x8xf32> to vector<48x8xf32>
    %436 = arith.addf %431, %435 : vector<48x8xf32>
    %437 = vector.shape_cast %436 : vector<48x8xf32> to vector<2x24x8xf32>
    %cst_309 = arith.constant dense<0.000000e+00> : vector<2x24x24xf32>
    %438 = tpu.matmul %419, %428, %cst_309 {dimension_numbers = #tpu.dot_dimension_numbers<[2], [2], [1], [1], [0, 0, 0, 1, 1, 1], [0], [0]>} : vector<2x24x8xf32>, vector<2x24x8xf32>, vector<2x24x24xf32> -> vector<2x24x24xf32>
    %cst_310 = arith.constant 0.353553385 : f32
    %439 = vector.broadcast %cst_310 : f32 to vector<2x24x24xf32>
    %440 = arith.mulf %438, %439 : vector<2x24x24xf32>
    %cst_311 = arith.constant -1.000000e+30 : f32
    %441 = vector.shape_cast %2 : vector<1x1x24xi1> to vector<1x1x24xi1>
    %442 = vector.broadcast %441 : vector<1x1x24xi1> to vector<2x24x24xi1>
    %443 = vector.broadcast %cst_311 : f32 to vector<2x24x24xf32>
    %444 = arith.select %442, %440, %443 : vector<2x24x24xi1>, vector<2x24x24xf32>
    %cst_312 = arith.constant dense<0xFF800000> : vector<2x24xf32>
    %445 = vector.multi_reduction <maximumf>, %444, %cst_312 [2] : vector<2x24x24xf32> to vector<2x24xf32>
    %446 = vector.shape_cast %445 : vector<2x24xf32> to vector<2x24x1xf32>
    %447 = vector.broadcast %446 : vector<2x24x1xf32> to vector<2x24x24xf32>
    %448 = arith.subf %444, %447 : vector<2x24x24xf32>
    %449 = math.exp %448 : vector<2x24x24xf32>
    %cst_313 = arith.constant dense<0.000000e+00> : vector<2x24xf32>
    %450 = vector.multi_reduction <add>, %449, %cst_313 [2] : vector<2x24x24xf32> to vector<2x24xf32>
    %451 = vector.shape_cast %450 : vector<2x24xf32> to vector<2x24x1xf32>
    %452 = tpu.reciprocal %451 {approx = true} : vector<2x24x1xf32> -> vector<2x24x1xf32>
    %453 = vector.broadcast %452 : vector<2x24x1xf32> to vector<2x24x24xf32>
    %454 = arith.mulf %449, %453 : vector<2x24x24xf32>
    %cst_314 = arith.constant dense<0.000000e+00> : vector<2x24x8xf32>
    %455 = tpu.matmul %454, %437, %cst_314 {dimension_numbers = #tpu.dot_dimension_numbers<[2], [1], [1], [2], [0, 0, 0, 1, 1, 2], [0], [0]>} : vector<2x24x24xf32>, vector<2x24x8xf32>, vector<2x24x8xf32> -> vector<2x24x8xf32>
    %456 = vector.shape_cast %455 : vector<2x24x8xf32> to vector<48x8xf32>
    %c1_315 = arith.constant 1 : index
    %c1_316 = arith.constant 1 : index
    %c0_317 = arith.constant 0 : index
    %c0_318 = arith.constant 0 : index
    %457 = vector.load %arg7[%c1_315, %c1_316, %c0_317, %c0_318] : memref<2x4x8x32xf32, #tpu.memory_space<vmem>>, vector<1x1x8x32xf32>
    %458 = vector.shape_cast %457 : vector<1x1x8x32xf32> to vector<8x32xf32>
    %cst_319 = arith.constant dense<0.000000e+00> : vector<48x32xf32>
    %459 = tpu.matmul %456, %458, %cst_319 {dimension_numbers = #tpu.dot_dimension_numbers<[1], [0], [0], [1], [0, 0, 1, 1], [], []>} : vector<48x8xf32>, vector<8x32xf32>, vector<48x32xf32> -> vector<48x32xf32>
    %460 = arith.addf %410, %459 : vector<48x32xf32>
    %c1_320 = arith.constant 1 : index
    %c0_321 = arith.constant 0 : index
    %c2_322 = arith.constant 2 : index
    %c0_323 = arith.constant 0 : index
    %c0_324 = arith.constant 0 : index
    %461 = vector.load %arg5[%c1_320, %c0_321, %c2_322, %c0_323, %c0_324] : memref<2x3x4x32x8xf32, #tpu.memory_space<vmem>>, vector<1x1x1x32x8xf32>
    %462 = vector.shape_cast %461 : vector<1x1x1x32x8xf32> to vector<32x8xf32>
    %cst_325 = arith.constant dense<0.000000e+00> : vector<48x8xf32>
    %463 = tpu.matmul %359, %462, %cst_325 {dimension_numbers = #tpu.dot_dimension_numbers<[1], [0], [0], [1], [0, 0, 1, 1], [], []>} : vector<48x32xf32>, vector<32x8xf32>, vector<48x8xf32> -> vector<48x8xf32>
    %c1_326 = arith.constant 1 : index
    %c0_327 = arith.constant 0 : index
    %c2_328 = arith.constant 2 : index
    %c0_329 = arith.constant 0 : index
    %464 = vector.load %arg6[%c1_326, %c0_327, %c2_328, %c0_329] : memref<2x3x4x8xf32, #tpu.memory_space<vmem>>, vector<1x1x1x8xf32>
    %465 = vector.shape_cast %464 : vector<1x1x1x8xf32> to vector<8xf32>
    %466 = vector.shape_cast %465 : vector<8xf32> to vector<1x8xf32>
    %467 = vector.broadcast %466 : vector<1x8xf32> to vector<48x8xf32>
    %468 = arith.addf %463, %467 : vector<48x8xf32>
    %469 = vector.shape_cast %468 : vector<48x8xf32> to vector<2x24x8xf32>
    %c1_330 = arith.constant 1 : index
    %c1_331 = arith.constant 1 : index
    %c2_332 = arith.constant 2 : index
    %c0_333 = arith.constant 0 : index
    %c0_334 = arith.constant 0 : index
    %470 = vector.load %arg5[%c1_330, %c1_331, %c2_332, %c0_333, %c0_334] : memref<2x3x4x32x8xf32, #tpu.memory_space<vmem>>, vector<1x1x1x32x8xf32>
    %471 = vector.shape_cast %470 : vector<1x1x1x32x8xf32> to vector<32x8xf32>
    %cst_335 = arith.constant dense<0.000000e+00> : vector<48x8xf32>
    %472 = tpu.matmul %359, %471, %cst_335 {dimension_numbers = #tpu.dot_dimension_numbers<[1], [0], [0], [1], [0, 0, 1, 1], [], []>} : vector<48x32xf32>, vector<32x8xf32>, vector<48x8xf32> -> vector<48x8xf32>
    %c1_336 = arith.constant 1 : index
    %c1_337 = arith.constant 1 : index
    %c2_338 = arith.constant 2 : index
    %c0_339 = arith.constant 0 : index
    %473 = vector.load %arg6[%c1_336, %c1_337, %c2_338, %c0_339] : memref<2x3x4x8xf32, #tpu.memory_space<vmem>>, vector<1x1x1x8xf32>
    %474 = vector.shape_cast %473 : vector<1x1x1x8xf32> to vector<8xf32>
    %475 = vector.shape_cast %474 : vector<8xf32> to vector<1x8xf32>
    %476 = vector.broadcast %475 : vector<1x8xf32> to vector<48x8xf32>
    %477 = arith.addf %472, %476 : vector<48x8xf32>
    %478 = vector.shape_cast %477 : vector<48x8xf32> to vector<2x24x8xf32>
    %c1_340 = arith.constant 1 : index
    %c2_341 = arith.constant 2 : index
    %c2_342 = arith.constant 2 : index
    %c0_343 = arith.constant 0 : index
    %c0_344 = arith.constant 0 : index
    %479 = vector.load %arg5[%c1_340, %c2_341, %c2_342, %c0_343, %c0_344] : memref<2x3x4x32x8xf32, #tpu.memory_space<vmem>>, vector<1x1x1x32x8xf32>
    %480 = vector.shape_cast %479 : vector<1x1x1x32x8xf32> to vector<32x8xf32>
    %cst_345 = arith.constant dense<0.000000e+00> : vector<48x8xf32>
    %481 = tpu.matmul %359, %480, %cst_345 {dimension_numbers = #tpu.dot_dimension_numbers<[1], [0], [0], [1], [0, 0, 1, 1], [], []>} : vector<48x32xf32>, vector<32x8xf32>, vector<48x8xf32> -> vector<48x8xf32>
    %c1_346 = arith.constant 1 : index
    %c2_347 = arith.constant 2 : index
    %c2_348 = arith.constant 2 : index
    %c0_349 = arith.constant 0 : index
    %482 = vector.load %arg6[%c1_346, %c2_347, %c2_348, %c0_349] : memref<2x3x4x8xf32, #tpu.memory_space<vmem>>, vector<1x1x1x8xf32>
    %483 = vector.shape_cast %482 : vector<1x1x1x8xf32> to vector<8xf32>
    %484 = vector.shape_cast %483 : vector<8xf32> to vector<1x8xf32>
    %485 = vector.broadcast %484 : vector<1x8xf32> to vector<48x8xf32>
    %486 = arith.addf %481, %485 : vector<48x8xf32>
    %487 = vector.shape_cast %486 : vector<48x8xf32> to vector<2x24x8xf32>
    %cst_350 = arith.constant dense<0.000000e+00> : vector<2x24x24xf32>
    %488 = tpu.matmul %469, %478, %cst_350 {dimension_numbers = #tpu.dot_dimension_numbers<[2], [2], [1], [1], [0, 0, 0, 1, 1, 1], [0], [0]>} : vector<2x24x8xf32>, vector<2x24x8xf32>, vector<2x24x24xf32> -> vector<2x24x24xf32>
    %cst_351 = arith.constant 0.353553385 : f32
    %489 = vector.broadcast %cst_351 : f32 to vector<2x24x24xf32>
    %490 = arith.mulf %488, %489 : vector<2x24x24xf32>
    %cst_352 = arith.constant -1.000000e+30 : f32
    %491 = vector.shape_cast %2 : vector<1x1x24xi1> to vector<1x1x24xi1>
    %492 = vector.broadcast %491 : vector<1x1x24xi1> to vector<2x24x24xi1>
    %493 = vector.broadcast %cst_352 : f32 to vector<2x24x24xf32>
    %494 = arith.select %492, %490, %493 : vector<2x24x24xi1>, vector<2x24x24xf32>
    %cst_353 = arith.constant dense<0xFF800000> : vector<2x24xf32>
    %495 = vector.multi_reduction <maximumf>, %494, %cst_353 [2] : vector<2x24x24xf32> to vector<2x24xf32>
    %496 = vector.shape_cast %495 : vector<2x24xf32> to vector<2x24x1xf32>
    %497 = vector.broadcast %496 : vector<2x24x1xf32> to vector<2x24x24xf32>
    %498 = arith.subf %494, %497 : vector<2x24x24xf32>
    %499 = math.exp %498 : vector<2x24x24xf32>
    %cst_354 = arith.constant dense<0.000000e+00> : vector<2x24xf32>
    %500 = vector.multi_reduction <add>, %499, %cst_354 [2] : vector<2x24x24xf32> to vector<2x24xf32>
    %501 = vector.shape_cast %500 : vector<2x24xf32> to vector<2x24x1xf32>
    %502 = tpu.reciprocal %501 {approx = true} : vector<2x24x1xf32> -> vector<2x24x1xf32>
    %503 = vector.broadcast %502 : vector<2x24x1xf32> to vector<2x24x24xf32>
    %504 = arith.mulf %499, %503 : vector<2x24x24xf32>
    %cst_355 = arith.constant dense<0.000000e+00> : vector<2x24x8xf32>
    %505 = tpu.matmul %504, %487, %cst_355 {dimension_numbers = #tpu.dot_dimension_numbers<[2], [1], [1], [2], [0, 0, 0, 1, 1, 2], [0], [0]>} : vector<2x24x24xf32>, vector<2x24x8xf32>, vector<2x24x8xf32> -> vector<2x24x8xf32>
    %506 = vector.shape_cast %505 : vector<2x24x8xf32> to vector<48x8xf32>
    %c1_356 = arith.constant 1 : index
    %c2_357 = arith.constant 2 : index
    %c0_358 = arith.constant 0 : index
    %c0_359 = arith.constant 0 : index
    %507 = vector.load %arg7[%c1_356, %c2_357, %c0_358, %c0_359] : memref<2x4x8x32xf32, #tpu.memory_space<vmem>>, vector<1x1x8x32xf32>
    %508 = vector.shape_cast %507 : vector<1x1x8x32xf32> to vector<8x32xf32>
    %cst_360 = arith.constant dense<0.000000e+00> : vector<48x32xf32>
    %509 = tpu.matmul %506, %508, %cst_360 {dimension_numbers = #tpu.dot_dimension_numbers<[1], [0], [0], [1], [0, 0, 1, 1], [], []>} : vector<48x8xf32>, vector<8x32xf32>, vector<48x32xf32> -> vector<48x32xf32>
    %510 = arith.addf %460, %509 : vector<48x32xf32>
    %c1_361 = arith.constant 1 : index
    %c0_362 = arith.constant 0 : index
    %c3_363 = arith.constant 3 : index
    %c0_364 = arith.constant 0 : index
    %c0_365 = arith.constant 0 : index
    %511 = vector.load %arg5[%c1_361, %c0_362, %c3_363, %c0_364, %c0_365] : memref<2x3x4x32x8xf32, #tpu.memory_space<vmem>>, vector<1x1x1x32x8xf32>
    %512 = vector.shape_cast %511 : vector<1x1x1x32x8xf32> to vector<32x8xf32>
    %cst_366 = arith.constant dense<0.000000e+00> : vector<48x8xf32>
    %513 = tpu.matmul %359, %512, %cst_366 {dimension_numbers = #tpu.dot_dimension_numbers<[1], [0], [0], [1], [0, 0, 1, 1], [], []>} : vector<48x32xf32>, vector<32x8xf32>, vector<48x8xf32> -> vector<48x8xf32>
    %c1_367 = arith.constant 1 : index
    %c0_368 = arith.constant 0 : index
    %c3_369 = arith.constant 3 : index
    %c0_370 = arith.constant 0 : index
    %514 = vector.load %arg6[%c1_367, %c0_368, %c3_369, %c0_370] : memref<2x3x4x8xf32, #tpu.memory_space<vmem>>, vector<1x1x1x8xf32>
    %515 = vector.shape_cast %514 : vector<1x1x1x8xf32> to vector<8xf32>
    %516 = vector.shape_cast %515 : vector<8xf32> to vector<1x8xf32>
    %517 = vector.broadcast %516 : vector<1x8xf32> to vector<48x8xf32>
    %518 = arith.addf %513, %517 : vector<48x8xf32>
    %519 = vector.shape_cast %518 : vector<48x8xf32> to vector<2x24x8xf32>
    %c1_371 = arith.constant 1 : index
    %c1_372 = arith.constant 1 : index
    %c3_373 = arith.constant 3 : index
    %c0_374 = arith.constant 0 : index
    %c0_375 = arith.constant 0 : index
    %520 = vector.load %arg5[%c1_371, %c1_372, %c3_373, %c0_374, %c0_375] : memref<2x3x4x32x8xf32, #tpu.memory_space<vmem>>, vector<1x1x1x32x8xf32>
    %521 = vector.shape_cast %520 : vector<1x1x1x32x8xf32> to vector<32x8xf32>
    %cst_376 = arith.constant dense<0.000000e+00> : vector<48x8xf32>
    %522 = tpu.matmul %359, %521, %cst_376 {dimension_numbers = #tpu.dot_dimension_numbers<[1], [0], [0], [1], [0, 0, 1, 1], [], []>} : vector<48x32xf32>, vector<32x8xf32>, vector<48x8xf32> -> vector<48x8xf32>
    %c1_377 = arith.constant 1 : index
    %c1_378 = arith.constant 1 : index
    %c3_379 = arith.constant 3 : index
    %c0_380 = arith.constant 0 : index
    %523 = vector.load %arg6[%c1_377, %c1_378, %c3_379, %c0_380] : memref<2x3x4x8xf32, #tpu.memory_space<vmem>>, vector<1x1x1x8xf32>
    %524 = vector.shape_cast %523 : vector<1x1x1x8xf32> to vector<8xf32>
    %525 = vector.shape_cast %524 : vector<8xf32> to vector<1x8xf32>
    %526 = vector.broadcast %525 : vector<1x8xf32> to vector<48x8xf32>
    %527 = arith.addf %522, %526 : vector<48x8xf32>
    %528 = vector.shape_cast %527 : vector<48x8xf32> to vector<2x24x8xf32>
    %c1_381 = arith.constant 1 : index
    %c2_382 = arith.constant 2 : index
    %c3_383 = arith.constant 3 : index
    %c0_384 = arith.constant 0 : index
    %c0_385 = arith.constant 0 : index
    %529 = vector.load %arg5[%c1_381, %c2_382, %c3_383, %c0_384, %c0_385] : memref<2x3x4x32x8xf32, #tpu.memory_space<vmem>>, vector<1x1x1x32x8xf32>
    %530 = vector.shape_cast %529 : vector<1x1x1x32x8xf32> to vector<32x8xf32>
    %cst_386 = arith.constant dense<0.000000e+00> : vector<48x8xf32>
    %531 = tpu.matmul %359, %530, %cst_386 {dimension_numbers = #tpu.dot_dimension_numbers<[1], [0], [0], [1], [0, 0, 1, 1], [], []>} : vector<48x32xf32>, vector<32x8xf32>, vector<48x8xf32> -> vector<48x8xf32>
    %c1_387 = arith.constant 1 : index
    %c2_388 = arith.constant 2 : index
    %c3_389 = arith.constant 3 : index
    %c0_390 = arith.constant 0 : index
    %532 = vector.load %arg6[%c1_387, %c2_388, %c3_389, %c0_390] : memref<2x3x4x8xf32, #tpu.memory_space<vmem>>, vector<1x1x1x8xf32>
    %533 = vector.shape_cast %532 : vector<1x1x1x8xf32> to vector<8xf32>
    %534 = vector.shape_cast %533 : vector<8xf32> to vector<1x8xf32>
    %535 = vector.broadcast %534 : vector<1x8xf32> to vector<48x8xf32>
    %536 = arith.addf %531, %535 : vector<48x8xf32>
    %537 = vector.shape_cast %536 : vector<48x8xf32> to vector<2x24x8xf32>
    %cst_391 = arith.constant dense<0.000000e+00> : vector<2x24x24xf32>
    %538 = tpu.matmul %519, %528, %cst_391 {dimension_numbers = #tpu.dot_dimension_numbers<[2], [2], [1], [1], [0, 0, 0, 1, 1, 1], [0], [0]>} : vector<2x24x8xf32>, vector<2x24x8xf32>, vector<2x24x24xf32> -> vector<2x24x24xf32>
    %cst_392 = arith.constant 0.353553385 : f32
    %539 = vector.broadcast %cst_392 : f32 to vector<2x24x24xf32>
    %540 = arith.mulf %538, %539 : vector<2x24x24xf32>
    %cst_393 = arith.constant -1.000000e+30 : f32
    %541 = vector.shape_cast %2 : vector<1x1x24xi1> to vector<1x1x24xi1>
    %542 = vector.broadcast %541 : vector<1x1x24xi1> to vector<2x24x24xi1>
    %543 = vector.broadcast %cst_393 : f32 to vector<2x24x24xf32>
    %544 = arith.select %542, %540, %543 : vector<2x24x24xi1>, vector<2x24x24xf32>
    %cst_394 = arith.constant dense<0xFF800000> : vector<2x24xf32>
    %545 = vector.multi_reduction <maximumf>, %544, %cst_394 [2] : vector<2x24x24xf32> to vector<2x24xf32>
    %546 = vector.shape_cast %545 : vector<2x24xf32> to vector<2x24x1xf32>
    %547 = vector.broadcast %546 : vector<2x24x1xf32> to vector<2x24x24xf32>
    %548 = arith.subf %544, %547 : vector<2x24x24xf32>
    %549 = math.exp %548 : vector<2x24x24xf32>
    %cst_395 = arith.constant dense<0.000000e+00> : vector<2x24xf32>
    %550 = vector.multi_reduction <add>, %549, %cst_395 [2] : vector<2x24x24xf32> to vector<2x24xf32>
    %551 = vector.shape_cast %550 : vector<2x24xf32> to vector<2x24x1xf32>
    %552 = tpu.reciprocal %551 {approx = true} : vector<2x24x1xf32> -> vector<2x24x1xf32>
    %553 = vector.broadcast %552 : vector<2x24x1xf32> to vector<2x24x24xf32>
    %554 = arith.mulf %549, %553 : vector<2x24x24xf32>
    %cst_396 = arith.constant dense<0.000000e+00> : vector<2x24x8xf32>
    %555 = tpu.matmul %554, %537, %cst_396 {dimension_numbers = #tpu.dot_dimension_numbers<[2], [1], [1], [2], [0, 0, 0, 1, 1, 2], [0], [0]>} : vector<2x24x24xf32>, vector<2x24x8xf32>, vector<2x24x8xf32> -> vector<2x24x8xf32>
    %556 = vector.shape_cast %555 : vector<2x24x8xf32> to vector<48x8xf32>
    %c1_397 = arith.constant 1 : index
    %c3_398 = arith.constant 3 : index
    %c0_399 = arith.constant 0 : index
    %c0_400 = arith.constant 0 : index
    %557 = vector.load %arg7[%c1_397, %c3_398, %c0_399, %c0_400] : memref<2x4x8x32xf32, #tpu.memory_space<vmem>>, vector<1x1x8x32xf32>
    %558 = vector.shape_cast %557 : vector<1x1x8x32xf32> to vector<8x32xf32>
    %cst_401 = arith.constant dense<0.000000e+00> : vector<48x32xf32>
    %559 = tpu.matmul %556, %558, %cst_401 {dimension_numbers = #tpu.dot_dimension_numbers<[1], [0], [0], [1], [0, 0, 1, 1], [], []>} : vector<48x8xf32>, vector<8x32xf32>, vector<48x32xf32> -> vector<48x32xf32>
    %560 = arith.addf %510, %559 : vector<48x32xf32>
    %561 = arith.addf %323, %560 : vector<48x32xf32>
    %562 = vector.shape_cast %333 : vector<32xf32> to vector<1x32xf32>
    %563 = vector.broadcast %562 : vector<1x32xf32> to vector<48x32xf32>
    %564 = arith.addf %561, %563 : vector<48x32xf32>
    %cst_402 = arith.constant dense<0.000000e+00> : vector<48xf32>
    %565 = vector.multi_reduction <add>, %564, %cst_402 [1] : vector<48x32xf32> to vector<48xf32>
    %566 = vector.shape_cast %565 : vector<48xf32> to vector<48x1xf32>
    %cst_403 = arith.constant 3.200000e+01 : f32
    %567 = vector.broadcast %cst_403 : f32 to vector<48x1xf32>
    %568 = arith.divf %566, %567 : vector<48x1xf32>
    %569 = vector.broadcast %568 : vector<48x1xf32> to vector<48x32xf32>
    %570 = arith.subf %564, %569 : vector<48x32xf32>
    %571 = arith.mulf %570, %570 : vector<48x32xf32>
    %cst_404 = arith.constant dense<0.000000e+00> : vector<48xf32>
    %572 = vector.multi_reduction <add>, %571, %cst_404 [1] : vector<48x32xf32> to vector<48xf32>
    %573 = vector.shape_cast %572 : vector<48xf32> to vector<48x1xf32>
    %cst_405 = arith.constant 3.200000e+01 : f32
    %574 = vector.broadcast %cst_405 : f32 to vector<48x1xf32>
    %575 = arith.divf %573, %574 : vector<48x1xf32>
    %576 = vector.broadcast %568 : vector<48x1xf32> to vector<48x32xf32>
    %577 = arith.subf %564, %576 : vector<48x32xf32>
    %cst_406 = arith.constant 9.99999974E-6 : f32
    %578 = vector.broadcast %cst_406 : f32 to vector<48x1xf32>
    %579 = arith.addf %575, %578 : vector<48x1xf32>
    %580 = math.rsqrt %579 : vector<48x1xf32>
    %581 = vector.broadcast %580 : vector<48x1xf32> to vector<48x32xf32>
    %582 = arith.mulf %577, %581 : vector<48x32xf32>
    %583 = vector.shape_cast %329 : vector<32xf32> to vector<1x32xf32>
    %584 = vector.broadcast %583 : vector<1x32xf32> to vector<48x32xf32>
    %585 = arith.mulf %582, %584 : vector<48x32xf32>
    %586 = vector.shape_cast %331 : vector<32xf32> to vector<1x32xf32>
    %587 = vector.broadcast %586 : vector<1x32xf32> to vector<48x32xf32>
    %588 = arith.addf %585, %587 : vector<48x32xf32>
    %c1_407 = arith.constant 1 : index
    %c0_408 = arith.constant 0 : index
    %c0_409 = arith.constant 0 : index
    %589 = vector.load %arg9[%c1_407, %c0_408, %c0_409] : memref<2x32x128xf32, #tpu.memory_space<vmem>>, vector<1x32x128xf32>
    %590 = vector.shape_cast %589 : vector<1x32x128xf32> to vector<32x128xf32>
    %cst_410 = arith.constant dense<0.000000e+00> : vector<48x128xf32>
    %591 = tpu.matmul %588, %590, %cst_410 {dimension_numbers = #tpu.dot_dimension_numbers<[1], [0], [0], [1], [0, 0, 1, 1], [], []>} : vector<48x32xf32>, vector<32x128xf32>, vector<48x128xf32> -> vector<48x128xf32>
    %c1_411 = arith.constant 1 : index
    %c0_412 = arith.constant 0 : index
    %592 = vector.load %arg10[%c1_411, %c0_412] : memref<2x128xf32, #tpu.memory_space<vmem>>, vector<1x128xf32>
    %593 = vector.shape_cast %592 : vector<1x128xf32> to vector<128xf32>
    %594 = vector.shape_cast %593 : vector<128xf32> to vector<1x128xf32>
    %595 = vector.broadcast %594 : vector<1x128xf32> to vector<48x128xf32>
    %596 = arith.addf %591, %595 : vector<48x128xf32>
    %cst_413 = arith.constant 1.702000e+00 : f32
    %597 = vector.broadcast %cst_413 : f32 to vector<48x128xf32>
    %598 = arith.mulf %597, %596 : vector<48x128xf32>
    %599 = arith.negf %598 : vector<48x128xf32>
    %600 = math.exp %599 : vector<48x128xf32>
    %cst_414 = arith.constant 1.000000e+00 : f32
    %601 = vector.broadcast %cst_414 : f32 to vector<48x128xf32>
    %602 = arith.addf %601, %600 : vector<48x128xf32>
    %603 = arith.divf %601, %602 : vector<48x128xf32>
    %604 = arith.mulf %596, %603 : vector<48x128xf32>
    %c1_415 = arith.constant 1 : index
    %c0_416 = arith.constant 0 : index
    %c0_417 = arith.constant 0 : index
    %605 = vector.load %arg11[%c1_415, %c0_416, %c0_417] : memref<2x128x32xf32, #tpu.memory_space<vmem>>, vector<1x128x32xf32>
    %606 = vector.shape_cast %605 : vector<1x128x32xf32> to vector<128x32xf32>
    %cst_418 = arith.constant dense<0.000000e+00> : vector<48x32xf32>
    %607 = tpu.matmul %604, %606, %cst_418 {dimension_numbers = #tpu.dot_dimension_numbers<[1], [0], [0], [1], [0, 0, 1, 1], [], []>} : vector<48x128xf32>, vector<128x32xf32>, vector<48x32xf32> -> vector<48x32xf32>
    %608 = arith.addf %564, %607 : vector<48x32xf32>
    %609 = vector.shape_cast %335 : vector<32xf32> to vector<1x32xf32>
    %610 = vector.broadcast %609 : vector<1x32xf32> to vector<48x32xf32>
    %611 = arith.addf %608, %610 : vector<48x32xf32>
    %612 = vector.extract_strided_slice %611 {offsets = [0, 0], sizes = [1, 32], strides = [1, 1]} : vector<48x32xf32> to vector<1x32xf32>
    %613 = vector.extract_strided_slice %611 {offsets = [24, 0], sizes = [1, 32], strides = [1, 1]} : vector<48x32xf32> to vector<1x32xf32>
    %614 = tpu.concatenate %612, %613 in 0 : vector<1x32xf32>, vector<1x32xf32> -> vector<2x32xf32>
    %c0_419 = arith.constant 0 : index
    %c0_420 = arith.constant 0 : index
    %615 = vector.load %arg12[%c0_419, %c0_420] : memref<32x128xf32, #tpu.memory_space<vmem>>, vector<32x128xf32>
    %cst_421 = arith.constant dense<0.000000e+00> : vector<2x128xf32>
    %616 = tpu.matmul %614, %615, %cst_421 {dimension_numbers = #tpu.dot_dimension_numbers<[1], [0], [0], [1], [0, 0, 1, 1], [], []>} : vector<2x32xf32>, vector<32x128xf32>, vector<2x128xf32> -> vector<2x128xf32>
    %c0_422 = arith.constant 0 : index
    %c0_423 = arith.constant 0 : index
    %617 = vector.load %arg13[%c0_422, %c0_423] : memref<1x128xf32, #tpu.memory_space<vmem>>, vector<1x128xf32>
    %618 = vector.broadcast %617 : vector<1x128xf32> to vector<2x128xf32>
    %619 = arith.addf %616, %618 : vector<2x128xf32>
    %c0_424 = arith.constant 0 : index
    %c0_425 = arith.constant 0 : index
    %620 = vector.load %arg14[%c0_424, %c0_425] : memref<2x128xf32, #tpu.memory_space<vmem>>, vector<2x128xf32>
    tpu.vector_store %arg14[%c0_424, %c0_425], %619 {strides = array<i32>} : memref<2x128xf32, #tpu.memory_space<vmem>>, vector<2x128xf32>,
    return
  }
  func.func @transform_0(%arg0: i32) -> (i32, i32) {
    %c0_i32 = arith.constant 0 : i32
    %c0_i32_0 = arith.constant 0 : i32
    %c0_i32_1 = arith.constant 0 : i32
    return %c0_i32, %c0_i32_0 : i32, i32
  }
  func.func @transform_1(%arg0: i32) -> (i32, i32) {
    %c0_i32 = arith.constant 0 : i32
    %c0_i32_0 = arith.constant 0 : i32
    %c0_i32_1 = arith.constant 0 : i32
    return %c0_i32, %c0_i32_0 : i32, i32
  }
  func.func @transform_2(%arg0: i32) -> (i32, i32) {
    %c0_i32 = arith.constant 0 : i32
    %c0_i32_0 = arith.constant 0 : i32
    %c0_i32_1 = arith.constant 0 : i32
    return %c0_i32, %c0_i32_0 : i32, i32
  }
  func.func @transform_3(%arg0: i32) -> (i32, i32) {
    %c0_i32 = arith.constant 0 : i32
    %c0_i32_0 = arith.constant 0 : i32
    %c0_i32_1 = arith.constant 0 : i32
    return %c0_i32, %c0_i32_0 : i32, i32
  }
  func.func @transform_4(%arg0: i32) -> (i32, i32, i32, i32, i32) {
    %c0_i32 = arith.constant 0 : i32
    %c0_i32_0 = arith.constant 0 : i32
    %c0_i32_1 = arith.constant 0 : i32
    %c0_i32_2 = arith.constant 0 : i32
    %c0_i32_3 = arith.constant 0 : i32
    %c0_i32_4 = arith.constant 0 : i32
    return %c0_i32, %c0_i32_0, %c0_i32_1, %c0_i32_2, %c0_i32_3 : i32, i32, i32, i32, i32
  }
  func.func @transform_5(%arg0: i32) -> (i32, i32, i32, i32) {
    %c0_i32 = arith.constant 0 : i32
    %c0_i32_0 = arith.constant 0 : i32
    %c0_i32_1 = arith.constant 0 : i32
    %c0_i32_2 = arith.constant 0 : i32
    %c0_i32_3 = arith.constant 0 : i32
    return %c0_i32, %c0_i32_0, %c0_i32_1, %c0_i32_2 : i32, i32, i32, i32
  }
  func.func @transform_6(%arg0: i32) -> (i32, i32, i32, i32) {
    %c0_i32 = arith.constant 0 : i32
    %c0_i32_0 = arith.constant 0 : i32
    %c0_i32_1 = arith.constant 0 : i32
    %c0_i32_2 = arith.constant 0 : i32
    %c0_i32_3 = arith.constant 0 : i32
    return %c0_i32, %c0_i32_0, %c0_i32_1, %c0_i32_2 : i32, i32, i32, i32
  }
  func.func @transform_7(%arg0: i32) -> (i32, i32, i32) {
    %c0_i32 = arith.constant 0 : i32
    %c0_i32_0 = arith.constant 0 : i32
    %c0_i32_1 = arith.constant 0 : i32
    %c0_i32_2 = arith.constant 0 : i32
    return %c0_i32, %c0_i32_0, %c0_i32_1 : i32, i32, i32
  }
  func.func @transform_8(%arg0: i32) -> (i32, i32, i32) {
    %c0_i32 = arith.constant 0 : i32
    %c0_i32_0 = arith.constant 0 : i32
    %c0_i32_1 = arith.constant 0 : i32
    %c0_i32_2 = arith.constant 0 : i32
    return %c0_i32, %c0_i32_0, %c0_i32_1 : i32, i32, i32
  }
  func.func @transform_9(%arg0: i32) -> (i32, i32) {
    %c0_i32 = arith.constant 0 : i32
    %c0_i32_0 = arith.constant 0 : i32
    %c0_i32_1 = arith.constant 0 : i32
    return %c0_i32, %c0_i32_0 : i32, i32
  }
  func.func @transform_10(%arg0: i32) -> (i32, i32, i32) {
    %c0_i32 = arith.constant 0 : i32
    %c0_i32_0 = arith.constant 0 : i32
    %c0_i32_1 = arith.constant 0 : i32
    %c0_i32_2 = arith.constant 0 : i32
    return %c0_i32, %c0_i32_0, %c0_i32_1 : i32, i32, i32
  }
  func.func @transform_11(%arg0: i32) -> (i32, i32) {
    %c0_i32 = arith.constant 0 : i32
    %c0_i32_0 = arith.constant 0 : i32
    %c0_i32_1 = arith.constant 0 : i32
    return %c0_i32, %c0_i32_0 : i32, i32
  }
  func.func @transform_12(%arg0: i32) -> (i32, i32) {
    %c0_i32 = arith.constant 0 : i32
    %c0_i32_0 = arith.constant 0 : i32
    %c0_i32_1 = arith.constant 0 : i32
    return %c0_i32, %c0_i32_0 : i32, i32
  }
  func.func @transform_13(%arg0: i32) -> (i32, i32) {
    %c0_i32 = arith.constant 0 : i32
    %c0_i32_0 = arith.constant 0 : i32
    %c0_i32_1 = arith.constant 0 : i32
    return %c0_i32, %c0_i32_0 : i32, i32
  }
}

</mosaic_0001>

<bundles_post_ra>
// kernel: mul.5
= control target key start
LH: loop header
LB: loop body
LE: loop exit
PB: predicated region body
PF: predicated region fallthrough
CT: control target
= control target key end

     0   :  { %vm8_vm0 = vcmask 523264   ;;  %s23_s8 = smov 64   ;;  %vm14_vm1 = vcmask 1048064   ;;  %s40_s0 = inlined_call_operand.vmem [shape: f32[3,64], index: 0, kind: input, shape index: {}]   ;;  %s41_s1 = inlined_call_operand.vmem [shape: f32[192], index: 1, kind: output, shape index: {}]  }
   0x1   :  { %v4_v0 = vld [vmem:[%s40_s0] sm:$0xf]  ;;  %s6_s0 = smov 3 }
   0x2   :  { %5 = vst [vmem:[#allocation1] sm:$0xf] %v4_v0 }
   0x9   :  { %v11_v1 = vld [vmem:[#allocation1 + $0x1] sm:$0x1]   ;;  %v7_v2 = vld [vmem:[#allocation1] ss:$2 sm:%s6_s0]  }
   0xa   :  { %12 = vrot.lane.b32.xlu0 %v11_v1, %s23_s8  ;;  %9 = vst.msk [vmem:[#allocation0] sm:$0x3] %vm8_vm0, %v7_v2  }
  0x7c   :  { %v13_v3 = vpop.permute.xlu0 %12  }
  0x7d   :  { %15 = vst.msk [vmem:[#allocation0] sm:$0x1] %vm14_vm1, %v13_v3  }
  0x84   :  { %v18_v4 = vld [vmem:[#allocation0] sm:$0x3] }
  0x85   :  { %21 = vst [vmem:[%s41_s1] sm:$0x3] %v18_v4 }

// kernel: cloth_encoder_forward.1
= control target key start
LH: loop header
LB: loop body
LE: loop exit
PB: predicated region body
PF: predicated region fallthrough
CT: control target
= control target key end

     0   :  { %vm90_vm0 = vcmask 523264   ;;  %s7947_s0 = inlined_call_operand.vmem [shape: f32[48,192], index: 0, kind: input, shape index: {}]   ;;  %s7948_s1 = inlined_call_operand.vmem [shape: f32[192,32], index: 1, kind: input, shape index: {}]   ;;  %s7949_s2 = inlined_call_operand.vmem [shape: f32[48,32], index: 2, kind: input, shape index: {}]   ;;  %s7950_s3 = inlined_call_operand.vmem [shape: f32[2,32], index: 3, kind: input, shape index: {}]   ;;  %s7951_s4 = inlined_call_operand.vmem [shape: f32[2,3,4,32,8], index: 4, kind: input, shape index: {}]   ;;  %s7952_s5 = inlined_call_operand.vmem [shape: f32[2,3,4,8], index: 5, kind: input, shape index: {}]   ;;  %s7953_s6 = inlined_call_operand.vmem [shape: f32[2,4,8,32], index: 6, kind: input, shape index: {}]   ;;  %s7954_s7 = inlined_call_operand.vmem [shape: f32[2,6,32], index: 7, kind: input, shape index: {}]   ;;  %s7955_s8 = inlined_call_operand.vmem [shape: f32[2,32,128], index: 8, kind: input, shape index: {}]   ;;  %s7956_s9 = inlined_call_operand.vmem [shape: f32[2,128], index: 9, kind: input, shape index: {}]   ;;  %s7957_s10 = inlined_call_operand.vmem [shape: f32[2,128,32], index: 10, kind: input, shape index: {}]   ;;  %s7958_s11 = inlined_call_operand.vmem [shape: f32[32,128], index: 11, kind: input, shape index: {}]   ;;  %s7959_s12 = inlined_call_operand.vmem [shape: f32[1,128], index: 12, kind: input, shape index: {}]   ;;  %s7960_s13 = inlined_call_operand.hbm [shape: f32[2,128], index: 13, kind: output, shape index: {}]  }
   0x1   :  { %v75_v0 = vld [vmem:[%s7948_s1 + $0x78] sm:$0xff]  ;;  %v74_v1 = vld [vmem:[%s7948_s1 + $0x70] sm:$0xff]  ;;  %v73_v2 = vld [vmem:[%s7948_s1 + $0x68] sm:$0xff] }
   0x2   :  { %109 = vmatpush.msra.mxu0 %v75_v0  ;;  %v83_v3 = vld [vmem:[%s7948_s1 + $0xb8] sm:$0xff]  ;;  %v72_v4 = vld [vmem:[%s7948_s1 + $0x60] sm:$0xff]  ;;  %v82_v5 = vld [vmem:[%s7948_s1 + $0xb0] sm:$0xff] }
   0x3   :  { %152 = vmatpush.msra.mxu1 %v83_v3  ;;  %v81_v6 = vld [vmem:[%s7948_s1 + $0xa8] sm:$0xff]  ;;  %v71_v7 = vld [vmem:[%s7948_s1 + $0x58] sm:$0xff]  ;;  %v80_v8 = vld [vmem:[%s7948_s1 + $0xa0] sm:$0xff] }
   0x4   :  { %110 = vmatpush.msra.mxu0 %v74_v1  ;;  %v70_v9 = vld [vmem:[%s7948_s1 + $0x50] sm:$0xff]  ;;  %v69_v10 = vld [vmem:[%s7948_s1 + $0x48] sm:$0xff]  ;;  %v79_v11 = vld [vmem:[%s7948_s1 + $0x98] sm:$0xff] }
   0x5   :  { %153 = vmatpush.msra.mxu1 %v82_v5  ;;  %v78_v12 = vld [vmem:[%s7948_s1 + $0x90] sm:$0xff]  ;;  %v68_v13 = vld [vmem:[%s7948_s1 + $0x40] sm:$0xff]  ;;  %v77_v14 = vld [vmem:[%s7948_s1 + $0x88] sm:$0xff] }
   0x6   :  { %111 = vmatpush.msra.mxu0 %v73_v2  ;;  %v67_v15 = vld [vmem:[%s7948_s1 + $0x38] sm:$0xff]  ;;  %v76_v16 = vld [vmem:[%s7948_s1 + $0x80] sm:$0xff]  ;;  %v66_v17 = vld [vmem:[%s7948_s1 + $0x30] sm:$0xff] }
   0x7   :  { %154 = vmatpush.msra.mxu1 %v81_v6  ;;  %v65_v18 = vld [vmem:[%s7948_s1 + $0x28] sm:$0xff]  ;;  %v64_v20 = vld [vmem:[%s7948_s1 + $0x20] sm:$0xff]  ;;  %v63_v21 = vld [vmem:[%s7948_s1 + $0x18] sm:$0xff] }
   0x8   :  { %112 = vmatpush.msra.mxu0 %v72_v4  ;;  %v49_v19 = vld [vmem:[%s7947_s0 + $0x8] sm:$0xff]  ;;  %v62_v22 = vld [vmem:[%s7948_s1 + $0x10] sm:$0xff]  ;;  %v51_v23 = vld [vmem:[%s7947_s0 + $0x18] sm:$0xff] }
   0x9   :  { %155 = vmatpush.msra.mxu1 %v80_v8 }
   0xa   :  { %113 = vmatpush.msra.mxu0 %v71_v7 }
   0xb   :  { %156 = vmatpush.msra.mxu1 %v79_v11 }
   0xc   :  { %114 = vmatpush.msra.mxu0 %v70_v9 }
   0xd   :  { %157 = vmatpush.msra.mxu1 %v78_v12 }
   0xe   :  { %115 = vmatpush.msra.mxu0 %v69_v10 }
   0xf   :  { %158 = vmatpush.msra.mxu1 %v77_v14 }
  0x10   :  { %116 = vmatpush.msra.mxu0 %v68_v13 }
  0x11   :  { %159 = vmatpush.msra.mxu1 %v76_v16 }
  0x12   :  { %117 = vmatpush.msra.mxu0 %v67_v15  ;;  %4902 = vmatmul.msk.f32.vlgmr.msra.gmra.mxu1 %vm90_vm0, %v49_v19 }
  0x14   :  { %118 = vmatpush.msra.mxu0 %v66_v17 }
  0x16   :  { %119 = vmatpush.msra.mxu0 %v65_v18 }
  0x18   :  { %120 = vmatpush.msra.mxu0 %v64_v20 }
  0x19   :  { %18 = vsyncpa [#allocation3], 0  ;;  %v61_v24 = vld [vmem:[%s7948_s1 + $0x8] sm:$0xff]  ;;  %v60_v25 = vld [vmem:[%s7948_s1] sm:$0xff]  ;;  %vm181_vm1 = vcmask 261120   ;;  %v5792_v54 = vmov 32.0  }
  0x1a   :  { %121 = vmatpush.msra.mxu0 %v63_v21  ;;  %4903 = vmatmul.msk.f32.gmra.mxu1 %vm90_vm0, %v51_v23  ;;  %v48_v26 = vld [vmem:[%s7947_s0] sm:$0xff]  ;;  %v53_v27 = vld [vmem:[%s7947_s0 + $0x28] sm:$0xff]  ;;  %v50_v28 = vld [vmem:[%s7947_s0 + $0x10] sm:$0xff]  ;;  %5464 = vrcp.f32 %v5792_v54  ;;  %s5793_s26 = smov [#allocation2]  }
  0x1b   :  { %v52_v29 = vld [vmem:[%s7947_s0 + $0x20] sm:$0xff]  ;;  %v54_v30 = vld [vmem:[%s7947_s0 + $0x30] sm:$0xff]  ;;  %v55_v32 = vld [vmem:[%s7947_s0 + $0x38] sm:$0xff]  ;;  %s4891_s27 = sshll.u32 %s5793_s26, 4  ;;  %s4892_s27 = int_to_ptr.vmem [resolvable:$true] %s4891_s27 }
  0x1c   :  { %122 = vmatpush.msra.mxu0 %v62_v22  ;;  %v56_v33 = vld [vmem:[%s7947_s0 + $0x40] sm:$0xff]  ;;  %v57_v35 = vld [vmem:[%s7947_s0 + $0x48] sm:$0xff]  ;;  %v58_v36 = vld [vmem:[%s7947_s0 + $0x50] sm:$0xff] }
  0x1d   :  { %v85_v37 = vld [vmem:[%s7949_s2 + $0x8] sm:$0xff]  ;;  %v59_v42 = vld [vmem:[%s7947_s0 + $0x58] sm:$0xff]  ;;  %v86_v44 = vld [vmem:[%s7949_s2 + $0x10] sm:$0xff] }
  0x1e   :  { %123 = vmatpush.msra.mxu0 %v61_v24  ;;  %v84_v48 = vld [vmem:[%s7949_s2] sm:$0xff]  ;;  %v87_v13 = vld [vmem:[%s7949_s2 + $0x18] sm:$0xff]  ;;  %v89_v19 = vld [vmem:[%s7949_s2 + $0x28] sm:$0xff] }
  0x20   :  { %124 = vmatpush.msra.mxu0 %v60_v25  ;;  %v5465_v55 = vpop.eup %5464 }
  0x21   :  { %125 = vmatmul.f32.vlgmr.msra.gmra.mxu0 %v48_v26  ;;  %v201_v56 = vmul.f32 32.0, %v5465_v55  ;;  %vm205_vm2 = vweird.f32 %v5465_v55 }
  0x22   :  { %4904 = vmatmul.msk.f32.gmra.mxu1 %vm90_vm0, %v53_v27 }
  0x23   :  { %v202_v57 = vsub.f32 1.0, %v201_v56 }
  0x25   :  { %v203_v58 = vmul.f32 %v5465_v55, %v202_v57 }
  0x27   :  { %v204_v59 = vadd.f32 %v5465_v55, %v203_v58 }
  0x29   :  { %128 = vmatmul.f32.gmra.mxu0 %v50_v28  ;;  %v5990_v60 = vsel %vm205_vm2, %v5465_v55, %v204_v59 }
  0x2a   :  { %4905 = vmatmul.msk.f32.gmra.mxu1 %vm90_vm0, %v55_v32 }
  0x31   :  { %131 = vmatmul.f32.gmra.mxu0 %v52_v29 }
  0x32   :  { %4906 = vmatmul.msk.f32.gmra.mxu1 %vm90_vm0, %v57_v35 }
  0x39   :  { %134 = vmatmul.f32.gmra.mxu0 %v54_v30 }
  0x3a   :  { %4907 = vmatmul.msk.f32.gmra.mxu1 %vm90_vm0, %v59_v42 }
  0x41   :  { %137 = vmatmul.f32.gmra.mxu0 %v56_v33 }
  0x49   :  { %140 = vmatmul.f32.gmra.mxu0 %v58_v36 }
  0x8f   :  { %v161_v31 = vpop.f32.mrf.mxu1 }
  0x97   :  { %v164_v38 = vpop.f32.mrf.mxu1 }
  0x9e   :  { %v126_v34 = vpop.f32.mrf.mxu0 }
  0x9f   :  { %v167_v46 = vpop.f32.mrf.mxu1  ;;  %v127_v50 = vadd.f32 %v126_v34, %v84_v48 }
  0xa1   :  { %v162_v52 = vadd.f32 %v161_v31, %v127_v50 }
  0xa3   :  { %v182_v53 = vsel %vm181_vm1, %v162_v52, 0.0 }
  0xa6   :  { %v129_v39 = vpop.f32.mrf.mxu0 }
  0xa7   :  { %v130_v40 = vadd.f32 %v129_v39, %v85_v37  ;;  %v170_v6 = vpop.f32.mrf.mxu1 }
  0xa9   :  { %v165_v41 = vadd.f32 %v164_v38, %v130_v40 }
  0xab   :  { %v185_v43 = vsel %vm181_vm1, %v165_v41, 0.0 }
  0xac   :  { %186 = vadd.xlane.f32.xlu1 %v185_v43  ;;  %v6024_v43 = vld [vmem:[%s7950_s3] ss:$0 sm:$0xff] }
  0xae   :  { %v132_v45 = vpop.f32.mrf.mxu0 }
  0xaf   :  { %v133_v47 = vadd.f32 %v132_v45, %v86_v44  ;;  %v6010_v15 = vpop.f32.mrf.mxu1 }
  0xb1   :  { %v168_v49 = vadd.f32 %v167_v46, %v133_v47  ;;  %v6029_v47 = vld [vmem:[%s7950_s3 + $0x1] ss:$0 sm:$0xff] }
  0xb3   :  { %v188_v51 = vsel %vm181_vm1, %v168_v49, 0.0 }
  0xb4   :  { %189 = vadd.xlane.f32.xlu0 %v188_v51 }
  0xb6   :  { %v135_v1 = vpop.f32.mrf.mxu0 }
  0xb7   :  { %v136_v16 = vadd.f32 %v135_v1, %v87_v13  ;;  %v176_v23 = vpop.f32.mrf.mxu1  ;;  %v88_v1 = vld [vmem:[%s7949_s2 + $0x20] sm:$0xff] }
  0xb9   :  { %v171_v18 = vadd.f32 %v170_v6, %v136_v16 }
  0xbb   :  { %v191_v21 = vsel %vm181_vm1, %v171_v18, 0.0 }
  0xbc   :  { %183 = vadd.xlane.f32.xlu0 %v182_v53 }
  0xbe   :  { %v6003_v12 = vpop.f32.mrf.mxu0 }
  0xc6   :  { %v141_v20 = vpop.f32.mrf.mxu0 }
  0xc7   :  { %v142_v22 = vadd.f32 %v141_v20, %v89_v19 }
  0xc9   :  { %v177_v24 = vadd.f32 %v176_v23, %v142_v22 }
  0xcb   :  { %v197_v25 = vsel %vm181_vm1, %v177_v24, 0.0 }
 0x11f   :  { %v187_v3 = vpop.xlane.xlu1 %186 }
 0x120   :  { %v208_v7 = vmul.f32 %v5990_v60, %v187_v3 }
 0x122   :  { %v6000_v10 = vsub.f32 %v165_v41, %v208_v7  ;;  %v139_v7 = vadd.f32 %v6003_v12, %v88_v1 }
 0x124   :  { %v220_v14 = vmul.f32 %v6000_v10, %v6000_v10 }
 0x126   :  { %v228_v17 = vsel %vm181_vm1, %v220_v14, 0.0 }
 0x127   :  { %v190_v61 = vpop.xlane.xlu0 %189 }
 0x128   :  { %v209_v62 = vmul.f32 %v5990_v60, %v190_v61 }
 0x12a   :  { %v215_v63 = vsub.f32 %v168_v49, %v209_v62 }
 0x12c   :  { %v221_v0 = vmul.f32 %v215_v63, %v215_v63 }
 0x12e   :  { %v231_v2 = vsel %vm181_vm1, %v221_v0, 0.0 }
 0x12f   :  { %232 = vadd.xlane.f32.xlu1 %v231_v2  ;;  %v184_v4 = vpop.xlane.xlu0 %183 }
 0x130   :  { %v207_v5 = vmul.f32 %v5990_v60, %v184_v4 }
 0x132   :  { %v5996_v8 = vsub.f32 %v162_v52, %v207_v5 }
 0x134   :  { %v219_v9 = vmul.f32 %v5996_v8, %v5996_v8 }
 0x136   :  { %v225_v11 = vsel %vm181_vm1, %v219_v9, 0.0 }
 0x137   :  { %226 = vadd.xlane.f32.xlu2 %v225_v11 }
 0x13f   :  { %229 = vadd.xlane.f32.xlu2 %v228_v17  ;;  %v174_v17 = vadd.f32 %v6010_v15, %v139_v7 }
 0x141   :  { %v194_v20 = vsel %vm181_vm1, %v174_v17, 0.0 }
 0x147   :  { %192 = vadd.xlane.f32.xlu2 %v191_v21 }
 0x14f   :  { %198 = vadd.xlane.f32.xlu2 %v197_v25 }
 0x1a2   :  { %v233_v26 = vpop.xlane.xlu1 %232 }
 0x1a3   :  { %v245_v27 = vmul.f32 %v233_v26, %v5990_v60 }
 0x1a5   :  { %v251_v28 = vadd.f32 1e-05, %v245_v27 }
 0x1a7   :  { %5466 = vrsqrt.f32 %v251_v28  ;;  %vm281_vm4 = vweird.f32 %v251_v28 }
 0x1aa   :  { %v227_v29 = vpop.xlane.xlu2 %226 }
 0x1ab   :  { %v243_v30 = vmul.f32 %v227_v29, %v5990_v60 }
 0x1ad   :  { %v5467_v31 = vpop.eup %5466  ;;  %v249_v32 = vadd.f32 1e-05, %v243_v30 }
 0x1ae   :  { %v276_v33 = vmul.f32 %v5467_v31, %v251_v28  ;;  %vm282_vm3 = vweird.f32 %v5467_v31 }
 0x1af   :  { %5468 = vrsqrt.f32 %v249_v32  ;;  %vm283_vm5 = vmor %vm281_vm4, %vm282_vm3  ;;  %vm261_vm7 = vweird.f32 %v249_v32 }
 0x1b0   :  { %v277_v34 = vmul.f32 %v5467_v31, %v276_v33 }
 0x1b2   :  { %v278_v35 = vmul.f32 0.5, %v277_v34  ;;  %v230_v36 = vpop.xlane.xlu2 %229 }
 0x1b3   :  { %v244_v37 = vmul.f32 %v230_v36, %v5990_v60 }
 0x1b4   :  { %v279_v38 = vsub.f32 1.5, %v278_v35 }
 0x1b5   :  { %v5469_v39 = vpop.eup %5468  ;;  %v250_v40 = vadd.f32 1e-05, %v244_v37 }
 0x1b6   :  { %v280_v41 = vmul.f32 %v5467_v31, %v279_v38  ;;  %v256_v42 = vmul.f32 %v5469_v39, %v249_v32  ;;  %vm262_vm6 = vweird.f32 %v5469_v39 }
 0x1b7   :  { %5470 = vrsqrt.f32 %v250_v40  ;;  %vm263_vm8 = vmor %vm261_vm7, %vm262_vm6  ;;  %vm271_vm10 = vweird.f32 %v250_v40 }
 0x1b8   :  { %v257_v44 = vmul.f32 %v5469_v39, %v256_v42  ;;  %v284_v45 = vsel %vm283_vm5, %v5467_v31, %v280_v41 }
 0x1b9   :  { %v317_v46 = vmul.f32 %v284_v45, %v215_v63 }
 0x1ba   :  { %v258_v48 = vmul.f32 0.5, %v257_v44  ;;  %v193_v49 = vpop.xlane.xlu2 %192 }
 0x1bb   :  { %v210_v50 = vmul.f32 %v5990_v60, %v193_v49  ;;  %v324_v51 = vmul.f32 %v6024_v43, %v317_v46 }
 0x1bc   :  { %v259_v52 = vsub.f32 1.5, %v258_v48 }
 0x1bd   :  { %v5471_v53 = vpop.eup %5470  ;;  %v6033_v54 = vsub.f32 %v171_v18, %v210_v50  ;;  %v6036_v55 = vadd.f32 %v6029_v47, %v324_v51 }
 0x1be   :  { %v260_v56 = vmul.f32 %v5469_v39, %v259_v52  ;;  %v266_v57 = vmul.f32 %v5471_v53, %v250_v40  ;;  %vm272_vm9 = vweird.f32 %v5471_v53 }
 0x1bf   :  { %v347_v58 = vsel %vm181_vm1, %v6036_v55, 0.0  ;;  %v222_v59 = vmul.f32 %v6033_v54, %v6033_v54  ;;  %vm273_vm11 = vmor %vm271_vm10, %vm272_vm9 }
 0x1c0   :  { %v267_v61 = vmul.f32 %v5471_v53, %v266_v57  ;;  %348 = vadd.xlane.f32.xlu0 %v347_v58  ;;  %v264_v62 = vsel %vm263_vm8, %v5469_v39, %v260_v56 }
 0x1c1   :  { %v234_v63 = vsel %vm181_vm1, %v222_v59, 0.0  ;;  %v315_v0 = vmul.f32 %v264_v62, %v5996_v8 }
 0x1c2   :  { %v268_v2 = vmul.f32 0.5, %v267_v61  ;;  %235 = vadd.xlane.f32.xlu2 %v234_v63  ;;  %v199_v3 = vpop.xlane.xlu2 %198 }
 0x1c3   :  { %v212_v4 = vmul.f32 %v5990_v60, %v199_v3  ;;  %v322_v5 = vmul.f32 %v6024_v43, %v315_v0 }
 0x1c4   :  { %v269_v6 = vsub.f32 1.5, %v268_v2 }
 0x1c5   :  { %v6050_v9 = vsub.f32 %v177_v24, %v212_v4  ;;  %v6053_v11 = vadd.f32 %v6029_v47, %v322_v5 }
 0x1c6   :  { %v270_v8 = vmul.f32 %v5471_v53, %v269_v6 }
 0x1c7   :  { %v341_v13 = vsel %vm181_vm1, %v6053_v11, 0.0  ;;  %v224_v14 = vmul.f32 %v6050_v9, %v6050_v9 }
 0x1c8   :  { %342 = vadd.xlane.f32.xlu1 %v341_v13  ;;  %v274_v16 = vsel %vm273_vm11, %v5471_v53, %v270_v8  ;;  %v4917_v13 = vld [vmem:[%s7951_s4 + $0x98] sm:$0xff] }
 0x1c9   :  { %v240_v12 = vsel %vm181_vm1, %v224_v14, 0.0  ;;  %v316_v18 = vmul.f32 %v274_v16, %v6000_v10  ;;  %5414 = vmatpush.msra.mxu3 %v4917_v13  ;;  %566 = vmatpush.msrb.mxu1 %v4917_v13  ;;  %v4916_v14 = vld [vmem:[%s7951_s4 + $0x90] sm:$0xff]  ;;  %v4914_v16 = vld [vmem:[%s7951_s4 + $0x80] sm:$0xff] }
 0x1ca   :  { %241 = vadd.xlane.f32.xlu2 %v240_v12 }
 0x1cb   :  { %v323_v19 = vmul.f32 %v6024_v43, %v316_v18  ;;  %5415 = vmatpush.msra.mxu3 %v4916_v14  ;;  %567 = vmatpush.msrb.mxu1 %v4916_v14  ;;  %v489_v18 = vld [vmem:[%s7951_s4 + $0x10] sm:$0xff] }
 0x1cd   :  { %v6065_v21 = vadd.f32 %v6029_v47, %v323_v19 }
 0x1cf   :  { %v344_v22 = vsel %vm181_vm1, %v6065_v21, 0.0 }
 0x1d0   :  { %195 = vadd.xlane.f32.xlu1 %v194_v20  ;;  %345 = vadd.xlane.f32.xlu0 %v344_v22  ;;  %v488_v20 = vld [vmem:[%s7951_s4 + $0x8] sm:$0xff] }
 0x233   :  { %v349_v23 = vpop.xlane.xlu0 %348 }
 0x234   :  { %v361_v15 = vmul.f32 %v349_v23, %v5990_v60  ;;  %v487_v23 = vld [vmem:[%s7951_s4] sm:$0xff] }
 0x235   :  { %v236_v24 = vpop.xlane.xlu2 %235 }
 0x236   :  { %v6071_v25 = vsub.f32 %v6036_v55, %v361_v15  ;;  %v246_v10 = vmul.f32 %v236_v24, %v5990_v60 }
 0x238   :  { %v252_v26 = vadd.f32 1e-05, %v246_v10  ;;  %v373_v27 = vmul.f32 %v6071_v25, %v6071_v25 }
 0x23a   :  { %5472 = vrsqrt.f32 %v252_v26  ;;  %v383_v28 = vsel %vm181_vm1, %v373_v27, 0.0  ;;  %vm291_vm12 = vweird.f32 %v252_v26 }
 0x23b   :  { %v343_v29 = vpop.xlane.xlu1 %342  ;;  %384 = vadd.xlane.f32.xlu0 %v383_v28 }
 0x23c   :  { %v359_v30 = vmul.f32 %v343_v29, %v5990_v60 }
 0x23d   :  { %v242_v31 = vpop.xlane.xlu2 %241 }
 0x23e   :  { %v6079_v32 = vsub.f32 %v6053_v11, %v359_v30  ;;  %v248_v33 = vmul.f32 %v242_v31, %v5990_v60 }
 0x240   :  { %v5473_v34 = vpop.eup %5472  ;;  %v254_v35 = vadd.f32 1e-05, %v248_v33  ;;  %v371_v36 = vmul.f32 %v6079_v32, %v6079_v32 }
 0x241   :  { %v286_v37 = vmul.f32 %v5473_v34, %v252_v26  ;;  %vm292_vm13 = vweird.f32 %v5473_v34 }
 0x242   :  { %5474 = vrsqrt.f32 %v254_v35  ;;  %v377_v38 = vsel %vm181_vm1, %v371_v36, 0.0  ;;  %vm293_vm14 = vmor %vm291_vm12, %vm292_vm13  ;;  %vm311_vm15 = vweird.f32 %v254_v35 }
 0x243   :  { %v287_v39 = vmul.f32 %v5473_v34, %v286_v37  ;;  %378 = vadd.xlane.f32.xlu1 %v377_v38  ;;  %v196_v40 = vpop.xlane.xlu1 %195  ;;  %v346_v41 = vpop.xlane.xlu0 %345 }
 0x244   :  { %v211_v42 = vmul.f32 %v5990_v60, %v196_v40  ;;  %v360_v44 = vmul.f32 %v346_v41, %v5990_v60  ;;  %v6143_v41 = vld [vmem:[%s7954_s7] ss:$0 sm:$0xff] }
 0x245   :  { %v288_v45 = vmul.f32 0.5, %v287_v39 }
 0x246   :  { %v6087_v46 = vsub.f32 %v174_v17, %v211_v42  ;;  %v6090_v48 = vsub.f32 %v6065_v21, %v360_v44  ;;  %v490_v17 = vld [vmem:[%s7951_s4 + $0x18] sm:$0xff] }
 0x247   :  { %v289_v49 = vsub.f32 1.5, %v288_v45  ;;  %523 = vmatpush.msra.mxu2 %v490_v17  ;;  %v6148_v45 = vld [vmem:[%s7954_s7 + $0x1] ss:$0 sm:$0xff] }
 0x248   :  { %v5475_v50 = vpop.eup %5474  ;;  %v223_v51 = vmul.f32 %v6087_v46, %v6087_v46  ;;  %v372_v52 = vmul.f32 %v6090_v48, %v6090_v48 }
 0x249   :  { %v290_v53 = vmul.f32 %v5473_v34, %v289_v49  ;;  %v306_v56 = vmul.f32 %v5475_v50, %v254_v35  ;;  %vm312_vm0 = vweird.f32 %v5475_v50  ;;  %524 = vmatpush.msra.mxu2 %v489_v18 }
 0x24a   :  { %v237_v57 = vsel %vm181_vm1, %v223_v51, 0.0  ;;  %v380_v58 = vsel %vm181_vm1, %v372_v52, 0.0  ;;  %vm313_vm2 = vmor %vm311_vm15, %vm312_vm0  ;;  %vm632_vm15 = vcmask 64512  }
 0x24b   :  { %v294_v59 = vsel %vm293_vm14, %v5473_v34, %v290_v53  ;;  %v307_v61 = vmul.f32 %v5475_v50, %v306_v56  ;;  %238 = vadd.xlane.f32.xlu1 %v237_v57  ;;  %381 = vadd.xlane.f32.xlu0 %v380_v58 }
 0x24c   :  { %v318_v62 = vmul.f32 %v294_v59, %v6033_v54  ;;  %525 = vmatpush.msra.mxu2 %v488_v20 }
 0x24d   :  { %v308_v63 = vmul.f32 0.5, %v307_v61 }
 0x24e   :  { %v325_v0 = vmul.f32 %v6024_v43, %v318_v62  ;;  %526 = vmatpush.msra.mxu2 %v487_v23 }
 0x24f   :  { %v309_v1 = vsub.f32 1.5, %v308_v63 }
 0x250   :  { %v6101_v2 = vadd.f32 %v6029_v47, %v325_v0 }
 0x251   :  { %v310_v3 = vmul.f32 %v5475_v50, %v309_v1 }
 0x252   :  { %v350_v4 = vsel %vm181_vm1, %v6101_v2, 0.0 }
 0x253   :  { %v314_v5 = vsel %vm313_vm2, %v5475_v50, %v310_v3  ;;  %351 = vadd.xlane.f32.xlu0 %v350_v4 }
 0x254   :  { %v320_v6 = vmul.f32 %v314_v5, %v6050_v9  ;;  %v4915_v9 = vld [vmem:[%s7951_s4 + $0x88] sm:$0xff] }
 0x255   :  { %5416 = vmatpush.msra.mxu3 %v4915_v9  ;;  %568 = vmatpush.msrb.mxu1 %v4915_v9 }
 0x256   :  { %v327_v54 = vmul.f32 %v6024_v43, %v320_v6 }
 0x257   :  { %5417 = vmatpush.msra.mxu3 %v4914_v16  ;;  %569 = vmatpush.msrb.mxu1 %v4914_v16 }
 0x258   :  { %v6108_v7 = vadd.f32 %v6029_v47, %v327_v54 }
 0x25a   :  { %v356_v8 = vsel %vm181_vm1, %v6108_v7, 0.0 }
 0x25b   :  { %357 = vadd.xlane.f32.xlu2 %v356_v8 }
 0x2ae   :  { %v385_v12 = vpop.xlane.xlu0 %384 }
 0x2af   :  { %v397_v19 = vmul.f32 %v385_v12, %v5990_v60 }
 0x2b1   :  { %v403_v22 = vadd.f32 1e-05, %v397_v19 }
 0x2b3   :  { %5476 = vrsqrt.f32 %v403_v22  ;;  %vm433_vm4 = vweird.f32 %v403_v22 }
 0x2b6   :  { %v379_v15 = vpop.xlane.xlu1 %378 }
 0x2b7   :  { %v395_v24 = vmul.f32 %v379_v15, %v5990_v60 }
 0x2b9   :  { %v5477_v10 = vpop.eup %5476  ;;  %v401_v26 = vadd.f32 1e-05, %v395_v24 }
 0x2ba   :  { %v428_v27 = vmul.f32 %v5477_v10, %v403_v22  ;;  %vm434_vm3 = vweird.f32 %v5477_v10 }
 0x2bb   :  { %5478 = vrsqrt.f32 %v401_v26  ;;  %vm435_vm5 = vmor %vm433_vm4, %vm434_vm3  ;;  %vm413_vm7 = vweird.f32 %v401_v26 }
 0x2bc   :  { %v429_v28 = vmul.f32 %v5477_v10, %v428_v27 }
 0x2be   :  { %v430_v29 = vmul.f32 0.5, %v429_v28  ;;  %v239_v30 = vpop.xlane.xlu1 %238  ;;  %v382_v31 = vpop.xlane.xlu0 %381 }
 0x2bf   :  { %v247_v33 = vmul.f32 %v239_v30, %v5990_v60  ;;  %v396_v34 = vmul.f32 %v382_v31, %v5990_v60 }
 0x2c0   :  { %v431_v35 = vsub.f32 1.5, %v430_v29 }
 0x2c1   :  { %v5479_v36 = vpop.eup %5478  ;;  %v253_v37 = vadd.f32 1e-05, %v247_v33  ;;  %v402_v38 = vadd.f32 1e-05, %v396_v34 }
 0x2c2   :  { %v432_v39 = vmul.f32 %v5477_v10, %v431_v35  ;;  %v408_v40 = vmul.f32 %v5479_v36, %v401_v26  ;;  %vm414_vm6 = vweird.f32 %v5479_v36 }
 0x2c3   :  { %5480 = vrsqrt.f32 %v253_v37  ;;  %vm415_vm8 = vmor %vm413_vm7, %vm414_vm6  ;;  %vm301_vm11 = vweird.f32 %v253_v37  ;;  %vm423_vm13 = vweird.f32 %v402_v38 }
 0x2c4   :  { %v436_v42 = vsel %vm435_vm5, %v5477_v10, %v432_v39  ;;  %v409_v44 = vmul.f32 %v5479_v36, %v408_v40  ;;  %5482 = vrsqrt.f32 %v402_v38 }
 0x2c5   :  { %v469_v49 = vmul.f32 %v436_v42, %v6071_v25 }
 0x2c6   :  { %v410_v50 = vmul.f32 0.5, %v409_v44  ;;  %v352_v51 = vpop.xlane.xlu0 %351 }
 0x2c7   :  { %v476_v52 = vmul.f32 %v6143_v41, %v469_v49  ;;  %v362_v53 = vmul.f32 %v352_v51, %v5990_v60 }
 0x2c8   :  { %v411_v56 = vsub.f32 1.5, %v410_v50 }
 0x2c9   :  { %v5481_v57 = vpop.eup %5480  ;;  %v6154_v58 = vadd.f32 %v6148_v45, %v476_v52  ;;  %v6157_v59 = vsub.f32 %v6101_v2, %v362_v53 }
 0x2ca   :  { %v5483_v61 = vpop.eup %5482  ;;  %v412_v62 = vmul.f32 %v5479_v36, %v411_v56  ;;  %v296_v63 = vmul.f32 %v5481_v57, %v253_v37  ;;  %vm302_vm9 = vweird.f32 %v5481_v57 }
 0x2cb   :  { %v418_v25 = vmul.f32 %v5483_v61, %v402_v38  ;;  %4921 = vmatmul.msk.f32.vlgmr.msra.gmra.mxu3 %vm181_vm1, %v6154_v58  ;;  %v374_v0 = vmul.f32 %v6157_v59, %v6157_v59  ;;  %vm424_vm10 = vweird.f32 %v5483_v61  ;;  %vm303_vm12 = vmor %vm301_vm11, %vm302_vm9  ;;  %vm735_vm11 = vcmask 195584  }
 0x2cc   :  { %v416_v1 = vsel %vm415_vm8, %v5479_v36, %v412_v62  ;;  %v297_v3 = vmul.f32 %v5481_v57, %v296_v63  ;;  %vm425_vm14 = vmor %vm423_vm13, %vm424_vm10 }
 0x2cd   :  { %v467_v4 = vmul.f32 %v416_v1, %v6079_v32  ;;  %v419_v5 = vmul.f32 %v5483_v61, %v418_v25  ;;  %v386_v6 = vsel %vm181_vm1, %v374_v0, 0.0 }
 0x2ce   :  { %v298_v54 = vmul.f32 0.5, %v297_v3  ;;  %v358_v8 = vpop.xlane.xlu2 %357  ;;  %387 = vadd.xlane.f32.xlu0 %v386_v6 }
 0x2cf   :  { %v474_v13 = vmul.f32 %v6143_v41, %v467_v4  ;;  %v420_v14 = vmul.f32 0.5, %v419_v5  ;;  %v364_v9 = vmul.f32 %v358_v8, %v5990_v60  ;;  %v4927_v8 = vld [vmem:[%s7951_s4 + $0x110] sm:$0xff] }
 0x2d0   :  { %v299_v16 = vsub.f32 1.5, %v298_v54  ;;  %v4928_v54 = vld [vmem:[%s7951_s4 + $0x118] sm:$0xff] }
 0x2d1   :  { %v6168_v17 = vadd.f32 %v6148_v45, %v474_v13  ;;  %v421_v12 = vsub.f32 1.5, %v420_v14  ;;  %v6171_v32 = vsub.f32 %v6108_v7, %v364_v9  ;;  %609 = vmatpush.msrb.mxu2 %v4928_v54  ;;  %v4926_v13 = vld [vmem:[%s7951_s4 + $0x108] sm:$0xff]  ;;  %v4925_v9 = vld [vmem:[%s7951_s4 + $0x100] sm:$0xff] }
 0x2d2   :  { %v300_v18 = vmul.f32 %v5481_v57, %v299_v16 }
 0x2d3   :  { %v422_v19 = vmul.f32 %v5483_v61, %v421_v12  ;;  %4908 = vmatmul.msk.f32.vlgmr.msra.gmra.mxu2 %vm181_vm1, %v6168_v17  ;;  %4919 = vmatmul.msk.f32.vlgmr.msrb.gmra.mxu1 %vm181_vm1, %v6168_v17  ;;  %v376_v20 = vmul.f32 %v6171_v32, %v6171_v32 }
 0x2d4   :  { %v304_v22 = vsel %vm303_vm12, %v5481_v57, %v300_v18  ;;  %610 = vmatpush.msrb.mxu2 %v4927_v8 }
 0x2d5   :  { %v426_v23 = vsel %vm425_vm14, %v5483_v61, %v422_v19  ;;  %v392_v15 = vsel %vm181_vm1, %v376_v20, 0.0  ;;  %v319_v24 = vmul.f32 %v304_v22, %v6087_v46 }
 0x2d6   :  { %v468_v10 = vmul.f32 %v426_v23, %v6090_v48  ;;  %393 = vadd.xlane.f32.xlu2 %v392_v15  ;;  %v6202_v48 = vld [vmem:[%s7952_s5 + $0x4] ss:$0 sm:$0xff]  ;;  %611 = vmatpush.msrb.mxu2 %v4926_v13 }
 0x2d7   :  { %v326_v26 = vmul.f32 %v6024_v43, %v319_v24 }
 0x2d8   :  { %v475_v27 = vmul.f32 %v6143_v41, %v468_v10  ;;  %612 = vmatpush.msrb.mxu2 %v4925_v9 }
 0x2d9   :  { %v6185_v28 = vadd.f32 %v6029_v47, %v326_v26 }
 0x2da   :  { %v6188_v29 = vadd.f32 %v6148_v45, %v475_v27 }
 0x2db   :  { %v353_v30 = vsel %vm181_vm1, %v6185_v28, 0.0 }
 0x2dc   :  { %4909 = vmatmul.msk.f32.gmra.mxu2 %vm181_vm1, %v6188_v29  ;;  %4920 = vmatmul.msk.f32.gmra.mxu1 %vm181_vm1, %v6188_v29 }
 0x2dd   :  { %354 = vadd.xlane.f32.xlu1 %v353_v30 }
 0x2e4   :  { %4910 = vmatmul.msk.f32.gmra.mxu2 %vm181_vm1, %v6154_v58 }
 0x341   :  { %v388_v43 = vpop.xlane.xlu0 %387 }
 0x342   :  { %v398_v47 = vmul.f32 %v388_v43, %v5990_v60 }
 0x344   :  { %v404_v46 = vadd.f32 1e-05, %v398_v47 }
 0x346   :  { %5484 = vrsqrt.f32 %v404_v46  ;;  %vm443_vm2 = vweird.f32 %v404_v46 }
 0x34c   :  { %v5485_v31 = vpop.eup %5484 }
 0x34d   :  { %v438_v33 = vmul.f32 %v5485_v31, %v404_v46  ;;  %vm444_vm0 = vweird.f32 %v5485_v31 }
 0x34e   :  { %v577_v34 = vpop.f32.mrf.mxu3  ;;  %vm445_vm3 = vmor %vm443_vm2, %vm444_vm0 }
 0x34f   :  { %v439_v35 = vmul.f32 %v5485_v31, %v438_v33  ;;  %v578_v36 = vadd.f32 %v6202_v48, %v577_v34 }
 0x350   :  { %v355_v37 = vpop.xlane.xlu1 %354  ;;  %v571_v38 = vpop.f32.mrf.mxu1 }
 0x351   :  { %v440_v39 = vmul.f32 0.5, %v439_v35  ;;  %v363_v40 = vmul.f32 %v355_v37, %v5990_v60  ;;  %4936 = vmatpush.xpose.msk.msrb.mxu3 %vm632_vm15, %v578_v36  ;;  %v572_v63 = vadd.f32 %v6202_v48, %v571_v38  ;;  %v4978_v35 = vld [vmem:[%s7951_s4 + $0x138] sm:$0xff]  ;;  %v4977_v36 = vld [vmem:[%s7951_s4 + $0x130] sm:$0xff]  ;;  %v4976_v37 = vld [vmem:[%s7951_s4 + $0x128] sm:$0xff] }
 0x352   :  { %976 = vmatpush.msra.mxu2 %v4978_v35 }
 0x353   :  { %v441_v42 = vsub.f32 1.5, %v440_v39  ;;  %v369_v44 = vsub.f32 %v6185_v28, %v363_v40  ;;  %v4975_v39 = vld [vmem:[%s7951_s4 + $0x120] sm:$0xff] }
 0x354   :  { %977 = vmatpush.msra.mxu2 %v4977_v36 }
 0x355   :  { %v442_v49 = vmul.f32 %v5485_v31, %v441_v42  ;;  %v375_v50 = vmul.f32 %v369_v44, %v369_v44 }
 0x356   :  { %v528_v33 = vpop.f32.mrf.mxu2  ;;  %978 = vmatpush.msra.mxu2 %v4976_v37 }
 0x357   :  { %v446_v51 = vsel %vm445_vm3, %v5485_v31, %v442_v49  ;;  %v389_v52 = vsel %vm181_vm1, %v375_v50, 0.0 }
 0x358   :  { %v470_v53 = vmul.f32 %v446_v51, %v6157_v59  ;;  %390 = vadd.xlane.f32.xlu1 %v389_v52  ;;  %v394_v59 = vpop.xlane.xlu2 %393  ;;  %979 = vmatpush.msra.mxu2 %v4975_v39 }
 0x359   :  { %v574_v56 = vpop.f32.mrf.mxu1  ;;  %v400_v25 = vmul.f32 %v394_v59, %v5990_v60 }
 0x35a   :  { %v477_v57 = vmul.f32 %v6143_v41, %v470_v53  ;;  %v575_v61 = vadd.f32 %v6202_v48, %v574_v56  ;;  %v45_v53 = vlaneseq }
 0x35b   :  { %v406_v0 = vadd.f32 1e-05, %v400_v25 }
 0x35c   :  { %v6213_v62 = vadd.f32 %v6148_v45, %v477_v57  ;;  %4937 = vmatpush.xpose.msk.msrb.mxu3 %vm632_vm15, %v575_v61  ;;  %v6302_v57 = vand.u32 127, %v45_v53 }
 0x35d   :  { %5486 = vrsqrt.f32 %v406_v0  ;;  %vm463_vm8 = vweird.f32 %v406_v0 }
 0x35e   :  { %4911 = vmatmul.msk.f32.gmra.mxu2 %vm181_vm1, %v6213_v62  ;;  %4922 = vmatmul.msk.f32.gmra.mxu3 %vm181_vm1, %v6213_v62  ;;  %vm47_vm10 = vcmp.lt.s32.totalorder %v6302_v57, 17 }
 0x360   :  { %4938 = vmatpush.xpose.msk.msrb.mxu3 %vm632_vm15, %v572_v63 }
 0x363   :  { %v5487_v3 = vpop.eup %5486 }
 0x364   :  { %v458_v6 = vmul.f32 %v5487_v3, %v406_v0  ;;  %vm464_vm5 = vweird.f32 %v5487_v3 }
 0x365   :  { %vm465_vm9 = vmor %vm463_vm8, %vm464_vm5 }
 0x366   :  { %v459_v14 = vmul.f32 %v5487_v3, %v458_v6 }
 0x368   :  { %v460_v12 = vmul.f32 0.5, %v459_v14  ;;  %v5429_v14 = vld [vmem:[%s7952_s5 + $0x8] ss:$0 sm:$0xff] }
 0x36a   :  { %v461_v20 = vsub.f32 1.5, %v460_v12 }
 0x36c   :  { %v462_v15 = vmul.f32 %v5487_v3, %v461_v20 }
 0x36e   :  { %v466_v27 = vsel %vm465_vm9, %v5487_v3, %v462_v15 }
 0x36f   :  { %v472_v43 = vmul.f32 %v466_v27, %v6171_v32  ;;  %v6256_v32 = vld [vmem:[%s7952_s5] ss:$0 sm:$0xff] }
 0x370   :  { %v529_v34 = vadd.f32 %v6256_v32, %v528_v33 }
 0x371   :  { %v479_v46 = vmul.f32 %v6143_v41, %v472_v43 }
 0x373   :  { %v6247_v31 = vadd.f32 %v6148_v45, %v479_v46 }
 0x3cb   :  { %v391_v1 = vpop.xlane.xlu1 %390 }
 0x3cc   :  { %v399_v4 = vmul.f32 %v391_v1, %v5990_v60 }
 0x3ce   :  { %v405_v5 = vadd.f32 1e-05, %v399_v4 }
 0x3d0   :  { %5488 = vrsqrt.f32 %v405_v5  ;;  %vm453_vm6 = vweird.f32 %v405_v5 }
 0x3d6   :  { %v5489_v16 = vpop.eup %5488 }
 0x3d7   :  { %v448_v18 = vmul.f32 %v5489_v16, %v405_v5  ;;  %vm454_vm4 = vweird.f32 %v5489_v16 }
 0x3d8   :  { %vm455_vm7 = vmor %vm453_vm6, %vm454_vm4 }
 0x3d9   :  { %v449_v19 = vmul.f32 %v5489_v16, %v448_v18 }
 0x3db   :  { %v450_v22 = vmul.f32 0.5, %v449_v19 }
 0x3dd   :  { %v451_v23 = vsub.f32 1.5, %v450_v22 }
 0x3df   :  { %v452_v24 = vmul.f32 %v5489_v16, %v451_v23 }
 0x3e1   :  { %v456_v10 = vsel %vm455_vm7, %v5489_v16, %v452_v24 }
 0x3e2   :  { %v471_v26 = vmul.f32 %v456_v10, %v369_v44  ;;  %v580_v44 = vpop.f32.mrf.mxu3 }
 0x3e3   :  { %v581_v25 = vadd.f32 %v6202_v48, %v580_v44 }
 0x3e4   :  { %v478_v30 = vmul.f32 %v6143_v41, %v471_v26  ;;  %v531_v41 = vpop.f32.mrf.mxu2 }
 0x3e6   :  { %v6239_v47 = vadd.f32 %v6148_v45, %v478_v30  ;;  %v532_v45 = vadd.f32 %v6256_v32, %v531_v41 }
 0x3e8   :  { %4912 = vmatmul.msk.f32.gmra.mxu2 %vm181_vm1, %v6239_v47  ;;  %4923 = vmatmul.msk.f32.gmra.mxu3 %vm181_vm1, %v6239_v47 }
 0x3ec   :  { %v534_v38 = vpop.f32.mrf.mxu2 }
 0x3ed   :  { %v535_v40 = vadd.f32 %v6256_v32, %v534_v38 }
 0x3f0   :  { %4913 = vmatmul.msk.f32.gmra.mxu2 %vm181_vm1, %v6247_v31  ;;  %4924 = vmatmul.msk.f32.gmra.mxu3 %vm181_vm1, %v6247_v31 }
 0x3f4   :  { %v537_v42 = vpop.f32.mrf.mxu2 }
 0x3f5   :  { %v538_v3 = vadd.f32 %v6256_v32, %v537_v42 }
 0x3f8   :  { %4930 = vmatmul.msk.f32.vlgmr.msrb.gmra.mxu2 %vm181_vm1, %v6168_v17  ;;  %4939 = vmatmul.msk.f32.vlgmr.msrb.gmra.mxu3 %vm632_vm15, %v529_v34 }
 0x400   :  { %4931 = vmatmul.msk.f32.gmra.mxu2 %vm181_vm1, %v6188_v29  ;;  %4940 = vmatmul.msk.f32.gmra.mxu3 %vm632_vm15, %v532_v45 }
 0x408   :  { %4932 = vmatmul.msk.f32.gmra.mxu2 %vm181_vm1, %v6154_v58  ;;  %4941 = vmatmul.msk.f32.gmra.mxu3 %vm632_vm15, %v535_v40 }
 0x410   :  { %4933 = vmatmul.msk.f32.gmra.mxu2 %vm181_vm1, %v6213_v62 }
 0x418   :  { %4934 = vmatmul.msk.f32.gmra.mxu2 %vm181_vm1, %v6239_v47 }
 0x420   :  { %4935 = vmatmul.msk.f32.gmra.mxu2 %vm181_vm1, %v6247_v31 }
 0x428   :  { %4980 = vmatmul.msk.f32.vlgmr.msra.gmra.mxu2 %vm181_vm1, %v6168_v17 }
 0x430   :  { %4981 = vmatmul.msk.f32.gmra.mxu2 %vm181_vm1, %v6188_v29 }
 0x438   :  { %4982 = vmatmul.msk.f32.gmra.mxu2 %vm181_vm1, %v6154_v58 }
 0x440   :  { %4983 = vmatmul.msk.f32.gmra.mxu2 %vm181_vm1, %v6213_v62 }
 0x448   :  { %4984 = vmatmul.msk.f32.gmra.mxu2 %vm181_vm1, %v6239_v47 }
 0x450   :  { %4985 = vmatmul.msk.f32.gmra.mxu2 %vm181_vm1, %v6247_v31 }
 0x46b   :  { %v540_v49 = vpop.f32.mrf.mxu2  ;;  %v583_v50 = vpop.f32.mrf.mxu3 }
 0x46c   :  { %v584_v61 = vadd.f32 %v6202_v48, %v583_v50  ;;  %v541_v8 = vadd.f32 %v6256_v32, %v540_v49 }
 0x473   :  { %v543_v51 = vpop.f32.mrf.mxu2  ;;  %v586_v52 = vpop.f32.mrf.mxu3 }
 0x474   :  { %v587_v56 = vadd.f32 %v6202_v48, %v586_v52  ;;  %v544_v22 = vadd.f32 %v6256_v32, %v543_v51 }
 0x476   :  { %4942 = vmatpush.xpose.msk.msra.mxu1 %vm632_vm15, %v587_v56 }
 0x47a   :  { %4943 = vmatpush.xpose.msk.msra.mxu1 %vm632_vm15, %v584_v61 }
 0x47b   :  { %v614_v63 = vpop.f32.mrf.mxu2  ;;  %v668_v59 = vpop.f32.mrf.mxu3 }
 0x47c   :  { %v721_v0 = vmul.f32 0.35355338, %v668_v59  ;;  %v615_v15 = vadd.f32 %v5429_v14, %v614_v63 }
 0x47e   :  { %4944 = vmatpush.xpose.msk.msra.mxu1 %vm632_vm15, %v581_v25  ;;  %v729_v1 = vsel %vm47_vm10, %v721_v0, -1e+30 }
 0x47f   :  { %v736_v4 = vsel %vm735_vm11, %v729_v1, -inf }
 0x480   :  { %737 = vmax.xlane.f32.xlu0 %v736_v4 }
 0x481   :  { %4945 = vmatmul.msk.f32.vlgmr.msra.gmra.mxu1 %vm632_vm15, %v538_v3 }
 0x483   :  { %v617_v5 = vpop.f32.mrf.mxu2  ;;  %v671_v6 = vpop.f32.mrf.mxu3 }
 0x484   :  { %v722_v54 = vmul.f32 0.35355338, %v671_v6  ;;  %v618_v19 = vadd.f32 %v5429_v14, %v617_v5  ;;  %v4967_v6 = vld [vmem:[%s7951_s4 + $0xb8] sm:$0xff] }
 0x486   :  { %v730_v48 = vsel %vm47_vm10, %v722_v54, -1e+30  ;;  %v4966_v54 = vld [vmem:[%s7951_s4 + $0xb0] sm:$0xff] }
 0x487   :  { %v739_v13 = vsel %vm735_vm11, %v730_v48, -inf }
 0x488   :  { %740 = vmax.xlane.f32.xlu1 %v739_v13  ;;  %v4964_v13 = vld [vmem:[%s7951_s4 + $0xa0] sm:$0xff] }
 0x489   :  { %4946 = vmatmul.msk.f32.gmra.mxu1 %vm632_vm15, %v541_v8 }
 0x48b   :  { %v620_v9 = vpop.f32.mrf.mxu2  ;;  %v674_v16 = vpop.f32.mrf.mxu3 }
 0x48c   :  { %v723_v12 = vmul.f32 0.35355338, %v674_v16  ;;  %v621_v18 = vadd.f32 %v5429_v14, %v620_v9  ;;  %v4957_v9 = vld [vmem:[%s7951_s4 + $0x38] sm:$0xff]  ;;  %v4956_v16 = vld [vmem:[%s7951_s4 + $0x30] sm:$0xff] }
 0x48e   :  { %824 = vmatpush.msrb.mxu0 %v621_v18  ;;  %5418 = vmatpush.msrb.mxu1 %v621_v18  ;;  %v731_v20 = vsel %vm47_vm10, %v723_v12, -1e+30  ;;  %v4955_v12 = vld [vmem:[%s7951_s4 + $0x28] sm:$0xff]  ;;  %v4954_v18 = vld [vmem:[%s7951_s4 + $0x20] sm:$0xff] }
 0x48f   :  { %v742_v23 = vsel %vm735_vm11, %v731_v20, -inf }
 0x490   :  { %825 = vmatpush.msrb.mxu0 %v618_v19  ;;  %5419 = vmatpush.msrb.mxu1 %v618_v19 }
 0x491   :  { %743 = vmax.xlane.f32.xlu2 %v742_v23  ;;  %4947 = vmatmul.msk.f32.gmra.mxu1 %vm632_vm15, %v544_v22 }
 0x492   :  { %826 = vmatpush.msrb.mxu0 %v615_v15  ;;  %5420 = vmatpush.msrb.mxu1 %v615_v15  ;;  %v5430_v15 = vld [vmem:[%s7952_s5 + $0x9] ss:$0 sm:$0xff] }
 0x493   :  { %v623_v24 = vpop.f32.mrf.mxu2 }
 0x494   :  { %v624_v43 = vadd.f32 %v5429_v14, %v623_v24  ;;  %934 = vmatpush.msra.mxu0 %v4967_v6  ;;  %892 = vmatpush.msra.mxu1 %v4957_v9 }
 0x496   :  { %935 = vmatpush.msra.mxu0 %v4966_v54  ;;  %893 = vmatpush.msra.mxu1 %v4956_v16  ;;  %v5431_v16 = vld [vmem:[%s7952_s5 + $0x5] ss:$0 sm:$0xff] }
 0x498   :  { %894 = vmatpush.msra.mxu1 %v4955_v12 }
 0x49a   :  { %895 = vmatpush.msra.mxu1 %v4954_v18 }
 0x49b   :  { %v626_v10 = vpop.f32.mrf.mxu2 }
 0x49c   :  { %v627_v30 = vadd.f32 %v5429_v14, %v626_v10 }
 0x4a3   :  { %v629_v26 = vpop.f32.mrf.mxu2 }
 0x4a4   :  { %v630_v27 = vadd.f32 %v5429_v14, %v629_v26 }
 0x4a6   :  { %859 = vmatpush.msra.mxu3 %v630_v27 }
 0x4a8   :  { %860 = vmatpush.msra.mxu3 %v627_v30 }
 0x4aa   :  { %861 = vmatpush.msra.mxu3 %v624_v43 }
 0x4ab   :  { %v6342_v4 = vpop.f32.mrf.mxu2 }
 0x4b3   :  { %v984_v5 = vpop.f32.mrf.mxu2 }
 0x4bb   :  { %v987_v8 = vpop.f32.mrf.mxu2 }
 0x4c3   :  { %v990_v14 = vpop.f32.mrf.mxu2 }
 0x4cb   :  { %v993_v19 = vpop.f32.mrf.mxu2 }
 0x4cc   :  { %v994_v43 = vadd.f32 %v5430_v15, %v993_v19 }
 0x4d3   :  { %v996_v22 = vpop.f32.mrf.mxu2 }
 0x4d4   :  { %v997_v27 = vadd.f32 %v5430_v15, %v996_v22  ;;  %v5432_v22 = vld [vmem:[%s7952_s5 + $0x1] ss:$0 sm:$0xff] }
 0x4f3   :  { %v738_v46 = vpop.xlane.xlu0 %737 }
 0x4f4   :  { %v754_v33 = vsub.f32 %v729_v1, %v738_v46 }
 0x4f6   :  { %v760_v32 = vmul.f32 1.442695, %v754_v33  ;;  %v991_v33 = vadd.f32 %v5430_v15, %v990_v14 }
 0x4f8   :  { %5490 = vpow2.f32 %v760_v32 }
 0x4fb   :  { %v741_v34 = vpop.xlane.xlu1 %740 }
 0x4fc   :  { %v755_v41 = vsub.f32 %v730_v48, %v741_v34  ;;  %v4965_v48 = vld [vmem:[%s7951_s4 + $0xa8] sm:$0xff] }
 0x4fd   :  { %936 = vmatpush.msra.mxu0 %v4965_v48 }
 0x4fe   :  { %v5491_v45 = vpop.eup %5490  ;;  %v762_v35 = vmul.f32 1.442695, %v755_v41  ;;  %v712_v36 = vpop.f32.mrf.mxu1 }
 0x4ff   :  { %v772_v37 = vsel %vm735_vm11, %v5491_v45, 0.0  ;;  %v724_v38 = vmul.f32 0.35355338, %v712_v36  ;;  %937 = vmatpush.msra.mxu0 %v4964_v13 }
 0x500   :  { %5492 = vpow2.f32 %v762_v35  ;;  %773 = vadd.xlane.f32.xlu0 %v772_v37 }
 0x501   :  { %v732_v40 = vsel %vm47_vm10, %v724_v38, -1e+30 }
 0x502   :  { %v745_v52 = vsel %vm735_vm11, %v732_v40, -inf }
 0x504   :  { %v744_v39 = vpop.xlane.xlu2 %743 }
 0x505   :  { %v756_v42 = vsub.f32 %v731_v20, %v744_v39 }
 0x506   :  { %v5493_v44 = vpop.eup %5492  ;;  %v715_v49 = vpop.f32.mrf.mxu1 }
 0x507   :  { %v764_v50 = vmul.f32 1.442695, %v756_v42  ;;  %v775_v51 = vsel %vm735_vm11, %v5493_v44, 0.0  ;;  %v725_v53 = vmul.f32 0.35355338, %v715_v49  ;;  %v988_v49 = vadd.f32 %v5430_v15, %v987_v8 }
 0x508   :  { %776 = vadd.xlane.f32.xlu1 %v775_v51  ;;  %746 = vmax.xlane.f32.xlu0 %v745_v52  ;;  %v985_v51 = vadd.f32 %v5430_v15, %v984_v5 }
 0x509   :  { %5494 = vpow2.f32 %v764_v50  ;;  %v733_v56 = vsel %vm47_vm10, %v725_v53, -1e+30 }
 0x50a   :  { %v748_v59 = vsel %vm735_vm11, %v733_v56, -inf }
 0x50e   :  { %v718_v61 = vpop.f32.mrf.mxu1 }
 0x50f   :  { %v5495_v63 = vpop.eup %5494  ;;  %v726_v0 = vmul.f32 0.35355338, %v718_v61 }
 0x510   :  { %v778_v25 = vsel %vm735_vm11, %v5495_v63, 0.0  ;;  %749 = vmax.xlane.f32.xlu1 %v748_v59 }
 0x511   :  { %779 = vadd.xlane.f32.xlu2 %v778_v25  ;;  %v6338_v1 = vsel %vm47_vm10, %v726_v0, -1e+30 }
 0x512   :  { %v751_v3 = vsel %vm735_vm11, %v6338_v1, -inf }
 0x519   :  { %752 = vmax.xlane.f32.xlu2 %v751_v3 }
 0x573   :  { %v774_v20 = vpop.xlane.xlu0 %773 }
 0x574   :  { %5496 = vrcp.f32 %v774_v20 }
 0x57a   :  { %v5497_v23 = vpop.eup %5496 }
 0x57b   :  { %v777_v24 = vpop.xlane.xlu1 %776  ;;  %v747_v10 = vpop.xlane.xlu0 %746  ;;  %v796_v26 = vmul.f32 %v5497_v23, %v5491_v45 }
 0x57c   :  { %5498 = vrcp.f32 %v777_v24  ;;  %v757_v30 = vsub.f32 %v732_v40, %v747_v10 }
 0x57d   :  { %4948 = vmatmul.msk.f32.vlgmr.msrb.gmra.mxu0 %vm735_vm11, %v796_v26 }
 0x57e   :  { %v766_v46 = vmul.f32 1.442695, %v757_v30  ;;  %1222 = vmatpush.msrb.mxu0 %v997_v27 }
 0x580   :  { %5500 = vpow2.f32 %v766_v46  ;;  %1223 = vmatpush.msrb.mxu0 %v994_v43 }
 0x582   :  { %v5499_v32 = vpop.eup %5498  ;;  %1224 = vmatpush.msrb.mxu0 %v991_v33 }
 0x583   :  { %v750_v34 = vpop.xlane.xlu1 %749  ;;  %v797_v41 = vmul.f32 %v5499_v32, %v5493_v44 }
 0x584   :  { %v780_v35 = vpop.xlane.xlu2 %779  ;;  %v758_v36 = vsub.f32 %v733_v56, %v750_v34  ;;  %v982_v56 = vadd.f32 %v5430_v15, %v6342_v4 }
 0x585   :  { %5502 = vrcp.f32 %v780_v35  ;;  %4949 = vmatmul.msk.f32.gmra.mxu0 %vm735_vm11, %v797_v41  ;;  %v872_v35 = vld [vmem:[%s7953_s6] sm:$0xff] }
 0x586   :  { %v5501_v45 = vpop.eup %5500  ;;  %v768_v37 = vmul.f32 1.442695, %v758_v36 }
 0x587   :  { %v781_v38 = vsel %vm735_vm11, %v5501_v45, 0.0 }
 0x588   :  { %5504 = vpow2.f32 %v768_v37  ;;  %782 = vadd.xlane.f32.xlu0 %v781_v38 }
 0x58b   :  { %v5503_v39 = vpop.eup %5502 }
 0x58c   :  { %v798_v40 = vmul.f32 %v5503_v39, %v5495_v63  ;;  %v753_v42 = vpop.xlane.xlu2 %752 }
 0x58d   :  { %v759_v50 = vsub.f32 %v6338_v1, %v753_v42  ;;  %4969 = vmatmul.msk.f32.vlgmr.msra.gmra.mxu0 %vm181_vm1, %v6168_v17 }
 0x58e   :  { %v5505_v44 = vpop.eup %5504  ;;  %4950 = vmatmul.msk.f32.vlgmr.msrb.gmra.mxu1 %vm735_vm11, %v798_v40 }
 0x58f   :  { %v770_v52 = vmul.f32 1.442695, %v759_v50  ;;  %1187 = vmatpush.msrb.mxu1 %v988_v49  ;;  %v784_v53 = vsel %vm735_vm11, %v5505_v44, 0.0 }
 0x590   :  { %785 = vadd.xlane.f32.xlu1 %v784_v53 }
 0x591   :  { %5506 = vpow2.f32 %v770_v52  ;;  %1188 = vmatpush.msrb.mxu1 %v985_v51 }
 0x593   :  { %1189 = vmatpush.msrb.mxu1 %v982_v56 }
 0x595   :  { %4970 = vmatmul.msk.f32.gmra.mxu0 %vm181_vm1, %v6188_v29 }
 0x596   :  { %4958 = vmatmul.msk.f32.vlgmr.msra.gmra.mxu1 %vm181_vm1, %v6168_v17 }
 0x597   :  { %v5507_v61 = vpop.eup %5506 }
 0x598   :  { %v787_v63 = vsel %vm735_vm11, %v5507_v61, 0.0 }
 0x599   :  { %788 = vadd.xlane.f32.xlu2 %v787_v63 }
 0x59d   :  { %4971 = vmatmul.msk.f32.gmra.mxu0 %vm181_vm1, %v6154_v58 }
 0x59e   :  { %4959 = vmatmul.msk.f32.gmra.mxu1 %vm181_vm1, %v6188_v29 }
 0x5a5   :  { %4972 = vmatmul.msk.f32.gmra.mxu0 %vm181_vm1, %v6213_v62 }
 0x5a6   :  { %4960 = vmatmul.msk.f32.gmra.mxu1 %vm181_vm1, %v6154_v58 }
 0x5ad   :  { %4973 = vmatmul.msk.f32.gmra.mxu0 %vm181_vm1, %v6239_v47 }
 0x5ae   :  { %4961 = vmatmul.msk.f32.gmra.mxu1 %vm181_vm1, %v6213_v62 }
 0x5b5   :  { %4974 = vmatmul.msk.f32.gmra.mxu0 %vm181_vm1, %v6247_v31 }
 0x5b6   :  { %4962 = vmatmul.msk.f32.gmra.mxu1 %vm181_vm1, %v6239_v47 }
 0x5be   :  { %4963 = vmatmul.msk.f32.gmra.mxu1 %vm181_vm1, %v6247_v31 }
 0x5fa   :  { %v828_v59 = vpop.f32.mrf.mxu0 }
 0x5fb   :  { %v783_v25 = vpop.xlane.xlu0 %782 }
 0x5fc   :  { %5508 = vrcp.f32 %v783_v25 }
 0x602   :  { %v5509_v0 = vpop.eup %5508  ;;  %v831_v1 = vpop.f32.mrf.mxu0 }
 0x603   :  { %v799_v3 = vmul.f32 %v5509_v0, %v5501_v45  ;;  %v786_v4 = vpop.xlane.xlu1 %785 }
 0x604   :  { %5510 = vrcp.f32 %v786_v4 }
 0x605   :  { %4951 = vmatmul.msk.f32.vlgmr.msra.gmra.mxu3 %vm735_vm11, %v799_v3 }
 0x60a   :  { %v5511_v5 = vpop.eup %5510  ;;  %v939_v6 = vpop.f32.mrf.mxu0 }
 0x60b   :  { %v800_v54 = vmul.f32 %v5511_v5, %v5505_v44  ;;  %v834_v8 = vpop.f32.mrf.mxu1  ;;  %v940_v15 = vadd.f32 %v5431_v16, %v939_v6 }
 0x60c   :  { %v789_v48 = vpop.xlane.xlu2 %788 }
 0x60d   :  { %5512 = vrcp.f32 %v789_v48  ;;  %4952 = vmatmul.msk.f32.gmra.mxu3 %vm735_vm11, %v800_v54 }
 0x612   :  { %v942_v13 = vpop.f32.mrf.mxu0 }
 0x613   :  { %v5513_v14 = vpop.eup %5512  ;;  %v897_v12 = vpop.f32.mrf.mxu1  ;;  %v943_v20 = vadd.f32 %v5431_v16, %v942_v13 }
 0x614   :  { %v801_v9 = vmul.f32 %v5513_v14, %v5507_v61  ;;  %v898_v10 = vadd.f32 %v5432_v22, %v897_v12 }
 0x616   :  { %4953 = vmatmul.msk.f32.gmra.mxu3 %vm735_vm11, %v801_v9 }
 0x61a   :  { %v945_v18 = vpop.f32.mrf.mxu0 }
 0x61b   :  { %v946_v19 = vadd.f32 %v5431_v16, %v945_v18  ;;  %v900_v24 = vpop.f32.mrf.mxu1 }
 0x61c   :  { %v901_v30 = vadd.f32 %v5432_v22, %v900_v24 }
 0x61d   :  { %4986 = vmatpush.xpose.msk.msrb.mxu3 %vm632_vm15, %v946_v19 }
 0x621   :  { %4987 = vmatpush.xpose.msk.msrb.mxu3 %vm632_vm15, %v943_v20 }
 0x622   :  { %v948_v23 = vpop.f32.mrf.mxu0 }
 0x623   :  { %v903_v27 = vpop.f32.mrf.mxu1  ;;  %v949_v41 = vadd.f32 %v5431_v16, %v948_v23 }
 0x624   :  { %v904_v33 = vadd.f32 %v5432_v22, %v903_v27 }
 0x625   :  { %4988 = vmatpush.xpose.msk.msrb.mxu3 %vm632_vm15, %v940_v15 }
 0x628   :  { %4989 = vmatmul.msk.f32.vlgmr.msrb.gmra.mxu3 %vm632_vm15, %v898_v10 }
 0x62a   :  { %v951_v26 = vpop.f32.mrf.mxu0 }
 0x62b   :  { %v906_v32 = vpop.f32.mrf.mxu1  ;;  %v952_v34 = vadd.f32 %v5431_v16, %v951_v26 }
 0x62c   :  { %v907_v36 = vadd.f32 %v5432_v22, %v906_v32 }
 0x630   :  { %4990 = vmatmul.msk.f32.gmra.mxu3 %vm632_vm15, %v901_v30 }
 0x632   :  { %v954_v43 = vpop.f32.mrf.mxu0 }
 0x633   :  { %v955_v46 = vadd.f32 %v5431_v16, %v954_v43  ;;  %v909_v45 = vpop.f32.mrf.mxu1 }
 0x634   :  { %v910_v37 = vadd.f32 %v5432_v22, %v909_v45 }
 0x635   :  { %4992 = vmatpush.xpose.msk.msra.mxu3 %vm632_vm15, %v955_v46 }
 0x638   :  { %4991 = vmatmul.msk.f32.gmra.mxu3 %vm632_vm15, %v904_v33 }
 0x639   :  { %4993 = vmatpush.xpose.msk.msra.mxu3 %vm632_vm15, %v952_v34 }
 0x63b   :  { %v912_v38 = vpop.f32.mrf.mxu1 }
 0x63c   :  { %v913_v39 = vadd.f32 %v5432_v22, %v912_v38 }
 0x63d   :  { %4994 = vmatpush.xpose.msk.msra.mxu3 %vm632_vm15, %v949_v41 }
 0x640   :  { %4995 = vmatmul.msk.f32.vlgmr.msra.gmra.mxu3 %vm632_vm15, %v907_v36 }
 0x641   :  { %1323 = vmatpush.msrb.mxu3 %v872_v35 }
 0x648   :  { %4996 = vmatmul.msk.f32.gmra.mxu3 %vm632_vm15, %v910_v37 }
 0x650   :  { %4997 = vmatmul.msk.f32.gmra.mxu3 %vm632_vm15, %v913_v39 }
 0x658   :  { %5011 = vmatmul.msk.f32.vlgmr.msrb.gmra.mxu3 %vm632_vm15, %v828_v59 }
 0x660   :  { %5012 = vmatmul.msk.f32.gmra.mxu3 %vm632_vm15, %v831_v1 }
 0x668   :  { %5013 = vmatmul.msk.f32.gmra.mxu3 %vm632_vm15, %v834_v8 }
 0x688   :  { %v863_v40 = vpop.f32.mrf.mxu3 }
 0x689   :  { %5014 = vmatmul.msk.f32.gmra.mxu3 %vm632_vm15, %v863_v40 }
 0x690   :  { %v866_v42 = vpop.f32.mrf.mxu3 }
 0x691   :  { %5015 = vmatmul.msk.f32.gmra.mxu3 %vm632_vm15, %v866_v42 }
 0x699   :  { %v869_v49 = vpop.f32.mrf.mxu3 }
 0x69a   :  { %5016 = vmatmul.msk.f32.gmra.mxu3 %vm632_vm15, %v869_v49 }
 0x6ab   :  { %v1034_v50 = vpop.f32.mrf.mxu3 }
 0x6ac   :  { %v1087_v63 = vmul.f32 0.35355338, %v1034_v50 }
 0x6ae   :  { %v1093_v0 = vsel %vm47_vm10, %v1087_v63, -1e+30 }
 0x6af   :  { %v1099_v3 = vsel %vm735_vm11, %v1093_v0, -inf }
 0x6b3   :  { %v1037_v44 = vpop.f32.mrf.mxu3 }
 0x6b4   :  { %v1088_v5 = vmul.f32 0.35355338, %v1037_v44 }
 0x6b6   :  { %v1094_v48 = vsel %vm47_vm10, %v1088_v5, -1e+30 }
 0x6b7   :  { %v1102_v13 = vsel %vm735_vm11, %v1094_v48, -inf }
 0x6bb   :  { %v1040_v51 = vpop.f32.mrf.mxu3 }
 0x6bc   :  { %v1089_v9 = vmul.f32 0.35355338, %v1040_v51 }
 0x6be   :  { %v1095_v16 = vsel %vm47_vm10, %v1089_v9, -1e+30 }
 0x6bf   :  { %v1105_v12 = vsel %vm735_vm11, %v1095_v16, -inf }
 0x6c3   :  { %v1078_v52 = vpop.f32.mrf.mxu3 }
 0x6c4   :  { %v1090_v53 = vmul.f32 0.35355338, %v1078_v52 }
 0x6c6   :  { %v1096_v56 = vsel %vm47_vm10, %v1090_v53, -1e+30  ;;  %v5030_v53 = vld [vmem:[%s7951_s4 + $0xd8] sm:$0xff] }
 0x6c7   :  { %v1108_v61 = vsel %vm735_vm11, %v1096_v56, -inf  ;;  %1404 = vmatpush.msra.mxu0 %v5030_v53 }
 0x6c8   :  { %1109 = vmax.xlane.f32.xlu0 %v1108_v61  ;;  %v5028_v61 = vld [vmem:[%s7951_s4 + $0xc8] sm:$0xff] }
 0x6cb   :  { %v1081_v59 = vpop.f32.mrf.mxu3 }
 0x6cc   :  { %v1091_v25 = vmul.f32 0.35355338, %v1081_v59  ;;  %v5027_v59 = vld [vmem:[%s7951_s4 + $0xc0] sm:$0xff] }
 0x6ce   :  { %v1097_v1 = vsel %vm47_vm10, %v1091_v25, -1e+30  ;;  %v5020_v25 = vld [vmem:[%s7951_s4 + $0x58] sm:$0xff] }
 0x6cf   :  { %v1111_v4 = vsel %vm735_vm11, %v1097_v1, -inf  ;;  %1362 = vmatpush.msra.mxu1 %v5020_v25 }
 0x6d0   :  { %1100 = vmax.xlane.f32.xlu0 %v1099_v3  ;;  %1112 = vmax.xlane.f32.xlu1 %v1111_v4 }
 0x6d3   :  { %v1084_v6 = vpop.f32.mrf.mxu3 }
 0x6d4   :  { %v1092_v54 = vmul.f32 0.35355338, %v1084_v6  ;;  %v5017_v6 = vld [vmem:[%s7951_s4 + $0x40] sm:$0xff] }
 0x6d6   :  { %v1098_v8 = vsel %vm47_vm10, %v1092_v54, -1e+30 }
 0x6d7   :  { %v1114_v14 = vsel %vm735_vm11, %v1098_v8, -inf }
 0x6d8   :  { %1103 = vmax.xlane.f32.xlu1 %v1102_v13  ;;  %1115 = vmax.xlane.f32.xlu2 %v1114_v14 }
 0x6e0   :  { %1106 = vmax.xlane.f32.xlu2 %v1105_v12 }
 0x73b   :  { %v1110_v18 = vpop.xlane.xlu0 %1109 }
 0x73c   :  { %v1120_v19 = vsub.f32 %v1096_v56, %v1110_v18  ;;  %v5029_v56 = vld [vmem:[%s7951_s4 + $0xd0] sm:$0xff] }
 0x73d   :  { %1405 = vmatpush.msra.mxu0 %v5029_v56 }
 0x73e   :  { %v1129_v20 = vmul.f32 1.442695, %v1120_v19 }
 0x73f   :  { %1406 = vmatpush.msra.mxu0 %v5028_v61 }
 0x740   :  { %5514 = vpow2.f32 %v1129_v20 }
 0x741   :  { %1407 = vmatpush.msra.mxu0 %v5027_v59  ;;  %v5086_v59 = vld [vmem:[%s7951_s4 + $0xf0] sm:$0xff] }
 0x743   :  { %v1101_v22 = vpop.xlane.xlu0 %1100  ;;  %v1113_v23 = vpop.xlane.xlu1 %1112 }
 0x744   :  { %v1117_v15 = vsub.f32 %v1093_v0, %v1101_v22  ;;  %v1121_v24 = vsub.f32 %v1097_v1, %v1113_v23  ;;  %v5019_v0 = vld [vmem:[%s7951_s4 + $0x50] sm:$0xff]  ;;  %v5018_v1 = vld [vmem:[%s7951_s4 + $0x48] sm:$0xff] }
 0x745   :  { %1363 = vmatpush.msra.mxu1 %v5019_v0  ;;  %v5085_v0 = vld [vmem:[%s7951_s4 + $0xe8] sm:$0xff] }
 0x746   :  { %v5515_v10 = vpop.eup %5514  ;;  %v1123_v26 = vmul.f32 1.442695, %v1117_v15  ;;  %v1131_v27 = vmul.f32 1.442695, %v1121_v24  ;;  %v5004_v24 = vld [vmem:[%s7953_s6 + $0x8] sm:$0xff] }
 0x747   :  { %v1144_v30 = vsel %vm735_vm11, %v5515_v10, 0.0  ;;  %1364 = vmatpush.msra.mxu1 %v5018_v1  ;;  %1270 = vmatpush.msrb.mxu2 %v5004_v24 }
 0x748   :  { %5516 = vpow2.f32 %v1123_v26  ;;  %1145 = vadd.xlane.f32.xlu0 %v1144_v30 }
 0x749   :  { %5518 = vpow2.f32 %v1131_v27  ;;  %1365 = vmatpush.msra.mxu1 %v5017_v6 }
 0x74b   :  { %v1104_v43 = vpop.xlane.xlu1 %1103  ;;  %v1116_v46 = vpop.xlane.xlu2 %1115 }
 0x74c   :  { %v1118_v33 = vsub.f32 %v1094_v48, %v1104_v43  ;;  %v1122_v32 = vsub.f32 %v1098_v8, %v1116_v46  ;;  %v5041_v46 = vld [vmem:[%s7951_s4 + $0x158] sm:$0xff] }
 0x74d   :  { %1446 = vmatpush.msra.mxu2 %v5041_v46 }
 0x74e   :  { %v5517_v34 = vpop.eup %5516  ;;  %v1125_v41 = vmul.f32 1.442695, %v1118_v33  ;;  %v1133_v35 = vmul.f32 1.442695, %v1122_v32  ;;  %v5040_v33 = vld [vmem:[%s7951_s4 + $0x150] sm:$0xff]  ;;  %v5039_v32 = vld [vmem:[%s7951_s4 + $0x148] sm:$0xff] }
 0x74f   :  { %v5519_v36 = vpop.eup %5518  ;;  %v1135_v45 = vsel %vm735_vm11, %v5517_v34, 0.0  ;;  %1447 = vmatpush.msra.mxu2 %v5040_v33 }
 0x750   :  { %5520 = vpow2.f32 %v1125_v41  ;;  %1136 = vadd.xlane.f32.xlu0 %v1135_v45  ;;  %v1147_v37 = vsel %vm735_vm11, %v5519_v36, 0.0  ;;  %v5038_v41 = vld [vmem:[%s7951_s4 + $0x140] sm:$0xff] }
 0x751   :  { %5522 = vpow2.f32 %v1133_v35  ;;  %1148 = vadd.xlane.f32.xlu1 %v1147_v37  ;;  %1448 = vmatpush.msra.mxu2 %v5039_v32  ;;  %v5433_v45 = vld [vmem:[%s7952_s5 + $0x6] ss:$0 sm:$0xff] }
 0x753   :  { %v1107_v38 = vpop.xlane.xlu2 %1106  ;;  %1449 = vmatpush.msra.mxu2 %v5038_v41 }
 0x754   :  { %v1119_v39 = vsub.f32 %v1095_v16, %v1107_v38 }
 0x756   :  { %v5521_v40 = vpop.eup %5520  ;;  %v1127_v42 = vmul.f32 1.442695, %v1119_v39 }
 0x757   :  { %v5523_v49 = vpop.eup %5522  ;;  %v1138_v50 = vsel %vm735_vm11, %v5521_v40, 0.0 }
 0x758   :  { %5524 = vpow2.f32 %v1127_v42  ;;  %v1150_v44 = vsel %vm735_vm11, %v5523_v49, 0.0  ;;  %v5434_v42 = vld [vmem:[%s7952_s5 + $0x2] ss:$0 sm:$0xff] }
 0x759   :  { %1139 = vadd.xlane.f32.xlu1 %v1138_v50  ;;  %1151 = vadd.xlane.f32.xlu2 %v1150_v44 }
 0x75e   :  { %v5525_v51 = vpop.eup %5524 }
 0x75f   :  { %v1141_v52 = vsel %vm735_vm11, %v5525_v51, 0.0 }
 0x761   :  { %1142 = vadd.xlane.f32.xlu2 %v1141_v52 }
 0x7bb   :  { %v1146_v63 = vpop.xlane.xlu0 %1145 }
 0x7bc   :  { %5526 = vrcp.f32 %v1146_v63  ;;  %v5087_v63 = vld [vmem:[%s7951_s4 + $0xf8] sm:$0xff] }
 0x7c2   :  { %v5527_v3 = vpop.eup %5526 }
 0x7c3   :  { %v1162_v4 = vmul.f32 %v5527_v3, %v5515_v10  ;;  %v1137_v5 = vpop.xlane.xlu0 %1136  ;;  %v5084_v3 = vld [vmem:[%s7951_s4 + $0xe0] sm:$0xff] }
 0x7c4   :  { %5528 = vrcp.f32 %v1137_v5  ;;  %v1149_v54 = vpop.xlane.xlu1 %1148 }
 0x7c5   :  { %5530 = vrcp.f32 %v1149_v54  ;;  %5001 = vmatmul.msk.f32.vlgmr.msrb.gmra.mxu0 %vm735_vm11, %v1162_v4 }
 0x7ca   :  { %v5529_v48 = vpop.eup %5528 }
 0x7cb   :  { %v5531_v8 = vpop.eup %5530  ;;  %v1159_v13 = vmul.f32 %v5529_v48, %v5517_v34 }
 0x7cc   :  { %v1140_v14 = vpop.xlane.xlu1 %1139  ;;  %v1152_v9 = vpop.xlane.xlu2 %1151  ;;  %v1163_v16 = vmul.f32 %v5531_v8, %v5519_v36 }
 0x7cd   :  { %5532 = vrcp.f32 %v1140_v14  ;;  %4998 = vmatmul.msk.f32.vlgmr.msrb.gmra.mxu1 %vm735_vm11, %v1159_v13 }
 0x7ce   :  { %5534 = vrcp.f32 %v1152_v9  ;;  %5002 = vmatmul.msk.f32.gmra.mxu0 %vm735_vm11, %v1163_v16  ;;  %v6582_v9 = vpop.f32.mrf.mxu3 }
 0x7d3   :  { %v5533_v12 = vpop.eup %5532 }
 0x7d4   :  { %v5535_v18 = vpop.eup %5534  ;;  %v1143_v19 = vpop.xlane.xlu2 %1142  ;;  %v1160_v20 = vmul.f32 %v5533_v12, %v5521_v40 }
 0x7d5   :  { %5536 = vrcp.f32 %v1143_v19  ;;  %v1164_v22 = vmul.f32 %v5535_v18, %v5523_v49 }
 0x7d6   :  { %4999 = vmatmul.msk.f32.gmra.mxu1 %vm735_vm11, %v1160_v20  ;;  %v6588_v12 = vpop.f32.mrf.mxu3 }
 0x7d7   :  { %5003 = vmatmul.msk.f32.gmra.mxu0 %vm735_vm11, %v1164_v22 }
 0x7db   :  { %v5537_v23 = vpop.eup %5536 }
 0x7dc   :  { %v1161_v15 = vmul.f32 %v5537_v23, %v5525_v51 }
 0x7de   :  { %5000 = vmatmul.msk.f32.gmra.mxu1 %vm735_vm11, %v1161_v15  ;;  %v6594_v19 = vpop.f32.mrf.mxu3 }
 0x7df   :  { %5032 = vmatmul.msk.f32.vlgmr.msra.gmra.mxu0 %vm181_vm1, %v6168_v17 }
 0x7e6   :  { %5021 = vmatmul.msk.f32.vlgmr.msra.gmra.mxu1 %vm181_vm1, %v6168_v17  ;;  %v6598_v22 = vpop.f32.mrf.mxu3 }
 0x7e7   :  { %5033 = vmatmul.msk.f32.gmra.mxu0 %vm181_vm1, %v6188_v29 }
 0x7ee   :  { %5022 = vmatmul.msk.f32.gmra.mxu1 %vm181_vm1, %v6188_v29  ;;  %v6602_v15 = vpop.f32.mrf.mxu3 }
 0x7ef   :  { %5034 = vmatmul.msk.f32.gmra.mxu0 %vm181_vm1, %v6154_v58 }
 0x7f6   :  { %5023 = vmatmul.msk.f32.gmra.mxu1 %vm181_vm1, %v6154_v58 }
 0x7f7   :  { %5035 = vmatmul.msk.f32.gmra.mxu0 %vm181_vm1, %v6213_v62 }
 0x7fe   :  { %5024 = vmatmul.msk.f32.gmra.mxu1 %vm181_vm1, %v6213_v62 }
 0x7ff   :  { %5036 = vmatmul.msk.f32.gmra.mxu0 %vm181_vm1, %v6239_v47 }
 0x806   :  { %5025 = vmatmul.msk.f32.gmra.mxu1 %vm181_vm1, %v6239_v47 }
 0x807   :  { %5037 = vmatmul.msk.f32.gmra.mxu0 %vm181_vm1, %v6247_v31 }
 0x80e   :  { %5026 = vmatmul.msk.f32.gmra.mxu1 %vm181_vm1, %v6247_v31 }
 0x842   :  { %v1226_v10 = vpop.f32.mrf.mxu0 }
 0x84a   :  { %v1191_v26 = vpop.f32.mrf.mxu1 }
 0x84b   :  { %v1229_v27 = vpop.f32.mrf.mxu0  ;;  %5005 = vmatmul.msk.f32.vlgmr.msrb.gmra.mxu2 %vm632_vm15, %v1191_v26 }
 0x84c   :  { %1827 = vmatpush.msrb.mxu2 %v5087_v63 }
 0x84e   :  { %1828 = vmatpush.msrb.mxu2 %v5086_v59 }
 0x850   :  { %1829 = vmatpush.msrb.mxu2 %v5085_v0 }
 0x852   :  { %1830 = vmatpush.msrb.mxu2 %v5084_v3 }
 0x853   :  { %v1194_v30 = vpop.f32.mrf.mxu1 }
 0x854   :  { %v1232_v43 = vpop.f32.mrf.mxu0  ;;  %5006 = vmatmul.msk.f32.gmra.mxu2 %vm632_vm15, %v1194_v30 }
 0x85b   :  { %v1197_v34 = vpop.f32.mrf.mxu1 }
 0x85c   :  { %v1409_v35 = vpop.f32.mrf.mxu0  ;;  %5007 = vmatmul.msk.f32.gmra.mxu2 %vm632_vm15, %v1197_v34 }
 0x85d   :  { %v1410_v50 = vadd.f32 %v5433_v45, %v1409_v35 }
 0x863   :  { %v1367_v37 = vpop.f32.mrf.mxu1 }
 0x864   :  { %v1412_v36 = vpop.f32.mrf.mxu0  ;;  %5008 = vmatmul.msk.f32.gmra.mxu2 %vm632_vm15, %v1226_v10  ;;  %v1368_v51 = vadd.f32 %v5434_v42, %v1367_v37  ;;  %v6606_v10 = vpop.f32.mrf.mxu3  ;;  %v5435_v37 = vld [vmem:[%s7952_s5 + $0xa] ss:$0 sm:$0xff] }
 0x865   :  { %v1413_v40 = vadd.f32 %v5433_v45, %v1412_v36 }
 0x86b   :  { %v1370_v44 = vpop.f32.mrf.mxu1 }
 0x86c   :  { %v1415_v38 = vpop.f32.mrf.mxu0  ;;  %5009 = vmatmul.msk.f32.gmra.mxu2 %vm632_vm15, %v1229_v27  ;;  %v1371_v56 = vadd.f32 %v5434_v42, %v1370_v44 }
 0x86d   :  { %v1416_v39 = vadd.f32 %v5433_v45, %v1415_v38 }
 0x86f   :  { %5049 = vmatpush.xpose.msk.msra.mxu3 %vm632_vm15, %v1416_v39 }
 0x873   :  { %5050 = vmatpush.xpose.msk.msra.mxu3 %vm632_vm15, %v1413_v40  ;;  %v1373_v53 = vpop.f32.mrf.mxu1 }
 0x874   :  { %v1418_v49 = vpop.f32.mrf.mxu0  ;;  %5010 = vmatmul.msk.f32.gmra.mxu2 %vm632_vm15, %v1232_v43  ;;  %v1374_v1 = vadd.f32 %v5434_v42, %v1373_v53 }
 0x875   :  { %v1419_v6 = vadd.f32 %v5433_v45, %v1418_v49 }
 0x877   :  { %5051 = vmatpush.xpose.msk.msra.mxu3 %vm632_vm15, %v1410_v50 }
 0x87a   :  { %5052 = vmatmul.msk.f32.vlgmr.msra.gmra.mxu3 %vm632_vm15, %v1368_v51 }
 0x87b   :  { %v1376_v4 = vpop.f32.mrf.mxu1 }
 0x87c   :  { %v1421_v52 = vpop.f32.mrf.mxu0  ;;  %5043 = vmatmul.msk.f32.vlgmr.msra.gmra.mxu2 %vm181_vm1, %v6168_v17  ;;  %v1377_v54 = vadd.f32 %v5434_v42, %v1376_v4 }
 0x87d   :  { %v1422_v5 = vadd.f32 %v5433_v45, %v1421_v52 }
 0x882   :  { %5053 = vmatmul.msk.f32.gmra.mxu3 %vm632_vm15, %v1371_v56 }
 0x883   :  { %v1379_v48 = vpop.f32.mrf.mxu1 }
 0x884   :  { %v1424_v61 = vpop.f32.mrf.mxu0  ;;  %5044 = vmatmul.msk.f32.gmra.mxu2 %vm181_vm1, %v6188_v29  ;;  %v1380_v8 = vadd.f32 %v5434_v42, %v1379_v48 }
 0x885   :  { %v1425_v25 = vadd.f32 %v5433_v45, %v1424_v61 }
 0x887   :  { %5055 = vmatpush.xpose.msk.msrb.mxu1 %vm632_vm15, %v1425_v25 }
 0x88a   :  { %5054 = vmatmul.msk.f32.gmra.mxu3 %vm632_vm15, %v1374_v1 }
 0x88b   :  { %5056 = vmatpush.xpose.msk.msrb.mxu1 %vm632_vm15, %v1422_v5  ;;  %v1382_v13 = vpop.f32.mrf.mxu1  ;;  %v5067_v5 = vld [vmem:[%s7953_s6 + $0x10] sm:$0xff] }
 0x88c   :  { %5045 = vmatmul.msk.f32.gmra.mxu2 %vm181_vm1, %v6154_v58  ;;  %v1383_v14 = vadd.f32 %v5434_v42, %v1382_v13 }
 0x88f   :  { %5057 = vmatpush.xpose.msk.msrb.mxu1 %vm632_vm15, %v1419_v6 }
 0x892   :  { %5058 = vmatmul.msk.f32.vlgmr.msrb.gmra.mxu1 %vm632_vm15, %v1377_v54 }
 0x893   :  { %1740 = vmatpush.msra.mxu1 %v5067_v5 }
 0x894   :  { %5046 = vmatmul.msk.f32.gmra.mxu2 %vm181_vm1, %v6213_v62 }
 0x89a   :  { %5059 = vmatmul.msk.f32.gmra.mxu1 %vm632_vm15, %v1380_v8 }
 0x89c   :  { %5047 = vmatmul.msk.f32.gmra.mxu2 %vm181_vm1, %v6239_v47 }
 0x8a2   :  { %5060 = vmatmul.msk.f32.gmra.mxu1 %vm632_vm15, %v1383_v14 }
 0x8a4   :  { %5048 = vmatmul.msk.f32.gmra.mxu2 %vm181_vm1, %v6247_v31 }
 0x8ac   :  { %5089 = vmatmul.msk.f32.vlgmr.msrb.gmra.mxu2 %vm181_vm1, %v6168_v17 }
 0x8b4   :  { %5090 = vmatmul.msk.f32.gmra.mxu2 %vm181_vm1, %v6188_v29 }
 0x8bc   :  { %5091 = vmatmul.msk.f32.gmra.mxu2 %vm181_vm1, %v6154_v58 }
 0x8c4   :  { %5092 = vmatmul.msk.f32.gmra.mxu2 %vm181_vm1, %v6213_v62 }
 0x8cc   :  { %5093 = vmatmul.msk.f32.gmra.mxu2 %vm181_vm1, %v6239_v47 }
 0x8ce   :  { %v6586_v16 = vpop.f32.mrf.mxu2 }
 0x8d4   :  { %5094 = vmatmul.msk.f32.gmra.mxu2 %vm181_vm1, %v6247_v31 }
 0x8d7   :  { %v6592_v18 = vpop.f32.mrf.mxu2 }
 0x8df   :  { %v6596_v20 = vpop.f32.mrf.mxu2 }
 0x8e7   :  { %v6600_v23 = vpop.f32.mrf.mxu2 }
 0x8ef   :  { %v6604_v24 = vpop.f32.mrf.mxu2 }
 0x8f7   :  { %v6608_v26 = vpop.f32.mrf.mxu2 }
 0x8fd   :  { %v1504_v27 = vpop.f32.mrf.mxu3 }
 0x8fe   :  { %v1557_v30 = vmul.f32 0.35355338, %v1504_v27 }
 0x8ff   :  { %v1451_v43 = vpop.f32.mrf.mxu2 }
 0x900   :  { %v1563_v46 = vsel %vm47_vm10, %v1557_v30, -1e+30  ;;  %v1452_v56 = vadd.f32 %v5435_v37, %v1451_v43  ;;  %v6637_v43 = vld [vmem:[%s7952_s5 + $0x7] ss:$0 sm:$0xff] }
 0x901   :  { %v1569_v33 = vsel %vm735_vm11, %v1563_v46, -inf }
 0x902   :  { %1570 = vmax.xlane.f32.xlu0 %v1569_v33 }
 0x905   :  { %v1507_v32 = vpop.f32.mrf.mxu3 }
 0x906   :  { %v1558_v34 = vmul.f32 0.35355338, %v1507_v32 }
 0x907   :  { %v1454_v41 = vpop.f32.mrf.mxu2 }
 0x908   :  { %v1564_v35 = vsel %vm47_vm10, %v1558_v34, -1e+30  ;;  %v1455_v51 = vadd.f32 %v5435_v37, %v1454_v41 }
 0x909   :  { %v1572_v36 = vsel %vm735_vm11, %v1564_v35, -inf }
 0x90a   :  { %1573 = vmax.xlane.f32.xlu1 %v1572_v36 }
 0x90d   :  { %v1510_v45 = vpop.f32.mrf.mxu3 }
 0x90e   :  { %v1559_v38 = vmul.f32 0.35355338, %v1510_v45 }
 0x90f   :  { %v1548_v39 = vpop.f32.mrf.mxu1  ;;  %v1457_v40 = vpop.f32.mrf.mxu2 }
 0x910   :  { %v1560_v42 = vmul.f32 0.35355338, %v1548_v39  ;;  %v1458_v49 = vadd.f32 %v5435_v37, %v1457_v40  ;;  %v1565_v50 = vsel %vm47_vm10, %v1559_v38, -1e+30 }
 0x911   :  { %v1575_v44 = vsel %vm735_vm11, %v1565_v50, -inf }
 0x912   :  { %1576 = vmax.xlane.f32.xlu2 %v1575_v44  ;;  %1657 = vmatpush.msrb.mxu0 %v1458_v49  ;;  %v1566_v52 = vsel %vm47_vm10, %v1560_v42, -1e+30 }
 0x913   :  { %v1578_v53 = vsel %vm735_vm11, %v1566_v52, -inf }
 0x914   :  { %1579 = vmax.xlane.f32.xlu0 %v1578_v53  ;;  %1658 = vmatpush.msrb.mxu0 %v1455_v51 }
 0x916   :  { %1659 = vmatpush.msrb.mxu0 %v1452_v56 }
 0x917   :  { %v1551_v61 = vpop.f32.mrf.mxu1  ;;  %v1460_v63 = vpop.f32.mrf.mxu2 }
 0x918   :  { %v1561_v59 = vmul.f32 0.35355338, %v1551_v61  ;;  %v1461_v14 = vadd.f32 %v5435_v37, %v1460_v63 }
 0x91a   :  { %v1567_v25 = vsel %vm47_vm10, %v1561_v59, -1e+30 }
 0x91b   :  { %v1581_v0 = vsel %vm735_vm11, %v1567_v25, -inf }
 0x91c   :  { %1582 = vmax.xlane.f32.xlu1 %v1581_v0 }
 0x91f   :  { %v1554_v1 = vpop.f32.mrf.mxu1  ;;  %v1463_v3 = vpop.f32.mrf.mxu2 }
 0x920   :  { %v1562_v4 = vmul.f32 0.35355338, %v1554_v1  ;;  %v1464_v13 = vadd.f32 %v5435_v37, %v1463_v3 }
 0x922   :  { %v1568_v6 = vsel %vm47_vm10, %v1562_v4, -1e+30 }
 0x923   :  { %v1584_v54 = vsel %vm735_vm11, %v1568_v6, -inf }
 0x924   :  { %1585 = vmax.xlane.f32.xlu2 %v1584_v54 }
 0x927   :  { %v1466_v48 = vpop.f32.mrf.mxu2 }
 0x928   :  { %v1467_v8 = vadd.f32 %v5435_v37, %v1466_v48 }
 0x92a   :  { %1692 = vmatpush.msrb.mxu3 %v1467_v8 }
 0x92c   :  { %1693 = vmatpush.msrb.mxu3 %v1464_v13 }
 0x92e   :  { %1694 = vmatpush.msrb.mxu3 %v1461_v14 }
 0x92f   :  { %v1832_v27 = vpop.f32.mrf.mxu2 }
 0x930   :  { %v1833_v41 = vadd.f32 %v6637_v43, %v1832_v27  ;;  %v5077_v27 = vld [vmem:[%s7951_s4 + $0x78] sm:$0xff] }
 0x931   :  { %1785 = vmatpush.msra.mxu0 %v5077_v27 }
 0x937   :  { %v1835_v30 = vpop.f32.mrf.mxu2 }
 0x938   :  { %v1836_v34 = vadd.f32 %v6637_v43, %v1835_v30  ;;  %v5076_v30 = vld [vmem:[%s7951_s4 + $0x70] sm:$0xff] }
 0x939   :  { %1786 = vmatpush.msra.mxu0 %v5076_v30 }
 0x93f   :  { %v1838_v33 = vpop.f32.mrf.mxu2 }
 0x940   :  { %v1839_v32 = vadd.f32 %v6637_v43, %v1838_v33  ;;  %v5074_v33 = vld [vmem:[%s7951_s4 + $0x60] sm:$0xff] }
 0x942   :  { %5106 = vmatpush.xpose.msk.msrb.mxu1 %vm632_vm15, %v1839_v32 }
 0x946   :  { %5107 = vmatpush.xpose.msk.msrb.mxu1 %vm632_vm15, %v1836_v34 }
 0x947   :  { %v1841_v32 = vpop.f32.mrf.mxu2 }
 0x94a   :  { %5108 = vmatpush.xpose.msk.msrb.mxu1 %vm632_vm15, %v1833_v41 }
 0x94f   :  { %v1844_v34 = vpop.f32.mrf.mxu2 }
 0x975   :  { %v1571_v36 = vpop.xlane.xlu0 %1570 }
 0x976   :  { %v1587_v45 = vsub.f32 %v1563_v46, %v1571_v36  ;;  %v1847_v36 = vpop.f32.mrf.mxu2 }
 0x978   :  { %v1593_v37 = vmul.f32 1.442695, %v1587_v45 }
 0x97a   :  { %5538 = vpow2.f32 %v1593_v37 }
 0x97d   :  { %v1574_v38 = vpop.xlane.xlu1 %1573 }
 0x97e   :  { %v1588_v39 = vsub.f32 %v1564_v35, %v1574_v38 }
 0x980   :  { %v5539_v40 = vpop.eup %5538  ;;  %v1595_v42 = vmul.f32 1.442695, %v1588_v39  ;;  %v1848_v39 = vadd.f32 %v6637_v43, %v1847_v36  ;;  %v5438_v36 = vld [vmem:[%s7952_s5 + $0xb] ss:$0 sm:$0xff] }
 0x981   :  { %v1605_v49 = vsel %vm735_vm11, %v5539_v40, 0.0 }
 0x982   :  { %5540 = vpow2.f32 %v1595_v42  ;;  %1606 = vadd.xlane.f32.xlu0 %v1605_v49  ;;  %v5098_v42 = vld [vmem:[%s7951_s4 + $0x178] sm:$0xff]  ;;  %v5097_v49 = vld [vmem:[%s7951_s4 + $0x170] sm:$0xff] }
 0x983   :  { %1869 = vmatpush.msra.mxu3 %v5098_v42 }
 0x985   :  { %v1577_v44 = vpop.xlane.xlu2 %1576  ;;  %1870 = vmatpush.msra.mxu3 %v5097_v49 }
 0x986   :  { %v1589_v51 = vsub.f32 %v1565_v50, %v1577_v44  ;;  %v1845_v44 = vadd.f32 %v6637_v43, %v1844_v34 }
 0x987   :  { %v1580_v53 = vpop.xlane.xlu0 %1579 }
 0x988   :  { %v5541_v56 = vpop.eup %5540  ;;  %v1597_v61 = vmul.f32 1.442695, %v1589_v51  ;;  %v1590_v63 = vsub.f32 %v1566_v52, %v1580_v53 }
 0x989   :  { %v1608_v59 = vsel %vm735_vm11, %v5541_v56, 0.0 }
 0x98a   :  { %5542 = vpow2.f32 %v1597_v61  ;;  %v1599_v46 = vmul.f32 1.442695, %v1590_v63  ;;  %1609 = vadd.xlane.f32.xlu1 %v1608_v59  ;;  %v1842_v63 = vadd.f32 %v6637_v43, %v1841_v32 }
 0x98c   :  { %5544 = vpow2.f32 %v1599_v46  ;;  %v5095_v46 = vld [vmem:[%s7951_s4 + $0x160] sm:$0xff] }
 0x98f   :  { %v1583_v0 = vpop.xlane.xlu1 %1582 }
 0x990   :  { %v5543_v35 = vpop.eup %5542  ;;  %v1591_v1 = vsub.f32 %v1567_v25, %v1583_v0 }
 0x991   :  { %v1611_v3 = vsel %vm735_vm11, %v5543_v35, 0.0 }
 0x992   :  { %v5545_v4 = vpop.eup %5544  ;;  %v1601_v5 = vmul.f32 1.442695, %v1591_v1  ;;  %1612 = vadd.xlane.f32.xlu2 %v1611_v3 }
 0x993   :  { %v1614_v50 = vsel %vm735_vm11, %v5545_v4, 0.0 }
 0x994   :  { %5546 = vpow2.f32 %v1601_v5  ;;  %1615 = vadd.xlane.f32.xlu0 %v1614_v50 }
 0x997   :  { %v1586_v54 = vpop.xlane.xlu2 %1585 }
 0x998   :  { %v1592_v52 = vsub.f32 %v1568_v6, %v1586_v54  ;;  %v5075_v6 = vld [vmem:[%s7951_s4 + $0x68] sm:$0xff] }
 0x999   :  { %1787 = vmatpush.msra.mxu0 %v5075_v6 }
 0x99a   :  { %v5547_v48 = vpop.eup %5546  ;;  %v1603_v8 = vmul.f32 1.442695, %v1592_v52 }
 0x99b   :  { %v1617_v13 = vsel %vm735_vm11, %v5547_v48, 0.0  ;;  %1788 = vmatpush.msra.mxu0 %v5074_v33 }
 0x99c   :  { %5548 = vpow2.f32 %v1603_v8  ;;  %1618 = vadd.xlane.f32.xlu1 %v1617_v13 }
 0x9a2   :  { %v5549_v14 = vpop.eup %5548 }
 0x9a3   :  { %v1620_v25 = vsel %vm735_vm11, %v5549_v14, 0.0 }
 0x9a4   :  { %1621 = vadd.xlane.f32.xlu2 %v1620_v25 }
 0x9f5   :  { %v1607_v41 = vpop.xlane.xlu0 %1606 }
 0x9f6   :  { %5550 = vrcp.f32 %v1607_v41 }
 0x9fc   :  { %v5551_v45 = vpop.eup %5550 }
 0x9fd   :  { %v1629_v37 = vmul.f32 %v5551_v45, %v5539_v40  ;;  %v1610_v38 = vpop.xlane.xlu1 %1609  ;;  %v5096_v40 = vld [vmem:[%s7951_s4 + $0x168] sm:$0xff] }
 0x9fe   :  { %5552 = vrcp.f32 %v1610_v38  ;;  %1871 = vmatpush.msra.mxu3 %v5096_v40 }
 0x9ff   :  { %5061 = vmatmul.msk.f32.vlgmr.msrb.gmra.mxu0 %vm735_vm11, %v1629_v37 }
 0xa00   :  { %5112 = vmatpush.xpose.msk.msrb.mxu0 %vm632_vm15, %v1848_v39  ;;  %1872 = vmatpush.msra.mxu3 %v5095_v46 }
 0xa04   :  { %v5553_v51 = vpop.eup %5552  ;;  %5113 = vmatpush.xpose.msk.msrb.mxu0 %vm632_vm15, %v1845_v44 }
 0xa05   :  { %v1613_v53 = vpop.xlane.xlu2 %1612  ;;  %v1630_v61 = vmul.f32 %v5553_v51, %v5541_v56 }
 0xa06   :  { %5554 = vrcp.f32 %v1613_v53 }
 0xa07   :  { %v1616_v59 = vpop.xlane.xlu0 %1615  ;;  %5062 = vmatmul.msk.f32.gmra.mxu0 %vm735_vm11, %v1630_v61 }
 0xa08   :  { %5556 = vrcp.f32 %v1616_v59  ;;  %5114 = vmatpush.xpose.msk.msrb.mxu0 %vm632_vm15, %v1842_v63 }
 0xa0c   :  { %v5555_v0 = vpop.eup %5554 }
 0xa0d   :  { %v1631_v1 = vmul.f32 %v5555_v0, %v5543_v35 }
 0xa0e   :  { %v5557_v3 = vpop.eup %5556 }
 0xa0f   :  { %v1632_v5 = vmul.f32 %v5557_v3, %v5545_v4  ;;  %v1619_v56 = vpop.xlane.xlu1 %1618  ;;  %5063 = vmatmul.msk.f32.gmra.mxu0 %vm735_vm11, %v1631_v1 }
 0xa10   :  { %5558 = vrcp.f32 %v1619_v56 }
 0xa11   :  { %5064 = vmatmul.msk.f32.vlgmr.msrb.gmra.mxu3 %vm735_vm11, %v1632_v5 }
 0xa16   :  { %v5559_v43 = vpop.eup %5558 }
 0xa17   :  { %v1622_v50 = vpop.xlane.xlu2 %1621  ;;  %5078 = vmatmul.msk.f32.vlgmr.msra.gmra.mxu0 %vm181_vm1, %v6168_v17  ;;  %v1633_v54 = vmul.f32 %v5559_v43, %v5547_v48 }
 0xa18   :  { %5560 = vrcp.f32 %v1622_v50 }
 0xa19   :  { %5065 = vmatmul.msk.f32.gmra.mxu3 %vm735_vm11, %v1633_v54 }
 0xa1e   :  { %v5561_v52 = vpop.eup %5560 }
 0xa1f   :  { %5079 = vmatmul.msk.f32.gmra.mxu0 %vm181_vm1, %v6188_v29  ;;  %v1634_v35 = vmul.f32 %v5561_v52, %v5549_v14 }
 0xa21   :  { %5066 = vmatmul.msk.f32.gmra.mxu3 %vm735_vm11, %v1634_v35 }
 0xa27   :  { %5080 = vmatmul.msk.f32.gmra.mxu0 %vm181_vm1, %v6154_v58 }
 0xa29   :  { %5100 = vmatmul.msk.f32.vlgmr.msra.gmra.mxu3 %vm181_vm1, %v6168_v17 }
 0xa2f   :  { %5081 = vmatmul.msk.f32.gmra.mxu0 %vm181_vm1, %v6213_v62 }
 0xa31   :  { %5101 = vmatmul.msk.f32.gmra.mxu3 %vm181_vm1, %v6188_v29 }
 0xa37   :  { %5082 = vmatmul.msk.f32.gmra.mxu0 %vm181_vm1, %v6239_v47 }
 0xa39   :  { %5102 = vmatmul.msk.f32.gmra.mxu3 %vm181_vm1, %v6154_v58 }
 0xa3f   :  { %5083 = vmatmul.msk.f32.gmra.mxu0 %vm181_vm1, %v6247_v31 }
 0xa41   :  { %5103 = vmatmul.msk.f32.gmra.mxu3 %vm181_vm1, %v6213_v62 }
 0xa49   :  { %5104 = vmatmul.msk.f32.gmra.mxu3 %vm181_vm1, %v6239_v47 }
 0xa51   :  { %5105 = vmatmul.msk.f32.gmra.mxu3 %vm181_vm1, %v6247_v31  ;;  %v5437_v31 = vld [vmem:[%s7952_s5 + $0x3] ss:$0 sm:$0xff] }
 0xa7c   :  { %v1661_v17 = vpop.f32.mrf.mxu0 }
 0xa7d   :  { %5068 = vmatmul.msk.f32.vlgmr.msra.gmra.mxu1 %vm632_vm15, %v1661_v17 }
 0xa84   :  { %v1664_v29 = vpop.f32.mrf.mxu0 }
 0xa85   :  { %5069 = vmatmul.msk.f32.gmra.mxu1 %vm632_vm15, %v1664_v29 }
 0xa8c   :  { %v1667_v4 = vpop.f32.mrf.mxu0 }
 0xa8d   :  { %5070 = vmatmul.msk.f32.gmra.mxu1 %vm632_vm15, %v1667_v4 }
 0xa94   :  { %v1696_v58 = vpop.f32.mrf.mxu3  ;;  %v1790_v48 = vpop.f32.mrf.mxu0 }
 0xa95   :  { %5071 = vmatmul.msk.f32.gmra.mxu1 %vm632_vm15, %v1696_v58  ;;  %v1791_v14 = vadd.f32 %v5437_v31, %v1790_v48 }
 0xa9c   :  { %v1699_v62 = vpop.f32.mrf.mxu3  ;;  %v1793_v8 = vpop.f32.mrf.mxu0 }
 0xa9d   :  { %5072 = vmatmul.msk.f32.gmra.mxu1 %vm632_vm15, %v1699_v62  ;;  %v1794_v6 = vadd.f32 %v5437_v31, %v1793_v8 }
 0xaa4   :  { %v1702_v47 = vpop.f32.mrf.mxu3  ;;  %v1796_v13 = vpop.f32.mrf.mxu0 }
 0xaa5   :  { %5073 = vmatmul.msk.f32.gmra.mxu1 %vm632_vm15, %v1702_v47  ;;  %v1797_v41 = vadd.f32 %v5437_v31, %v1796_v13 }
 0xaac   :  { %v1799_v25 = vpop.f32.mrf.mxu0  ;;  %v1874_v27 = vpop.f32.mrf.mxu3 }
 0xaad   :  { %v1800_v30 = vadd.f32 %v5437_v31, %v1799_v25  ;;  %5109 = vmatmul.msk.f32.vlgmr.msrb.gmra.mxu1 %vm632_vm15, %v1791_v14  ;;  %v1875_v49 = vadd.f32 %v5438_v36, %v1874_v27 }
 0xaaf   :  { %5115 = vmatmul.msk.f32.vlgmr.msrb.gmra.mxu0 %vm632_vm15, %v1800_v30 }
 0xab4   :  { %v1802_v33 = vpop.f32.mrf.mxu0  ;;  %v1877_v32 = vpop.f32.mrf.mxu3 }
 0xab5   :  { %v1803_v34 = vadd.f32 %v5437_v31, %v1802_v33  ;;  %5110 = vmatmul.msk.f32.gmra.mxu1 %vm632_vm15, %v1794_v6  ;;  %v1878_v42 = vadd.f32 %v5438_v36, %v1877_v32 }
 0xab7   :  { %5116 = vmatmul.msk.f32.gmra.mxu0 %vm632_vm15, %v1803_v34 }
 0xabc   :  { %v1805_v45 = vpop.f32.mrf.mxu0  ;;  %v1880_v37 = vpop.f32.mrf.mxu3 }
 0xabd   :  { %v1806_v38 = vadd.f32 %v5437_v31, %v1805_v45  ;;  %v1881_v39 = vadd.f32 %v5438_v36, %v1880_v37  ;;  %5111 = vmatmul.msk.f32.gmra.mxu1 %vm632_vm15, %v1797_v41 }
 0xabf   :  { %5117 = vmatmul.msk.f32.gmra.mxu0 %vm632_vm15, %v1806_v38  ;;  %2080 = vmatpush.msra.mxu2 %v1881_v39 }
 0xac1   :  { %2081 = vmatpush.msra.mxu2 %v1878_v42 }
 0xac3   :  { %2082 = vmatpush.msra.mxu2 %v1875_v49 }
 0xac4   :  { %v1883_v44 = vpop.f32.mrf.mxu3 }
 0xac5   :  { %v1884_v63 = vadd.f32 %v5438_v36, %v1883_v44 }
 0xacc   :  { %v1886_v40 = vpop.f32.mrf.mxu3 }
 0xacd   :  { %v1887_v61 = vadd.f32 %v5438_v36, %v1886_v40 }
 0xad4   :  { %v1889_v51 = vpop.f32.mrf.mxu3 }
 0xad5   :  { %v1890_v53 = vadd.f32 %v5438_v36, %v1889_v51 }
 0xad7   :  { %2115 = vmatpush.msrb.mxu3 %v1890_v53 }
 0xad9   :  { %2116 = vmatpush.msrb.mxu3 %v1887_v61 }
 0xadb   :  { %2117 = vmatpush.msrb.mxu3 %v1884_v63 }
 0xafa   :  { %v6729_v59 = vpop.f32.mrf.mxu1 }
 0xb02   :  { %v6731_v46 = vpop.f32.mrf.mxu1 }
 0xb0a   :  { %v6733_v0 = vpop.f32.mrf.mxu1 }
 0xb12   :  { %v6735_v1 = vpop.f32.mrf.mxu1 }
 0xb1a   :  { %v6737_v3 = vpop.f32.mrf.mxu1 }
 0xb22   :  { %v6739_v5 = vpop.f32.mrf.mxu1 }
 0xb2a   :  { %v1927_v56 = vpop.f32.mrf.mxu1 }
 0xb2b   :  { %v1980_v43 = vmul.f32 0.35355338, %v1927_v56 }
 0xb2c   :  { %v1971_v50 = vpop.f32.mrf.mxu0 }
 0xb2d   :  { %v1986_v54 = vsel %vm47_vm10, %v1980_v43, -1e+30  ;;  %v1983_v35 = vmul.f32 0.35355338, %v1971_v50 }
 0xb2e   :  { %v1992_v52 = vsel %vm735_vm11, %v1986_v54, -inf }
 0xb2f   :  { %1993 = vmax.xlane.f32.xlu0 %v1992_v52  ;;  %v1989_v4 = vsel %vm47_vm10, %v1983_v35, -1e+30 }
 0xb30   :  { %v2001_v62 = vsel %vm735_vm11, %v1989_v4, -inf }
 0xb32   :  { %v1930_v17 = vpop.f32.mrf.mxu1 }
 0xb33   :  { %v1981_v29 = vmul.f32 0.35355338, %v1930_v17 }
 0xb34   :  { %v1974_v58 = vpop.f32.mrf.mxu0 }
 0xb35   :  { %v1987_v48 = vsel %vm47_vm10, %v1981_v29, -1e+30  ;;  %v1984_v47 = vmul.f32 0.35355338, %v1974_v58 }
 0xb36   :  { %v1995_v8 = vsel %vm735_vm11, %v1987_v48, -inf }
 0xb37   :  { %2002 = vmax.xlane.f32.xlu0 %v2001_v62  ;;  %1996 = vmax.xlane.f32.xlu1 %v1995_v8  ;;  %v1990_v14 = vsel %vm47_vm10, %v1984_v47, -1e+30 }
 0xb38   :  { %v2004_v30 = vsel %vm735_vm11, %v1990_v14, -inf }
 0xb3a   :  { %v1933_v13 = vpop.f32.mrf.mxu1 }
 0xb3b   :  { %v1982_v31 = vmul.f32 0.35355338, %v1933_v13 }
 0xb3c   :  { %v1977_v25 = vpop.f32.mrf.mxu0 }
 0xb3d   :  { %v1988_v27 = vsel %vm47_vm10, %v1982_v31, -1e+30  ;;  %v1985_v33 = vmul.f32 0.35355338, %v1977_v25 }
 0xb3e   :  { %v1998_v6 = vsel %vm735_vm11, %v1988_v27, -inf }
 0xb3f   :  { %2005 = vmax.xlane.f32.xlu1 %v2004_v30  ;;  %1999 = vmax.xlane.f32.xlu2 %v1998_v6  ;;  %v1991_v32 = vsel %vm47_vm10, %v1985_v33, -1e+30 }
 0xb40   :  { %v2007_v34 = vsel %vm735_vm11, %v1991_v32, -inf }
 0xb47   :  { %2008 = vmax.xlane.f32.xlu2 %v2007_v34 }
 0xba2   :  { %v1994_v41 = vpop.xlane.xlu0 %1993 }
 0xba3   :  { %v2010_v36 = vsub.f32 %v1986_v54, %v1994_v41 }
 0xba5   :  { %v2016_v45 = vmul.f32 1.442695, %v2010_v36 }
 0xba7   :  { %5562 = vpow2.f32 %v2016_v45 }
 0xbaa   :  { %v2003_v37 = vpop.xlane.xlu0 %2002  ;;  %v1997_v38 = vpop.xlane.xlu1 %1996 }
 0xbab   :  { %v2013_v39 = vsub.f32 %v1989_v4, %v2003_v37  ;;  %v2011_v42 = vsub.f32 %v1987_v48, %v1997_v38 }
 0xbad   :  { %v5563_v49 = vpop.eup %5562  ;;  %v2022_v44 = vmul.f32 1.442695, %v2013_v39  ;;  %v2018_v40 = vmul.f32 1.442695, %v2011_v42 }
 0xbae   :  { %v2028_v51 = vsel %vm735_vm11, %v5563_v49, 0.0 }
 0xbaf   :  { %5564 = vpow2.f32 %v2022_v44  ;;  %2029 = vadd.xlane.f32.xlu0 %v2028_v51  ;;  %v5124_v51 = vld [vmem:[%s7953_s6 + $0x18] sm:$0xff] }
 0xbb0   :  { %5566 = vpow2.f32 %v2018_v40  ;;  %2163 = vmatpush.msra.mxu1 %v5124_v51 }
 0xbb2   :  { %v2006_v53 = vpop.xlane.xlu1 %2005  ;;  %v2000_v61 = vpop.xlane.xlu2 %1999 }
 0xbb3   :  { %v2014_v63 = vsub.f32 %v1990_v14, %v2006_v53  ;;  %v2012_v56 = vsub.f32 %v1988_v27, %v2000_v61 }
 0xbb5   :  { %v5565_v43 = vpop.eup %5564  ;;  %v2024_v50 = vmul.f32 1.442695, %v2014_v63  ;;  %v2020_v54 = vmul.f32 1.442695, %v2012_v56 }
 0xbb6   :  { %v5567_v52 = vpop.eup %5566  ;;  %v2037_v35 = vsel %vm735_vm11, %v5565_v43, 0.0 }
 0xbb7   :  { %5568 = vpow2.f32 %v2024_v50  ;;  %2038 = vadd.xlane.f32.xlu0 %v2037_v35  ;;  %v2031_v17 = vsel %vm735_vm11, %v5567_v52, 0.0 }
 0xbb8   :  { %5570 = vpow2.f32 %v2020_v54  ;;  %2032 = vadd.xlane.f32.xlu1 %v2031_v17  ;;  %v1326_v54 = vadd.f32 %v6582_v9, %v6586_v16 }
 0xbba   :  { %v2009_v29 = vpop.xlane.xlu2 %2008 }
 0xbbb   :  { %v2015_v4 = vsub.f32 %v1991_v32, %v2009_v29  ;;  %v5439_v29 = vld [vmem:[%s7954_s7 + $0x4] ss:$0 sm:$0xff] }
 0xbbd   :  { %v5569_v58 = vpop.eup %5568  ;;  %v2026_v48 = vmul.f32 1.442695, %v2015_v4 }
 0xbbe   :  { %v5571_v62 = vpop.eup %5570  ;;  %v2040_v8 = vsel %vm735_vm11, %v5569_v58, 0.0 }
 0xbbf   :  { %5572 = vpow2.f32 %v2026_v48  ;;  %v2034_v47 = vsel %vm735_vm11, %v5571_v62, 0.0  ;;  %v1329_v48 = vadd.f32 %v6588_v12, %v6592_v18 }
 0xbc0   :  { %2041 = vadd.xlane.f32.xlu1 %v2040_v8  ;;  %2035 = vadd.xlane.f32.xlu2 %v2034_v47 }
 0xbc1   :  { %v1761_v9 = vadd.f32 %v6731_v46, %v1329_v48 }
 0xbc5   :  { %v5573_v13 = vpop.eup %5572 }
 0xbc6   :  { %v2043_v31 = vsel %vm735_vm11, %v5573_v13, 0.0 }
 0xbc8   :  { %2044 = vadd.xlane.f32.xlu2 %v2043_v31 }
 0xc22   :  { %v2030_v14 = vpop.xlane.xlu0 %2029 }
 0xc23   :  { %5574 = vrcp.f32 %v2030_v14  ;;  %v1335_v14 = vadd.f32 %v6598_v22, %v6600_v23 }
 0xc29   :  { %v5575_v25 = vpop.eup %5574 }
 0xc2a   :  { %v2052_v27 = vmul.f32 %v5575_v25, %v5563_v49  ;;  %v2039_v30 = vpop.xlane.xlu0 %2038 }
 0xc2b   :  { %5576 = vrcp.f32 %v2039_v30  ;;  %v2033_v6 = vpop.xlane.xlu1 %2032  ;;  %v1338_v30 = vadd.f32 %v6602_v15, %v6604_v24 }
 0xc2c   :  { %5578 = vrcp.f32 %v2033_v6  ;;  %5118 = vmatmul.msk.f32.vlgmr.msra.gmra.mxu2 %vm735_vm11, %v2052_v27 }
 0xc31   :  { %v5577_v33 = vpop.eup %5576 }
 0xc32   :  { %v5579_v32 = vpop.eup %5578  ;;  %v2055_v34 = vmul.f32 %v5577_v33, %v5565_v43 }
 0xc33   :  { %v2042_v41 = vpop.xlane.xlu1 %2041  ;;  %v2036_v36 = vpop.xlane.xlu2 %2035  ;;  %v2053_v45 = vmul.f32 %v5579_v32, %v5567_v52  ;;  %v1760_v52 = vadd.f32 %v6729_v59, %v1326_v54  ;;  %v1341_v32 = vadd.f32 %v6606_v10, %v6608_v26 }
 0xc34   :  { %5580 = vrcp.f32 %v2042_v41  ;;  %5121 = vmatmul.msk.f32.vlgmr.msrb.gmra.mxu3 %vm735_vm11, %v2055_v34 }
 0xc35   :  { %5582 = vrcp.f32 %v2036_v36  ;;  %5119 = vmatmul.msk.f32.gmra.mxu2 %vm735_vm11, %v2053_v45 }
 0xc3a   :  { %v5581_v37 = vpop.eup %5580 }
 0xc3b   :  { %v5583_v38 = vpop.eup %5582  ;;  %v2045_v39 = vpop.xlane.xlu2 %2044  ;;  %v2056_v42 = vmul.f32 %v5581_v37, %v5569_v58 }
 0xc3c   :  { %5584 = vrcp.f32 %v2045_v39  ;;  %v2054_v49 = vmul.f32 %v5583_v38, %v5571_v62 }
 0xc3d   :  { %5122 = vmatmul.msk.f32.gmra.mxu3 %vm735_vm11, %v2056_v42 }
 0xc3e   :  { %5120 = vmatmul.msk.f32.gmra.mxu2 %vm735_vm11, %v2054_v49 }
 0xc42   :  { %v5585_v44 = vpop.eup %5584 }
 0xc43   :  { %v2057_v40 = vmul.f32 %v5585_v44, %v5573_v13 }
 0xc45   :  { %5123 = vmatmul.msk.f32.gmra.mxu3 %vm735_vm11, %v2057_v40 }
 0xcaf   :  { %v2084_v53 = vpop.f32.mrf.mxu2 }
 0xcb0   :  { %5125 = vmatmul.msk.f32.vlgmr.msra.gmra.mxu1 %vm632_vm15, %v2084_v53 }
 0xcb7   :  { %v2119_v56 = vpop.f32.mrf.mxu3 }
 0xcb8   :  { %v2087_v61 = vpop.f32.mrf.mxu2 }
 0xcb9   :  { %5126 = vmatmul.msk.f32.gmra.mxu1 %vm632_vm15, %v2087_v61 }
 0xcc0   :  { %v2122_v43 = vpop.f32.mrf.mxu3 }
 0xcc1   :  { %v2090_v63 = vpop.f32.mrf.mxu2 }
 0xcc2   :  { %5127 = vmatmul.msk.f32.gmra.mxu1 %vm632_vm15, %v2090_v63 }
 0xcc8   :  { %v2125_v50 = vpop.f32.mrf.mxu3 }
 0xcca   :  { %5128 = vmatmul.msk.f32.gmra.mxu1 %vm632_vm15, %v2119_v56 }
 0xcd2   :  { %5129 = vmatmul.msk.f32.gmra.mxu1 %vm632_vm15, %v2122_v43 }
 0xcda   :  { %5130 = vmatmul.msk.f32.gmra.mxu1 %vm632_vm15, %v2125_v50 }
 0xd2d   :  { %v2165_v35 = vpop.f32.mrf.mxu1 }
 0xd2e   :  { %v2183_v17 = vadd.f32 %v2165_v35, %v1760_v52 }
 0xd30   :  { %v2189_v4 = vadd.f32 %v2183_v17, %v6053_v11  ;;  %v1332_v11 = vadd.f32 %v6594_v19, %v6596_v20 }
 0xd32   :  { %v6787_v58 = vadd.f32 %v5439_v29, %v2189_v4  ;;  %v1762_v12 = vadd.f32 %v6733_v0, %v1332_v11  ;;  %v2350_v11 = vld [vmem:[%s7955_s8 + $0x10] sm:$0xff] }
 0xd34   :  { %v2202_v62 = vsel %vm181_vm1, %v6787_v58, 0.0 }
 0xd35   :  { %2203 = vadd.xlane.f32.xlu0 %v2202_v62 }
 0xd36   :  { %v2168_v16 = vpop.f32.mrf.mxu1 }
 0xd37   :  { %v2184_v59 = vadd.f32 %v2168_v16, %v1761_v9 }
 0xd39   :  { %v2190_v8 = vadd.f32 %v2184_v59, %v6065_v21  ;;  %v1763_v21 = vadd.f32 %v6735_v1, %v1335_v14 }
 0xd3b   :  { %v6795_v47 = vadd.f32 %v5439_v29, %v2190_v8  ;;  %v2351_v8 = vld [vmem:[%s7955_s8 + $0x18] sm:$0xff] }
 0xd3c   :  { %2384 = vmatpush.msra.mxu0 %v2351_v8 }
 0xd3d   :  { %v2205_v13 = vsel %vm181_vm1, %v6795_v47, 0.0 }
 0xd3e   :  { %2206 = vadd.xlane.f32.xlu1 %v2205_v13  ;;  %2385 = vmatpush.msra.mxu0 %v2350_v11  ;;  %v2349_v13 = vld [vmem:[%s7955_s8 + $0x8] sm:$0xff] }
 0xd3f   :  { %v2171_v18 = vpop.f32.mrf.mxu1 }
 0xd40   :  { %v2185_v31 = vadd.f32 %v2171_v18, %v1762_v12  ;;  %2386 = vmatpush.msra.mxu0 %v2349_v13  ;;  %v2348_v12 = vld [vmem:[%s7955_s8] sm:$0xff] }
 0xd42   :  { %v2191_v46 = vadd.f32 %v2185_v31, %v6036_v55  ;;  %v1764_v55 = vadd.f32 %v6737_v3, %v1338_v30  ;;  %2387 = vmatpush.msra.mxu0 %v2348_v12 }
 0xd44   :  { %v6805_v25 = vadd.f32 %v5439_v29, %v2191_v46 }
 0xd46   :  { %v2208_v19 = vsel %vm181_vm1, %v6805_v25, 0.0 }
 0xd47   :  { %2209 = vadd.xlane.f32.xlu2 %v2208_v19  ;;  %v2174_v20 = vpop.f32.mrf.mxu1 }
 0xd48   :  { %v2186_v27 = vadd.f32 %v2174_v20, %v1763_v21 }
 0xd4a   :  { %v2192_v0 = vadd.f32 %v2186_v27, %v6101_v2  ;;  %v1765_v2 = vadd.f32 %v6739_v5, %v1341_v32  ;;  %v6891_v32 = vld [vmem:[%s7954_s7 + $0x2] ss:$0 sm:$0xff] }
 0xd4c   :  { %v6813_v6 = vadd.f32 %v5439_v29, %v2192_v0 }
 0xd4e   :  { %v2211_v22 = vsel %vm181_vm1, %v6813_v6, 0.0 }
 0xd4f   :  { %2212 = vadd.xlane.f32.xlu0 %v2211_v22  ;;  %v2177_v23 = vpop.f32.mrf.mxu1 }
 0xd50   :  { %v2187_v1 = vadd.f32 %v2177_v23, %v1764_v55 }
 0xd52   :  { %v2193_v33 = vadd.f32 %v2187_v1, %v6185_v28 }
 0xd54   :  { %v6821_v34 = vadd.f32 %v5439_v29, %v2193_v33 }
 0xd56   :  { %v2214_v15 = vsel %vm181_vm1, %v6821_v34, 0.0 }
 0xd57   :  { %2215 = vadd.xlane.f32.xlu1 %v2214_v15  ;;  %v2180_v24 = vpop.f32.mrf.mxu1 }
 0xd58   :  { %v2188_v3 = vadd.f32 %v2180_v24, %v1765_v2 }
 0xd5a   :  { %v2194_v41 = vadd.f32 %v2188_v3, %v6108_v7  ;;  %v6896_v3 = vld [vmem:[%s7954_s7 + $0x3] ss:$0 sm:$0xff] }
 0xd5c   :  { %v6827_v36 = vadd.f32 %v5439_v29, %v2194_v41 }
 0xd5e   :  { %v2217_v28 = vsel %vm181_vm1, %v6827_v36, 0.0 }
 0xd5f   :  { %2218 = vadd.xlane.f32.xlu2 %v2217_v28 }
 0xda8   :  { %v2204_v45 = vpop.xlane.xlu0 %2203 }
 0xda9   :  { %v2220_v10 = vmul.f32 %v2204_v45, %v5990_v60 }
 0xdab   :  { %v6833_v26 = vsub.f32 %v6787_v58, %v2220_v10 }
 0xdad   :  { %v2232_v5 = vmul.f32 %v6833_v26, %v6833_v26 }
 0xdaf   :  { %v2238_v37 = vsel %vm181_vm1, %v2232_v5, 0.0 }
 0xdb0   :  { %2239 = vadd.xlane.f32.xlu0 %v2238_v37 }
 0xdb1   :  { %v2207_v38 = vpop.xlane.xlu1 %2206 }
 0xdb2   :  { %v2221_v7 = vmul.f32 %v2207_v38, %v5990_v60 }
 0xdb4   :  { %v6840_v39 = vsub.f32 %v6795_v47, %v2221_v7 }
 0xdb6   :  { %v2233_v42 = vmul.f32 %v6840_v39, %v6840_v39 }
 0xdb8   :  { %v2241_v49 = vsel %vm181_vm1, %v2233_v42, 0.0 }
 0xdb9   :  { %2242 = vadd.xlane.f32.xlu1 %v2241_v49 }
 0xdba   :  { %v2210_v44 = vpop.xlane.xlu2 %2209 }
 0xdbb   :  { %v2222_v40 = vmul.f32 %v2210_v44, %v5990_v60 }
 0xdbd   :  { %v6847_v51 = vsub.f32 %v6805_v25, %v2222_v40 }
 0xdbf   :  { %v2234_v53 = vmul.f32 %v6847_v51, %v6847_v51 }
 0xdc1   :  { %v2244_v61 = vsel %vm181_vm1, %v2234_v53, 0.0 }
 0xdc2   :  { %v2213_v63 = vpop.xlane.xlu0 %2212  ;;  %2245 = vadd.xlane.f32.xlu2 %v2244_v61 }
 0xdc3   :  { %v2223_v56 = vmul.f32 %v2213_v63, %v5990_v60 }
 0xdc5   :  { %v6854_v43 = vsub.f32 %v6813_v6, %v2223_v56 }
 0xdc7   :  { %v2235_v50 = vmul.f32 %v6854_v43, %v6854_v43 }
 0xdc9   :  { %v2247_v54 = vsel %vm181_vm1, %v2235_v50, 0.0 }
 0xdca   :  { %2248 = vadd.xlane.f32.xlu0 %v2247_v54  ;;  %v2216_v52 = vpop.xlane.xlu1 %2215 }
 0xdcb   :  { %v2224_v35 = vmul.f32 %v2216_v52, %v5990_v60 }
 0xdcd   :  { %v6861_v17 = vsub.f32 %v6821_v34, %v2224_v35 }
 0xdcf   :  { %v2236_v29 = vmul.f32 %v6861_v17, %v6861_v17 }
 0xdd1   :  { %v2250_v4 = vsel %vm181_vm1, %v2236_v29, 0.0 }
 0xdd2   :  { %2251 = vadd.xlane.f32.xlu1 %v2250_v4  ;;  %v2219_v48 = vpop.xlane.xlu2 %2218 }
 0xdd3   :  { %v2225_v62 = vmul.f32 %v2219_v48, %v5990_v60 }
 0xdd5   :  { %v6868_v9 = vsub.f32 %v6827_v36, %v2225_v62 }
 0xdd7   :  { %v2237_v16 = vmul.f32 %v6868_v9, %v6868_v9 }
 0xdd9   :  { %v2253_v59 = vsel %vm181_vm1, %v2237_v16, 0.0 }
 0xdda   :  { %2254 = vadd.xlane.f32.xlu2 %v2253_v59 }
 0xe23   :  { %v2240_v18 = vpop.xlane.xlu0 %2239 }
 0xe24   :  { %v2256_v31 = vmul.f32 %v2240_v18, %v5990_v60 }
 0xe26   :  { %v2262_v46 = vadd.f32 1e-05, %v2256_v31 }
 0xe28   :  { %5586 = vrsqrt.f32 %v2262_v46  ;;  %vm2274_vm13 = vweird.f32 %v2262_v46 }
 0xe2c   :  { %v2243_v14 = vpop.xlane.xlu1 %2242 }
 0xe2d   :  { %v2257_v21 = vmul.f32 %v2243_v14, %v5990_v60 }
 0xe2e   :  { %v5587_v19 = vpop.eup %5586 }
 0xe2f   :  { %v2269_v20 = vmul.f32 %v5587_v19, %v2262_v46  ;;  %v2263_v27 = vadd.f32 1e-05, %v2257_v21  ;;  %vm2275_vm12 = vweird.f32 %v5587_v19 }
 0xe30   :  { %vm2276_vm14 = vmor %vm2274_vm13, %vm2275_vm12 }
 0xe31   :  { %v2270_v0 = vmul.f32 %v5587_v19, %v2269_v20  ;;  %5588 = vrsqrt.f32 %v2263_v27  ;;  %vm2284_vm2 = vweird.f32 %v2263_v27 }
 0xe33   :  { %v2271_v30 = vmul.f32 0.5, %v2270_v0 }
 0xe35   :  { %v2272_v55 = vsub.f32 1.5, %v2271_v30  ;;  %v2246_v22 = vpop.xlane.xlu2 %2245 }
 0xe36   :  { %v2258_v23 = vmul.f32 %v2246_v22, %v5990_v60 }
 0xe37   :  { %v5589_v1 = vpop.eup %5588  ;;  %v2273_v33 = vmul.f32 %v5587_v19, %v2272_v55 }
 0xe38   :  { %v2279_v2 = vmul.f32 %v5589_v1, %v2263_v27  ;;  %v2264_v15 = vadd.f32 1e-05, %v2258_v23  ;;  %vm2285_vm0 = vweird.f32 %v5589_v1 }
 0xe39   :  { %v2277_v24 = vsel %vm2276_vm14, %v5587_v19, %v2273_v33  ;;  %vm2286_vm3 = vmor %vm2284_vm2, %vm2285_vm0 }
 0xe3a   :  { %v2328_v41 = vmul.f32 %v2277_v24, %v6833_v26  ;;  %v2280_v28 = vmul.f32 %v5589_v1, %v2279_v2  ;;  %5590 = vrsqrt.f32 %v2264_v15  ;;  %vm2294_vm5 = vweird.f32 %v2264_v15 }
 0xe3c   :  { %v2335_v45 = vmul.f32 %v6891_v32, %v2328_v41  ;;  %v2281_v10 = vmul.f32 0.5, %v2280_v28 }
 0xe3d   :  { %v2249_v5 = vpop.xlane.xlu0 %2248 }
 0xe3e   :  { %v2342_v37 = vadd.f32 %v6896_v3, %v2335_v45  ;;  %v2282_v38 = vsub.f32 1.5, %v2281_v10  ;;  %v2259_v7 = vmul.f32 %v2249_v5, %v5990_v60 }
 0xe40   :  { %v5591_v42 = vpop.eup %5590  ;;  %v2283_v49 = vmul.f32 %v5589_v1, %v2282_v38  ;;  %v2265_v44 = vadd.f32 1e-05, %v2259_v7  ;;  %5131 = vmatmul.msk.f32.vlgmr.msra.gmra.mxu0 %vm181_vm1, %v2342_v37 }
 0xe41   :  { %v2289_v26 = vmul.f32 %v5591_v42, %v2264_v15  ;;  %vm2295_vm4 = vweird.f32 %v5591_v42 }
 0xe42   :  { %v2287_v40 = vsel %vm2286_vm3, %v5589_v1, %v2283_v49  ;;  %5592 = vrsqrt.f32 %v2265_v44  ;;  %vm2296_vm6 = vmor %vm2294_vm5, %vm2295_vm4  ;;  %vm2304_vm8 = vweird.f32 %v2265_v44  ;;  %v2543_v49 = vld [vmem:[%s7957_s10 + $0x50] sm:$0xff] }
 0xe43   :  { %v2329_v53 = vmul.f32 %v2287_v40, %v6840_v39  ;;  %v2290_v61 = vmul.f32 %v5591_v42, %v2289_v26  ;;  %v2541_v26 = vld [vmem:[%s7957_s10 + $0x40] sm:$0xff]  ;;  %v2540_v40 = vld [vmem:[%s7957_s10 + $0x38] sm:$0xff] }
 0xe45   :  { %v2291_v63 = vmul.f32 0.5, %v2290_v61  ;;  %v2252_v56 = vpop.xlane.xlu1 %2251  ;;  %v2336_v50 = vmul.f32 %v6891_v32, %v2329_v53  ;;  %v2539_v53 = vld [vmem:[%s7957_s10 + $0x30] sm:$0xff]  ;;  %v2538_v61 = vld [vmem:[%s7957_s10 + $0x28] sm:$0xff] }
 0xe46   :  { %v2260_v54 = vmul.f32 %v2252_v56, %v5990_v60  ;;  %v6964_v56 = vld [vmem:[%s7956_s9] ss:$0 sm:$0xff] }
 0xe47   :  { %v2292_v52 = vsub.f32 1.5, %v2291_v63  ;;  %v2343_v35 = vadd.f32 %v6896_v3, %v2336_v50  ;;  %v2537_v63 = vld [vmem:[%s7957_s10 + $0x20] sm:$0xff]  ;;  %v2536_v50 = vld [vmem:[%s7957_s10 + $0x18] sm:$0xff] }
 0xe48   :  { %v5593_v29 = vpop.eup %5592  ;;  %v2266_v4 = vadd.f32 1e-05, %v2260_v54 }
 0xe49   :  { %v2293_v48 = vmul.f32 %v5591_v42, %v2292_v52  ;;  %v2299_v62 = vmul.f32 %v5593_v29, %v2265_v44  ;;  %5132 = vmatmul.msk.f32.gmra.mxu0 %vm181_vm1, %v2343_v35  ;;  %vm2305_vm7 = vweird.f32 %v5593_v29  ;;  %v2542_v44 = vld [vmem:[%s7957_s10 + $0x48] sm:$0xff]  ;;  %v2535_v52 = vld [vmem:[%s7957_s10 + $0x10] sm:$0xff] }
 0xe4a   :  { %5594 = vrsqrt.f32 %v2266_v4  ;;  %vm2306_vm9 = vmor %vm2304_vm8, %vm2305_vm7  ;;  %vm2314_vm13 = vweird.f32 %v2266_v4 }
 0xe4b   :  { %v2297_v39 = vsel %vm2296_vm6, %v5591_v42, %v2293_v48  ;;  %v2300_v16 = vmul.f32 %v5593_v29, %v2299_v62  ;;  %v2547_v42 = vld [vmem:[%s7957_s10 + $0x70] sm:$0xff]  ;;  %v2533_v48 = vld [vmem:[%s7957_s10] sm:$0xff] }
 0xe4c   :  { %v2330_v59 = vmul.f32 %v2297_v39, %v6847_v51 }
 0xe4d   :  { %v2301_v8 = vmul.f32 0.5, %v2300_v16  ;;  %v2255_v11 = vpop.xlane.xlu2 %2254 }
 0xe4e   :  { %v2261_v13 = vmul.f32 %v2255_v11, %v5990_v60  ;;  %v2337_v12 = vmul.f32 %v6891_v32, %v2330_v59 }
 0xe4f   :  { %v2302_v18 = vsub.f32 1.5, %v2301_v8 }
 0xe50   :  { %v5595_v31 = vpop.eup %5594  ;;  %v2267_v46 = vadd.f32 1e-05, %v2261_v13  ;;  %v2344_v14 = vadd.f32 %v6896_v3, %v2337_v12 }
 0xe51   :  { %v2303_v21 = vmul.f32 %v5593_v29, %v2302_v18  ;;  %v2309_v19 = vmul.f32 %v5595_v31, %v2266_v4  ;;  %vm2315_vm12 = vweird.f32 %v5595_v31 }
 0xe52   :  { %5596 = vrsqrt.f32 %v2267_v46  ;;  %5133 = vmatmul.msk.f32.gmra.mxu0 %vm181_vm1, %v2344_v14  ;;  %vm2316_vm14 = vmor %vm2314_vm13, %vm2315_vm12  ;;  %vm2324_vm2 = vweird.f32 %v2267_v46 }
 0xe53   :  { %v2307_v51 = vsel %vm2306_vm9, %v5593_v29, %v2303_v21  ;;  %v2310_v20 = vmul.f32 %v5595_v31, %v2309_v19  ;;  %v2534_v29 = vld [vmem:[%s7957_s10 + $0x8] sm:$0xff] }
 0xe54   :  { %v2331_v27 = vmul.f32 %v2307_v51, %v6854_v43 }
 0xe55   :  { %v2311_v0 = vmul.f32 0.5, %v2310_v20 }
 0xe56   :  { %v2338_v30 = vmul.f32 %v6891_v32, %v2331_v27 }
 0xe57   :  { %v2312_v55 = vsub.f32 1.5, %v2311_v0 }
 0xe58   :  { %v5597_v22 = vpop.eup %5596  ;;  %v2345_v23 = vadd.f32 %v6896_v3, %v2338_v30 }
 0xe59   :  { %v2313_v1 = vmul.f32 %v5595_v31, %v2312_v55  ;;  %v2319_v33 = vmul.f32 %v5597_v22, %v2267_v46  ;;  %vm2325_vm0 = vweird.f32 %v5597_v22 }
 0xe5a   :  { %5134 = vmatmul.msk.f32.gmra.mxu0 %vm181_vm1, %v2345_v23  ;;  %vm2326_vm3 = vmor %vm2324_vm2, %vm2325_vm0 }
 0xe5b   :  { %v2317_v2 = vsel %vm2316_vm14, %v5595_v31, %v2313_v1  ;;  %v2320_v15 = vmul.f32 %v5597_v22, %v2319_v33 }
 0xe5c   :  { %v2332_v24 = vmul.f32 %v2317_v2, %v6861_v17  ;;  %v2548_v17 = vld [vmem:[%s7957_s10 + $0x78] sm:$0xff] }
 0xe5d   :  { %v2321_v41 = vmul.f32 0.5, %v2320_v15  ;;  %2549 = vmatpush.msrb.mxu2 %v2548_v17 }
 0xe5e   :  { %v2339_v43 = vmul.f32 %v6891_v32, %v2332_v24 }
 0xe5f   :  { %v2322_v28 = vsub.f32 1.5, %v2321_v41  ;;  %2550 = vmatpush.msrb.mxu2 %v2547_v42 }
 0xe60   :  { %v2346_v45 = vadd.f32 %v6896_v3, %v2339_v43 }
 0xe61   :  { %v2323_v10 = vmul.f32 %v5597_v22, %v2322_v28 }
 0xe62   :  { %5135 = vmatmul.msk.f32.gmra.mxu0 %vm181_vm1, %v2346_v45 }
 0xe63   :  { %v2327_v5 = vsel %vm2326_vm3, %v5597_v22, %v2323_v10 }
 0xe64   :  { %v2333_v37 = vmul.f32 %v2327_v5, %v6868_v9  ;;  %v2546_v9 = vld [vmem:[%s7957_s10 + $0x68] sm:$0xff] }
 0xe65   :  { %2551 = vmatpush.msrb.mxu2 %v2546_v9 }
 0xe66   :  { %v2340_v38 = vmul.f32 %v6891_v32, %v2333_v37  ;;  %v2545_v32 = vld [vmem:[%s7957_s10 + $0x60] sm:$0xff] }
 0xe67   :  { %2552 = vmatpush.msrb.mxu2 %v2545_v32 }
 0xe68   :  { %v2347_v7 = vadd.f32 %v6896_v3, %v2340_v38  ;;  %v2544_v3 = vld [vmem:[%s7957_s10 + $0x58] sm:$0xff] }
 0xe69   :  { %2553 = vmatpush.msrb.mxu2 %v2544_v3 }
 0xe6a   :  { %5136 = vmatmul.msk.f32.gmra.mxu0 %vm181_vm1, %v2347_v7 }
 0xe6b   :  { %2554 = vmatpush.msrb.mxu2 %v2543_v49 }
 0xe6d   :  { %2555 = vmatpush.msrb.mxu2 %v2542_v44 }
 0xe6f   :  { %2556 = vmatpush.msrb.mxu2 %v2541_v26 }
 0xe71   :  { %2557 = vmatpush.msrb.mxu2 %v2540_v40 }
 0xe73   :  { %2558 = vmatpush.msrb.mxu2 %v2539_v53 }
 0xe75   :  { %2559 = vmatpush.msrb.mxu2 %v2538_v61 }
 0xe77   :  { %2560 = vmatpush.msrb.mxu2 %v2537_v63 }
 0xe79   :  { %2561 = vmatpush.msrb.mxu2 %v2536_v50 }
 0xe7b   :  { %2562 = vmatpush.msrb.mxu2 %v2535_v52 }
 0xe7d   :  { %2563 = vmatpush.msrb.mxu2 %v2534_v29 }
 0xe7f   :  { %2564 = vmatpush.msrb.mxu2 %v2533_v48 }
 0xebd   :  { %v2389_v54 = vpop.f32.mrf.mxu0 }
 0xebe   :  { %v2390_v35 = vadd.f32 %v6964_v56, %v2389_v54 }
 0xec0   :  { %v5137_v4 = vmul.f32 -1.702, %v2390_v35 }
 0xec2   :  { %v2419_v62 = vmul.f32 1.442695, %v5137_v4 }
 0xec4   :  { %5598 = vpow2.f32 %v2419_v62 }
 0xec6   :  { %v2392_v39 = vpop.f32.mrf.mxu0 }
 0xec7   :  { %v6980_v16 = vadd.f32 %v6964_v56, %v2392_v39 }
 0xec9   :  { %v5138_v59 = vmul.f32 -1.702, %v6980_v16 }
 0xeca   :  { %v5599_v8 = vpop.eup %5598 }
 0xecb   :  { %v2431_v11 = vadd.f32 1.0, %v5599_v8  ;;  %v2421_v13 = vmul.f32 1.442695, %v5138_v59 }
 0xecd   :  { %5600 = vrcp.f32 %v2431_v11  ;;  %v2448_v27 = vand.u32 2147483648, %v2431_v11  ;;  %v2446_v55 = vand.u32 2147483647, %v2431_v11  ;;  %vm2442_vm5 = vweird.f32 %v2431_v11 }
 0xece   :  { %5602 = vpow2.f32 %v2421_v13 }
 0xecf   :  { %v2395_v12 = vpop.f32.mrf.mxu0  ;;  %v2449_v33 = vor.u32 1.1754944e-38, %v2448_v27  ;;  %vm2447_vm7 = vcmp.eq.f32.partialorder %v2446_v55, 8.507059e+37 }
 0xed0   :  { %v6984_v18 = vadd.f32 %v6964_v56, %v2395_v12 }
 0xed2   :  { %v5139_v31 = vmul.f32 -1.702, %v6984_v18 }
 0xed3   :  { %v5601_v46 = vpop.eup %5600 }
 0xed4   :  { %v5603_v14 = vpop.eup %5602  ;;  %v2438_v21 = vmul.f32 %v5601_v46, %v2431_v11  ;;  %v2423_v19 = vmul.f32 1.442695, %v5139_v31  ;;  %vm2443_vm4 = vweird.f32 %v5601_v46 }
 0xed5   :  { %v2432_v51 = vadd.f32 1.0, %v5603_v14  ;;  %vm2444_vm6 = vmor %vm2442_vm5, %vm2443_vm4 }
 0xed6   :  { %v2439_v20 = vsub.f32 1.0, %v2438_v21  ;;  %5604 = vpow2.f32 %v2423_v19 }
 0xed7   :  { %5606 = vrcp.f32 %v2432_v51  ;;  %v2398_v0 = vpop.f32.mrf.mxu0  ;;  %v2463_v7 = vand.u32 2147483648, %v2432_v51  ;;  %v2461_v42 = vand.u32 2147483647, %v2432_v51  ;;  %vm2457_vm9 = vweird.f32 %v2432_v51 }
 0xed8   :  { %v2440_v30 = vmul.f32 %v5601_v46, %v2439_v20  ;;  %v6988_v22 = vadd.f32 %v6964_v56, %v2398_v0 }
 0xed9   :  { %v2464_v26 = vor.u32 1.1754944e-38, %v2463_v7  ;;  %vm2462_vm13 = vcmp.eq.f32.partialorder %v2461_v42, 8.507059e+37 }
 0xeda   :  { %v2441_v23 = vadd.f32 %v5601_v46, %v2440_v30  ;;  %v5140_v1 = vmul.f32 -1.702, %v6988_v22 }
 0xedc   :  { %v5605_v2 = vpop.eup %5604  ;;  %v2445_v15 = vsel %vm2444_vm6, %v5601_v46, %v2441_v23  ;;  %v2425_v24 = vmul.f32 1.442695, %v5140_v1 }
 0xedd   :  { %v5607_v41 = vpop.eup %5606  ;;  %v2450_v43 = vsel %vm2447_vm7, %v2449_v33, %v2445_v15  ;;  %v2433_v28 = vadd.f32 1.0, %v5605_v2 }
 0xede   :  { %v2527_v45 = vmul.f32 %v2450_v43, %v2390_v35  ;;  %v2453_v10 = vmul.f32 %v5607_v41, %v2432_v51  ;;  %5608 = vpow2.f32 %v2425_v24  ;;  %vm2458_vm8 = vweird.f32 %v5607_v41 }
 0xedf   :  { %5610 = vrcp.f32 %v2433_v28  ;;  %v2401_v5 = vpop.f32.mrf.mxu0  ;;  %vm2459_vm12 = vmor %vm2457_vm9, %vm2458_vm8  ;;  %v2478_v29 = vand.u32 2147483648, %v2433_v28  ;;  %v2476_v48 = vand.u32 2147483647, %v2433_v28  ;;  %vm2472_vm0 = vweird.f32 %v2433_v28 }
 0xee0   :  { %v2454_v37 = vsub.f32 1.0, %v2453_v10  ;;  %v6992_v38 = vadd.f32 %v6964_v56, %v2401_v5  ;;  %2565 = vmatmul.f32.vlgmr.msrb.gmra.mxu2 %v2527_v45 }
 0xee1   :  { %v2479_v13 = vor.u32 1.1754944e-38, %v2478_v29  ;;  %vm2477_vm3 = vcmp.eq.f32.partialorder %v2476_v48, 8.507059e+37 }
 0xee2   :  { %v2455_v17 = vmul.f32 %v5607_v41, %v2454_v37  ;;  %v5141_v9 = vmul.f32 -1.702, %v6992_v38 }
 0xee4   :  { %v5609_v32 = vpop.eup %5608  ;;  %v2456_v3 = vadd.f32 %v5607_v41, %v2455_v17  ;;  %v2427_v49 = vmul.f32 1.442695, %v5141_v9 }
 0xee5   :  { %v5611_v44 = vpop.eup %5610  ;;  %v2434_v40 = vadd.f32 1.0, %v5609_v32 }
 0xee6   :  { %v2460_v53 = vsel %vm2459_vm12, %v5607_v41, %v2456_v3  ;;  %v2468_v61 = vmul.f32 %v5611_v44, %v2433_v28  ;;  %5612 = vpow2.f32 %v2427_v49  ;;  %vm2473_vm14 = vweird.f32 %v5611_v44 }
 0xee7   :  { %v2465_v63 = vsel %vm2462_vm13, %v2464_v26, %v2460_v53  ;;  %5614 = vrcp.f32 %v2434_v40  ;;  %v2404_v50 = vpop.f32.mrf.mxu0  ;;  %vm2474_vm2 = vmor %vm2472_vm0, %vm2473_vm14  ;;  %v2493_v21 = vand.u32 2147483648, %v2434_v40  ;;  %v2491_v51 = vand.u32 2147483647, %v2434_v40 }
 0xee8   :  { %v2528_v54 = vmul.f32 %v2465_v63, %v6980_v16  ;;  %v2469_v52 = vsub.f32 1.0, %v2468_v61  ;;  %v6997_v35 = vadd.f32 %v6964_v56, %v2404_v50  ;;  %vm2487_vm5 = vweird.f32 %v2434_v40 }
 0xee9   :  { %v2494_v30 = vor.u32 1.1754944e-38, %v2493_v21  ;;  %vm2492_vm7 = vcmp.eq.f32.partialorder %v2491_v51, 8.507059e+37 }
 0xeea   :  { %v2470_v4 = vmul.f32 %v5611_v44, %v2469_v52  ;;  %v5142_v62 = vmul.f32 -1.702, %v6997_v35  ;;  %2568 = vmatmul.f32.gmra.mxu2 %v2528_v54 }
 0xeec   :  { %v5613_v39 = vpop.eup %5612  ;;  %v2471_v59 = vadd.f32 %v5611_v44, %v2470_v4  ;;  %v2429_v8 = vmul.f32 1.442695, %v5142_v62 }
 0xeed   :  { %v5615_v11 = vpop.eup %5614  ;;  %v2435_v12 = vadd.f32 1.0, %v5613_v39 }
 0xeee   :  { %v2475_v16 = vsel %vm2474_vm2, %v5611_v44, %v2471_v59  ;;  %v2483_v31 = vmul.f32 %v5615_v11, %v2434_v40  ;;  %5616 = vpow2.f32 %v2429_v8  ;;  %vm2488_vm4 = vweird.f32 %v5615_v11 }
 0xeef   :  { %v2480_v56 = vsel %vm2477_vm3, %v2479_v13, %v2475_v16  ;;  %5618 = vrcp.f32 %v2435_v12  ;;  %vm2489_vm6 = vmor %vm2487_vm5, %vm2488_vm4  ;;  %v2508_v15 = vand.u32 2147483648, %v2435_v12  ;;  %v2506_v41 = vand.u32 2147483647, %v2435_v12 }
 0xef0   :  { %v2529_v46 = vmul.f32 %v2480_v56, %v6984_v18  ;;  %v2484_v14 = vsub.f32 1.0, %v2483_v31  ;;  %vm2502_vm9 = vweird.f32 %v2435_v12 }
 0xef1   :  { %v2509_v45 = vor.u32 1.1754944e-38, %v2508_v15  ;;  %vm2507_vm13 = vcmp.eq.f32.partialorder %v2506_v41, 8.507059e+37 }
 0xef2   :  { %v2485_v19 = vmul.f32 %v5615_v11, %v2484_v14  ;;  %2571 = vmatmul.f32.gmra.mxu2 %v2529_v46 }
 0xef4   :  { %v5617_v20 = vpop.eup %5616  ;;  %v2486_v27 = vadd.f32 %v5615_v11, %v2485_v19 }
 0xef5   :  { %v5619_v0 = vpop.eup %5618  ;;  %v2436_v55 = vadd.f32 1.0, %v5617_v20 }
 0xef6   :  { %v2490_v23 = vsel %vm2489_vm6, %v5615_v11, %v2486_v27  ;;  %v2498_v1 = vmul.f32 %v5619_v0, %v2435_v12  ;;  %vm2503_vm8 = vweird.f32 %v5619_v0 }
 0xef7   :  { %v2495_v33 = vsel %vm2492_vm7, %v2494_v30, %v2490_v23  ;;  %5620 = vrcp.f32 %v2436_v55  ;;  %vm2504_vm12 = vmor %vm2502_vm9, %vm2503_vm8  ;;  %v2523_v42 = vand.u32 2147483648, %v2436_v55  ;;  %v2521_v9 = vand.u32 2147483647, %v2436_v55 }
 0xef8   :  { %v2530_v18 = vmul.f32 %v2495_v33, %v6988_v22  ;;  %v2499_v2 = vsub.f32 1.0, %v2498_v1  ;;  %vm2517_vm0 = vweird.f32 %v2436_v55 }
 0xef9   :  { %v2524_v3 = vor.u32 1.1754944e-38, %v2523_v42  ;;  %vm2522_vm3 = vcmp.eq.f32.partialorder %v2521_v9, 8.507059e+37  ;;  %v5152_v9 = vld [vmem:[%s7951_s4 + $0x198] sm:$0xff] }
 0xefa   :  { %v2500_v24 = vmul.f32 %v5619_v0, %v2499_v2  ;;  %2574 = vmatmul.f32.gmra.mxu2 %v2530_v18  ;;  %2788 = vmatpush.msra.mxu3 %v5152_v9 }
 0xefc   :  { %v2501_v43 = vadd.f32 %v5619_v0, %v2500_v24 }
 0xefd   :  { %v5621_v28 = vpop.eup %5620 }
 0xefe   :  { %v2505_v10 = vsel %vm2504_vm12, %v5619_v0, %v2501_v43  ;;  %v2513_v5 = vmul.f32 %v5621_v28, %v2436_v55  ;;  %vm2518_vm14 = vweird.f32 %v5621_v28 }
 0xeff   :  { %v2510_v37 = vsel %vm2507_vm13, %v2509_v45, %v2505_v10  ;;  %vm2519_vm2 = vmor %vm2517_vm0, %vm2518_vm14 }
 0xf00   :  { %v2531_v7 = vmul.f32 %v2510_v37, %v6992_v38  ;;  %v2514_v17 = vsub.f32 1.0, %v2513_v5  ;;  %v5443_v38 = vld [vmem:[%s7954_s7 + $0x5] ss:$0 sm:$0xff] }
 0xf02   :  { %v2515_v22 = vmul.f32 %v5621_v28, %v2514_v17  ;;  %2577 = vmatmul.f32.gmra.mxu2 %v2531_v7 }
 0xf04   :  { %v2516_v32 = vadd.f32 %v5621_v28, %v2515_v22  ;;  %v5163_v22 = vld [vmem:[%s7951_s4 + $0x218] sm:$0xff] }
 0xf05   :  { %2831 = vmatpush.msrb.mxu1 %v5163_v22 }
 0xf06   :  { %v2520_v49 = vsel %vm2519_vm2, %v5621_v28, %v2516_v32  ;;  %v5174_v32 = vld [vmem:[%s7951_s4 + $0x298] sm:$0xff] }
 0xf07   :  { %v2525_v44 = vsel %vm2522_vm3, %v2524_v3, %v2520_v49  ;;  %2874 = vmatpush.msrb.mxu0 %v5174_v32  ;;  %v5151_v3 = vld [vmem:[%s7951_s4 + $0x190] sm:$0xff] }
 0xf08   :  { %v2532_v26 = vmul.f32 %v2525_v44, %v6997_v35  ;;  %v5162_v49 = vld [vmem:[%s7951_s4 + $0x210] sm:$0xff]  ;;  %2789 = vmatpush.msra.mxu3 %v5151_v3 }
 0xf09   :  { %v5173_v44 = vld [vmem:[%s7951_s4 + $0x290] sm:$0xff]  ;;  %2832 = vmatpush.msrb.mxu1 %v5162_v49 }
 0xf0a   :  { %2580 = vmatmul.f32.gmra.mxu2 %v2532_v26  ;;  %2875 = vmatpush.msrb.mxu0 %v5173_v44  ;;  %v5150_v26 = vld [vmem:[%s7951_s4 + $0x188] sm:$0xff] }
 0xf0b   :  { %2790 = vmatpush.msra.mxu3 %v5150_v26 }
 0xf63   :  { %v2566_v40 = vpop.f32.mrf.mxu2 }
 0xf64   :  { %v2584_v53 = vadd.f32 %v2566_v40, %v6787_v58  ;;  %v5172_v40 = vld [vmem:[%s7951_s4 + $0x288] sm:$0xff] }
 0xf65   :  { %2876 = vmatpush.msrb.mxu0 %v5172_v40  ;;  %v5214_v40 = vld [vmem:[%s7951_s4 + $0x230] sm:$0xff] }
 0xf66   :  { %v7008_v61 = vadd.f32 %v5443_v38, %v2584_v53  ;;  %v5149_v53 = vld [vmem:[%s7951_s4 + $0x180] sm:$0xff] }
 0xf67   :  { %2791 = vmatpush.msra.mxu3 %v5149_v53 }
 0xf68   :  { %v2604_v63 = vsel %vm181_vm1, %v7008_v61, 0.0 }
 0xf69   :  { %2605 = vadd.xlane.f32.xlu0 %v2604_v63  ;;  %v5160_v63 = vld [vmem:[%s7951_s4 + $0x200] sm:$0xff] }
 0xf6d   :  { %v2569_v50 = vpop.f32.mrf.mxu2 }
 0xf6e   :  { %v2585_v54 = vadd.f32 %v2569_v50, %v6795_v47  ;;  %v5171_v50 = vld [vmem:[%s7951_s4 + $0x280] sm:$0xff] }
 0xf6f   :  { %2877 = vmatpush.msrb.mxu0 %v5171_v50 }
 0xf70   :  { %v7013_v52 = vadd.f32 %v5443_v38, %v2585_v54 }
 0xf72   :  { %v2607_v35 = vsel %vm181_vm1, %v7013_v52, 0.0 }
 0xf73   :  { %2608 = vadd.xlane.f32.xlu1 %v2607_v35 }
 0xf75   :  { %v2572_v29 = vpop.f32.mrf.mxu2 }
 0xf76   :  { %v2586_v4 = vadd.f32 %v2572_v29, %v6805_v25 }
 0xf78   :  { %v7018_v48 = vadd.f32 %v5443_v38, %v2586_v4 }
 0xf7a   :  { %v2610_v58 = vsel %vm181_vm1, %v7018_v48, 0.0 }
 0xf7b   :  { %2611 = vadd.xlane.f32.xlu2 %v2610_v58 }
 0xf7d   :  { %v2575_v62 = vpop.f32.mrf.mxu2 }
 0xf7e   :  { %v2587_v39 = vadd.f32 %v2575_v62, %v6813_v6 }
 0xf80   :  { %v7023_v59 = vadd.f32 %v5443_v38, %v2587_v39 }
 0xf82   :  { %v2613_v47 = vsel %vm181_vm1, %v7023_v59, 0.0 }
 0xf83   :  { %2614 = vadd.xlane.f32.xlu0 %v2613_v47 }
 0xf85   :  { %v2578_v8 = vpop.f32.mrf.mxu2 }
 0xf86   :  { %v2588_v11 = vadd.f32 %v2578_v8, %v6821_v34 }
 0xf88   :  { %v7028_v13 = vadd.f32 %v5443_v38, %v2588_v11 }
 0xf8a   :  { %v2616_v25 = vsel %vm181_vm1, %v7028_v13, 0.0 }
 0xf8b   :  { %2617 = vadd.xlane.f32.xlu1 %v2616_v25 }
 0xf8d   :  { %v2581_v12 = vpop.f32.mrf.mxu2 }
 0xf8e   :  { %v2589_v16 = vadd.f32 %v2581_v12, %v6827_v36 }
 0xf90   :  { %v7033_v31 = vadd.f32 %v5443_v38, %v2589_v16  ;;  %v5161_v38 = vld [vmem:[%s7951_s4 + $0x208] sm:$0xff] }
 0xf91   :  { %2833 = vmatpush.msrb.mxu1 %v5161_v38  ;;  %v5215_v38 = vld [vmem:[%s7951_s4 + $0x238] sm:$0xff] }
 0xf92   :  { %v2619_v6 = vsel %vm181_vm1, %v7033_v31, 0.0  ;;  %3196 = vmatpush.msra.mxu0 %v5215_v38 }
 0xf93   :  { %2620 = vadd.xlane.f32.xlu2 %v2619_v6  ;;  %2834 = vmatpush.msrb.mxu1 %v5160_v63 }
 0xf94   :  { %3197 = vmatpush.msra.mxu0 %v5214_v40 }
 0xfdc   :  { %v2606_v56 = vpop.xlane.xlu0 %2605 }
 0xfdd   :  { %v2622_v46 = vmul.f32 %v2606_v56, %v5990_v60 }
 0xfdf   :  { %v7039_v34 = vsub.f32 %v7008_v61, %v2622_v46  ;;  %v7121_v46 = vld [vmem:[%s7954_s7 + $0x8] ss:$0 sm:$0xff] }
 0xfe1   :  { %v2634_v14 = vmul.f32 %v7039_v34, %v7039_v34 }
 0xfe3   :  { %v2640_v21 = vsel %vm181_vm1, %v2634_v14, 0.0 }
 0xfe4   :  { %2641 = vadd.xlane.f32.xlu0 %v2640_v21 }
 0xfe6   :  { %v2609_v19 = vpop.xlane.xlu1 %2608 }
 0xfe7   :  { %v2623_v36 = vmul.f32 %v2609_v19, %v5990_v60 }
 0xfe9   :  { %v7046_v51 = vsub.f32 %v7013_v52, %v2623_v36  ;;  %v7126_v36 = vld [vmem:[%s7954_s7 + $0x9] ss:$0 sm:$0xff] }
 0xfeb   :  { %v2635_v20 = vmul.f32 %v7046_v51, %v7046_v51 }
 0xfed   :  { %v2643_v27 = vsel %vm181_vm1, %v2635_v20, 0.0 }
 0xfee   :  { %2644 = vadd.xlane.f32.xlu1 %v2643_v27  ;;  %v2612_v0 = vpop.xlane.xlu2 %2611 }
 0xfef   :  { %v2624_v30 = vmul.f32 %v2612_v0, %v5990_v60 }
 0xff1   :  { %v7053_v55 = vsub.f32 %v7018_v48, %v2624_v30 }
 0xff3   :  { %v2636_v23 = vmul.f32 %v7053_v55, %v7053_v55 }
 0xff5   :  { %v2646_v1 = vsel %vm181_vm1, %v2636_v23, 0.0 }
 0xff6   :  { %v2615_v33 = vpop.xlane.xlu0 %2614  ;;  %2647 = vadd.xlane.f32.xlu2 %v2646_v1 }
 0xff7   :  { %v2625_v18 = vmul.f32 %v2615_v33, %v5990_v60 }
 0xff9   :  { %v7060_v2 = vsub.f32 %v7023_v59, %v2625_v18 }
 0xffb   :  { %v2637_v15 = vmul.f32 %v7060_v2, %v7060_v2 }
 0xffd   :  { %v2649_v24 = vsel %vm181_vm1, %v2637_v15, 0.0 }
 0xffe   :  { %2650 = vadd.xlane.f32.xlu0 %v2649_v24  ;;  %v2618_v41 = vpop.xlane.xlu1 %2617 }
 0xfff   :  { %v2626_v43 = vmul.f32 %v2618_v41, %v5990_v60 }
0x1001   :  { %v7067_v28 = vsub.f32 %v7028_v13, %v2626_v43 }
0x1003   :  { %v2638_v45 = vmul.f32 %v7067_v28, %v7067_v28 }
0x1005   :  { %v2652_v10 = vsel %vm181_vm1, %v2638_v45, 0.0 }
0x1006   :  { %2653 = vadd.xlane.f32.xlu1 %v2652_v10  ;;  %v2621_v5 = vpop.xlane.xlu2 %2620 }
0x1007   :  { %v2627_v37 = vmul.f32 %v2621_v5, %v5990_v60 }
0x1009   :  { %v7074_v7 = vsub.f32 %v7033_v31, %v2627_v37 }
0x100b   :  { %v2639_v17 = vmul.f32 %v7074_v7, %v7074_v7 }
0x100d   :  { %v2655_v42 = vsel %vm181_vm1, %v2639_v17, 0.0 }
0x100e   :  { %2656 = vadd.xlane.f32.xlu2 %v2655_v42 }
0x1057   :  { %v2642_v54 = vpop.xlane.xlu0 %2641 }
0x1058   :  { %v2658_v35 = vmul.f32 %v2642_v54, %v5990_v60  ;;  %v5213_v54 = vld [vmem:[%s7951_s4 + $0x228] sm:$0xff] }
0x1059   :  { %3198 = vmatpush.msra.mxu0 %v5213_v54 }
0x105a   :  { %v2664_v29 = vadd.f32 1e-05, %v2658_v35 }
0x105c   :  { %5622 = vrsqrt.f32 %v2664_v29  ;;  %vm2676_vm5 = vweird.f32 %v2664_v29 }
0x1061   :  { %v2645_v4 = vpop.xlane.xlu1 %2644 }
0x1062   :  { %v5623_v58 = vpop.eup %5622  ;;  %v2659_v62 = vmul.f32 %v2645_v4, %v5990_v60 }
0x1063   :  { %v2671_v39 = vmul.f32 %v5623_v58, %v2664_v29  ;;  %vm2677_vm4 = vweird.f32 %v5623_v58 }
0x1064   :  { %v2665_v47 = vadd.f32 1e-05, %v2659_v62  ;;  %vm2678_vm6 = vmor %vm2676_vm5, %vm2677_vm4 }
0x1065   :  { %v2672_v8 = vmul.f32 %v5623_v58, %v2671_v39 }
0x1066   :  { %5624 = vrsqrt.f32 %v2665_v47  ;;  %vm2686_vm8 = vweird.f32 %v2665_v47 }
0x1067   :  { %v2673_v11 = vmul.f32 0.5, %v2672_v8  ;;  %v5212_v8 = vld [vmem:[%s7951_s4 + $0x220] sm:$0xff] }
0x1068   :  { %3199 = vmatpush.msra.mxu0 %v5212_v8 }
0x1069   :  { %v2674_v25 = vsub.f32 1.5, %v2673_v11  ;;  %v2648_v12 = vpop.xlane.xlu2 %2647 }
0x106a   :  { %v2660_v16 = vmul.f32 %v2648_v12, %v5990_v60 }
0x106b   :  { %v2675_v6 = vmul.f32 %v5623_v58, %v2674_v25 }
0x106c   :  { %v5625_v56 = vpop.eup %5624  ;;  %v2666_v14 = vadd.f32 1e-05, %v2660_v16 }
0x106d   :  { %v2679_v21 = vsel %vm2678_vm6, %v5623_v58, %v2675_v6  ;;  %v2681_v19 = vmul.f32 %v5625_v56, %v2665_v47  ;;  %vm2687_vm7 = vweird.f32 %v5625_v56 }
0x106e   :  { %v2730_v20 = vmul.f32 %v2679_v21, %v7039_v34  ;;  %5626 = vrsqrt.f32 %v2666_v14  ;;  %vm2688_vm9 = vmor %vm2686_vm8, %vm2687_vm7  ;;  %vm2696_vm13 = vweird.f32 %v2666_v14 }
0x106f   :  { %v2682_v27 = vmul.f32 %v5625_v56, %v2681_v19 }
0x1070   :  { %v2737_v0 = vmul.f32 %v7121_v46, %v2730_v20 }
0x1071   :  { %v2683_v30 = vmul.f32 0.5, %v2682_v27  ;;  %v2651_v23 = vpop.xlane.xlu0 %2650 }
0x1072   :  { %v7131_v1 = vadd.f32 %v7126_v36, %v2737_v0  ;;  %v2661_v33 = vmul.f32 %v2651_v23, %v5990_v60 }
0x1073   :  { %v2684_v18 = vsub.f32 1.5, %v2683_v30 }
0x1074   :  { %v5627_v15 = vpop.eup %5626  ;;  %v2667_v24 = vadd.f32 1e-05, %v2661_v33  ;;  %5154 = vmatmul.msk.f32.vlgmr.msra.gmra.mxu3 %vm181_vm1, %v7131_v1  ;;  %5165 = vmatmul.msk.f32.vlgmr.msrb.gmra.mxu1 %vm181_vm1, %v7131_v1 }
0x1075   :  { %v2685_v34 = vmul.f32 %v5625_v56, %v2684_v18  ;;  %v2691_v41 = vmul.f32 %v5627_v15, %v2666_v14  ;;  %5176 = vmatmul.msk.f32.vlgmr.msrb.gmra.mxu0 %vm181_vm1, %v7131_v1  ;;  %vm2697_vm12 = vweird.f32 %v5627_v15 }
0x1076   :  { %5628 = vrsqrt.f32 %v2667_v24  ;;  %vm2698_vm14 = vmor %vm2696_vm13, %vm2697_vm12  ;;  %vm2706_vm2 = vweird.f32 %v2667_v24 }
0x1077   :  { %v2689_v43 = vsel %vm2688_vm9, %v5625_v56, %v2685_v34  ;;  %v2692_v45 = vmul.f32 %v5627_v15, %v2691_v41 }
0x1078   :  { %v2731_v10 = vmul.f32 %v2689_v43, %v7046_v51 }
0x1079   :  { %v2693_v5 = vmul.f32 0.5, %v2692_v45  ;;  %v2654_v37 = vpop.xlane.xlu1 %2653  ;;  %v5446_v45 = vld [vmem:[%s7952_s5 + $0x10] ss:$0 sm:$0xff] }
0x107a   :  { %v2738_v17 = vmul.f32 %v7121_v46, %v2731_v10  ;;  %v2662_v42 = vmul.f32 %v2654_v37, %v5990_v60 }
0x107b   :  { %v2694_v22 = vsub.f32 1.5, %v2693_v5 }
0x107c   :  { %v5629_v9 = vpop.eup %5628  ;;  %v7144_v32 = vadd.f32 %v7126_v36, %v2738_v17  ;;  %v2668_v3 = vadd.f32 1e-05, %v2662_v42 }
0x107d   :  { %v2695_v49 = vmul.f32 %v5627_v15, %v2694_v22  ;;  %v2701_v44 = vmul.f32 %v5629_v9, %v2667_v24  ;;  %vm2707_vm0 = vweird.f32 %v5629_v9  ;;  %v5447_v22 = vld [vmem:[%s7952_s5 + $0x14] ss:$0 sm:$0xff] }
0x107e   :  { %5630 = vrsqrt.f32 %v2668_v3  ;;  %5155 = vmatmul.msk.f32.gmra.mxu3 %vm181_vm1, %v7144_v32  ;;  %5166 = vmatmul.msk.f32.gmra.mxu1 %vm181_vm1, %v7144_v32  ;;  %vm2708_vm3 = vmor %vm2706_vm2, %vm2707_vm0  ;;  %vm2716_vm5 = vweird.f32 %v2668_v3 }
0x107f   :  { %v2699_v51 = vsel %vm2698_vm14, %v5627_v15, %v2695_v49  ;;  %v2702_v26 = vmul.f32 %v5629_v9, %v2701_v44  ;;  %5177 = vmatmul.msk.f32.gmra.mxu0 %vm181_vm1, %v7144_v32 }
0x1080   :  { %v2732_v53 = vmul.f32 %v2699_v51, %v7053_v55 }
0x1081   :  { %v2703_v63 = vmul.f32 0.5, %v2702_v26  ;;  %v2657_v50 = vpop.xlane.xlu2 %2656 }
0x1082   :  { %v2739_v35 = vmul.f32 %v7121_v46, %v2732_v53  ;;  %v2663_v29 = vmul.f32 %v2657_v50, %v5990_v60 }
0x1083   :  { %v2704_v4 = vsub.f32 1.5, %v2703_v63 }
0x1084   :  { %v5631_v58 = vpop.eup %5630  ;;  %v7165_v62 = vadd.f32 %v7126_v36, %v2739_v35  ;;  %v2669_v39 = vadd.f32 1e-05, %v2663_v29 }
0x1085   :  { %v2705_v55 = vmul.f32 %v5629_v9, %v2704_v4  ;;  %v2711_v47 = vmul.f32 %v5631_v58, %v2668_v3  ;;  %vm2717_vm4 = vweird.f32 %v5631_v58 }
0x1086   :  { %5632 = vrsqrt.f32 %v2669_v39  ;;  %5156 = vmatmul.msk.f32.gmra.mxu3 %vm181_vm1, %v7165_v62  ;;  %5167 = vmatmul.msk.f32.gmra.mxu1 %vm181_vm1, %v7165_v62  ;;  %vm2718_vm6 = vmor %vm2716_vm5, %vm2717_vm4  ;;  %vm2726_vm8 = vweird.f32 %v2669_v39 }
0x1087   :  { %v2709_v11 = vsel %vm2708_vm3, %v5629_v9, %v2705_v55  ;;  %v2712_v25 = vmul.f32 %v5631_v58, %v2711_v47  ;;  %5178 = vmatmul.msk.f32.gmra.mxu0 %vm181_vm1, %v7165_v62  ;;  %v5448_v9 = vld [vmem:[%s7952_s5 + $0xc] ss:$0 sm:$0xff] }
0x1088   :  { %v2733_v12 = vmul.f32 %v2709_v11, %v7060_v2 }
0x1089   :  { %v2713_v16 = vmul.f32 0.5, %v2712_v25 }
0x108a   :  { %v2740_v6 = vmul.f32 %v7121_v46, %v2733_v12 }
0x108b   :  { %v2714_v56 = vsub.f32 1.5, %v2713_v16 }
0x108c   :  { %v5633_v14 = vpop.eup %5632  ;;  %v7179_v21 = vadd.f32 %v7126_v36, %v2740_v6  ;;  %v5204_v6 = vld [vmem:[%s7951_s4 + $0x1b8] sm:$0xff] }
0x108d   :  { %v2715_v19 = vmul.f32 %v5631_v58, %v2714_v56  ;;  %v2721_v20 = vmul.f32 %v5633_v14, %v2669_v39  ;;  %vm2727_vm7 = vweird.f32 %v5633_v14 }
0x108e   :  { %5157 = vmatmul.msk.f32.gmra.mxu3 %vm181_vm1, %v7179_v21  ;;  %5168 = vmatmul.msk.f32.gmra.mxu1 %vm181_vm1, %v7179_v21  ;;  %vm2728_vm9 = vmor %vm2726_vm8, %vm2727_vm7 }
0x108f   :  { %v2719_v2 = vsel %vm2718_vm6, %v5631_v58, %v2715_v19  ;;  %v2722_v27 = vmul.f32 %v5633_v14, %v2721_v20  ;;  %5179 = vmatmul.msk.f32.gmra.mxu0 %vm181_vm1, %v7179_v21  ;;  %v5202_v19 = vld [vmem:[%s7951_s4 + $0x1a8] sm:$0xff] }
0x1090   :  { %v2734_v0 = vmul.f32 %v2719_v2, %v7067_v28  ;;  %v5201_v2 = vld [vmem:[%s7951_s4 + $0x1a0] sm:$0xff] }
0x1091   :  { %v2723_v30 = vmul.f32 0.5, %v2722_v27 }
0x1092   :  { %v2741_v23 = vmul.f32 %v7121_v46, %v2734_v0 }
0x1093   :  { %v2724_v33 = vsub.f32 1.5, %v2723_v30  ;;  %v7256_v30 = vld [vmem:[%s7952_s5 + $0x11] ss:$0 sm:$0xff] }
0x1094   :  { %v7190_v18 = vadd.f32 %v7126_v36, %v2741_v23 }
0x1095   :  { %v2725_v15 = vmul.f32 %v5633_v14, %v2724_v33 }
0x1096   :  { %5158 = vmatmul.msk.f32.gmra.mxu3 %vm181_vm1, %v7190_v18  ;;  %5169 = vmatmul.msk.f32.gmra.mxu1 %vm181_vm1, %v7190_v18 }
0x1097   :  { %v2729_v24 = vsel %vm2728_vm9, %v5633_v14, %v2725_v15  ;;  %5180 = vmatmul.msk.f32.gmra.mxu0 %vm181_vm1, %v7190_v18  ;;  %v5203_v14 = vld [vmem:[%s7951_s4 + $0x1b0] sm:$0xff] }
0x1098   :  { %v2735_v28 = vmul.f32 %v2729_v24, %v7074_v7 }
0x109a   :  { %v2742_v34 = vmul.f32 %v7121_v46, %v2735_v28 }
0x109c   :  { %v7201_v41 = vadd.f32 %v7126_v36, %v2742_v34 }
0x109e   :  { %5159 = vmatmul.msk.f32.gmra.mxu3 %vm181_vm1, %v7201_v41  ;;  %5170 = vmatmul.msk.f32.gmra.mxu1 %vm181_vm1, %v7201_v41 }
0x109f   :  { %5181 = vmatmul.msk.f32.gmra.mxu0 %vm181_vm1, %v7201_v41 }
0x10a7   :  { %5217 = vmatmul.msk.f32.vlgmr.msra.gmra.mxu0 %vm181_vm1, %v7131_v1 }
0x10af   :  { %5218 = vmatmul.msk.f32.gmra.mxu0 %vm181_vm1, %v7144_v32 }
0x10b7   :  { %5219 = vmatmul.msk.f32.gmra.mxu0 %vm181_vm1, %v7165_v62 }
0x10bf   :  { %5220 = vmatmul.msk.f32.gmra.mxu0 %vm181_vm1, %v7179_v21 }
0x10c7   :  { %5221 = vmatmul.msk.f32.gmra.mxu0 %vm181_vm1, %v7190_v18 }
0x10cf   :  { %5222 = vmatmul.msk.f32.gmra.mxu0 %vm181_vm1, %v7201_v41 }
0x10f1   :  { %v2836_v7 = vpop.f32.mrf.mxu1 }
0x10f2   :  { %v2879_v46 = vpop.f32.mrf.mxu0  ;;  %v2837_v49 = vadd.f32 %v5446_v45, %v2836_v7 }
0x10f3   :  { %v2880_v53 = vadd.f32 %v5447_v22, %v2879_v46 }
0x10f7   :  { %v2793_v10 = vpop.f32.mrf.mxu3 }
0x10f8   :  { %v2794_v38 = vadd.f32 %v5448_v9, %v2793_v10 }
0x10fb   :  { %v2839_v36 = vpop.f32.mrf.mxu1 }
0x10fc   :  { %v2882_v43 = vpop.f32.mrf.mxu0  ;;  %v2840_v42 = vadd.f32 %v5446_v45, %v2839_v36 }
0x10fd   :  { %v2883_v40 = vadd.f32 %v5447_v22, %v2882_v43 }
0x1101   :  { %v2796_v44 = vpop.f32.mrf.mxu3 }
0x1102   :  { %v2797_v35 = vadd.f32 %v5448_v9, %v2796_v44 }
0x1103   :  { %v2842_v5 = vpop.f32.mrf.mxu1 }
0x1104   :  { %v2843_v37 = vadd.f32 %v5446_v45, %v2842_v5  ;;  %v2885_v17 = vpop.f32.mrf.mxu0 }
0x1105   :  { %v2886_v26 = vadd.f32 %v5447_v22, %v2885_v17 }
0x1106   :  { %5182 = vmatpush.xpose.msk.msrb.mxu3 %vm632_vm15, %v2843_v37 }
0x1109   :  { %v2799_v54 = vpop.f32.mrf.mxu3 }
0x110a   :  { %5183 = vmatpush.xpose.msk.msrb.mxu3 %vm632_vm15, %v2840_v42  ;;  %v2800_v55 = vadd.f32 %v5448_v9, %v2799_v54 }
0x110b   :  { %v2845_v3 = vpop.f32.mrf.mxu1 }
0x110c   :  { %v2888_v51 = vpop.f32.mrf.mxu0  ;;  %v2846_v12 = vadd.f32 %v5446_v45, %v2845_v3 }
0x110d   :  { %v2889_v25 = vadd.f32 %v5447_v22, %v2888_v51 }
0x110e   :  { %5184 = vmatpush.xpose.msk.msrb.mxu3 %vm632_vm15, %v2837_v49 }
0x1111   :  { %5185 = vmatmul.msk.f32.vlgmr.msrb.gmra.mxu3 %vm632_vm15, %v2794_v38  ;;  %v2802_v8 = vpop.f32.mrf.mxu3 }
0x1112   :  { %3085 = vmatpush.msra.mxu3 %v2886_v26  ;;  %v2803_v56 = vadd.f32 %v5448_v9, %v2802_v8 }
0x1113   :  { %v2848_v63 = vpop.f32.mrf.mxu1 }
0x1114   :  { %3086 = vmatpush.msra.mxu3 %v2883_v40  ;;  %v2891_v50 = vpop.f32.mrf.mxu0  ;;  %v2849_v11 = vadd.f32 %v5446_v45, %v2848_v63 }
0x1115   :  { %v2892_v47 = vadd.f32 %v5447_v22, %v2891_v50 }
0x1116   :  { %3087 = vmatpush.msra.mxu3 %v2880_v53 }
0x1119   :  { %5186 = vmatmul.msk.f32.gmra.mxu3 %vm632_vm15, %v2797_v35  ;;  %v2805_v20 = vpop.f32.mrf.mxu3 }
0x111a   :  { %v2806_v0 = vadd.f32 %v5448_v9, %v2805_v20 }
0x111b   :  { %v2851_v29 = vpop.f32.mrf.mxu1 }
0x111c   :  { %v2852_v4 = vadd.f32 %v5446_v45, %v2851_v29  ;;  %v2894_v58 = vpop.f32.mrf.mxu0 }
0x111d   :  { %v2895_v39 = vadd.f32 %v5447_v22, %v2894_v58 }
0x111e   :  { %5188 = vmatpush.xpose.msk.msra.mxu2 %vm632_vm15, %v2852_v4 }
0x111f   :  { %3120 = vmatpush.msra.mxu1 %v2895_v39 }
0x1121   :  { %3121 = vmatpush.msra.mxu1 %v2892_v47  ;;  %5187 = vmatmul.msk.f32.gmra.mxu3 %vm632_vm15, %v2800_v55  ;;  %v2808_v23 = vpop.f32.mrf.mxu3 }
0x1122   :  { %5189 = vmatpush.xpose.msk.msra.mxu2 %vm632_vm15, %v2849_v11  ;;  %v2809_v24 = vadd.f32 %v5448_v9, %v2808_v23 }
0x1123   :  { %3122 = vmatpush.msra.mxu1 %v2889_v25 }
0x1124   :  { %v3201_v16 = vpop.f32.mrf.mxu0 }
0x1125   :  { %v3202_v34 = vadd.f32 %v7256_v30, %v3201_v16 }
0x1126   :  { %5190 = vmatpush.xpose.msk.msra.mxu2 %vm632_vm15, %v2846_v12 }
0x1129   :  { %5191 = vmatmul.msk.f32.vlgmr.msra.gmra.mxu2 %vm632_vm15, %v2803_v56 }
0x112a   :  { %3154 = vmatpush.msrb.mxu2 %v5204_v6 }
0x112c   :  { %3155 = vmatpush.msrb.mxu2 %v5203_v14  ;;  %v3204_v27 = vpop.f32.mrf.mxu0 }
0x112d   :  { %v3205_v28 = vadd.f32 %v7256_v30, %v3204_v27 }
0x112e   :  { %3156 = vmatpush.msrb.mxu2 %v5202_v19 }
0x1130   :  { %3157 = vmatpush.msrb.mxu2 %v5201_v2 }
0x1131   :  { %5192 = vmatmul.msk.f32.gmra.mxu2 %vm632_vm15, %v2806_v0 }
0x1134   :  { %v3207_v33 = vpop.f32.mrf.mxu0 }
0x1135   :  { %v3208_v15 = vadd.f32 %v7256_v30, %v3207_v33 }
0x1137   :  { %5234 = vmatpush.xpose.msk.msrb.mxu1 %vm632_vm15, %v3208_v15 }
0x1139   :  { %5193 = vmatmul.msk.f32.gmra.mxu2 %vm632_vm15, %v2809_v24 }
0x113b   :  { %5235 = vmatpush.xpose.msk.msrb.mxu1 %vm632_vm15, %v3205_v28 }
0x113c   :  { %v3210_v20 = vpop.f32.mrf.mxu0 }
0x113f   :  { %5236 = vmatpush.xpose.msk.msrb.mxu1 %vm632_vm15, %v3202_v34 }
0x1141   :  { %5206 = vmatmul.msk.f32.vlgmr.msrb.gmra.mxu2 %vm181_vm1, %v7131_v1 }
0x1144   :  { %v3213_v2 = vpop.f32.mrf.mxu0 }
0x1149   :  { %5207 = vmatmul.msk.f32.gmra.mxu2 %vm181_vm1, %v7144_v32 }
0x114c   :  { %v3216_v0 = vpop.f32.mrf.mxu0 }
0x114d   :  { %v3217_v28 = vadd.f32 %v7256_v30, %v3216_v0 }
0x1151   :  { %5208 = vmatmul.msk.f32.gmra.mxu2 %vm181_vm1, %v7165_v62 }
0x1159   :  { %5209 = vmatmul.msk.f32.gmra.mxu2 %vm181_vm1, %v7179_v21 }
0x1161   :  { %5210 = vmatmul.msk.f32.gmra.mxu2 %vm181_vm1, %v7190_v18 }
0x1169   :  { %5211 = vmatmul.msk.f32.gmra.mxu2 %vm181_vm1, %v7201_v41 }
0x1194   :  { %v2932_v51 = vpop.f32.mrf.mxu3 }
0x1195   :  { %v2985_v50 = vmul.f32 0.35355338, %v2932_v51 }
0x1197   :  { %v2991_v4 = vsel %vm47_vm10, %v2985_v50, -1e+30 }
0x1198   :  { %v2997_v47 = vsel %vm735_vm11, %v2991_v4, -inf }
0x119c   :  { %v2935_v54 = vpop.f32.mrf.mxu3 }
0x119d   :  { %v2986_v8 = vmul.f32 0.35355338, %v2935_v54 }
0x119f   :  { %v2992_v11 = vsel %vm47_vm10, %v2986_v8, -1e+30 }
0x11a0   :  { %v3000_v16 = vsel %vm735_vm11, %v2992_v11, -inf }
0x11a4   :  { %v2938_v25 = vpop.f32.mrf.mxu3 }
0x11a5   :  { %v2987_v56 = vmul.f32 0.35355338, %v2938_v25  ;;  %v5226_v25 = vld [vmem:[%s7951_s4 + $0x2b8] sm:$0xff] }
0x11a6   :  { %3238 = vmatpush.msrb.mxu3 %v5226_v25 }
0x11a7   :  { %v2993_v14 = vsel %vm47_vm10, %v2987_v56, -1e+30 }
0x11a8   :  { %v3003_v19 = vsel %vm735_vm11, %v2993_v14, -inf }
0x11ac   :  { %v2976_v7 = vpop.f32.mrf.mxu2 }
0x11ad   :  { %v2988_v46 = vmul.f32 0.35355338, %v2976_v7 }
0x11af   :  { %v2994_v36 = vsel %vm47_vm10, %v2988_v46, -1e+30  ;;  %v3214_v46 = vadd.f32 %v7256_v30, %v3213_v2 }
0x11b0   :  { %v3006_v43 = vsel %vm735_vm11, %v2994_v36, -inf }
0x11b1   :  { %3007 = vmax.xlane.f32.xlu0 %v3006_v43 }
0x11b4   :  { %v2979_v45 = vpop.f32.mrf.mxu2 }
0x11b5   :  { %v2989_v10 = vmul.f32 0.35355338, %v2979_v45 }
0x11b7   :  { %v2995_v5 = vsel %vm47_vm10, %v2989_v10, -1e+30 }
0x11b8   :  { %v3009_v37 = vsel %vm735_vm11, %v2995_v5, -inf }
0x11b9   :  { %3010 = vmax.xlane.f32.xlu1 %v3009_v37 }
0x11bc   :  { %v2982_v17 = vpop.f32.mrf.mxu2 }
0x11bd   :  { %v2990_v42 = vmul.f32 0.35355338, %v2982_v17 }
0x11bf   :  { %v2996_v22 = vsel %vm47_vm10, %v2990_v42, -1e+30 }
0x11c0   :  { %v3012_v9 = vsel %vm735_vm11, %v2996_v22, -inf }
0x11c1   :  { %3013 = vmax.xlane.f32.xlu2 %v3012_v9 }
0x11c4   :  { %v3159_v42 = vpop.f32.mrf.mxu2 }
0x1224   :  { %v3008_v3 = vpop.xlane.xlu0 %3007 }
0x1225   :  { %v3018_v49 = vsub.f32 %v2994_v36, %v3008_v3 }
0x1227   :  { %v3027_v44 = vmul.f32 1.442695, %v3018_v49 }
0x1229   :  { %5634 = vpow2.f32 %v3027_v44 }
0x122c   :  { %v3011_v26 = vpop.xlane.xlu1 %3010 }
0x122d   :  { %v3019_v38 = vsub.f32 %v2995_v5, %v3011_v26  ;;  %v3211_v5 = vadd.f32 %v7256_v30, %v3210_v20 }
0x122f   :  { %v5635_v40 = vpop.eup %5634  ;;  %v3029_v53 = vmul.f32 1.442695, %v3019_v38  ;;  %v5450_v38 = vld [vmem:[%s7952_s5 + $0xd] ss:$0 sm:$0xff] }
0x1230   :  { %v3042_v63 = vsel %vm735_vm11, %v5635_v40, 0.0 }
0x1231   :  { %5636 = vpow2.f32 %v3029_v53  ;;  %3043 = vadd.xlane.f32.xlu0 %v3042_v63  ;;  %v3162_v53 = vpop.f32.mrf.mxu2  ;;  %v3160_v63 = vadd.f32 %v5450_v38, %v3159_v42 }
0x1234   :  { %v3014_v35 = vpop.xlane.xlu2 %3013 }
0x1235   :  { %v3020_v29 = vsub.f32 %v2996_v22, %v3014_v35 }
0x1237   :  { %v5637_v58 = vpop.eup %5636  ;;  %v3031_v39 = vmul.f32 1.442695, %v3020_v29  ;;  %v3163_v29 = vadd.f32 %v5450_v38, %v3162_v53 }
0x1238   :  { %v3045_v55 = vsel %vm735_vm11, %v5637_v58, 0.0 }
0x1239   :  { %5638 = vpow2.f32 %v3031_v39  ;;  %3046 = vadd.xlane.f32.xlu1 %v3045_v55  ;;  %2998 = vmax.xlane.f32.xlu0 %v2997_v47  ;;  %v3165_v35 = vpop.f32.mrf.mxu2 }
0x123f   :  { %v5639_v12 = vpop.eup %5638 }
0x1240   :  { %v3048_v6 = vsel %vm735_vm11, %v5639_v12, 0.0 }
0x1241   :  { %3001 = vmax.xlane.f32.xlu1 %v3000_v16  ;;  %3049 = vadd.xlane.f32.xlu2 %v3048_v6  ;;  %v5224_v16 = vld [vmem:[%s7951_s4 + $0x2a8] sm:$0xff] }
0x1249   :  { %3004 = vmax.xlane.f32.xlu2 %v3003_v19 }
0x12a4   :  { %v3044_v27 = vpop.xlane.xlu0 %3043 }
0x12a5   :  { %5640 = vrcp.f32 %v3044_v27 }
0x12ab   :  { %v5641_v23 = vpop.eup %5640 }
0x12ac   :  { %v3060_v33 = vmul.f32 %v5641_v23, %v5635_v40  ;;  %v3047_v15 = vpop.xlane.xlu1 %3046  ;;  %v2999_v24 = vpop.xlane.xlu0 %2998 }
0x12ad   :  { %5642 = vrcp.f32 %v3047_v15  ;;  %v3015_v34 = vsub.f32 %v2991_v4, %v2999_v24  ;;  %v3166_v4 = vadd.f32 %v5450_v38, %v3165_v35 }
0x12ae   :  { %5197 = vmatmul.msk.f32.vlgmr.msra.gmra.mxu1 %vm735_vm11, %v3060_v33 }
0x12af   :  { %v3021_v7 = vmul.f32 1.442695, %v3015_v34  ;;  %5240 = vmatpush.xpose.msk.msra.mxu1 %vm632_vm15, %v3217_v28 }
0x12b1   :  { %5644 = vpow2.f32 %v3021_v7 }
0x12b3   :  { %v5643_v36 = vpop.eup %5642  ;;  %5241 = vmatpush.xpose.msk.msra.mxu1 %vm632_vm15, %v3214_v46 }
0x12b4   :  { %v3002_v43 = vpop.xlane.xlu1 %3001  ;;  %v3050_v45 = vpop.xlane.xlu2 %3049  ;;  %v3061_v10 = vmul.f32 %v5643_v36, %v5637_v58 }
0x12b5   :  { %v3016_v37 = vsub.f32 %v2992_v11, %v3002_v43  ;;  %5646 = vrcp.f32 %v3050_v45  ;;  %v3168_v58 = vpop.f32.mrf.mxu2 }
0x12b6   :  { %5198 = vmatmul.msk.f32.gmra.mxu1 %vm735_vm11, %v3061_v10  ;;  %v3169_v39 = vadd.f32 %v5450_v38, %v3168_v58 }
0x12b7   :  { %v5645_v17 = vpop.eup %5644  ;;  %v3023_v22 = vmul.f32 1.442695, %v3016_v37  ;;  %5242 = vmatpush.xpose.msk.msra.mxu1 %vm632_vm15, %v3211_v5 }
0x12b8   :  { %v3033_v9 = vsel %vm735_vm11, %v5645_v17, 0.0 }
0x12b9   :  { %5648 = vpow2.f32 %v3023_v22  ;;  %3034 = vadd.xlane.f32.xlu0 %v3033_v9 }
0x12bb   :  { %v5647_v3 = vpop.eup %5646 }
0x12bc   :  { %v3005_v49 = vpop.xlane.xlu2 %3004  ;;  %v3062_v44 = vmul.f32 %v5647_v3, %v5639_v12  ;;  %v5225_v12 = vld [vmem:[%s7951_s4 + $0x2b0] sm:$0xff] }
0x12bd   :  { %v3017_v51 = vsub.f32 %v2993_v14, %v3005_v49  ;;  %v3171_v55 = vpop.f32.mrf.mxu2  ;;  %3239 = vmatpush.msrb.mxu3 %v5225_v12  ;;  %v5223_v14 = vld [vmem:[%s7951_s4 + $0x2a0] sm:$0xff] }
0x12be   :  { %5199 = vmatmul.msk.f32.gmra.mxu1 %vm735_vm11, %v3062_v44  ;;  %v3172_v47 = vadd.f32 %v5450_v38, %v3171_v55 }
0x12bf   :  { %v5649_v30 = vpop.eup %5648  ;;  %v3025_v26 = vmul.f32 1.442695, %v3017_v51  ;;  %3240 = vmatpush.msrb.mxu3 %v5224_v16 }
0x12c0   :  { %v3036_v40 = vsel %vm735_vm11, %v5649_v30, 0.0 }
0x12c1   :  { %5650 = vpow2.f32 %v3025_v26  ;;  %3037 = vadd.xlane.f32.xlu1 %v3036_v40  ;;  %3241 = vmatpush.msrb.mxu3 %v5223_v14 }
0x12c5   :  { %v3174_v8 = vpop.f32.mrf.mxu2 }
0x12c6   :  { %5237 = vmatmul.msk.f32.vlgmr.msrb.gmra.mxu1 %vm632_vm15, %v3160_v63  ;;  %v3175_v11 = vadd.f32 %v5450_v38, %v3174_v8 }
0x12c7   :  { %v5651_v50 = vpop.eup %5650 }
0x12c8   :  { %v3039_v54 = vsel %vm735_vm11, %v5651_v50, 0.0 }
0x12c9   :  { %3040 = vadd.xlane.f32.xlu2 %v3039_v54  ;;  %v5200_v54 = vld [vmem:[%s7953_s6 + $0x20] sm:$0xff] }
0x12ca   :  { %3585 = vmatpush.msrb.mxu1 %v5200_v54 }
0x12ce   :  { %5238 = vmatmul.msk.f32.gmra.mxu1 %vm632_vm15, %v3163_v29 }
0x12d6   :  { %5239 = vmatmul.msk.f32.gmra.mxu1 %vm632_vm15, %v3166_v4 }
0x12de   :  { %5243 = vmatmul.msk.f32.vlgmr.msra.gmra.mxu1 %vm632_vm15, %v3169_v39 }
0x12e6   :  { %5244 = vmatmul.msk.f32.gmra.mxu1 %vm632_vm15, %v3172_v47 }
0x12ee   :  { %5245 = vmatmul.msk.f32.gmra.mxu1 %vm632_vm15, %v3175_v11 }
0x132b   :  { %v7328_v6 = vpop.f32.mrf.mxu1 }
0x132c   :  { %v3035_v56 = vpop.xlane.xlu0 %3034 }
0x132d   :  { %5652 = vrcp.f32 %v3035_v56 }
0x1333   :  { %v5653_v19 = vpop.eup %5652  ;;  %v7333_v20 = vpop.f32.mrf.mxu1 }
0x1334   :  { %v3057_v2 = vmul.f32 %v5653_v19, %v5645_v17  ;;  %v3038_v27 = vpop.xlane.xlu1 %3037 }
0x1335   :  { %5654 = vrcp.f32 %v3038_v27 }
0x1336   :  { %5194 = vmatmul.msk.f32.vlgmr.msra.gmra.mxu3 %vm735_vm11, %v3057_v2 }
0x133b   :  { %v5655_v0 = vpop.eup %5654  ;;  %v7336_v23 = vpop.f32.mrf.mxu1 }
0x133c   :  { %v3041_v33 = vpop.xlane.xlu2 %3040  ;;  %v3058_v15 = vmul.f32 %v5655_v0, %v5649_v30 }
0x133d   :  { %5656 = vrcp.f32 %v3041_v33 }
0x133e   :  { %5195 = vmatmul.msk.f32.gmra.mxu3 %vm735_vm11, %v3058_v15 }
0x1343   :  { %v5657_v24 = vpop.eup %5656  ;;  %v3296_v28 = vpop.f32.mrf.mxu1 }
0x1344   :  { %v3059_v34 = vmul.f32 %v5657_v24, %v5651_v50  ;;  %v3349_v5 = vmul.f32 0.35355338, %v3296_v28 }
0x1346   :  { %5196 = vmatmul.msk.f32.gmra.mxu3 %vm735_vm11, %v3059_v34  ;;  %v3355_v42 = vsel %vm47_vm10, %v3349_v5, -1e+30 }
0x1347   :  { %v3361_v9 = vsel %vm735_vm11, %v3355_v42, -inf }
0x134b   :  { %v3299_v7 = vpop.f32.mrf.mxu1 }
0x134c   :  { %v3350_v49 = vmul.f32 0.35355338, %v3299_v7 }
0x134e   :  { %5228 = vmatmul.msk.f32.vlgmr.msrb.gmra.mxu3 %vm181_vm1, %v7131_v1  ;;  %v3356_v30 = vsel %vm47_vm10, %v3350_v49, -1e+30 }
0x134f   :  { %v3364_v38 = vsel %vm735_vm11, %v3356_v30, -inf }
0x1353   :  { %v3302_v46 = vpop.f32.mrf.mxu1 }
0x1354   :  { %v3351_v53 = vmul.f32 0.35355338, %v3302_v46 }
0x1356   :  { %5229 = vmatmul.msk.f32.gmra.mxu3 %vm181_vm1, %v7144_v32  ;;  %v3357_v63 = vsel %vm47_vm10, %v3351_v53, -1e+30  ;;  %v5279_v53 = vld [vmem:[%s7951_s4 + $0x258] sm:$0xff] }
0x1357   :  { %v3367_v50 = vsel %vm735_vm11, %v3357_v63, -inf }
0x135b   :  { %v3340_v36 = vpop.f32.mrf.mxu1 }
0x135c   :  { %v3352_v43 = vmul.f32 0.35355338, %v3340_v36 }
0x135e   :  { %5230 = vmatmul.msk.f32.gmra.mxu3 %vm181_vm1, %v7165_v62  ;;  %v3358_v45 = vsel %vm47_vm10, %v3352_v43, -1e+30 }
0x135f   :  { %v3370_v10 = vsel %vm735_vm11, %v3358_v45, -inf }
0x1360   :  { %3371 = vmax.xlane.f32.xlu0 %v3370_v10 }
0x1363   :  { %v3343_v37 = vpop.f32.mrf.mxu1 }
0x1364   :  { %v3353_v17 = vmul.f32 0.35355338, %v3343_v37 }
0x1366   :  { %5231 = vmatmul.msk.f32.gmra.mxu3 %vm181_vm1, %v7179_v21  ;;  %v3359_v22 = vsel %vm47_vm10, %v3353_v17, -1e+30 }
0x1367   :  { %v3373_v3 = vsel %vm735_vm11, %v3359_v22, -inf }
0x1368   :  { %3362 = vmax.xlane.f32.xlu0 %v3361_v9  ;;  %3374 = vmax.xlane.f32.xlu1 %v3373_v3 }
0x136b   :  { %v3346_v44 = vpop.f32.mrf.mxu1 }
0x136c   :  { %v3354_v51 = vmul.f32 0.35355338, %v3346_v44 }
0x136e   :  { %5232 = vmatmul.msk.f32.gmra.mxu3 %vm181_vm1, %v7190_v18  ;;  %v3360_v26 = vsel %vm47_vm10, %v3354_v51, -1e+30 }
0x136f   :  { %v3376_v40 = vsel %vm735_vm11, %v3360_v26, -inf }
0x1370   :  { %3365 = vmax.xlane.f32.xlu1 %v3364_v38  ;;  %3377 = vmax.xlane.f32.xlu2 %v3376_v40 }
0x1376   :  { %5233 = vmatmul.msk.f32.gmra.mxu3 %vm181_vm1, %v7201_v41 }
0x1378   :  { %3368 = vmax.xlane.f32.xlu2 %v3367_v50  ;;  %v5277_v50 = vld [vmem:[%s7951_s4 + $0x248] sm:$0xff] }
0x13b9   :  { %v3089_v35 = vpop.f32.mrf.mxu3 }
0x13ba   :  { %5259 = vmatmul.msk.f32.vlgmr.msrb.gmra.mxu1 %vm632_vm15, %v3089_v35  ;;  %v5276_v35 = vld [vmem:[%s7951_s4 + $0x240] sm:$0xff] }
0x13c1   :  { %v3092_v29 = vpop.f32.mrf.mxu3 }
0x13c2   :  { %5260 = vmatmul.msk.f32.gmra.mxu1 %vm632_vm15, %v3092_v29  ;;  %v5268_v29 = vld [vmem:[%s7951_s4 + $0x1d8] sm:$0xff] }
0x13c9   :  { %v3095_v4 = vpop.f32.mrf.mxu3 }
0x13ca   :  { %5261 = vmatmul.msk.f32.gmra.mxu1 %vm632_vm15, %v3095_v4  ;;  %v5267_v4 = vld [vmem:[%s7951_s4 + $0x1d0] sm:$0xff] }
0x13d1   :  { %v3243_v58 = vpop.f32.mrf.mxu3 }
0x13d2   :  { %5262 = vmatmul.msk.f32.gmra.mxu1 %vm632_vm15, %v7328_v6  ;;  %v5451_v6 = vld [vmem:[%s7952_s5 + $0x15] ss:$0 sm:$0xff] }
0x13d3   :  { %v3372_v39 = vpop.xlane.xlu0 %3371  ;;  %v3244_v7 = vadd.f32 %v5451_v6, %v3243_v58  ;;  %v5266_v58 = vld [vmem:[%s7951_s4 + $0x1c8] sm:$0xff] }
0x13d4   :  { %v3382_v55 = vsub.f32 %v3358_v45, %v3372_v39 }
0x13d6   :  { %v3391_v47 = vmul.f32 1.442695, %v3382_v55 }
0x13d8   :  { %5658 = vpow2.f32 %v3391_v47 }
0x13d9   :  { %v3246_v8 = vpop.f32.mrf.mxu3 }
0x13da   :  { %5263 = vmatmul.msk.f32.gmra.mxu1 %vm632_vm15, %v7333_v20  ;;  %v3247_v15 = vadd.f32 %v5451_v6, %v3246_v8  ;;  %v5265_v8 = vld [vmem:[%s7951_s4 + $0x1c0] sm:$0xff] }
0x13db   :  { %v3363_v11 = vpop.xlane.xlu0 %3362  ;;  %v3375_v25 = vpop.xlane.xlu1 %3374 }
0x13dc   :  { %v3379_v12 = vsub.f32 %v3355_v42, %v3363_v11  ;;  %v3383_v16 = vsub.f32 %v3359_v22, %v3375_v25 }
0x13de   :  { %v7380_v56 = vpop.eup %5658  ;;  %v3385_v14 = vmul.f32 1.442695, %v3379_v12  ;;  %v3393_v19 = vmul.f32 1.442695, %v3383_v16 }
0x13df   :  { %v3406_v2 = vsel %vm735_vm11, %v7380_v56, 0.0 }
0x13e0   :  { %5660 = vpow2.f32 %v3385_v14  ;;  %3407 = vadd.xlane.f32.xlu0 %v3406_v2 }
0x13e1   :  { %5662 = vpow2.f32 %v3393_v19  ;;  %v3249_v27 = vpop.f32.mrf.mxu3 }
0x13e2   :  { %v3250_v20 = vadd.f32 %v5451_v6, %v3249_v27  ;;  %5264 = vmatmul.msk.f32.gmra.mxu1 %vm632_vm15, %v7336_v23 }
0x13e3   :  { %v3366_v0 = vpop.xlane.xlu1 %3365  ;;  %v3378_v33 = vpop.xlane.xlu2 %3377 }
0x13e4   :  { %v3380_v24 = vsub.f32 %v3356_v30, %v3366_v0  ;;  %v3384_v28 = vsub.f32 %v3360_v26, %v3378_v33  ;;  %3449 = vmatpush.msra.mxu2 %v3250_v20 }
0x13e6   :  { %v5661_v34 = vpop.eup %5660  ;;  %v3387_v46 = vmul.f32 1.442695, %v3380_v24  ;;  %v3395_v36 = vmul.f32 1.442695, %v3384_v28  ;;  %3450 = vmatpush.msra.mxu2 %v3247_v15  ;;  %v5252_v24 = vld [vmem:[%s7953_s6 + $0x28] sm:$0xff] }
0x13e7   :  { %v5663_v43 = vpop.eup %5662  ;;  %v3397_v45 = vsel %vm735_vm11, %v5661_v34, 0.0  ;;  %3532 = vmatpush.msra.mxu3 %v5252_v24 }
0x13e8   :  { %5664 = vpow2.f32 %v3387_v46  ;;  %3398 = vadd.xlane.f32.xlu0 %v3397_v45  ;;  %v3409_v10 = vsel %vm735_vm11, %v5663_v43, 0.0  ;;  %3451 = vmatpush.msra.mxu2 %v3244_v7 }
0x13e9   :  { %5666 = vpow2.f32 %v3395_v36  ;;  %3410 = vadd.xlane.f32.xlu1 %v3409_v10  ;;  %v3252_v23 = vpop.f32.mrf.mxu3  ;;  %v5289_v10 = vld [vmem:[%s7951_s4 + $0x2d0] sm:$0xff] }
0x13ea   :  { %v3253_v40 = vadd.f32 %v5451_v6, %v3252_v23  ;;  %3624 = vmatpush.msrb.mxu2 %v5268_v29  ;;  %v5288_v23 = vld [vmem:[%s7951_s4 + $0x2c8] sm:$0xff] }
0x13eb   :  { %v3369_v5 = vpop.xlane.xlu2 %3368 }
0x13ec   :  { %v3381_v37 = vsub.f32 %v3357_v63, %v3369_v5  ;;  %v5278_v63 = vld [vmem:[%s7951_s4 + $0x250] sm:$0xff]  ;;  %3625 = vmatpush.msrb.mxu2 %v5267_v4 }
0x13ee   :  { %v5665_v17 = vpop.eup %5664  ;;  %v3389_v42 = vmul.f32 1.442695, %v3381_v37  ;;  %3626 = vmatpush.msrb.mxu2 %v5266_v58  ;;  %v5287_v37 = vld [vmem:[%s7951_s4 + $0x2c0] sm:$0xff]  ;;  %v5337_v58 = vld [vmem:[%s7951_s4 + $0x278] sm:$0xff] }
0x13ef   :  { %v5667_v22 = vpop.eup %5666  ;;  %v3400_v9 = vsel %vm735_vm11, %v5665_v17, 0.0 }
0x13f0   :  { %5668 = vpow2.f32 %v3389_v42  ;;  %v3412_v3 = vsel %vm735_vm11, %v5667_v22, 0.0  ;;  %3627 = vmatpush.msrb.mxu2 %v5265_v8  ;;  %v5452_v42 = vld [vmem:[%s7952_s5 + $0x12] ss:$0 sm:$0xff]  ;;  %v5334_v8 = vld [vmem:[%s7951_s4 + $0x260] sm:$0xff] }
0x13f1   :  { %3401 = vadd.xlane.f32.xlu1 %v3400_v9  ;;  %3413 = vadd.xlane.f32.xlu2 %v3412_v3  ;;  %v3255_v49 = vpop.f32.mrf.mxu3 }
0x13f2   :  { %v3256_v38 = vadd.f32 %v5451_v6, %v3255_v49 }
0x13f6   :  { %v5669_v44 = vpop.eup %5668 }
0x13f7   :  { %v3403_v51 = vsel %vm735_vm11, %v5669_v44, 0.0 }
0x13f9   :  { %3404 = vadd.xlane.f32.xlu2 %v3403_v51  ;;  %v3258_v30 = vpop.f32.mrf.mxu3 }
0x13fa   :  { %v3259_v26 = vadd.f32 %v5451_v6, %v3258_v30 }
0x13fc   :  { %3484 = vmatpush.msrb.mxu0 %v3259_v26 }
0x13fe   :  { %3485 = vmatpush.msrb.mxu0 %v3256_v38 }
0x1400   :  { %3486 = vmatpush.msrb.mxu0 %v3253_v40 }
0x1402   :  { %3666 = vmatpush.msra.mxu0 %v5279_v53 }
0x1404   :  { %3667 = vmatpush.msra.mxu0 %v5278_v63 }
0x1406   :  { %3668 = vmatpush.msra.mxu0 %v5277_v50 }
0x1408   :  { %3669 = vmatpush.msra.mxu0 %v5276_v35 }
0x1453   :  { %v3408_v54 = vpop.xlane.xlu0 %3407 }
0x1454   :  { %5670 = vrcp.f32 %v3408_v54 }
0x145a   :  { %v5671_v39 = vpop.eup %5670 }
0x145b   :  { %v3424_v55 = vmul.f32 %v5671_v39, %v7380_v56  ;;  %v3399_v47 = vpop.xlane.xlu0 %3398  ;;  %v5336_v39 = vld [vmem:[%s7951_s4 + $0x270] sm:$0xff] }
0x145c   :  { %5672 = vrcp.f32 %v3399_v47  ;;  %v3411_v11 = vpop.xlane.xlu1 %3410 }
0x145d   :  { %5674 = vrcp.f32 %v3411_v11  ;;  %5249 = vmatmul.msk.f32.vlgmr.msrb.gmra.mxu0 %vm735_vm11, %v3424_v55  ;;  %v5335_v55 = vld [vmem:[%s7951_s4 + $0x268] sm:$0xff] }
0x1462   :  { %v5673_v25 = vpop.eup %5672 }
0x1463   :  { %v5675_v12 = vpop.eup %5674  ;;  %v3421_v16 = vmul.f32 %v5673_v25, %v5661_v34 }
0x1464   :  { %v3402_v14 = vpop.xlane.xlu1 %3401  ;;  %v3414_v19 = vpop.xlane.xlu2 %3413  ;;  %v3425_v2 = vmul.f32 %v5675_v12, %v5663_v43  ;;  %v5290_v43 = vld [vmem:[%s7951_s4 + $0x2d8] sm:$0xff] }
0x1465   :  { %5676 = vrcp.f32 %v3402_v14  ;;  %5246 = vmatmul.msk.f32.vlgmr.msra.gmra.mxu2 %vm735_vm11, %v3421_v16  ;;  %3708 = vmatpush.msrb.mxu3 %v5290_v43 }
0x1466   :  { %5678 = vrcp.f32 %v3414_v19  ;;  %5250 = vmatmul.msk.f32.gmra.mxu0 %vm735_vm11, %v3425_v2  ;;  %v7516_v19 = vpop.f32.mrf.mxu1 }
0x1467   :  { %3709 = vmatpush.msrb.mxu3 %v5289_v10 }
0x1469   :  { %3710 = vmatpush.msrb.mxu3 %v5288_v23 }
0x146b   :  { %v5677_v56 = vpop.eup %5676  ;;  %3711 = vmatpush.msrb.mxu3 %v5287_v37 }
0x146c   :  { %v5679_v6 = vpop.eup %5678  ;;  %v3405_v27 = vpop.xlane.xlu2 %3404  ;;  %v3422_v20 = vmul.f32 %v5677_v56, %v5665_v17 }
0x146d   :  { %5680 = vrcp.f32 %v3405_v27  ;;  %v3426_v0 = vmul.f32 %v5679_v6, %v5667_v22 }
0x146e   :  { %5247 = vmatmul.msk.f32.gmra.mxu2 %vm735_vm11, %v3422_v20  ;;  %v7520_v2 = vpop.f32.mrf.mxu1 }
0x146f   :  { %5251 = vmatmul.msk.f32.gmra.mxu0 %vm735_vm11, %v3426_v0 }
0x1473   :  { %v5681_v33 = vpop.eup %5680 }
0x1474   :  { %v3423_v15 = vmul.f32 %v5681_v33, %v5669_v44  ;;  %v5453_v44 = vld [vmem:[%s7952_s5 + $0xe] ss:$0 sm:$0xff] }
0x1476   :  { %5248 = vmatmul.msk.f32.gmra.mxu2 %vm735_vm11, %v3423_v15  ;;  %v7524_v56 = vpop.f32.mrf.mxu1 }
0x1477   :  { %5281 = vmatmul.msk.f32.vlgmr.msra.gmra.mxu0 %vm181_vm1, %v7131_v1 }
0x147e   :  { %5270 = vmatmul.msk.f32.vlgmr.msrb.gmra.mxu2 %vm181_vm1, %v7131_v1  ;;  %v7532_v27 = vpop.f32.mrf.mxu1 }
0x147f   :  { %5282 = vmatmul.msk.f32.gmra.mxu0 %vm181_vm1, %v7144_v32 }
0x1486   :  { %5271 = vmatmul.msk.f32.gmra.mxu2 %vm181_vm1, %v7144_v32  ;;  %v7536_v0 = vpop.f32.mrf.mxu1 }
0x1487   :  { %5283 = vmatmul.msk.f32.gmra.mxu0 %vm181_vm1, %v7165_v62 }
0x148e   :  { %5272 = vmatmul.msk.f32.gmra.mxu2 %vm181_vm1, %v7165_v62  ;;  %v3602_v24 = vpop.f32.mrf.mxu1 }
0x148f   :  { %5284 = vmatmul.msk.f32.gmra.mxu0 %vm181_vm1, %v7179_v21 }
0x1496   :  { %5273 = vmatmul.msk.f32.gmra.mxu2 %vm181_vm1, %v7179_v21 }
0x1497   :  { %5285 = vmatmul.msk.f32.gmra.mxu0 %vm181_vm1, %v7190_v18 }
0x149e   :  { %5274 = vmatmul.msk.f32.gmra.mxu2 %vm181_vm1, %v7190_v18 }
0x149f   :  { %5286 = vmatmul.msk.f32.gmra.mxu0 %vm181_vm1, %v7201_v41 }
0x14a6   :  { %5275 = vmatmul.msk.f32.gmra.mxu2 %vm181_vm1, %v7201_v41 }
0x14da   :  { %v3488_v28 = vpop.f32.mrf.mxu0 }
0x14e3   :  { %v3491_v34 = vpop.f32.mrf.mxu0 }
0x14e8   :  { %v3453_v7 = vpop.f32.mrf.mxu2 }
0x14e9   :  { %5253 = vmatmul.msk.f32.vlgmr.msra.gmra.mxu3 %vm632_vm15, %v3453_v7 }
0x14ea   :  { %4089 = vmatpush.msra.mxu3 %v5337_v58 }
0x14ec   :  { %v3494_v46 = vpop.f32.mrf.mxu0  ;;  %4090 = vmatpush.msra.mxu3 %v5336_v39 }
0x14ee   :  { %4091 = vmatpush.msra.mxu3 %v5335_v55 }
0x14f0   :  { %4092 = vmatpush.msra.mxu3 %v5334_v8  ;;  %v5316_v8 = vld [vmem:[%s7953_s6 + $0x30] sm:$0xff] }
0x14f1   :  { %v3456_v36 = vpop.f32.mrf.mxu2 }
0x14f2   :  { %5254 = vmatmul.msk.f32.gmra.mxu3 %vm632_vm15, %v3456_v36 }
0x14f4   :  { %v3671_v45 = vpop.f32.mrf.mxu0 }
0x14f5   :  { %v3672_v30 = vadd.f32 %v5452_v42, %v3671_v45 }
0x14f9   :  { %v3459_v5 = vpop.f32.mrf.mxu2 }
0x14fa   :  { %5255 = vmatmul.msk.f32.gmra.mxu3 %vm632_vm15, %v3459_v5 }
0x14fc   :  { %v3674_v17 = vpop.f32.mrf.mxu0 }
0x14fd   :  { %v3675_v49 = vadd.f32 %v5452_v42, %v3674_v17 }
0x1501   :  { %v3629_v22 = vpop.f32.mrf.mxu2 }
0x1502   :  { %5256 = vmatmul.msk.f32.gmra.mxu3 %vm632_vm15, %v3488_v28  ;;  %v3630_v38 = vadd.f32 %v5453_v44, %v3629_v22 }
0x1504   :  { %v3677_v9 = vpop.f32.mrf.mxu0 }
0x1505   :  { %v3678_v3 = vadd.f32 %v5452_v42, %v3677_v9 }
0x1507   :  { %5298 = vmatpush.xpose.msk.msra.mxu1 %vm632_vm15, %v3678_v3 }
0x1509   :  { %v3632_v26 = vpop.f32.mrf.mxu2 }
0x150a   :  { %5257 = vmatmul.msk.f32.gmra.mxu3 %vm632_vm15, %v3491_v34  ;;  %v3633_v63 = vadd.f32 %v5453_v44, %v3632_v26 }
0x150b   :  { %5299 = vmatpush.xpose.msk.msra.mxu1 %vm632_vm15, %v3675_v49 }
0x150c   :  { %v3680_v51 = vpop.f32.mrf.mxu0 }
0x150d   :  { %v3681_v47 = vadd.f32 %v5452_v42, %v3680_v51 }
0x150f   :  { %5300 = vmatpush.xpose.msk.msra.mxu1 %vm632_vm15, %v3672_v30 }
0x1511   :  { %v3635_v53 = vpop.f32.mrf.mxu2 }
0x1512   :  { %5301 = vmatmul.msk.f32.vlgmr.msra.gmra.mxu1 %vm632_vm15, %v3630_v38  ;;  %5258 = vmatmul.msk.f32.gmra.mxu3 %vm632_vm15, %v3494_v46  ;;  %v3636_v35 = vadd.f32 %v5453_v44, %v3635_v53 }
0x1514   :  { %v3683_v40 = vpop.f32.mrf.mxu0 }
0x1515   :  { %v3684_v29 = vadd.f32 %v5452_v42, %v3683_v40 }
0x1519   :  { %v3638_v4 = vpop.f32.mrf.mxu2 }
0x151a   :  { %5302 = vmatmul.msk.f32.gmra.mxu1 %vm632_vm15, %v3633_v63  ;;  %5292 = vmatmul.msk.f32.vlgmr.msrb.gmra.mxu3 %vm181_vm1, %v7131_v1  ;;  %v3639_v11 = vadd.f32 %v5453_v44, %v3638_v4 }
0x151c   :  { %v3686_v50 = vpop.f32.mrf.mxu0 }
0x151d   :  { %v3687_v54 = vadd.f32 %v5452_v42, %v3686_v50 }
0x151f   :  { %5304 = vmatpush.xpose.msk.msra.mxu2 %vm632_vm15, %v3687_v54 }
0x1521   :  { %v3641_v25 = vpop.f32.mrf.mxu2 }
0x1522   :  { %5303 = vmatmul.msk.f32.gmra.mxu1 %vm632_vm15, %v3636_v35  ;;  %5293 = vmatmul.msk.f32.gmra.mxu3 %vm181_vm1, %v7144_v32  ;;  %v3642_v12 = vadd.f32 %v5453_v44, %v3641_v25 }
0x1523   :  { %5305 = vmatpush.xpose.msk.msra.mxu2 %vm632_vm15, %v3684_v29 }
0x1527   :  { %5306 = vmatpush.xpose.msk.msra.mxu2 %vm632_vm15, %v3681_v47 }
0x1529   :  { %v3644_v16 = vpop.f32.mrf.mxu2 }
0x152a   :  { %5307 = vmatmul.msk.f32.vlgmr.msra.gmra.mxu2 %vm632_vm15, %v3639_v11  ;;  %5294 = vmatmul.msk.f32.gmra.mxu3 %vm181_vm1, %v7165_v62  ;;  %v3645_v14 = vadd.f32 %v5453_v44, %v3644_v16  ;;  %v5454_v44 = vld [vmem:[%s7952_s5 + $0x16] ss:$0 sm:$0xff] }
0x152b   :  { %4002 = vmatpush.msrb.mxu2 %v5316_v8 }
0x1532   :  { %5308 = vmatmul.msk.f32.gmra.mxu2 %vm632_vm15, %v3642_v12  ;;  %5295 = vmatmul.msk.f32.gmra.mxu3 %vm181_vm1, %v7179_v21 }
0x153a   :  { %5309 = vmatmul.msk.f32.gmra.mxu2 %vm632_vm15, %v3645_v14  ;;  %5296 = vmatmul.msk.f32.gmra.mxu3 %vm181_vm1, %v7190_v18 }
0x1542   :  { %5297 = vmatmul.msk.f32.gmra.mxu3 %vm181_vm1, %v7201_v41 }
0x154a   :  { %5339 = vmatmul.msk.f32.vlgmr.msra.gmra.mxu3 %vm181_vm1, %v7131_v1 }
0x1552   :  { %5340 = vmatmul.msk.f32.gmra.mxu3 %vm181_vm1, %v7144_v32 }
0x155a   :  { %5341 = vmatmul.msk.f32.gmra.mxu3 %vm181_vm1, %v7165_v62 }
0x1562   :  { %5342 = vmatmul.msk.f32.gmra.mxu3 %vm181_vm1, %v7179_v21 }
0x156a   :  { %5343 = vmatmul.msk.f32.gmra.mxu3 %vm181_vm1, %v7190_v18 }
0x156c   :  { %v7528_v6 = vpop.f32.mrf.mxu3 }
0x1572   :  { %5344 = vmatmul.msk.f32.gmra.mxu3 %vm181_vm1, %v7201_v41 }
0x1575   :  { %v7534_v20 = vpop.f32.mrf.mxu3 }
0x157d   :  { %v7538_v33 = vpop.f32.mrf.mxu3 }
0x1585   :  { %v7540_v15 = vpop.f32.mrf.mxu3 }
0x158d   :  { %v7542_v28 = vpop.f32.mrf.mxu3 }
0x158f   :  { %v3766_v34 = vpop.f32.mrf.mxu1 }
0x1590   :  { %v3819_v7 = vmul.f32 0.35355338, %v3766_v34 }
0x1592   :  { %v7546_v46 = vsel %vm47_vm10, %v3819_v7, -1e+30 }
0x1593   :  { %v3831_v36 = vsel %vm735_vm11, %v7546_v46, -inf }
0x1594   :  { %3832 = vmax.xlane.f32.xlu0 %v3831_v36  ;;  %v7576_v36 = vld [vmem:[%s7952_s5 + $0x13] ss:$0 sm:$0xff] }
0x1595   :  { %v3549_v43 = vpop.f32.mrf.mxu3 }
0x1596   :  { %v7550_v45 = vadd.f32 %v3602_v24, %v3549_v43 }
0x1597   :  { %v3769_v10 = vpop.f32.mrf.mxu1 }
0x1598   :  { %v3820_v23 = vmul.f32 0.35355338, %v3769_v10 }
0x159a   :  { %v3826_v5 = vsel %vm47_vm10, %v3820_v23, -1e+30 }
0x159b   :  { %v3834_v37 = vsel %vm735_vm11, %v3826_v5, -inf }
0x159c   :  { %3835 = vmax.xlane.f32.xlu1 %v3834_v37 }
0x159d   :  { %v3713_v17 = vpop.f32.mrf.mxu3 }
0x159e   :  { %v3714_v50 = vadd.f32 %v5454_v44, %v3713_v17 }
0x159f   :  { %v3772_v42 = vpop.f32.mrf.mxu1 }
0x15a0   :  { %v3821_v22 = vmul.f32 0.35355338, %v3772_v42 }
0x15a2   :  { %v3827_v9 = vsel %vm47_vm10, %v3821_v22, -1e+30 }
0x15a3   :  { %v3837_v3 = vsel %vm735_vm11, %v3827_v9, -inf }
0x15a4   :  { %3838 = vmax.xlane.f32.xlu2 %v3837_v3 }
0x15a5   :  { %v3716_v49 = vpop.f32.mrf.mxu3 }
0x15a6   :  { %v3717_v40 = vadd.f32 %v5454_v44, %v3716_v49 }
0x15ad   :  { %v3810_v51 = vpop.f32.mrf.mxu2  ;;  %v3719_v30 = vpop.f32.mrf.mxu3 }
0x15ae   :  { %v3822_v26 = vmul.f32 0.35355338, %v3810_v51  ;;  %v3720_v38 = vadd.f32 %v5454_v44, %v3719_v30 }
0x15b0   :  { %3919 = vmatpush.msrb.mxu0 %v3720_v38  ;;  %v3828_v53 = vsel %vm47_vm10, %v3822_v26, -1e+30 }
0x15b1   :  { %v3840_v63 = vsel %vm735_vm11, %v3828_v53, -inf }
0x15b2   :  { %3841 = vmax.xlane.f32.xlu0 %v3840_v63  ;;  %3920 = vmatpush.msrb.mxu0 %v3717_v40 }
0x15b4   :  { %3921 = vmatpush.msrb.mxu0 %v3714_v50 }
0x15b5   :  { %v3813_v54 = vpop.f32.mrf.mxu2  ;;  %v3722_v35 = vpop.f32.mrf.mxu3 }
0x15b6   :  { %v3823_v29 = vmul.f32 0.35355338, %v3813_v54  ;;  %v3723_v24 = vadd.f32 %v5454_v44, %v3722_v35 }
0x15b8   :  { %v3829_v4 = vsel %vm47_vm10, %v3823_v29, -1e+30 }
0x15b9   :  { %v3843_v58 = vsel %vm735_vm11, %v3829_v4, -inf }
0x15ba   :  { %3844 = vmax.xlane.f32.xlu1 %v3843_v58 }
0x15bd   :  { %v3816_v39 = vpop.f32.mrf.mxu2  ;;  %v3725_v55 = vpop.f32.mrf.mxu3 }
0x15be   :  { %v3824_v47 = vmul.f32 0.35355338, %v3816_v39  ;;  %v3726_v14 = vadd.f32 %v5454_v44, %v3725_v55 }
0x15c0   :  { %v3830_v11 = vsel %vm47_vm10, %v3824_v47, -1e+30 }
0x15c1   :  { %v3846_v25 = vsel %vm735_vm11, %v3830_v11, -inf }
0x15c2   :  { %3847 = vmax.xlane.f32.xlu2 %v3846_v25 }
0x15c5   :  { %v3728_v12 = vpop.f32.mrf.mxu3 }
0x15c6   :  { %v3729_v16 = vadd.f32 %v5454_v44, %v3728_v12 }
0x15c8   :  { %3954 = vmatpush.msrb.mxu1 %v3729_v16 }
0x15ca   :  { %3955 = vmatpush.msrb.mxu1 %v3726_v14 }
0x15cc   :  { %3956 = vmatpush.msrb.mxu1 %v3723_v24 }
0x15cd   :  { %v4094_v34 = vpop.f32.mrf.mxu3 }
0x15ce   :  { %v4095_v37 = vadd.f32 %v7576_v36, %v4094_v34  ;;  %v5325_v34 = vld [vmem:[%s7951_s4 + $0x1f0] sm:$0xff] }
0x15d5   :  { %v4097_v7 = vpop.f32.mrf.mxu3 }
0x15d6   :  { %v4098_v23 = vadd.f32 %v7576_v36, %v4097_v7  ;;  %v5323_v7 = vld [vmem:[%s7951_s4 + $0x1e0] sm:$0xff] }
0x15dd   :  { %v4100_v43 = vpop.f32.mrf.mxu3 }
0x15de   :  { %v4101_v10 = vadd.f32 %v7576_v36, %v4100_v43 }
0x15e0   :  { %5356 = vmatpush.xpose.msk.msra.mxu2 %vm632_vm15, %v4101_v10 }
0x15e4   :  { %5357 = vmatpush.xpose.msk.msra.mxu2 %vm632_vm15, %v4098_v23 }
0x15e5   :  { %v4103_v43 = vpop.f32.mrf.mxu3 }
0x15e8   :  { %5358 = vmatpush.xpose.msk.msra.mxu2 %vm632_vm15, %v4095_v37 }
0x15ed   :  { %v4106_v10 = vpop.f32.mrf.mxu3 }
0x15f5   :  { %v4109_v37 = vpop.f32.mrf.mxu3 }
0x1607   :  { %v3833_v17 = vpop.xlane.xlu0 %3832 }
0x1608   :  { %v3849_v42 = vsub.f32 %v7546_v46, %v3833_v17 }
0x160a   :  { %v3855_v22 = vmul.f32 1.442695, %v3849_v42 }
0x160c   :  { %5682 = vpow2.f32 %v3855_v22 }
0x160f   :  { %v3836_v3 = vpop.xlane.xlu1 %3835 }
0x1610   :  { %v3850_v49 = vsub.f32 %v3826_v5, %v3836_v3  ;;  %v4110_v3 = vadd.f32 %v7576_v36, %v4109_v37 }
0x1612   :  { %v5683_v44 = vpop.eup %5682  ;;  %v3857_v51 = vmul.f32 1.442695, %v3850_v49  ;;  %v4107_v49 = vadd.f32 %v7576_v36, %v4106_v10 }
0x1613   :  { %v3867_v30 = vsel %vm735_vm11, %v5683_v44, 0.0 }
0x1614   :  { %5684 = vpow2.f32 %v3857_v51  ;;  %3868 = vadd.xlane.f32.xlu0 %v3867_v30 }
0x1617   :  { %v3839_v26 = vpop.xlane.xlu2 %3838 }
0x1618   :  { %v3851_v38 = vsub.f32 %v3827_v9, %v3839_v26 }
0x161a   :  { %v5685_v40 = vpop.eup %5684  ;;  %v3859_v63 = vmul.f32 1.442695, %v3851_v38  ;;  %v4104_v38 = vadd.f32 %v7576_v36, %v4103_v43  ;;  %v5346_v36 = vld [vmem:[%s7951_s4 + $0x2e8] sm:$0xff] }
0x161b   :  { %v3870_v50 = vsel %vm735_vm11, %v5685_v40, 0.0 }
0x161c   :  { %5686 = vpow2.f32 %v3859_v63  ;;  %3871 = vadd.xlane.f32.xlu1 %v3870_v50  ;;  %v5348_v50 = vld [vmem:[%s7951_s4 + $0x2f8] sm:$0xff] }
0x161d   :  { %4131 = vmatpush.msra.mxu1 %v5348_v50 }
0x1622   :  { %v5687_v54 = vpop.eup %5686 }
0x1623   :  { %v3873_v46 = vsel %vm735_vm11, %v5687_v54, 0.0 }
0x1624   :  { %3874 = vadd.xlane.f32.xlu2 %v3873_v46 }
0x1625   :  { %v3842_v35 = vpop.xlane.xlu0 %3841 }
0x1626   :  { %v3852_v5 = vsub.f32 %v3828_v53, %v3842_v35 }
0x1628   :  { %v3861_v29 = vmul.f32 1.442695, %v3852_v5 }
0x162a   :  { %5688 = vpow2.f32 %v3861_v29 }
0x162d   :  { %v3845_v58 = vpop.xlane.xlu1 %3844 }
0x162e   :  { %v3853_v39 = vsub.f32 %v3829_v4, %v3845_v58  ;;  %v5326_v4 = vld [vmem:[%s7951_s4 + $0x1f8] sm:$0xff] }
0x162f   :  { %4047 = vmatpush.msra.mxu0 %v5326_v4 }
0x1630   :  { %v5689_v55 = vpop.eup %5688  ;;  %v3863_v47 = vmul.f32 1.442695, %v3853_v39 }
0x1631   :  { %v3876_v9 = vsel %vm735_vm11, %v5689_v55, 0.0  ;;  %4048 = vmatpush.msra.mxu0 %v5325_v34 }
0x1632   :  { %5690 = vpow2.f32 %v3863_v47  ;;  %3877 = vadd.xlane.f32.xlu0 %v3876_v9 }
0x1635   :  { %v3848_v8 = vpop.xlane.xlu2 %3847 }
0x1636   :  { %v3854_v25 = vsub.f32 %v3830_v11, %v3848_v8  ;;  %v5324_v11 = vld [vmem:[%s7951_s4 + $0x1e8] sm:$0xff] }
0x1637   :  { %4049 = vmatpush.msra.mxu0 %v5324_v11 }
0x1638   :  { %v5691_v12 = vpop.eup %5690  ;;  %v3865_v16 = vmul.f32 1.442695, %v3854_v25 }
0x1639   :  { %v3879_v14 = vsel %vm735_vm11, %v5691_v12, 0.0  ;;  %4050 = vmatpush.msra.mxu0 %v5323_v7 }
0x163a   :  { %5692 = vpow2.f32 %v3865_v16  ;;  %3880 = vadd.xlane.f32.xlu1 %v3879_v14 }
0x1640   :  { %v5693_v24 = vpop.eup %5692 }
0x1641   :  { %v3882_v53 = vsel %vm735_vm11, %v5693_v24, 0.0 }
0x1642   :  { %3883 = vadd.xlane.f32.xlu2 %v3882_v53 }
0x1687   :  { %v3869_v23 = vpop.xlane.xlu0 %3868 }
0x1688   :  { %5694 = vrcp.f32 %v3869_v23 }
0x168e   :  { %v5695_v17 = vpop.eup %5694 }
0x168f   :  { %v3891_v42 = vmul.f32 %v5695_v17, %v5683_v44  ;;  %v3872_v22 = vpop.xlane.xlu1 %3871  ;;  %v5457_v17 = vld [vmem:[%s7952_s5 + $0x17] ss:$0 sm:$0xff] }
0x1690   :  { %5696 = vrcp.f32 %v3872_v22 }
0x1691   :  { %5310 = vmatmul.msk.f32.vlgmr.msrb.gmra.mxu0 %vm735_vm11, %v3891_v42 }
0x1692   :  { %5362 = vmatpush.xpose.msk.msrb.mxu0 %vm632_vm15, %v4110_v3 }
0x1696   :  { %v5697_v51 = vpop.eup %5696  ;;  %5363 = vmatpush.xpose.msk.msrb.mxu0 %vm632_vm15, %v4107_v49 }
0x1697   :  { %v3875_v30 = vpop.xlane.xlu2 %3874  ;;  %v3892_v26 = vmul.f32 %v5697_v51, %v5685_v40  ;;  %v5347_v40 = vld [vmem:[%s7951_s4 + $0x2f0] sm:$0xff] }
0x1698   :  { %5698 = vrcp.f32 %v3875_v30  ;;  %4132 = vmatpush.msra.mxu1 %v5347_v40 }
0x1699   :  { %5311 = vmatmul.msk.f32.gmra.mxu0 %vm735_vm11, %v3892_v26 }
0x169a   :  { %5364 = vmatpush.xpose.msk.msrb.mxu0 %vm632_vm15, %v4104_v38  ;;  %4133 = vmatpush.msra.mxu1 %v5346_v36 }
0x169e   :  { %v5699_v44 = vpop.eup %5698 }
0x169f   :  { %v3893_v63 = vmul.f32 %v5699_v44, %v5687_v54  ;;  %v5345_v54 = vld [vmem:[%s7951_s4 + $0x2e0] sm:$0xff] }
0x16a0   :  { %4134 = vmatpush.msra.mxu1 %v5345_v54  ;;  %v3597_v54 = vadd.f32 %v7532_v27, %v7540_v15 }
0x16a1   :  { %5312 = vmatmul.msk.f32.gmra.mxu0 %vm735_vm11, %v3893_v63 }
0x16a5   :  { %v3878_v46 = vpop.xlane.xlu0 %3877 }
0x16a6   :  { %5700 = vrcp.f32 %v3878_v46 }
0x16a9   :  { %5328 = vmatmul.msk.f32.vlgmr.msra.gmra.mxu0 %vm181_vm1, %v7131_v1 }
0x16ac   :  { %v5701_v35 = vpop.eup %5700 }
0x16ad   :  { %v3894_v5 = vmul.f32 %v5701_v35, %v5689_v55  ;;  %v3881_v29 = vpop.xlane.xlu1 %3880 }
0x16ae   :  { %5702 = vrcp.f32 %v3881_v29 }
0x16af   :  { %5313 = vmatmul.msk.f32.vlgmr.msrb.gmra.mxu1 %vm735_vm11, %v3894_v5  ;;  %v3600_v5 = vadd.f32 %v7536_v0, %v7542_v28 }
0x16b1   :  { %5329 = vmatmul.msk.f32.gmra.mxu0 %vm181_vm1, %v7144_v32 }
0x16b4   :  { %v5703_v58 = vpop.eup %5702 }
0x16b5   :  { %v3884_v39 = vpop.xlane.xlu2 %3883  ;;  %v3895_v47 = vmul.f32 %v5703_v58, %v5691_v12 }
0x16b6   :  { %5704 = vrcp.f32 %v3884_v39 }
0x16b7   :  { %5314 = vmatmul.msk.f32.gmra.mxu1 %vm735_vm11, %v3895_v47 }
0x16b9   :  { %5330 = vmatmul.msk.f32.gmra.mxu0 %vm181_vm1, %v7165_v62 }
0x16bc   :  { %v5705_v9 = vpop.eup %5704 }
0x16bd   :  { %v3896_v8 = vmul.f32 %v5705_v9, %v5693_v24 }
0x16bf   :  { %5315 = vmatmul.msk.f32.gmra.mxu1 %vm735_vm11, %v3896_v8 }
0x16c1   :  { %5331 = vmatmul.msk.f32.gmra.mxu0 %vm181_vm1, %v7179_v21 }
0x16c7   :  { %5350 = vmatmul.msk.f32.vlgmr.msra.gmra.mxu1 %vm181_vm1, %v7131_v1 }
0x16c9   :  { %5332 = vmatmul.msk.f32.gmra.mxu0 %vm181_vm1, %v7190_v18 }
0x16cf   :  { %5351 = vmatmul.msk.f32.gmra.mxu1 %vm181_vm1, %v7144_v32 }
0x16d1   :  { %5333 = vmatmul.msk.f32.gmra.mxu0 %vm181_vm1, %v7201_v41 }
0x16d7   :  { %5352 = vmatmul.msk.f32.gmra.mxu1 %vm181_vm1, %v7165_v62 }
0x16df   :  { %5353 = vmatmul.msk.f32.gmra.mxu1 %vm181_vm1, %v7179_v21 }
0x16e7   :  { %5354 = vmatmul.msk.f32.gmra.mxu1 %vm181_vm1, %v7190_v18 }
0x16ef   :  { %5355 = vmatmul.msk.f32.gmra.mxu1 %vm181_vm1, %v7201_v41  ;;  %v5456_v41 = vld [vmem:[%s7952_s5 + $0xf] ss:$0 sm:$0xff] }
0x170e   :  { %v3923_v1 = vpop.f32.mrf.mxu0 }
0x170f   :  { %5317 = vmatmul.msk.f32.vlgmr.msrb.gmra.mxu2 %vm632_vm15, %v3923_v1 }
0x1716   :  { %v3926_v55 = vpop.f32.mrf.mxu0 }
0x1717   :  { %5318 = vmatmul.msk.f32.gmra.mxu2 %vm632_vm15, %v3926_v55 }
0x171e   :  { %v3929_v32 = vpop.f32.mrf.mxu0 }
0x171f   :  { %5319 = vmatmul.msk.f32.gmra.mxu2 %vm632_vm15, %v3929_v32 }
0x1726   :  { %v4052_v25 = vpop.f32.mrf.mxu0 }
0x1727   :  { %v4053_v53 = vadd.f32 %v5456_v41, %v4052_v25 }
0x172c   :  { %v3958_v62 = vpop.f32.mrf.mxu1 }
0x172d   :  { %5320 = vmatmul.msk.f32.gmra.mxu2 %vm632_vm15, %v3958_v62 }
0x172e   :  { %v4055_v21 = vpop.f32.mrf.mxu0 }
0x172f   :  { %v4056_v7 = vadd.f32 %v5456_v41, %v4055_v21 }
0x1734   :  { %v3961_v12 = vpop.f32.mrf.mxu1 }
0x1735   :  { %5321 = vmatmul.msk.f32.gmra.mxu2 %vm632_vm15, %v3961_v12 }
0x1736   :  { %v4058_v18 = vpop.f32.mrf.mxu0 }
0x1737   :  { %v4059_v37 = vadd.f32 %v5456_v41, %v4058_v18 }
0x173c   :  { %v3964_v16 = vpop.f32.mrf.mxu1 }
0x173d   :  { %5322 = vmatmul.msk.f32.gmra.mxu2 %vm632_vm15, %v3964_v16 }
0x173e   :  { %v4061_v14 = vpop.f32.mrf.mxu0 }
0x173f   :  { %v4062_v24 = vadd.f32 %v5456_v41, %v4061_v14 }
0x1741   :  { %5365 = vmatmul.msk.f32.vlgmr.msrb.gmra.mxu0 %vm632_vm15, %v4062_v24 }
0x1744   :  { %v4136_v4 = vpop.f32.mrf.mxu1 }
0x1745   :  { %5359 = vmatmul.msk.f32.vlgmr.msra.gmra.mxu2 %vm632_vm15, %v4053_v53  ;;  %v4137_v49 = vadd.f32 %v5457_v17, %v4136_v4 }
0x1746   :  { %v4064_v34 = vpop.f32.mrf.mxu0 }
0x1747   :  { %v4065_v11 = vadd.f32 %v5456_v41, %v4064_v34 }
0x1749   :  { %5366 = vmatmul.msk.f32.gmra.mxu0 %vm632_vm15, %v4065_v11 }
0x174c   :  { %v4139_v43 = vpop.f32.mrf.mxu1 }
0x174d   :  { %5360 = vmatmul.msk.f32.gmra.mxu2 %vm632_vm15, %v4056_v7  ;;  %v4140_v3 = vadd.f32 %v5457_v17, %v4139_v43 }
0x174e   :  { %v4067_v10 = vpop.f32.mrf.mxu0 }
0x174f   :  { %v4068_v23 = vadd.f32 %v5456_v41, %v4067_v10 }
0x1751   :  { %5367 = vmatmul.msk.f32.gmra.mxu0 %vm632_vm15, %v4068_v23 }
0x1754   :  { %v4142_v42 = vpop.f32.mrf.mxu1 }
0x1755   :  { %v4143_v22 = vadd.f32 %v5457_v17, %v4142_v42  ;;  %5361 = vmatmul.msk.f32.gmra.mxu2 %vm632_vm15, %v4059_v37 }
0x1757   :  { %4342 = vmatpush.msrb.mxu3 %v4143_v22 }
0x1759   :  { %4343 = vmatpush.msrb.mxu3 %v4140_v3 }
0x175b   :  { %4344 = vmatpush.msrb.mxu3 %v4137_v49 }
0x175c   :  { %v4145_v51 = vpop.f32.mrf.mxu1 }
0x175d   :  { %v4146_v63 = vadd.f32 %v5457_v17, %v4145_v51 }
0x1764   :  { %v4148_v30 = vpop.f32.mrf.mxu1 }
0x1765   :  { %v4149_v44 = vadd.f32 %v5457_v17, %v4148_v30 }
0x176c   :  { %v4151_v26 = vpop.f32.mrf.mxu1 }
0x176d   :  { %v4152_v38 = vadd.f32 %v5457_v17, %v4151_v26 }
0x176f   :  { %4377 = vmatpush.msrb.mxu1 %v4152_v38 }
0x1771   :  { %4378 = vmatpush.msrb.mxu1 %v4149_v44 }
0x1773   :  { %4379 = vmatpush.msrb.mxu1 %v4146_v63 }
0x1792   :  { %v7669_v50 = vpop.f32.mrf.mxu2 }
0x179a   :  { %v7671_v40 = vpop.f32.mrf.mxu2 }
0x17a2   :  { %v7673_v36 = vpop.f32.mrf.mxu2 }
0x17b0   :  { %v4013_v46 = vpop.f32.mrf.mxu2 }
0x17b1   :  { %v7677_v35 = vadd.f32 %v4013_v46, %v3597_v54 }
0x17b8   :  { %v4016_v29 = vpop.f32.mrf.mxu2 }
0x17b9   :  { %v7681_v58 = vadd.f32 %v4016_v29, %v3600_v5 }
0x17be   :  { %v4233_v1 = vpop.f32.mrf.mxu0 }
0x17bf   :  { %v4245_v15 = vmul.f32 0.35355338, %v4233_v1 }
0x17c0   :  { %v4019_v39 = vpop.f32.mrf.mxu2 }
0x17c1   :  { %v7684_v47 = vadd.f32 %v4019_v39, %v7550_v45  ;;  %v4251_v0 = vsel %vm47_vm10, %v4245_v15, -1e+30 }
0x17c2   :  { %v4263_v45 = vsel %vm735_vm11, %v4251_v0, -inf }
0x17c6   :  { %v4236_v37 = vpop.f32.mrf.mxu0 }
0x17c7   :  { %v4246_v26 = vmul.f32 0.35355338, %v4236_v37 }
0x17c8   :  { %v4189_v9 = vpop.f32.mrf.mxu2 }
0x17c9   :  { %v4242_v8 = vmul.f32 0.35355338, %v4189_v9  ;;  %v4252_v44 = vsel %vm47_vm10, %v4246_v26, -1e+30 }
0x17ca   :  { %v4266_v5 = vsel %vm735_vm11, %v4252_v44, -inf }
0x17cb   :  { %v4248_v55 = vsel %vm47_vm10, %v4242_v8, -1e+30 }
0x17cc   :  { %v4254_v27 = vsel %vm735_vm11, %v4248_v55, -inf }
0x17cd   :  { %4255 = vmax.xlane.f32.xlu0 %v4254_v27 }
0x17ce   :  { %v4239_v38 = vpop.f32.mrf.mxu0 }
0x17cf   :  { %v4247_v46 = vmul.f32 0.35355338, %v4239_v38  ;;  %v5458_v38 = vld [vmem:[%s7954_s7 + $0xc] ss:$0 sm:$0xff] }
0x17d0   :  { %v4192_v32 = vpop.f32.mrf.mxu2 }
0x17d1   :  { %v4243_v25 = vmul.f32 0.35355338, %v4192_v32  ;;  %v4253_v29 = vsel %vm47_vm10, %v4247_v46, -1e+30 }
0x17d2   :  { %v4269_v39 = vsel %vm735_vm11, %v4253_v29, -inf }
0x17d3   :  { %v4249_v28 = vsel %vm47_vm10, %v4243_v25, -1e+30 }
0x17d4   :  { %v4257_v62 = vsel %vm735_vm11, %v4249_v28, -inf }
0x17d5   :  { %4264 = vmax.xlane.f32.xlu0 %v4263_v45  ;;  %4258 = vmax.xlane.f32.xlu1 %v4257_v62 }
0x17d8   :  { %v4195_v21 = vpop.f32.mrf.mxu2 }
0x17d9   :  { %v4244_v12 = vmul.f32 0.35355338, %v4195_v21 }
0x17db   :  { %v4250_v18 = vsel %vm47_vm10, %v4244_v12, -1e+30 }
0x17dc   :  { %v4260_v16 = vsel %vm735_vm11, %v4250_v18, -inf }
0x17dd   :  { %4261 = vmax.xlane.f32.xlu2 %v4260_v16 }
0x1840   :  { %v4256_v41 = vpop.xlane.xlu0 %4255 }
0x1841   :  { %v4272_v14 = vsub.f32 %v4248_v55, %v4256_v41 }
0x1843   :  { %v4278_v24 = vmul.f32 1.442695, %v4272_v14 }
0x1845   :  { %5706 = vpow2.f32 %v4278_v24 }
0x1848   :  { %v4265_v53 = vpop.xlane.xlu0 %4264  ;;  %v4259_v4 = vpop.xlane.xlu1 %4258 }
0x1849   :  { %v4275_v34 = vsub.f32 %v4251_v0, %v4265_v53  ;;  %v4273_v11 = vsub.f32 %v4249_v28, %v4259_v4 }
0x184b   :  { %v5707_v7 = vpop.eup %5706  ;;  %v4284_v43 = vmul.f32 1.442695, %v4275_v34  ;;  %v4280_v10 = vmul.f32 1.442695, %v4273_v11  ;;  %v5374_v34 = vld [vmem:[%s7953_s6 + $0x38] sm:$0xff] }
0x184c   :  { %v4290_v23 = vsel %vm735_vm11, %v5707_v7, 0.0  ;;  %4425 = vmatpush.msrb.mxu2 %v5374_v34 }
0x184d   :  { %5708 = vpow2.f32 %v4284_v43  ;;  %4291 = vadd.xlane.f32.xlu1 %v4290_v23 }
0x184e   :  { %5710 = vpow2.f32 %v4280_v10 }
0x1850   :  { %v4262_v17 = vpop.xlane.xlu2 %4261 }
0x1851   :  { %v4274_v42 = vsub.f32 %v4250_v18, %v4262_v17 }
0x1853   :  { %v5709_v22 = vpop.eup %5708  ;;  %v4282_v3 = vmul.f32 1.442695, %v4274_v42 }
0x1854   :  { %v5711_v49 = vpop.eup %5710  ;;  %v4299_v51 = vsel %vm735_vm11, %v5709_v22, 0.0 }
0x1855   :  { %5712 = vpow2.f32 %v4282_v3  ;;  %4300 = vadd.xlane.f32.xlu1 %v4299_v51  ;;  %v4293_v30 = vsel %vm735_vm11, %v5711_v49, 0.0 }
0x1856   :  { %4294 = vadd.xlane.f32.xlu2 %v4293_v30 }
0x185b   :  { %v5713_v63 = vpop.eup %5712 }
0x185c   :  { %v4296_v54 = vsel %vm735_vm11, %v5713_v63, 0.0 }
0x185d   :  { %4297 = vadd.xlane.f32.xlu0 %v4296_v54  ;;  %v3591_v54 = vadd.f32 %v7520_v2, %v7534_v20 }
0x185e   :  { %4267 = vmax.xlane.f32.xlu2 %v4266_v5 }
0x1865   :  { %4270 = vmax.xlane.f32.xlu0 %v4269_v39 }
0x18c0   :  { %v4292_v9 = vpop.xlane.xlu1 %4291 }
0x18c1   :  { %5714 = vrcp.f32 %v4292_v9 }
0x18c7   :  { %v5715_v8 = vpop.eup %5714 }
0x18c8   :  { %v4314_v1 = vmul.f32 %v5715_v8, %v5707_v7  ;;  %v4301_v55 = vpop.xlane.xlu1 %4300 }
0x18c9   :  { %5716 = vrcp.f32 %v4301_v55  ;;  %v4295_v27 = vpop.xlane.xlu2 %4294 }
0x18ca   :  { %5718 = vrcp.f32 %v4295_v27  ;;  %5368 = vmatmul.msk.f32.vlgmr.msrb.gmra.mxu3 %vm735_vm11, %v4314_v1 }
0x18cf   :  { %v5717_v15 = vpop.eup %5716 }
0x18d0   :  { %v5719_v32 = vpop.eup %5718  ;;  %v4317_v25 = vmul.f32 %v5717_v15, %v5709_v22  ;;  %v4298_v0 = vpop.xlane.xlu0 %4297 }
0x18d1   :  { %5720 = vrcp.f32 %v4298_v0  ;;  %v4268_v57 = vpop.xlane.xlu2 %4267  ;;  %v4315_v28 = vmul.f32 %v5719_v32, %v5711_v49  ;;  %v3588_v49 = vadd.f32 %v7516_v19, %v7528_v6  ;;  %v4023_v19 = vadd.f32 %v7671_v40, %v3591_v54 }
0x18d2   :  { %v4276_v45 = vsub.f32 %v4252_v44, %v4268_v57  ;;  %5371 = vmatmul.msk.f32.vlgmr.msrb.gmra.mxu1 %vm735_vm11, %v4317_v25 }
0x18d3   :  { %5369 = vmatmul.msk.f32.gmra.mxu3 %vm735_vm11, %v4315_v28  ;;  %v4022_v51 = vadd.f32 %v7669_v50, %v3588_v49 }
0x18d4   :  { %v4286_v62 = vmul.f32 1.442695, %v4276_v45 }
0x18d6   :  { %5722 = vpow2.f32 %v4286_v62 }
0x18d7   :  { %v5721_v21 = vpop.eup %5720 }
0x18d8   :  { %v4271_v12 = vpop.xlane.xlu0 %4270  ;;  %v4316_v18 = vmul.f32 %v5721_v21, %v5713_v63 }
0x18d9   :  { %v4277_v16 = vsub.f32 %v4253_v29, %v4271_v12 }
0x18db   :  { %v4288_v41 = vmul.f32 1.442695, %v4277_v16  ;;  %5370 = vmatmul.msk.f32.gmra.mxu3 %vm735_vm11, %v4316_v18 }
0x18dc   :  { %v5723_v14 = vpop.eup %5722 }
0x18dd   :  { %5724 = vpow2.f32 %v4288_v41  ;;  %v4302_v24 = vsel %vm735_vm11, %v5723_v14, 0.0 }
0x18de   :  { %4303 = vadd.xlane.f32.xlu1 %v4302_v24 }
0x18e3   :  { %v5725_v53 = vpop.eup %5724 }
0x18e4   :  { %v4305_v4 = vsel %vm735_vm11, %v5725_v53, 0.0 }
0x18e5   :  { %4306 = vadd.xlane.f32.xlu2 %v4305_v4 }
0x194d   :  { %v4346_v11 = vpop.f32.mrf.mxu3 }
0x194e   :  { %5375 = vmatmul.msk.f32.vlgmr.msrb.gmra.mxu2 %vm632_vm15, %v4346_v11 }
0x194f   :  { %v4381_v3 = vpop.f32.mrf.mxu1 }
0x1951   :  { %v4304_v7 = vpop.xlane.xlu1 %4303 }
0x1952   :  { %5726 = vrcp.f32 %v4304_v7 }
0x1956   :  { %v4349_v43 = vpop.f32.mrf.mxu3 }
0x1957   :  { %5376 = vmatmul.msk.f32.gmra.mxu2 %vm632_vm15, %v4349_v43 }
0x1958   :  { %v5727_v10 = vpop.eup %5726  ;;  %v4307_v23 = vpop.xlane.xlu2 %4306 }
0x1959   :  { %5728 = vrcp.f32 %v4307_v23  ;;  %v4318_v37 = vmul.f32 %v5727_v10, %v5723_v14 }
0x195b   :  { %5372 = vmatmul.msk.f32.gmra.mxu1 %vm735_vm11, %v4318_v37 }
0x195e   :  { %v4352_v17 = vpop.f32.mrf.mxu3 }
0x195f   :  { %v5729_v42 = vpop.eup %5728  ;;  %5377 = vmatmul.msk.f32.gmra.mxu2 %vm632_vm15, %v4352_v17 }
0x1960   :  { %v4319_v22 = vmul.f32 %v5729_v42, %v5725_v53 }
0x1963   :  { %5373 = vmatmul.msk.f32.gmra.mxu1 %vm735_vm11, %v4319_v22  ;;  %v5382_v22 = vld [vmem:[%s7955_s8 + $0x28] sm:$0xff] }
0x1967   :  { %5378 = vmatmul.msk.f32.gmra.mxu2 %vm632_vm15, %v4381_v3  ;;  %v5381_v3 = vld [vmem:[%s7955_s8 + $0x20] sm:$0xff] }
0x19d1   :  { %v4427_v30 = vpop.f32.mrf.mxu2 }
0x19d2   :  { %v4445_v26 = vadd.f32 %v4427_v30, %v4022_v51 }
0x19d4   :  { %v4451_v44 = vadd.f32 %v4445_v26, %v7008_v61  ;;  %v3594_v61 = vadd.f32 %v7524_v56, %v7538_v33 }
0x19d6   :  { %v7730_v63 = vadd.f32 %v5458_v38, %v4451_v44  ;;  %v4024_v2 = vadd.f32 %v7673_v36, %v3594_v61 }
0x19d8   :  { %v4384_v46 = vpop.f32.mrf.mxu1  ;;  %v4464_v5 = vsel %vm181_vm1, %v7730_v63, 0.0 }
0x19d9   :  { %5379 = vmatmul.msk.f32.gmra.mxu2 %vm632_vm15, %v4384_v46  ;;  %4465 = vadd.xlane.f32.xlu0 %v4464_v5 }
0x19da   :  { %v4430_v6 = vpop.f32.mrf.mxu2 }
0x19db   :  { %v4446_v50 = vadd.f32 %v4430_v6, %v4023_v19 }
0x19dd   :  { %v4452_v29 = vadd.f32 %v4446_v50, %v7013_v52 }
0x19df   :  { %v4459_v39 = vadd.f32 %v5458_v38, %v4452_v29 }
0x19e0   :  { %v4387_v9 = vpop.f32.mrf.mxu1 }
0x19e1   :  { %5380 = vmatmul.msk.f32.gmra.mxu2 %vm632_vm15, %v4387_v9  ;;  %v4467_v20 = vsel %vm181_vm1, %v4459_v39, 0.0 }
0x19e2   :  { %v4433_v8 = vpop.f32.mrf.mxu2  ;;  %4468 = vadd.xlane.f32.xlu1 %v4467_v20 }
0x19e3   :  { %v4447_v40 = vadd.f32 %v4433_v8, %v4024_v2 }
0x19e5   :  { %v4453_v1 = vadd.f32 %v4447_v40, %v7018_v48  ;;  %v7805_v40 = vld [vmem:[%s7954_s7 + $0xa] ss:$0 sm:$0xff] }
0x19e7   :  { %v4460_v55 = vadd.f32 %v5458_v38, %v4453_v1 }
0x19e9   :  { %v4470_v27 = vsel %vm181_vm1, %v4460_v55, 0.0 }
0x19ea   :  { %4471 = vadd.xlane.f32.xlu2 %v4470_v27  ;;  %v4436_v52 = vpop.f32.mrf.mxu2 }
0x19eb   :  { %v4448_v56 = vadd.f32 %v4436_v52, %v7677_v35  ;;  %v7812_v52 = vld [vmem:[%s7954_s7 + $0xb] ss:$0 sm:$0xff] }
0x19ed   :  { %v4454_v33 = vadd.f32 %v4448_v56, %v7023_v59 }
0x19ef   :  { %v7748_v15 = vadd.f32 %v5458_v38, %v4454_v33 }
0x19f1   :  { %v4473_v36 = vsel %vm181_vm1, %v7748_v15, 0.0 }
0x19f2   :  { %4474 = vadd.xlane.f32.xlu0 %v4473_v36 }
0x1a4c   :  { %v4466_v32 = vpop.xlane.xlu0 %4465 }
0x1a4d   :  { %v4482_v25 = vmul.f32 %v4466_v32, %v5990_v60 }
0x1a4f   :  { %v7754_v48 = vsub.f32 %v7730_v63, %v4482_v25 }
0x1a51   :  { %v4494_v0 = vmul.f32 %v7754_v48, %v7754_v48 }
0x1a53   :  { %v4500_v57 = vsel %vm181_vm1, %v4494_v0, 0.0 }
0x1a54   :  { %4501 = vadd.xlane.f32.xlu1 %v4500_v57 }
0x1a55   :  { %v4469_v35 = vpop.xlane.xlu1 %4468 }
0x1a56   :  { %v4483_v59 = vmul.f32 %v4469_v35, %v5990_v60 }
0x1a58   :  { %v7760_v28 = vsub.f32 %v4459_v39, %v4483_v59 }
0x1a5a   :  { %v4495_v45 = vmul.f32 %v7760_v28, %v7760_v28 }
0x1a5c   :  { %v4439_v62 = vpop.f32.mrf.mxu2  ;;  %v4503_v21 = vsel %vm181_vm1, %v4495_v45, 0.0 }
0x1a5d   :  { %v4449_v12 = vadd.f32 %v4439_v62, %v7681_v58  ;;  %4504 = vadd.xlane.f32.xlu2 %v4503_v21  ;;  %v4472_v18 = vpop.xlane.xlu2 %4471 }
0x1a5e   :  { %v4484_v16 = vmul.f32 %v4472_v18, %v5990_v60 }
0x1a5f   :  { %v4455_v41 = vadd.f32 %v4449_v12, %v7028_v13 }
0x1a60   :  { %v7768_v14 = vsub.f32 %v4460_v55, %v4484_v16 }
0x1a61   :  { %v4462_v24 = vadd.f32 %v5458_v38, %v4455_v41 }
0x1a62   :  { %v4496_v53 = vmul.f32 %v7768_v14, %v7768_v14 }
0x1a63   :  { %v4476_v4 = vsel %vm181_vm1, %v4462_v24, 0.0 }
0x1a64   :  { %v4442_v34 = vpop.f32.mrf.mxu2  ;;  %v4506_v11 = vsel %vm181_vm1, %v4496_v53, 0.0 }
0x1a65   :  { %v4450_v7 = vadd.f32 %v4442_v34, %v7684_v47  ;;  %v4475_v58 = vpop.xlane.xlu0 %4474  ;;  %4477 = vadd.xlane.f32.xlu2 %v4476_v4  ;;  %4507 = vadd.xlane.f32.xlu0 %v4506_v11  ;;  %v5384_v47 = vld [vmem:[%s7955_s8 + $0x38] sm:$0xff] }
0x1a66   :  { %v4485_v43 = vmul.f32 %v4475_v58, %v5990_v60  ;;  %4647 = vmatpush.msra.mxu0 %v5384_v47 }
0x1a67   :  { %v4456_v13 = vadd.f32 %v4450_v7, %v7033_v31  ;;  %v5383_v31 = vld [vmem:[%s7955_s8 + $0x30] sm:$0xff] }
0x1a68   :  { %v7778_v10 = vsub.f32 %v7748_v15, %v4485_v43  ;;  %4648 = vmatpush.msra.mxu0 %v5383_v31 }
0x1a69   :  { %v4463_v23 = vadd.f32 %v5458_v38, %v4456_v13 }
0x1a6a   :  { %v4497_v37 = vmul.f32 %v7778_v10, %v7778_v10  ;;  %4649 = vmatpush.msra.mxu0 %v5382_v22 }
0x1a6b   :  { %v4479_v17 = vsel %vm181_vm1, %v4463_v23, 0.0 }
0x1a6c   :  { %v4509_v42 = vsel %vm181_vm1, %v4497_v37, 0.0  ;;  %4650 = vmatpush.msra.mxu0 %v5381_v3 }
0x1a6d   :  { %4510 = vadd.xlane.f32.xlu1 %v4509_v42  ;;  %4480 = vadd.xlane.f32.xlu0 %v4479_v17 }
0x1ac7   :  { %v4502_v49 = vpop.xlane.xlu1 %4501 }
0x1ac8   :  { %v4518_v51 = vmul.f32 %v4502_v49, %v5990_v60 }
0x1aca   :  { %v4524_v30 = vadd.f32 1e-05, %v4518_v51 }
0x1acc   :  { %5730 = vrsqrt.f32 %v4524_v30  ;;  %vm4536_vm10 = vweird.f32 %v4524_v30 }
0x1ad0   :  { %v4505_v26 = vpop.xlane.xlu2 %4504 }
0x1ad1   :  { %v4519_v38 = vmul.f32 %v4505_v26, %v5990_v60 }
0x1ad2   :  { %v5731_v44 = vpop.eup %5730 }
0x1ad3   :  { %v4531_v54 = vmul.f32 %v5731_v44, %v4524_v30  ;;  %v4525_v46 = vadd.f32 1e-05, %v4519_v38  ;;  %vm4537_vm15 = vweird.f32 %v5731_v44 }
0x1ad4   :  { %vm4538_vm11 = vmor %vm4536_vm10, %vm4537_vm15 }
0x1ad5   :  { %v4532_v5 = vmul.f32 %v5731_v44, %v4531_v54  ;;  %5732 = vrsqrt.f32 %v4525_v46  ;;  %vm4546_vm13 = vweird.f32 %v4525_v46  ;;  %v5409_v54 = vld [vmem:[%s7957_s10 + $0xe0] sm:$0xff] }
0x1ad7   :  { %v4533_v19 = vmul.f32 0.5, %v4532_v5  ;;  %v5407_v5 = vld [vmem:[%s7957_s10 + $0xd0] sm:$0xff] }
0x1ad8   :  { %v4508_v6 = vpop.xlane.xlu0 %4507  ;;  %v4478_v50 = vpop.xlane.xlu2 %4477 }
0x1ad9   :  { %v4534_v29 = vsub.f32 1.5, %v4533_v19  ;;  %v4520_v61 = vmul.f32 %v4508_v6, %v5990_v60  ;;  %v4486_v39 = vmul.f32 %v4478_v50, %v5990_v60  ;;  %v5406_v19 = vld [vmem:[%s7957_s10 + $0xc8] sm:$0xff] }
0x1adb   :  { %v5733_v9 = vpop.eup %5732  ;;  %v4535_v2 = vmul.f32 %v5731_v44, %v4534_v29  ;;  %v4526_v20 = vadd.f32 1e-05, %v4520_v61  ;;  %v7800_v8 = vsub.f32 %v4462_v24, %v4486_v39  ;;  %v5405_v29 = vld [vmem:[%s7957_s10 + $0xc0] sm:$0xff]  ;;  %v5404_v39 = vld [vmem:[%s7957_s10 + $0xb8] sm:$0xff] }
0x1adc   :  { %v4541_v1 = vmul.f32 %v5733_v9, %v4525_v46  ;;  %vm4547_vm12 = vweird.f32 %v5733_v9  ;;  %v5408_v46 = vld [vmem:[%s7957_s10 + $0xd8] sm:$0xff] }
0x1add   :  { %v4539_v55 = vsel %vm4538_vm11, %v5731_v44, %v4535_v2  ;;  %5734 = vrsqrt.f32 %v4526_v20  ;;  %v4498_v27 = vmul.f32 %v7800_v8, %v7800_v8  ;;  %vm4548_vm14 = vmor %vm4546_vm13, %vm4547_vm12  ;;  %vm4556_vm2 = vweird.f32 %v4526_v20  ;;  %v5411_v44 = vld [vmem:[%s7957_s10 + $0xf0] sm:$0xff] }
0x1ade   :  { %v4590_v56 = vmul.f32 %v4539_v55, %v7754_v48  ;;  %v4542_v33 = vmul.f32 %v5733_v9, %v4541_v1  ;;  %v5402_v1 = vld [vmem:[%s7957_s10 + $0xa8] sm:$0xff] }
0x1adf   :  { %v4512_v36 = vsel %vm181_vm1, %v4498_v27, 0.0 }
0x1ae0   :  { %v4597_v32 = vmul.f32 %v7805_v40, %v4590_v56  ;;  %v4543_v25 = vmul.f32 0.5, %v4542_v33  ;;  %v4511_v0 = vpop.xlane.xlu1 %4510  ;;  %4513 = vadd.xlane.f32.xlu1 %v4512_v36  ;;  %v4481_v57 = vpop.xlane.xlu0 %4480  ;;  %v7876_v56 = vld [vmem:[%s7956_s9 + $0x1] ss:$0 sm:$0xff] }
0x1ae1   :  { %v4521_v35 = vmul.f32 %v4511_v0, %v5990_v60  ;;  %v4487_v59 = vmul.f32 %v4481_v57, %v5990_v60  ;;  %v5401_v33 = vld [vmem:[%s7957_s10 + $0xa0] sm:$0xff]  ;;  %v5399_v57 = vld [vmem:[%s7957_s10 + $0x90] sm:$0xff] }
0x1ae2   :  { %v4604_v45 = vadd.f32 %v7812_v52, %v4597_v32  ;;  %v4544_v62 = vsub.f32 1.5, %v4543_v25 }
0x1ae3   :  { %v5735_v21 = vpop.eup %5734  ;;  %v4527_v12 = vadd.f32 1e-05, %v4521_v35  ;;  %v7820_v48 = vsub.f32 %v4463_v23, %v4487_v59 }
0x1ae4   :  { %v4545_v18 = vmul.f32 %v5733_v9, %v4544_v62  ;;  %v4551_v16 = vmul.f32 %v5735_v21, %v4526_v20  ;;  %5385 = vmatmul.msk.f32.vlgmr.msra.gmra.mxu0 %vm181_vm1, %v4604_v45  ;;  %vm4557_vm0 = vweird.f32 %v5735_v21  ;;  %v5398_v45 = vld [vmem:[%s7957_s10 + $0x88] sm:$0xff] }
0x1ae5   :  { %5736 = vrsqrt.f32 %v4527_v12  ;;  %v4499_v41 = vmul.f32 %v7820_v48, %v7820_v48  ;;  %vm4558_vm3 = vmor %vm4556_vm2, %vm4557_vm0  ;;  %vm4566_vm5 = vweird.f32 %v4527_v12 }
0x1ae6   :  { %v4549_v24 = vsel %vm4548_vm14, %v5733_v9, %v4545_v18  ;;  %v4552_v53 = vmul.f32 %v5735_v21, %v4551_v16  ;;  %v5403_v9 = vld [vmem:[%s7957_s10 + $0xb0] sm:$0xff]  ;;  %v5397_v18 = vld [vmem:[%s7957_s10 + $0x80] sm:$0xff] }
0x1ae7   :  { %v4591_v4 = vmul.f32 %v4549_v24, %v7760_v28  ;;  %v4515_v34 = vsel %vm181_vm1, %v4499_v41, 0.0 }
0x1ae8   :  { %v4553_v11 = vmul.f32 0.5, %v4552_v53  ;;  %4516 = vadd.xlane.f32.xlu2 %v4515_v34 }
0x1ae9   :  { %v4598_v7 = vmul.f32 %v7805_v40, %v4591_v4 }
0x1aea   :  { %v4554_v58 = vsub.f32 1.5, %v4553_v11 }
0x1aeb   :  { %v5737_v43 = vpop.eup %5736  ;;  %v4605_v13 = vadd.f32 %v7812_v52, %v4598_v7 }
0x1aec   :  { %v4555_v23 = vmul.f32 %v5735_v21, %v4554_v58  ;;  %v4561_v37 = vmul.f32 %v5737_v43, %v4527_v12  ;;  %vm4567_vm4 = vweird.f32 %v5737_v43 }
0x1aed   :  { %5386 = vmatmul.msk.f32.gmra.mxu0 %vm181_vm1, %v4605_v13  ;;  %vm4568_vm6 = vmor %vm4566_vm5, %vm4567_vm4 }
0x1aee   :  { %v4559_v17 = vsel %vm4558_vm3, %v5735_v21, %v4555_v23  ;;  %v4562_v42 = vmul.f32 %v5737_v43, %v4561_v37 }
0x1aef   :  { %v4592_v28 = vmul.f32 %v4559_v17, %v7768_v14  ;;  %v5412_v14 = vld [vmem:[%s7957_s10 + $0xf8] sm:$0xff] }
0x1af0   :  { %v4563_v47 = vmul.f32 0.5, %v4562_v42  ;;  %4813 = vmatpush.msra.mxu3 %v5412_v14 }
0x1af1   :  { %v4599_v31 = vmul.f32 %v7805_v40, %v4592_v28 }
0x1af2   :  { %v4564_v22 = vsub.f32 1.5, %v4563_v47  ;;  %4814 = vmatpush.msra.mxu3 %v5411_v44 }
0x1af3   :  { %v4606_v3 = vadd.f32 %v7812_v52, %v4599_v31 }
0x1af4   :  { %v4565_v49 = vmul.f32 %v5737_v43, %v4564_v22 }
0x1af5   :  { %5387 = vmatmul.msk.f32.gmra.mxu0 %vm181_vm1, %v4606_v3 }
0x1af6   :  { %v4569_v51 = vsel %vm4568_vm6, %v5737_v43, %v4565_v49 }
0x1af7   :  { %v4593_v30 = vmul.f32 %v4569_v51, %v7778_v10  ;;  %v5410_v10 = vld [vmem:[%s7957_s10 + $0xe8] sm:$0xff] }
0x1af8   :  { %4815 = vmatpush.msra.mxu3 %v5410_v10 }
0x1af9   :  { %v4600_v26 = vmul.f32 %v7805_v40, %v4593_v30 }
0x1afa   :  { %4816 = vmatpush.msra.mxu3 %v5409_v54 }
0x1afb   :  { %v4607_v38 = vadd.f32 %v7812_v52, %v4600_v26 }
0x1afc   :  { %4817 = vmatpush.msra.mxu3 %v5408_v46 }
0x1afd   :  { %5388 = vmatmul.msk.f32.gmra.mxu0 %vm181_vm1, %v4607_v38 }
0x1afe   :  { %4818 = vmatpush.msra.mxu3 %v5407_v5 }
0x1b00   :  { %4819 = vmatpush.msra.mxu3 %v5406_v19 }
0x1b02   :  { %4820 = vmatpush.msra.mxu3 %v5405_v29 }
0x1b04   :  { %4821 = vmatpush.msra.mxu3 %v5404_v39 }
0x1b06   :  { %4822 = vmatpush.msra.mxu3 %v5403_v9 }
0x1b08   :  { %4823 = vmatpush.msra.mxu3 %v5402_v1 }
0x1b0a   :  { %4824 = vmatpush.msra.mxu3 %v5401_v33 }
0x1b53   :  { %v4514_v6 = vpop.xlane.xlu1 %4513 }
0x1b54   :  { %v4522_v50 = vmul.f32 %v4514_v6, %v5990_v60 }
0x1b56   :  { %v4528_v61 = vadd.f32 1e-05, %v4522_v50 }
0x1b58   :  { %5738 = vrsqrt.f32 %v4528_v61  ;;  %vm4576_vm8 = vweird.f32 %v4528_v61 }
0x1b5b   :  { %v4517_v2 = vpop.xlane.xlu2 %4516 }
0x1b5c   :  { %v4523_v20 = vmul.f32 %v4517_v2, %v5990_v60  ;;  %v5400_v60 = vld [vmem:[%s7957_s10 + $0x98] sm:$0xff] }
0x1b5d   :  { %4825 = vmatpush.msra.mxu3 %v5400_v60 }
0x1b5e   :  { %v5739_v55 = vpop.eup %5738  ;;  %v4529_v27 = vadd.f32 1e-05, %v4523_v20 }
0x1b5f   :  { %v4571_v36 = vmul.f32 %v5739_v55, %v4528_v61  ;;  %4826 = vmatpush.msra.mxu3 %v5399_v57  ;;  %vm4577_vm7 = vweird.f32 %v5739_v55 }
0x1b60   :  { %5740 = vrsqrt.f32 %v4529_v27  ;;  %vm4578_vm9 = vmor %vm4576_vm8, %vm4577_vm7  ;;  %vm4586_vm10 = vweird.f32 %v4529_v27 }
0x1b61   :  { %v4572_v32 = vmul.f32 %v5739_v55, %v4571_v36  ;;  %v4652_v25 = vpop.f32.mrf.mxu0  ;;  %4827 = vmatpush.msra.mxu3 %v5398_v45 }
0x1b62   :  { %v7885_v0 = vadd.f32 %v7876_v56, %v4652_v25 }
0x1b63   :  { %v4573_v35 = vmul.f32 0.5, %v4572_v32  ;;  %4828 = vmatpush.msra.mxu3 %v5397_v18 }
0x1b64   :  { %v5391_v59 = vmul.f32 -1.702, %v7885_v0 }
0x1b65   :  { %v4574_v62 = vsub.f32 1.5, %v4573_v35 }
0x1b66   :  { %v5741_v21 = vpop.eup %5740  ;;  %v4682_v12 = vmul.f32 1.442695, %v5391_v59 }
0x1b67   :  { %v4575_v16 = vmul.f32 %v5739_v55, %v4574_v62  ;;  %v4581_v41 = vmul.f32 %v5741_v21, %v4529_v27  ;;  %vm4587_vm15 = vweird.f32 %v5741_v21 }
0x1b68   :  { %5742 = vpow2.f32 %v4682_v12  ;;  %vm4588_vm11 = vmor %vm4586_vm10, %vm4587_vm15 }
0x1b69   :  { %v4579_v24 = vsel %vm4578_vm9, %v5739_v55, %v4575_v16  ;;  %v4582_v53 = vmul.f32 %v5741_v21, %v4581_v41 }
0x1b6a   :  { %v4594_v4 = vmul.f32 %v4579_v24, %v7800_v8  ;;  %v4655_v34 = vpop.f32.mrf.mxu0 }
0x1b6b   :  { %v4583_v11 = vmul.f32 0.5, %v4582_v53  ;;  %v7899_v7 = vadd.f32 %v7876_v56, %v4655_v34 }
0x1b6c   :  { %v4601_v58 = vmul.f32 %v7805_v40, %v4594_v4 }
0x1b6d   :  { %v4584_v43 = vsub.f32 1.5, %v4583_v11  ;;  %v5392_v13 = vmul.f32 -1.702, %v7899_v7 }
0x1b6e   :  { %v5743_v23 = vpop.eup %5742  ;;  %v4608_v37 = vadd.f32 %v7812_v52, %v4601_v58 }
0x1b6f   :  { %v4585_v17 = vmul.f32 %v5741_v21, %v4584_v43  ;;  %v4694_v42 = vadd.f32 1.0, %v5743_v23  ;;  %v4684_v28 = vmul.f32 1.442695, %v5392_v13 }
0x1b70   :  { %5389 = vmatmul.msk.f32.gmra.mxu0 %vm181_vm1, %v4608_v37 }
0x1b71   :  { %v4589_v8 = vsel %vm4588_vm11, %v5741_v21, %v4585_v17  ;;  %5744 = vrcp.f32 %v4694_v42  ;;  %v4711_v54 = vand.u32 2147483648, %v4694_v42  ;;  %v4709_v5 = vand.u32 2147483647, %v4694_v42 }
0x1b72   :  { %v4595_v47 = vmul.f32 %v4589_v8, %v7820_v48  ;;  %5746 = vpow2.f32 %v4684_v28  ;;  %v4658_v31 = vpop.f32.mrf.mxu0  ;;  %vm4705_vm13 = vweird.f32 %v4694_v42 }
0x1b73   :  { %v7907_v22 = vadd.f32 %v7876_v56, %v4658_v31  ;;  %v4712_v50 = vor.u32 1.1754944e-38, %v4711_v54  ;;  %vm4710_vm0 = vcmp.eq.f32.partialorder %v4709_v5, 8.507059e+37  ;;  %v4857_v54 = vld [vmem:[%s7958_s11 + $0x18] sm:$0xff] }
0x1b74   :  { %v4602_v3 = vmul.f32 %v7805_v40, %v4595_v47  ;;  %4877 = vmatpush.msra.mxu1 %v4857_v54 }
0x1b75   :  { %v5393_v49 = vmul.f32 -1.702, %v7907_v22 }
0x1b76   :  { %v4609_v51 = vadd.f32 %v7812_v52, %v4602_v3 }
0x1b77   :  { %v5745_v30 = vpop.eup %5744  ;;  %v4686_v26 = vmul.f32 1.442695, %v5393_v49 }
0x1b78   :  { %v5747_v38 = vpop.eup %5746  ;;  %v4701_v14 = vmul.f32 %v5745_v30, %v4694_v42  ;;  %5390 = vmatmul.msk.f32.gmra.mxu0 %vm181_vm1, %v4609_v51  ;;  %vm4706_vm12 = vweird.f32 %v5745_v30 }
0x1b79   :  { %v4695_v44 = vadd.f32 1.0, %v5747_v38  ;;  %5748 = vpow2.f32 %v4686_v26  ;;  %vm4707_vm14 = vmor %vm4705_vm13, %vm4706_vm12 }
0x1b7a   :  { %v4702_v48 = vsub.f32 1.0, %v4701_v14  ;;  %v4661_v10 = vpop.f32.mrf.mxu0 }
0x1b7b   :  { %5750 = vrcp.f32 %v4695_v44  ;;  %v7914_v40 = vadd.f32 %v7876_v56, %v4661_v10  ;;  %v4726_v27 = vand.u32 2147483648, %v4695_v44  ;;  %v4724_v36 = vand.u32 2147483647, %v4695_v44 }
0x1b7c   :  { %v4703_v46 = vmul.f32 %v5745_v30, %v4702_v48  ;;  %vm4720_vm3 = vweird.f32 %v4695_v44 }
0x1b7d   :  { %v5394_v52 = vmul.f32 -1.702, %v7914_v40  ;;  %v4727_v57 = vor.u32 1.1754944e-38, %v4726_v27  ;;  %vm4725_vm5 = vcmp.eq.f32.partialorder %v4724_v36, 8.507059e+37 }
0x1b7e   :  { %v4704_v19 = vadd.f32 %v5745_v30, %v4703_v46 }
0x1b7f   :  { %v5749_v6 = vpop.eup %5748  ;;  %v4688_v39 = vmul.f32 1.442695, %v5394_v52  ;;  %v4855_v52 = vld [vmem:[%s7958_s11 + $0x8] sm:$0xff] }
0x1b80   :  { %v4708_v29 = vsel %vm4707_vm14, %v5745_v30, %v4704_v19  ;;  %v4696_v61 = vadd.f32 1.0, %v5749_v6 }
0x1b81   :  { %v5751_v9 = vpop.eup %5750  ;;  %v4713_v2 = vsel %vm4710_vm0, %v4712_v50, %v4708_v29  ;;  %v4854_v29 = vld [vmem:[%s7958_s11] sm:$0xff] }
0x1b82   :  { %v4790_v20 = vmul.f32 %v4713_v2, %v7885_v0  ;;  %v4716_v1 = vmul.f32 %v5751_v9, %v4695_v44  ;;  %5752 = vrcp.f32 %v4696_v61  ;;  %vm4721_vm2 = vweird.f32 %v5751_v9 }
0x1b83   :  { %5754 = vpow2.f32 %v4688_v39  ;;  %vm4722_vm4 = vmor %vm4720_vm3, %vm4721_vm2  ;;  %v4741_v12 = vand.u32 2147483648, %v4696_v61  ;;  %v4739_v16 = vand.u32 2147483647, %v4696_v61  ;;  %vm4735_vm7 = vweird.f32 %v4696_v61 }
0x1b84   :  { %v4717_v55 = vsub.f32 1.0, %v4716_v1  ;;  %4829 = vmatmul.f32.vlgmr.msra.gmra.mxu3 %v4790_v20 }
0x1b85   :  { %v4742_v24 = vor.u32 1.1754944e-38, %v4741_v12  ;;  %vm4740_vm9 = vcmp.eq.f32.partialorder %v4739_v16, 8.507059e+37  ;;  %v5462_v12 = vld [vmem:[%s7954_s7 + $0xd] ss:$0 sm:$0xff]  ;;  %s4893_s7 = sshll.u32 %s7960_s13, 4  ;;  %s4894_s7 = int_to_ptr.hbm [resolvable:$true] %s4893_s7 }
0x1b86   :  { %v4718_v33 = vmul.f32 %v5751_v9, %v4717_v55 }
0x1b88   :  { %v5753_v60 = vpop.eup %5752  ;;  %v4719_v32 = vadd.f32 %v5751_v9, %v4718_v33 }
0x1b89   :  { %v5755_v25 = vpop.eup %5754  ;;  %v4731_v35 = vmul.f32 %v5753_v60, %v4696_v61  ;;  %vm4736_vm6 = vweird.f32 %v5753_v60 }
0x1b8a   :  { %v4723_v59 = vsel %vm4722_vm4, %v5751_v9, %v4719_v32  ;;  %v4697_v45 = vadd.f32 1.0, %v5755_v25  ;;  %vm4737_vm8 = vmor %vm4735_vm7, %vm4736_vm6  ;;  %vm4852_vm7 = vcmask 1040384  }
0x1b8b   :  { %v4728_v0 = vsel %vm4725_vm5, %v4727_v57, %v4723_v59  ;;  %v4732_v62 = vsub.f32 1.0, %v4731_v35 }
0x1b8c   :  { %v4791_v21 = vmul.f32 %v4728_v0, %v7899_v7  ;;  %5756 = vrcp.f32 %v4697_v45  ;;  %v4756_v13 = vand.u32 2147483648, %v4697_v45  ;;  %v4754_v23 = vand.u32 2147483647, %v4697_v45 }
0x1b8d   :  { %v4733_v18 = vmul.f32 %v5753_v60, %v4732_v62  ;;  %vm4750_vm10 = vweird.f32 %v4697_v45 }
0x1b8e   :  { %4832 = vmatmul.f32.gmra.mxu3 %v4791_v21  ;;  %v4757_v17 = vor.u32 1.1754944e-38, %v4756_v13  ;;  %vm4755_vm12 = vcmp.eq.f32.partialorder %v4754_v23, 8.507059e+37 }
0x1b8f   :  { %v4734_v41 = vadd.f32 %v5753_v60, %v4733_v18 }
0x1b91   :  { %v4738_v53 = vsel %vm4737_vm8, %v5753_v60, %v4734_v41 }
0x1b92   :  { %v5757_v4 = vpop.eup %5756  ;;  %v4743_v34 = vsel %vm4740_vm9, %v4742_v24, %v4738_v53 }
0x1b93   :  { %v4792_v11 = vmul.f32 %v4743_v34, %v7907_v22  ;;  %v4746_v58 = vmul.f32 %v5757_v4, %v4697_v45  ;;  %vm4751_vm15 = vweird.f32 %v5757_v4 }
0x1b94   :  { %vm4752_vm11 = vmor %vm4750_vm10, %vm4751_vm15 }
0x1b95   :  { %v4747_v43 = vsub.f32 1.0, %v4746_v58 }
0x1b96   :  { %4834 = vmatmul.f32.gmra.mxu3 %v4792_v11  ;;  %v5463_v11 = vld [vmem:[%s7959_s12] ss:$0 sm:$0xff] }
0x1b97   :  { %v4748_v7 = vmul.f32 %v5757_v4, %v4747_v43 }
0x1b99   :  { %v4749_v37 = vadd.f32 %v5757_v4, %v4748_v7 }
0x1b9b   :  { %v4753_v42 = vsel %vm4752_vm11, %v5757_v4, %v4749_v37 }
0x1b9c   :  { %v4758_v28 = vsel %vm4755_vm12, %v4757_v17, %v4753_v42 }
0x1b9d   :  { %v4793_v8 = vmul.f32 %v4758_v28, %v7914_v40 }
0x1b9f   :  { %4836 = vmatmul.f32.gmra.mxu3 %v4793_v8 }
0x1bed   :  { %v4664_v47 = vpop.f32.mrf.mxu0 }
0x1bee   :  { %v4665_v31 = vadd.f32 %v7876_v56, %v4664_v47 }
0x1bf0   :  { %v5395_v22 = vmul.f32 -1.702, %v4665_v31 }
0x1bf2   :  { %v4690_v3 = vmul.f32 1.442695, %v5395_v22 }
0x1bf4   :  { %5758 = vpow2.f32 %v4690_v3 }
0x1bf5   :  { %v4667_v49 = vpop.f32.mrf.mxu0 }
0x1bf6   :  { %v4668_v51 = vadd.f32 %v7876_v56, %v4667_v49  ;;  %v4856_v56 = vld [vmem:[%s7958_s11 + $0x10] sm:$0xff] }
0x1bf7   :  { %4878 = vmatpush.msra.mxu1 %v4856_v56 }
0x1bf8   :  { %v5396_v30 = vmul.f32 -1.702, %v4668_v51 }
0x1bf9   :  { %4879 = vmatpush.msra.mxu1 %v4855_v52 }
0x1bfa   :  { %v5759_v26 = vpop.eup %5758  ;;  %v4692_v38 = vmul.f32 1.442695, %v5396_v30 }
0x1bfb   :  { %v4698_v14 = vadd.f32 1.0, %v5759_v26  ;;  %4880 = vmatpush.msra.mxu1 %v4854_v29 }
0x1bfc   :  { %5760 = vpow2.f32 %v4692_v38 }
0x1bfd   :  { %5762 = vrcp.f32 %v4698_v14  ;;  %v4771_v40 = vand.u32 2147483648, %v4698_v14  ;;  %v4769_v50 = vand.u32 2147483647, %v4698_v14  ;;  %vm4765_vm14 = vweird.f32 %v4698_v14 }
0x1bff   :  { %v4772_v9 = vor.u32 1.1754944e-38, %v4771_v40  ;;  %vm4770_vm2 = vcmp.eq.f32.partialorder %v4769_v50, 8.507059e+37 }
0x1c02   :  { %v5761_v44 = vpop.eup %5760 }
0x1c03   :  { %v5763_v48 = vpop.eup %5762  ;;  %v4699_v10 = vadd.f32 1.0, %v5761_v44 }
0x1c04   :  { %v4761_v46 = vmul.f32 %v5763_v48, %v4698_v14  ;;  %vm4766_vm13 = vweird.f32 %v5763_v48 }
0x1c05   :  { %5764 = vrcp.f32 %v4699_v10  ;;  %vm4767_vm0 = vmor %vm4765_vm14, %vm4766_vm13  ;;  %v4786_v33 = vand.u32 2147483648, %v4699_v10  ;;  %v4784_v60 = vand.u32 2147483647, %v4699_v10  ;;  %vm4780_vm4 = vweird.f32 %v4699_v10 }
0x1c06   :  { %v4762_v5 = vsub.f32 1.0, %v4761_v46 }
0x1c07   :  { %v4830_v19 = vpop.f32.mrf.mxu3  ;;  %v4787_v57 = vor.u32 1.1754944e-38, %v4786_v33  ;;  %vm4785_vm6 = vcmp.eq.f32.partialorder %v4784_v60, 8.507059e+37 }
0x1c08   :  { %v4763_v6 = vmul.f32 %v5763_v48, %v4762_v5  ;;  %v4844_v21 = vadd.f32 %v4830_v19, %v7730_v63 }
0x1c0a   :  { %v4764_v61 = vadd.f32 %v5763_v48, %v4763_v6  ;;  %v4847_v41 = vadd.f32 %v5462_v12, %v4844_v21 }
0x1c0b   :  { %v5765_v39 = vpop.eup %5764 }
0x1c0c   :  { %v4768_v2 = vsel %vm4767_vm0, %v5763_v48, %v4764_v61  ;;  %v4776_v20 = vmul.f32 %v5765_v39, %v4699_v10  ;;  %vm4781_vm3 = vweird.f32 %v5765_v39 }
0x1c0d   :  { %v4773_v1 = vsel %vm4770_vm2, %v4772_v9, %v4768_v2  ;;  %vm4782_vm5 = vmor %vm4780_vm4, %vm4781_vm3 }
0x1c0e   :  { %v4794_v55 = vmul.f32 %v4773_v1, %v4665_v31  ;;  %v4777_v27 = vsub.f32 1.0, %v4776_v20 }
0x1c10   :  { %v4778_v36 = vmul.f32 %v5765_v39, %v4777_v27  ;;  %4839 = vmatmul.f32.gmra.mxu3 %v4794_v55 }
0x1c11   :  { %v4833_v32 = vpop.f32.mrf.mxu3 }
0x1c12   :  { %v4779_v25 = vadd.f32 %v5765_v39, %v4778_v36 }
0x1c14   :  { %v4783_v35 = vsel %vm4782_vm5, %v5765_v39, %v4779_v25 }
0x1c15   :  { %v4788_v59 = vsel %vm4785_vm6, %v4787_v57, %v4783_v35 }
0x1c16   :  { %v4795_v45 = vmul.f32 %v4788_v59, %v4668_v51 }
0x1c18   :  { %4841 = vmatmul.f32.gmra.mxu3 %v4795_v45 }
0x1c19   :  { %v4835_v0 = vpop.f32.mrf.mxu3 }
0x1c22   :  { %v4837_v62 = vpop.f32.mrf.mxu3 }
0x1c23   :  { %v4845_v18 = vadd.f32 %v4837_v62, %v7748_v15 }
0x1c25   :  { %v4848_v16 = vadd.f32 %v5462_v12, %v4845_v18 }
0x1c27   :  { %v4850_v24 = vrot.slane %v4848_v16, 7 }
0x1c29   :  { %v4853_v53 = vsel %vm4852_vm7, %v4847_v41, %v4850_v24 }
0x1c2a   :  { %5413 = vmatmul.msk.f32.vlgmr.msra.gmra.mxu1 %vm181_vm1, %v4853_v53 }
0x1c93   :  { %v4840_v4 = vpop.f32.mrf.mxu3 }
0x1c9b   :  { %v4842_v34 = vpop.f32.mrf.mxu3 }
0x1ca7   :  { %v4882_v63 = vpop.f32.mrf.mxu1 }
0x1ca8   :  { %v4883_v15 = vadd.f32 %v5463_v11, %v4882_v63 }
0x1caa   :  { %4885 = vst [vmem:[#allocation2] sm:$0x3] %v4883_v15 }
0x1cab   :  { %4896 = dma.vmem_to_hbm [thread:$0]  %s4892_s27, 32, %s4894_s7, [#allocation3]  }
0x1cac   :  { %5790 = dma.done.wait [#allocation3], 32  }
0x1cad   :  { %5791 = vsyncadd [#allocation3], 4294967264 }
0x1cae   :  { %4901 = vsyncpa [#allocation3], 1 }

</bundles_post_ra>
